<compile_context>
chip_gen: v7x
topology: tpu7x:2x2x1
jax: 0.10.0
libtpu: 0.0.40
codegen_flags: <defaults>
</compile_context>

<pallas_src>
import numpy as np

import jax
import jax.numpy as jnp
from jax.experimental import pallas as pl
from jax.experimental.pallas import tpu as pltpu


_N_TAPS = 9
_PER_BLOCK = 10  # w1, b1, w2, b2, w3, b3, wd, b4, taps, sel


# ------------------------------ fused kernel ------------------------------- #

def _dot(a, b):
    """Matmul helper: tiny contractions run as VPU outer-product FMAs."""
    if a.shape[1] <= 8:
        acc = a[:, 0:1] * b[0:1, :]
        for k in range(1, a.shape[1]):
            acc = acc + a[:, k:k + 1] * b[k:k + 1, :]
        return acc
    return jnp.dot(a, b, preferred_element_type=jnp.float32)


def _residual_block(xv, w1, b1, w2, b2, w3, b3, wd, b4, g, s, *, stacked, m_out):
    """One ResidualBlock on a VMEM-resident (C, M) activation."""
    # conv1x1 -> BN (folded) -> ReLU
    h = jnp.maximum(_dot(w1[...], xv) + b1[...], 0.0)
    # conv3x3 stride 2, pad 1: tap gather via constant selection matrices.
    if stacked:
        # Single lane-dense gather matmul (32, M_in) @ (M_in, 9*M_out); the
        # per-tap 128-aligned lane slices are free vreg selections.
        hg = jnp.dot(h, g[...], preferred_element_type=jnp.float32)
        acc = _dot(w2[0], hg[:, 0:m_out])
        for t in range(1, _N_TAPS):
            acc = acc + _dot(w2[t], hg[:, t * m_out:(t + 1) * m_out])
    else:
        acc = _dot(w2[0], _dot(h, g[0]))
        for t in range(1, _N_TAPS):
            acc = acc + _dot(w2[t], _dot(h, g[t]))
    h = jnp.maximum(acc + b2[...], 0.0)
    # conv1x1 back to block output channels (+ folded BN)
    h = _dot(w3[...], h) + b3[...]
    # downsample path: 1x1 stride-2 conv (+ folded BN)
    r = _dot(_dot(wd[...], xv), s[...]) + b4[...]
    return jnp.maximum(h + r, 0.0)


def _build_kernel(block_meta):
    """block_meta: tuple of (stacked: bool, m_out: int) per residual block."""
    n_in = 1 + 3 * _PER_BLOCK + 5

    def kernel(*refs):
        in_refs = refs[:n_in]
        out_ref, gaze_ref = refs[n_in:]

        x = in_refs[0][...]
        ys = []
        y = x
        idx = 1
        for stacked, m_out in block_meta:
            y = _residual_block(y, *in_refs[idx:idx + _PER_BLOCK],
                                stacked=stacked, m_out=m_out)
            idx += _PER_BLOCK
            ys.append(y)
        u3, u2, u1, c1, wcomb = in_refs[idx:idx + 5]
        y1, y2, y3 = ys

        # bilinear upsample + residual adds (constant interpolation matrices)
        y4 = _dot(y3, u3[...]) + y2
        y5 = _dot(y4, u2[...]) + y1
        y6 = _dot(y5, u1[...]) + x

        # fused output heads: gazemap = C1 @ y,  out = (C2@C1 + Cskip) @ y + x
        gaze_ref[...] = _dot(c1[...], y6)
        out_ref[...] = _dot(wcomb[...], y6) + x

    return kernel


# --------------------- constant spatial operator matrices ------------------ #

def _kron_batch(mat, n):
    return np.kron(np.eye(n, dtype=np.float32), mat.astype(np.float32))


def _conv3x3_tap_mats(h, w, stride, n):
    """(9, N*H*W, N*Ho*Wo) 0/1 mats: tap t of a 3x3 / pad-1 / stride-s conv."""
    ho = (h - 1) // stride + 1
    wo = (w - 1) // stride + 1
    taps = np.zeros((_N_TAPS, n * h * w, n * ho * wo), np.float32)
    for kh in range(3):
        for kw in range(3):
            rsel = np.zeros((ho, h), np.float32)
            csel = np.zeros((wo, w), np.float32)
            for o in range(ho):
                i = o * stride + kh - 1
                if 0 <= i < h:
                    rsel[o, i] = 1.0
            for o in range(wo):
                i = o * stride + kw - 1
                if 0 <= i < w:
                    csel[o, i] = 1.0
            taps[kh * 3 + kw] = _kron_batch(np.kron(rsel, csel), n).T
    return taps, ho, wo


def _stride_select_mat(h, w, stride, n):
    """(N*H*W, N*Ho*Wo) selection matrix of a 1x1 stride-s conv."""
    ho = (h - 1) // stride + 1
    wo = (w - 1) // stride + 1
    rsel = np.zeros((ho, h), np.float32)
    csel = np.zeros((wo, w), np.float32)
    rsel[np.arange(ho), np.arange(ho) * stride] = 1.0
    csel[np.arange(wo), np.arange(wo) * stride] = 1.0
    return _kron_batch(np.kron(rsel, csel), n).T


def _bilinear_axis_weights(size_in, size_out):
    wm = np.zeros((size_out, size_in), np.float32)
    scale = size_in / size_out
    for o in range(size_out):
        src = max((o + 0.5) * scale - 0.5, 0.0)
        i0 = min(int(np.floor(src)), size_in - 1)
        i1 = min(i0 + 1, size_in - 1)
        frac = src - i0
        wm[o, i0] += 1.0 - frac
        wm[o, i1] += frac
    return wm


def _bilinear_mat(hin, win, hout, wout, n):
    """(N*Hin*Win, N*Hout*Wout) bilinear, align_corners=False (F.upsample)."""
    t = np.kron(_bilinear_axis_weights(hin, hout),
                _bilinear_axis_weights(win, wout))
    return _kron_batch(t, n).T


# ------------------------- parameter initialization ------------------------ #

def _conv_w(key, fan_in, cout):
    return (jax.random.normal(key, (fan_in, cout), jnp.float32)
            / jnp.sqrt(jnp.float32(fan_in)))


def _bn(key, c, eps):
    k1, k2, k3, k4 = jax.random.split(key, 4)
    gamma = jax.random.uniform(k1, (1, c), jnp.float32, 0.5, 1.5)
    beta = 0.1 * jax.random.normal(k2, (1, c), jnp.float32)
    mean = 0.1 * jax.random.normal(k3, (1, c), jnp.float32)
    var = jax.random.uniform(k4, (1, c), jnp.float32, 0.5, 1.5)
    scale = gamma / jnp.sqrt(var + eps)
    shift = beta - mean * scale
    return scale, shift


def init_residual_block(key, cin, cout):
    ks = jax.random.split(key, 8)
    p = {}
    p['w1'] = _conv_w(ks[0], cin, 32)                 # conv1x1 cin->32
    p['bn1_s'], p['bn1_b'] = _bn(ks[1], 32, 1e-5)
    p['w2'] = _conv_w(ks[2], 9 * 32, 32)              # conv3x3 32->32 (im2col layout)
    p['bn2_s'], p['bn2_b'] = _bn(ks[3], 32, 32.0)     # BatchNorm2d(32, 32): eps=32
    p['w3'] = _conv_w(ks[4], 32, cout)                # conv1x1 32->cout
    p['bn3_s'], p['bn3_b'] = _bn(ks[5], cout, float(cout))
    p['wd'] = _conv_w(ks[6], cin, cout)               # downsample conv1x1 stride 2
    p['bn4_s'], p['bn4_b'] = _bn(ks[7], cout, float(cout))
    return p


def init_params(key, channels):
    ks = jax.random.split(key, 6)
    return {
        'rm1': init_residual_block(ks[0], channels, channels),
        'rm2': init_residual_block(ks[1], channels, channels),
        'rm3': init_residual_block(ks[2], channels, channels),
        'c1': _conv_w(ks[3], channels, channels),
        'c2': _conv_w(ks[4], channels, channels),
        'cskip': _conv_w(ks[5], channels, channels),
    }


# ----------------------- trace-time weight preparation ---------------------- #

def _fold_block(p, h, w, n, stride=2):
    """Fold BN into conv weights and build the block's spatial matrices."""
    w1 = p['w1'].T * p['bn1_s'].reshape(-1, 1)                       # (32, cin)
    b1 = p['bn1_b'].reshape(-1, 1)
    w2 = (p['w2'].reshape(_N_TAPS, 32, 32).transpose(0, 2, 1)
          * p['bn2_s'].reshape(1, -1, 1))                            # (9, 32, 32)
    b2 = p['bn2_b'].reshape(-1, 1)
    w3 = p['w3'].T * p['bn3_s'].reshape(-1, 1)                       # (cout, 32)
    b3 = p['bn3_b'].reshape(-1, 1)
    wd = p['wd'].T * p['bn4_s'].reshape(-1, 1)                       # (cout, cin)
    b4 = p['bn4_b'].reshape(-1, 1)
    taps, ho, wo = _conv3x3_tap_mats(h, w, stride, n)
    m_out = n * ho * wo
    stacked = (m_out % 128 == 0)
    if stacked:
        # Lane-stack the nine tap matrices -> one lane-dense gather matmul.
        g = jnp.asarray(np.concatenate(list(taps), axis=1))          # (M_in, 9*M_out)
    else:
        g = jnp.asarray(taps)                                        # (9, M_in, M_out)
    sel = jnp.asarray(_stride_select_mat(h, w, stride, n))
    args = [w1, b1, w2, b2, w3, b3, wd, b4, g, sel]
    return args, ho, wo, stacked, m_out


# ---------------------------------- forward --------------------------------- #

def hourglass_module_forward(x_nchw, params):
    n, c, h, w = x_nchw.shape
    m0 = n * h * w
    x = jnp.transpose(x_nchw, (1, 0, 2, 3)).reshape(c, m0)   # channels x pixels

    inputs = [x]
    sizes = [(h, w)]
    block_meta = []
    for name in ('rm1', 'rm2', 'rm3'):
        blk, nh, nw, stacked, m_out = _fold_block(
            params[name], sizes[-1][0], sizes[-1][1], n)
        inputs.extend(blk)
        sizes.append((nh, nw))
        block_meta.append((stacked, m_out))
    (h0, w0), (h1, w1), (h2, w2), (h3, w3) = sizes

    u3 = jnp.asarray(_bilinear_mat(h3, w3, h2, w2, n))
    u2 = jnp.asarray(_bilinear_mat(h2, w2, h1, w1, n))
    u1 = jnp.asarray(_bilinear_mat(h1, w1, h0, w0, n))
    c1m = params['c1'].T
    wcomb = params['c2'].T @ c1m + params['cskip'].T          # fused output heads
    inputs.extend([u3, u2, u1, c1m, wcomb])

    vmem = pl.BlockSpec(memory_space=pltpu.MemorySpace.VMEM)
    out_flat, gaze_flat = pl.pallas_call(
        _build_kernel(tuple(block_meta)),
        out_shape=(jax.ShapeDtypeStruct((c, m0), jnp.float32),
                   jax.ShapeDtypeStruct((c, m0), jnp.float32)),
        in_specs=[vmem] * len(inputs),
        out_specs=(vmem, vmem),
    )(*inputs)

    out = jnp.transpose(out_flat.reshape(c, n, h, w), (1, 0, 2, 3))
    gaze = jnp.transpose(gaze_flat.reshape(c, n, h, w), (1, 0, 2, 3))
    return out, gaze


# ----------------- pure-JAX reference (for correctness check) --------------- #

def _ref_affine(a, w, scale, shift, relu):
    out = jnp.dot(a, w, precision=jax.lax.Precision.HIGHEST) * scale + shift
    return jnp.maximum(out, 0.0) if relu else out


def _ref_conv1x1(x, w, scale, shift, relu=False, stride=1):
    if stride > 1:
        x = x[:, ::stride, ::stride, :]
    n, h, ww, c = x.shape
    out = _ref_affine(x.reshape(n * h * ww, c), w, scale, shift, relu)
    return out.reshape(n, h, ww, -1)


def _ref_conv3x3(x, w, scale, shift, relu=False, stride=1):
    n, h, ww, c = x.shape
    ho = (h - 1) // stride + 1
    wo = (ww - 1) // stride + 1
    xp = jnp.pad(x, ((0, 0), (1, 1), (1, 1), (0, 0)))
    patches = [xp[:, kh:kh + stride * (ho - 1) + 1:stride,
                  kw:kw + stride * (wo - 1) + 1:stride, :]
               for kh in range(3) for kw in range(3)]
    a = jnp.stack(patches, axis=3).reshape(n * ho * wo, 9 * c)
    return _ref_affine(a, w, scale, shift, relu).reshape(n, ho, wo, -1)


def _ref_bilinear(x, out_h, out_w):
    n, h, w, c = x.shape

    def coords(size_in, size_out):
        src = (jnp.arange(size_out, dtype=jnp.float32) + 0.5) * (size_in / size_out) - 0.5
        src = jnp.maximum(src, 0.0)
        i0 = jnp.minimum(jnp.floor(src).astype(jnp.int32), size_in - 1)
        i1 = jnp.minimum(i0 + 1, size_in - 1)
        wgt1 = src - i0.astype(jnp.float32)
        return i0, i1, 1.0 - wgt1, wgt1

    i0, i1, wy0, wy1 = coords(h, out_h)
    j0, j1, wx0, wx1 = coords(w, out_w)
    xr = (x[:, i0, :, :] * wy0[None, :, None, None]
          + x[:, i1, :, :] * wy1[None, :, None, None])
    return (xr[:, :, j0, :] * wx0[None, None, :, None]
            + xr[:, :, j1, :] * wx1[None, None, :, None])


def _ref_block(x, p, stride=2):
    h = _ref_conv1x1(x, p['w1'], p['bn1_s'], p['bn1_b'], relu=True)
    h = _ref_conv3x3(h, p['w2'], p['bn2_s'], p['bn2_b'], relu=True, stride=stride)
    h = _ref_conv1x1(h, p['w3'], p['bn3_s'], p['bn3_b'])
    r = _ref_conv1x1(x, p['wd'], p['bn4_s'], p['bn4_b'], stride=stride)
    return jnp.maximum(h + r, 0.0)


def reference_forward(x_nchw, params):
    x = jnp.transpose(x_nchw, (0, 2, 3, 1))
    y1 = _ref_block(x, params['rm1'])
    y2 = _ref_block(y1, params['rm2'])
    y3 = _ref_block(y2, params['rm3'])
    y4 = _ref_bilinear(y3, y2.shape[1], y2.shape[2]) + y2
    y5 = _ref_bilinear(y4, y1.shape[1], y1.shape[2]) + y1
    y = _ref_bilinear(y5, x.shape[1], x.shape[2]) + x
    c = x.shape[-1]
    ones = jnp.ones((1, c), jnp.float32)
    zeros = jnp.zeros((1, c), jnp.float32)
    gaze = _ref_conv1x1(y, params['c1'], ones, zeros)
    out = (_ref_conv1x1(gaze, params['c2'], ones, zeros)
           + _ref_conv1x1(y, params['cskip'], ones, zeros) + x)
    return jnp.transpose(out, (0, 3, 1, 2)), jnp.transpose(gaze, (0, 3, 1, 2))


# ------------------------------------ main ---------------------------------- #

if __name__ == "__main__":
    key = jax.random.PRNGKey(0)
    k_x, k_p = jax.random.split(key)

    N, C, H, W = 2, 4, 16, 16                         # in_channels = out_channels = 4
    x = jax.random.normal(k_x, (N, C, H, W), jnp.float32)
    params = init_params(k_p, C)

    fwd = jax.jit(hourglass_module_forward)
    out, gazemap = fwd(x, params)
    jax.block_until_ready(out)
    jax.block_until_ready(gazemap)

    assert out.shape == (N, C, H, W) and gazemap.shape == (N, C, H, W)
    assert bool(jnp.all(jnp.isfinite(out))) and bool(jnp.all(jnp.isfinite(gazemap)))

    # correctness: fused Pallas kernel vs pure-JAX reference of the same module
    ref_out, ref_gaze = jax.jit(reference_forward)(x, params)

    def _max_rel(a, b):
        return float(jnp.max(jnp.abs(a - b)) / (jnp.max(jnp.abs(b)) + 1e-6))

    assert _max_rel(out, ref_out) < 5e-2
    assert _max_rel(gazemap, ref_gaze) < 5e-2

    print("KERNEL_OK")
</pallas_src>

<mosaic_0001>
module attributes {stable_mosaic.version = 11 : i64} {
  func.func @kernel(%arg0: memref<4x512xf32, #tpu.memory_space<vmem>>, %arg1: memref<32x4xf32, #tpu.memory_space<vmem>>, %arg2: memref<32x1xf32, #tpu.memory_space<vmem>>, %arg3: memref<9x32x32xf32, #tpu.memory_space<vmem>>, %arg4: memref<32x1xf32, #tpu.memory_space<vmem>>, %arg5: memref<4x32xf32, #tpu.memory_space<vmem>>, %arg6: memref<4x1xf32, #tpu.memory_space<vmem>>, %arg7: memref<4x4xf32, #tpu.memory_space<vmem>>, %arg8: memref<4x1xf32, #tpu.memory_space<vmem>>, %arg9: memref<512x1152xf32, #tpu.memory_space<vmem>>, %arg10: memref<512x128xf32, #tpu.memory_space<vmem>>, %arg11: memref<32x4xf32, #tpu.memory_space<vmem>>, %arg12: memref<32x1xf32, #tpu.memory_space<vmem>>, %arg13: memref<9x32x32xf32, #tpu.memory_space<vmem>>, %arg14: memref<32x1xf32, #tpu.memory_space<vmem>>, %arg15: memref<4x32xf32, #tpu.memory_space<vmem>>, %arg16: memref<4x1xf32, #tpu.memory_space<vmem>>, %arg17: memref<4x4xf32, #tpu.memory_space<vmem>>, %arg18: memref<4x1xf32, #tpu.memory_space<vmem>>, %arg19: memref<9x128x32xf32, #tpu.memory_space<vmem>>, %arg20: memref<128x32xf32, #tpu.memory_space<vmem>>, %arg21: memref<32x4xf32, #tpu.memory_space<vmem>>, %arg22: memref<32x1xf32, #tpu.memory_space<vmem>>, %arg23: memref<9x32x32xf32, #tpu.memory_space<vmem>>, %arg24: memref<32x1xf32, #tpu.memory_space<vmem>>, %arg25: memref<4x32xf32, #tpu.memory_space<vmem>>, %arg26: memref<4x1xf32, #tpu.memory_space<vmem>>, %arg27: memref<4x4xf32, #tpu.memory_space<vmem>>, %arg28: memref<4x1xf32, #tpu.memory_space<vmem>>, %arg29: memref<9x32x8xf32, #tpu.memory_space<vmem>>, %arg30: memref<32x8xf32, #tpu.memory_space<vmem>>, %arg31: memref<8x32xf32, #tpu.memory_space<vmem>>, %arg32: memref<32x128xf32, #tpu.memory_space<vmem>>, %arg33: memref<128x512xf32, #tpu.memory_space<vmem>>, %arg34: memref<4x4xf32, #tpu.memory_space<vmem>>, %arg35: memref<4x4xf32, #tpu.memory_space<vmem>>, %arg36: memref<4x512xf32, #tpu.memory_space<vmem>>, %arg37: memref<4x512xf32, #tpu.memory_space<vmem>>) attributes {dimension_semantics = [], scalar_prefetch = 0 : i64, scratch_operands = 0 : i64, tpu.core_type = #tpu.core_type<tc>} {
    %c0 = arith.constant 0 : index
    %c0_0 = arith.constant 0 : index
    %0 = vector.load %arg0[%c0, %c0_0] : memref<4x512xf32, #tpu.memory_space<vmem>>, vector<4x512xf32>
    %c0_1 = arith.constant 0 : index
    %c0_2 = arith.constant 0 : index
    %1 = vector.load %arg1[%c0_1, %c0_2] : memref<32x4xf32, #tpu.memory_space<vmem>>, vector<32x4xf32>
    %2 = vector.extract_strided_slice %1 {offsets = [0, 0], sizes = [32, 1], strides = [1, 1]} : vector<32x4xf32> to vector<32x1xf32>
    %3 = vector.extract_strided_slice %0 {offsets = [0, 0], sizes = [1, 512], strides = [1, 1]} : vector<4x512xf32> to vector<1x512xf32>
    %4 = vector.broadcast %2 : vector<32x1xf32> to vector<32x512xf32>
    %5 = vector.broadcast %3 : vector<1x512xf32> to vector<32x512xf32>
    %6 = arith.mulf %4, %5 : vector<32x512xf32>
    %7 = vector.extract_strided_slice %1 {offsets = [0, 1], sizes = [32, 1], strides = [1, 1]} : vector<32x4xf32> to vector<32x1xf32>
    %8 = vector.extract_strided_slice %0 {offsets = [1, 0], sizes = [1, 512], strides = [1, 1]} : vector<4x512xf32> to vector<1x512xf32>
    %9 = vector.broadcast %7 : vector<32x1xf32> to vector<32x512xf32>
    %10 = vector.broadcast %8 : vector<1x512xf32> to vector<32x512xf32>
    %11 = arith.mulf %9, %10 : vector<32x512xf32>
    %12 = arith.addf %6, %11 : vector<32x512xf32>
    %13 = vector.extract_strided_slice %1 {offsets = [0, 2], sizes = [32, 1], strides = [1, 1]} : vector<32x4xf32> to vector<32x1xf32>
    %14 = vector.extract_strided_slice %0 {offsets = [2, 0], sizes = [1, 512], strides = [1, 1]} : vector<4x512xf32> to vector<1x512xf32>
    %15 = vector.broadcast %13 : vector<32x1xf32> to vector<32x512xf32>
    %16 = vector.broadcast %14 : vector<1x512xf32> to vector<32x512xf32>
    %17 = arith.mulf %15, %16 : vector<32x512xf32>
    %18 = arith.addf %12, %17 : vector<32x512xf32>
    %19 = vector.extract_strided_slice %1 {offsets = [0, 3], sizes = [32, 1], strides = [1, 1]} : vector<32x4xf32> to vector<32x1xf32>
    %20 = vector.extract_strided_slice %0 {offsets = [3, 0], sizes = [1, 512], strides = [1, 1]} : vector<4x512xf32> to vector<1x512xf32>
    %21 = vector.broadcast %19 : vector<32x1xf32> to vector<32x512xf32>
    %22 = vector.broadcast %20 : vector<1x512xf32> to vector<32x512xf32>
    %23 = arith.mulf %21, %22 : vector<32x512xf32>
    %24 = arith.addf %18, %23 : vector<32x512xf32>
    %c0_3 = arith.constant 0 : index
    %c0_4 = arith.constant 0 : index
    %25 = vector.load %arg2[%c0_3, %c0_4] : memref<32x1xf32, #tpu.memory_space<vmem>>, vector<32x1xf32>
    %26 = vector.broadcast %25 : vector<32x1xf32> to vector<32x512xf32>
    %27 = arith.addf %24, %26 : vector<32x512xf32>
    %cst = arith.constant 0.000000e+00 : f32
    %28 = vector.broadcast %cst : f32 to vector<32x512xf32>
    %29 = arith.maximumf %27, %28 : vector<32x512xf32>
    %c0_5 = arith.constant 0 : index
    %c0_6 = arith.constant 0 : index
    %30 = vector.load %arg9[%c0_5, %c0_6] : memref<512x1152xf32, #tpu.memory_space<vmem>>, vector<512x1152xf32>
    %cst_7 = arith.constant dense<0.000000e+00> : vector<32x1152xf32>
    %31 = tpu.matmul %29, %30, %cst_7 {dimension_numbers = #tpu.dot_dimension_numbers<[1], [0], [0], [1], [0, 0, 1, 1], [], []>} : vector<32x512xf32>, vector<512x1152xf32>, vector<32x1152xf32> -> vector<32x1152xf32>
    %c0_8 = arith.constant 0 : index
    %c0_9 = arith.constant 0 : index
    %c0_10 = arith.constant 0 : index
    %32 = vector.load %arg3[%c0_8, %c0_9, %c0_10] : memref<9x32x32xf32, #tpu.memory_space<vmem>>, vector<1x32x32xf32>
    %33 = vector.shape_cast %32 : vector<1x32x32xf32> to vector<32x32xf32>
    %34 = vector.extract_strided_slice %31 {offsets = [0, 0], sizes = [32, 128], strides = [1, 1]} : vector<32x1152xf32> to vector<32x128xf32>
    %cst_11 = arith.constant dense<0.000000e+00> : vector<32x128xf32>
    %35 = tpu.matmul %33, %34, %cst_11 {dimension_numbers = #tpu.dot_dimension_numbers<[1], [0], [0], [1], [0, 0, 1, 1], [], []>} : vector<32x32xf32>, vector<32x128xf32>, vector<32x128xf32> -> vector<32x128xf32>
    %c1 = arith.constant 1 : index
    %c0_12 = arith.constant 0 : index
    %c0_13 = arith.constant 0 : index
    %36 = vector.load %arg3[%c1, %c0_12, %c0_13] : memref<9x32x32xf32, #tpu.memory_space<vmem>>, vector<1x32x32xf32>
    %37 = vector.shape_cast %36 : vector<1x32x32xf32> to vector<32x32xf32>
    %38 = vector.extract_strided_slice %31 {offsets = [0, 128], sizes = [32, 128], strides = [1, 1]} : vector<32x1152xf32> to vector<32x128xf32>
    %cst_14 = arith.constant dense<0.000000e+00> : vector<32x128xf32>
    %39 = tpu.matmul %37, %38, %cst_14 {dimension_numbers = #tpu.dot_dimension_numbers<[1], [0], [0], [1], [0, 0, 1, 1], [], []>} : vector<32x32xf32>, vector<32x128xf32>, vector<32x128xf32> -> vector<32x128xf32>
    %40 = arith.addf %35, %39 : vector<32x128xf32>
    %c2 = arith.constant 2 : index
    %c0_15 = arith.constant 0 : index
    %c0_16 = arith.constant 0 : index
    %41 = vector.load %arg3[%c2, %c0_15, %c0_16] : memref<9x32x32xf32, #tpu.memory_space<vmem>>, vector<1x32x32xf32>
    %42 = vector.shape_cast %41 : vector<1x32x32xf32> to vector<32x32xf32>
    %43 = vector.extract_strided_slice %31 {offsets = [0, 256], sizes = [32, 128], strides = [1, 1]} : vector<32x1152xf32> to vector<32x128xf32>
    %cst_17 = arith.constant dense<0.000000e+00> : vector<32x128xf32>
    %44 = tpu.matmul %42, %43, %cst_17 {dimension_numbers = #tpu.dot_dimension_numbers<[1], [0], [0], [1], [0, 0, 1, 1], [], []>} : vector<32x32xf32>, vector<32x128xf32>, vector<32x128xf32> -> vector<32x128xf32>
    %45 = arith.addf %40, %44 : vector<32x128xf32>
    %c3 = arith.constant 3 : index
    %c0_18 = arith.constant 0 : index
    %c0_19 = arith.constant 0 : index
    %46 = vector.load %arg3[%c3, %c0_18, %c0_19] : memref<9x32x32xf32, #tpu.memory_space<vmem>>, vector<1x32x32xf32>
    %47 = vector.shape_cast %46 : vector<1x32x32xf32> to vector<32x32xf32>
    %48 = vector.extract_strided_slice %31 {offsets = [0, 384], sizes = [32, 128], strides = [1, 1]} : vector<32x1152xf32> to vector<32x128xf32>
    %cst_20 = arith.constant dense<0.000000e+00> : vector<32x128xf32>
    %49 = tpu.matmul %47, %48, %cst_20 {dimension_numbers = #tpu.dot_dimension_numbers<[1], [0], [0], [1], [0, 0, 1, 1], [], []>} : vector<32x32xf32>, vector<32x128xf32>, vector<32x128xf32> -> vector<32x128xf32>
    %50 = arith.addf %45, %49 : vector<32x128xf32>
    %c4 = arith.constant 4 : index
    %c0_21 = arith.constant 0 : index
    %c0_22 = arith.constant 0 : index
    %51 = vector.load %arg3[%c4, %c0_21, %c0_22] : memref<9x32x32xf32, #tpu.memory_space<vmem>>, vector<1x32x32xf32>
    %52 = vector.shape_cast %51 : vector<1x32x32xf32> to vector<32x32xf32>
    %53 = vector.extract_strided_slice %31 {offsets = [0, 512], sizes = [32, 128], strides = [1, 1]} : vector<32x1152xf32> to vector<32x128xf32>
    %cst_23 = arith.constant dense<0.000000e+00> : vector<32x128xf32>
    %54 = tpu.matmul %52, %53, %cst_23 {dimension_numbers = #tpu.dot_dimension_numbers<[1], [0], [0], [1], [0, 0, 1, 1], [], []>} : vector<32x32xf32>, vector<32x128xf32>, vector<32x128xf32> -> vector<32x128xf32>
    %55 = arith.addf %50, %54 : vector<32x128xf32>
    %c5 = arith.constant 5 : index
    %c0_24 = arith.constant 0 : index
    %c0_25 = arith.constant 0 : index
    %56 = vector.load %arg3[%c5, %c0_24, %c0_25] : memref<9x32x32xf32, #tpu.memory_space<vmem>>, vector<1x32x32xf32>
    %57 = vector.shape_cast %56 : vector<1x32x32xf32> to vector<32x32xf32>
    %58 = vector.extract_strided_slice %31 {offsets = [0, 640], sizes = [32, 128], strides = [1, 1]} : vector<32x1152xf32> to vector<32x128xf32>
    %cst_26 = arith.constant dense<0.000000e+00> : vector<32x128xf32>
    %59 = tpu.matmul %57, %58, %cst_26 {dimension_numbers = #tpu.dot_dimension_numbers<[1], [0], [0], [1], [0, 0, 1, 1], [], []>} : vector<32x32xf32>, vector<32x128xf32>, vector<32x128xf32> -> vector<32x128xf32>
    %60 = arith.addf %55, %59 : vector<32x128xf32>
    %c6 = arith.constant 6 : index
    %c0_27 = arith.constant 0 : index
    %c0_28 = arith.constant 0 : index
    %61 = vector.load %arg3[%c6, %c0_27, %c0_28] : memref<9x32x32xf32, #tpu.memory_space<vmem>>, vector<1x32x32xf32>
    %62 = vector.shape_cast %61 : vector<1x32x32xf32> to vector<32x32xf32>
    %63 = vector.extract_strided_slice %31 {offsets = [0, 768], sizes = [32, 128], strides = [1, 1]} : vector<32x1152xf32> to vector<32x128xf32>
    %cst_29 = arith.constant dense<0.000000e+00> : vector<32x128xf32>
    %64 = tpu.matmul %62, %63, %cst_29 {dimension_numbers = #tpu.dot_dimension_numbers<[1], [0], [0], [1], [0, 0, 1, 1], [], []>} : vector<32x32xf32>, vector<32x128xf32>, vector<32x128xf32> -> vector<32x128xf32>
    %65 = arith.addf %60, %64 : vector<32x128xf32>
    %c7 = arith.constant 7 : index
    %c0_30 = arith.constant 0 : index
    %c0_31 = arith.constant 0 : index
    %66 = vector.load %arg3[%c7, %c0_30, %c0_31] : memref<9x32x32xf32, #tpu.memory_space<vmem>>, vector<1x32x32xf32>
    %67 = vector.shape_cast %66 : vector<1x32x32xf32> to vector<32x32xf32>
    %68 = vector.extract_strided_slice %31 {offsets = [0, 896], sizes = [32, 128], strides = [1, 1]} : vector<32x1152xf32> to vector<32x128xf32>
    %cst_32 = arith.constant dense<0.000000e+00> : vector<32x128xf32>
    %69 = tpu.matmul %67, %68, %cst_32 {dimension_numbers = #tpu.dot_dimension_numbers<[1], [0], [0], [1], [0, 0, 1, 1], [], []>} : vector<32x32xf32>, vector<32x128xf32>, vector<32x128xf32> -> vector<32x128xf32>
    %70 = arith.addf %65, %69 : vector<32x128xf32>
    %c8 = arith.constant 8 : index
    %c0_33 = arith.constant 0 : index
    %c0_34 = arith.constant 0 : index
    %71 = vector.load %arg3[%c8, %c0_33, %c0_34] : memref<9x32x32xf32, #tpu.memory_space<vmem>>, vector<1x32x32xf32>
    %72 = vector.shape_cast %71 : vector<1x32x32xf32> to vector<32x32xf32>
    %73 = vector.extract_strided_slice %31 {offsets = [0, 1024], sizes = [32, 128], strides = [1, 1]} : vector<32x1152xf32> to vector<32x128xf32>
    %cst_35 = arith.constant dense<0.000000e+00> : vector<32x128xf32>
    %74 = tpu.matmul %72, %73, %cst_35 {dimension_numbers = #tpu.dot_dimension_numbers<[1], [0], [0], [1], [0, 0, 1, 1], [], []>} : vector<32x32xf32>, vector<32x128xf32>, vector<32x128xf32> -> vector<32x128xf32>
    %75 = arith.addf %70, %74 : vector<32x128xf32>
    %c0_36 = arith.constant 0 : index
    %c0_37 = arith.constant 0 : index
    %76 = vector.load %arg4[%c0_36, %c0_37] : memref<32x1xf32, #tpu.memory_space<vmem>>, vector<32x1xf32>
    %77 = vector.broadcast %76 : vector<32x1xf32> to vector<32x128xf32>
    %78 = arith.addf %75, %77 : vector<32x128xf32>
    %cst_38 = arith.constant 0.000000e+00 : f32
    %79 = vector.broadcast %cst_38 : f32 to vector<32x128xf32>
    %80 = arith.maximumf %78, %79 : vector<32x128xf32>
    %c0_39 = arith.constant 0 : index
    %c0_40 = arith.constant 0 : index
    %81 = vector.load %arg5[%c0_39, %c0_40] : memref<4x32xf32, #tpu.memory_space<vmem>>, vector<4x32xf32>
    %cst_41 = arith.constant dense<0.000000e+00> : vector<4x128xf32>
    %82 = tpu.matmul %81, %80, %cst_41 {dimension_numbers = #tpu.dot_dimension_numbers<[1], [0], [0], [1], [0, 0, 1, 1], [], []>} : vector<4x32xf32>, vector<32x128xf32>, vector<4x128xf32> -> vector<4x128xf32>
    %c0_42 = arith.constant 0 : index
    %c0_43 = arith.constant 0 : index
    %83 = vector.load %arg6[%c0_42, %c0_43] : memref<4x1xf32, #tpu.memory_space<vmem>>, vector<4x1xf32>
    %84 = vector.broadcast %83 : vector<4x1xf32> to vector<4x128xf32>
    %85 = arith.addf %82, %84 : vector<4x128xf32>
    %c0_44 = arith.constant 0 : index
    %c0_45 = arith.constant 0 : index
    %86 = vector.load %arg7[%c0_44, %c0_45] : memref<4x4xf32, #tpu.memory_space<vmem>>, vector<4x4xf32>
    %87 = vector.extract_strided_slice %86 {offsets = [0, 0], sizes = [4, 1], strides = [1, 1]} : vector<4x4xf32> to vector<4x1xf32>
    %88 = vector.extract_strided_slice %0 {offsets = [0, 0], sizes = [1, 512], strides = [1, 1]} : vector<4x512xf32> to vector<1x512xf32>
    %89 = vector.broadcast %87 : vector<4x1xf32> to vector<4x512xf32>
    %90 = vector.broadcast %88 : vector<1x512xf32> to vector<4x512xf32>
    %91 = arith.mulf %89, %90 : vector<4x512xf32>
    %92 = vector.extract_strided_slice %86 {offsets = [0, 1], sizes = [4, 1], strides = [1, 1]} : vector<4x4xf32> to vector<4x1xf32>
    %93 = vector.extract_strided_slice %0 {offsets = [1, 0], sizes = [1, 512], strides = [1, 1]} : vector<4x512xf32> to vector<1x512xf32>
    %94 = vector.broadcast %92 : vector<4x1xf32> to vector<4x512xf32>
    %95 = vector.broadcast %93 : vector<1x512xf32> to vector<4x512xf32>
    %96 = arith.mulf %94, %95 : vector<4x512xf32>
    %97 = arith.addf %91, %96 : vector<4x512xf32>
    %98 = vector.extract_strided_slice %86 {offsets = [0, 2], sizes = [4, 1], strides = [1, 1]} : vector<4x4xf32> to vector<4x1xf32>
    %99 = vector.extract_strided_slice %0 {offsets = [2, 0], sizes = [1, 512], strides = [1, 1]} : vector<4x512xf32> to vector<1x512xf32>
    %100 = vector.broadcast %98 : vector<4x1xf32> to vector<4x512xf32>
    %101 = vector.broadcast %99 : vector<1x512xf32> to vector<4x512xf32>
    %102 = arith.mulf %100, %101 : vector<4x512xf32>
    %103 = arith.addf %97, %102 : vector<4x512xf32>
    %104 = vector.extract_strided_slice %86 {offsets = [0, 3], sizes = [4, 1], strides = [1, 1]} : vector<4x4xf32> to vector<4x1xf32>
    %105 = vector.extract_strided_slice %0 {offsets = [3, 0], sizes = [1, 512], strides = [1, 1]} : vector<4x512xf32> to vector<1x512xf32>
    %106 = vector.broadcast %104 : vector<4x1xf32> to vector<4x512xf32>
    %107 = vector.broadcast %105 : vector<1x512xf32> to vector<4x512xf32>
    %108 = arith.mulf %106, %107 : vector<4x512xf32>
    %109 = arith.addf %103, %108 : vector<4x512xf32>
    %c0_46 = arith.constant 0 : index
    %c0_47 = arith.constant 0 : index
    %110 = vector.load %arg10[%c0_46, %c0_47] : memref<512x128xf32, #tpu.memory_space<vmem>>, vector<512x128xf32>
    %cst_48 = arith.constant dense<0.000000e+00> : vector<4x128xf32>
    %111 = tpu.matmul %109, %110, %cst_48 {dimension_numbers = #tpu.dot_dimension_numbers<[1], [0], [0], [1], [0, 0, 1, 1], [], []>} : vector<4x512xf32>, vector<512x128xf32>, vector<4x128xf32> -> vector<4x128xf32>
    %c0_49 = arith.constant 0 : index
    %c0_50 = arith.constant 0 : index
    %112 = vector.load %arg8[%c0_49, %c0_50] : memref<4x1xf32, #tpu.memory_space<vmem>>, vector<4x1xf32>
    %113 = vector.broadcast %112 : vector<4x1xf32> to vector<4x128xf32>
    %114 = arith.addf %111, %113 : vector<4x128xf32>
    %115 = arith.addf %85, %114 : vector<4x128xf32>
    %cst_51 = arith.constant 0.000000e+00 : f32
    %116 = vector.broadcast %cst_51 : f32 to vector<4x128xf32>
    %117 = arith.maximumf %115, %116 : vector<4x128xf32>
    %c0_52 = arith.constant 0 : index
    %c0_53 = arith.constant 0 : index
    %118 = vector.load %arg11[%c0_52, %c0_53] : memref<32x4xf32, #tpu.memory_space<vmem>>, vector<32x4xf32>
    %119 = vector.extract_strided_slice %118 {offsets = [0, 0], sizes = [32, 1], strides = [1, 1]} : vector<32x4xf32> to vector<32x1xf32>
    %120 = vector.extract_strided_slice %117 {offsets = [0, 0], sizes = [1, 128], strides = [1, 1]} : vector<4x128xf32> to vector<1x128xf32>
    %121 = vector.broadcast %119 : vector<32x1xf32> to vector<32x128xf32>
    %122 = vector.broadcast %120 : vector<1x128xf32> to vector<32x128xf32>
    %123 = arith.mulf %121, %122 : vector<32x128xf32>
    %124 = vector.extract_strided_slice %118 {offsets = [0, 1], sizes = [32, 1], strides = [1, 1]} : vector<32x4xf32> to vector<32x1xf32>
    %125 = vector.extract_strided_slice %117 {offsets = [1, 0], sizes = [1, 128], strides = [1, 1]} : vector<4x128xf32> to vector<1x128xf32>
    %126 = vector.broadcast %124 : vector<32x1xf32> to vector<32x128xf32>
    %127 = vector.broadcast %125 : vector<1x128xf32> to vector<32x128xf32>
    %128 = arith.mulf %126, %127 : vector<32x128xf32>
    %129 = arith.addf %123, %128 : vector<32x128xf32>
    %130 = vector.extract_strided_slice %118 {offsets = [0, 2], sizes = [32, 1], strides = [1, 1]} : vector<32x4xf32> to vector<32x1xf32>
    %131 = vector.extract_strided_slice %117 {offsets = [2, 0], sizes = [1, 128], strides = [1, 1]} : vector<4x128xf32> to vector<1x128xf32>
    %132 = vector.broadcast %130 : vector<32x1xf32> to vector<32x128xf32>
    %133 = vector.broadcast %131 : vector<1x128xf32> to vector<32x128xf32>
    %134 = arith.mulf %132, %133 : vector<32x128xf32>
    %135 = arith.addf %129, %134 : vector<32x128xf32>
    %136 = vector.extract_strided_slice %118 {offsets = [0, 3], sizes = [32, 1], strides = [1, 1]} : vector<32x4xf32> to vector<32x1xf32>
    %137 = vector.extract_strided_slice %117 {offsets = [3, 0], sizes = [1, 128], strides = [1, 1]} : vector<4x128xf32> to vector<1x128xf32>
    %138 = vector.broadcast %136 : vector<32x1xf32> to vector<32x128xf32>
    %139 = vector.broadcast %137 : vector<1x128xf32> to vector<32x128xf32>
    %140 = arith.mulf %138, %139 : vector<32x128xf32>
    %141 = arith.addf %135, %140 : vector<32x128xf32>
    %c0_54 = arith.constant 0 : index
    %c0_55 = arith.constant 0 : index
    %142 = vector.load %arg12[%c0_54, %c0_55] : memref<32x1xf32, #tpu.memory_space<vmem>>, vector<32x1xf32>
    %143 = vector.broadcast %142 : vector<32x1xf32> to vector<32x128xf32>
    %144 = arith.addf %141, %143 : vector<32x128xf32>
    %cst_56 = arith.constant 0.000000e+00 : f32
    %145 = vector.broadcast %cst_56 : f32 to vector<32x128xf32>
    %146 = arith.maximumf %144, %145 : vector<32x128xf32>
    %c0_57 = arith.constant 0 : index
    %c0_58 = arith.constant 0 : index
    %c0_59 = arith.constant 0 : index
    %147 = vector.load %arg13[%c0_57, %c0_58, %c0_59] : memref<9x32x32xf32, #tpu.memory_space<vmem>>, vector<1x32x32xf32>
    %148 = vector.shape_cast %147 : vector<1x32x32xf32> to vector<32x32xf32>
    %c0_60 = arith.constant 0 : index
    %c0_61 = arith.constant 0 : index
    %c0_62 = arith.constant 0 : index
    %149 = vector.load %arg19[%c0_60, %c0_61, %c0_62] : memref<9x128x32xf32, #tpu.memory_space<vmem>>, vector<1x128x32xf32>
    %150 = vector.shape_cast %149 : vector<1x128x32xf32> to vector<128x32xf32>
    %cst_63 = arith.constant dense<0.000000e+00> : vector<32x32xf32>
    %151 = tpu.matmul %146, %150, %cst_63 {dimension_numbers = #tpu.dot_dimension_numbers<[1], [0], [0], [1], [0, 0, 1, 1], [], []>} : vector<32x128xf32>, vector<128x32xf32>, vector<32x32xf32> -> vector<32x32xf32>
    %cst_64 = arith.constant dense<0.000000e+00> : vector<32x32xf32>
    %152 = tpu.matmul %148, %151, %cst_64 {dimension_numbers = #tpu.dot_dimension_numbers<[1], [0], [0], [1], [0, 0, 1, 1], [], []>} : vector<32x32xf32>, vector<32x32xf32>, vector<32x32xf32> -> vector<32x32xf32>
    %c1_65 = arith.constant 1 : index
    %c0_66 = arith.constant 0 : index
    %c0_67 = arith.constant 0 : index
    %153 = vector.load %arg13[%c1_65, %c0_66, %c0_67] : memref<9x32x32xf32, #tpu.memory_space<vmem>>, vector<1x32x32xf32>
    %154 = vector.shape_cast %153 : vector<1x32x32xf32> to vector<32x32xf32>
    %c1_68 = arith.constant 1 : index
    %c0_69 = arith.constant 0 : index
    %c0_70 = arith.constant 0 : index
    %155 = vector.load %arg19[%c1_68, %c0_69, %c0_70] : memref<9x128x32xf32, #tpu.memory_space<vmem>>, vector<1x128x32xf32>
    %156 = vector.shape_cast %155 : vector<1x128x32xf32> to vector<128x32xf32>
    %cst_71 = arith.constant dense<0.000000e+00> : vector<32x32xf32>
    %157 = tpu.matmul %146, %156, %cst_71 {dimension_numbers = #tpu.dot_dimension_numbers<[1], [0], [0], [1], [0, 0, 1, 1], [], []>} : vector<32x128xf32>, vector<128x32xf32>, vector<32x32xf32> -> vector<32x32xf32>
    %cst_72 = arith.constant dense<0.000000e+00> : vector<32x32xf32>
    %158 = tpu.matmul %154, %157, %cst_72 {dimension_numbers = #tpu.dot_dimension_numbers<[1], [0], [0], [1], [0, 0, 1, 1], [], []>} : vector<32x32xf32>, vector<32x32xf32>, vector<32x32xf32> -> vector<32x32xf32>
    %159 = arith.addf %152, %158 : vector<32x32xf32>
    %c2_73 = arith.constant 2 : index
    %c0_74 = arith.constant 0 : index
    %c0_75 = arith.constant 0 : index
    %160 = vector.load %arg13[%c2_73, %c0_74, %c0_75] : memref<9x32x32xf32, #tpu.memory_space<vmem>>, vector<1x32x32xf32>
    %161 = vector.shape_cast %160 : vector<1x32x32xf32> to vector<32x32xf32>
    %c2_76 = arith.constant 2 : index
    %c0_77 = arith.constant 0 : index
    %c0_78 = arith.constant 0 : index
    %162 = vector.load %arg19[%c2_76, %c0_77, %c0_78] : memref<9x128x32xf32, #tpu.memory_space<vmem>>, vector<1x128x32xf32>
    %163 = vector.shape_cast %162 : vector<1x128x32xf32> to vector<128x32xf32>
    %cst_79 = arith.constant dense<0.000000e+00> : vector<32x32xf32>
    %164 = tpu.matmul %146, %163, %cst_79 {dimension_numbers = #tpu.dot_dimension_numbers<[1], [0], [0], [1], [0, 0, 1, 1], [], []>} : vector<32x128xf32>, vector<128x32xf32>, vector<32x32xf32> -> vector<32x32xf32>
    %cst_80 = arith.constant dense<0.000000e+00> : vector<32x32xf32>
    %165 = tpu.matmul %161, %164, %cst_80 {dimension_numbers = #tpu.dot_dimension_numbers<[1], [0], [0], [1], [0, 0, 1, 1], [], []>} : vector<32x32xf32>, vector<32x32xf32>, vector<32x32xf32> -> vector<32x32xf32>
    %166 = arith.addf %159, %165 : vector<32x32xf32>
    %c3_81 = arith.constant 3 : index
    %c0_82 = arith.constant 0 : index
    %c0_83 = arith.constant 0 : index
    %167 = vector.load %arg13[%c3_81, %c0_82, %c0_83] : memref<9x32x32xf32, #tpu.memory_space<vmem>>, vector<1x32x32xf32>
    %168 = vector.shape_cast %167 : vector<1x32x32xf32> to vector<32x32xf32>
    %c3_84 = arith.constant 3 : index
    %c0_85 = arith.constant 0 : index
    %c0_86 = arith.constant 0 : index
    %169 = vector.load %arg19[%c3_84, %c0_85, %c0_86] : memref<9x128x32xf32, #tpu.memory_space<vmem>>, vector<1x128x32xf32>
    %170 = vector.shape_cast %169 : vector<1x128x32xf32> to vector<128x32xf32>
    %cst_87 = arith.constant dense<0.000000e+00> : vector<32x32xf32>
    %171 = tpu.matmul %146, %170, %cst_87 {dimension_numbers = #tpu.dot_dimension_numbers<[1], [0], [0], [1], [0, 0, 1, 1], [], []>} : vector<32x128xf32>, vector<128x32xf32>, vector<32x32xf32> -> vector<32x32xf32>
    %cst_88 = arith.constant dense<0.000000e+00> : vector<32x32xf32>
    %172 = tpu.matmul %168, %171, %cst_88 {dimension_numbers = #tpu.dot_dimension_numbers<[1], [0], [0], [1], [0, 0, 1, 1], [], []>} : vector<32x32xf32>, vector<32x32xf32>, vector<32x32xf32> -> vector<32x32xf32>
    %173 = arith.addf %166, %172 : vector<32x32xf32>
    %c4_89 = arith.constant 4 : index
    %c0_90 = arith.constant 0 : index
    %c0_91 = arith.constant 0 : index
    %174 = vector.load %arg13[%c4_89, %c0_90, %c0_91] : memref<9x32x32xf32, #tpu.memory_space<vmem>>, vector<1x32x32xf32>
    %175 = vector.shape_cast %174 : vector<1x32x32xf32> to vector<32x32xf32>
    %c4_92 = arith.constant 4 : index
    %c0_93 = arith.constant 0 : index
    %c0_94 = arith.constant 0 : index
    %176 = vector.load %arg19[%c4_92, %c0_93, %c0_94] : memref<9x128x32xf32, #tpu.memory_space<vmem>>, vector<1x128x32xf32>
    %177 = vector.shape_cast %176 : vector<1x128x32xf32> to vector<128x32xf32>
    %cst_95 = arith.constant dense<0.000000e+00> : vector<32x32xf32>
    %178 = tpu.matmul %146, %177, %cst_95 {dimension_numbers = #tpu.dot_dimension_numbers<[1], [0], [0], [1], [0, 0, 1, 1], [], []>} : vector<32x128xf32>, vector<128x32xf32>, vector<32x32xf32> -> vector<32x32xf32>
    %cst_96 = arith.constant dense<0.000000e+00> : vector<32x32xf32>
    %179 = tpu.matmul %175, %178, %cst_96 {dimension_numbers = #tpu.dot_dimension_numbers<[1], [0], [0], [1], [0, 0, 1, 1], [], []>} : vector<32x32xf32>, vector<32x32xf32>, vector<32x32xf32> -> vector<32x32xf32>
    %180 = arith.addf %173, %179 : vector<32x32xf32>
    %c5_97 = arith.constant 5 : index
    %c0_98 = arith.constant 0 : index
    %c0_99 = arith.constant 0 : index
    %181 = vector.load %arg13[%c5_97, %c0_98, %c0_99] : memref<9x32x32xf32, #tpu.memory_space<vmem>>, vector<1x32x32xf32>
    %182 = vector.shape_cast %181 : vector<1x32x32xf32> to vector<32x32xf32>
    %c5_100 = arith.constant 5 : index
    %c0_101 = arith.constant 0 : index
    %c0_102 = arith.constant 0 : index
    %183 = vector.load %arg19[%c5_100, %c0_101, %c0_102] : memref<9x128x32xf32, #tpu.memory_space<vmem>>, vector<1x128x32xf32>
    %184 = vector.shape_cast %183 : vector<1x128x32xf32> to vector<128x32xf32>
    %cst_103 = arith.constant dense<0.000000e+00> : vector<32x32xf32>
    %185 = tpu.matmul %146, %184, %cst_103 {dimension_numbers = #tpu.dot_dimension_numbers<[1], [0], [0], [1], [0, 0, 1, 1], [], []>} : vector<32x128xf32>, vector<128x32xf32>, vector<32x32xf32> -> vector<32x32xf32>
    %cst_104 = arith.constant dense<0.000000e+00> : vector<32x32xf32>
    %186 = tpu.matmul %182, %185, %cst_104 {dimension_numbers = #tpu.dot_dimension_numbers<[1], [0], [0], [1], [0, 0, 1, 1], [], []>} : vector<32x32xf32>, vector<32x32xf32>, vector<32x32xf32> -> vector<32x32xf32>
    %187 = arith.addf %180, %186 : vector<32x32xf32>
    %c6_105 = arith.constant 6 : index
    %c0_106 = arith.constant 0 : index
    %c0_107 = arith.constant 0 : index
    %188 = vector.load %arg13[%c6_105, %c0_106, %c0_107] : memref<9x32x32xf32, #tpu.memory_space<vmem>>, vector<1x32x32xf32>
    %189 = vector.shape_cast %188 : vector<1x32x32xf32> to vector<32x32xf32>
    %c6_108 = arith.constant 6 : index
    %c0_109 = arith.constant 0 : index
    %c0_110 = arith.constant 0 : index
    %190 = vector.load %arg19[%c6_108, %c0_109, %c0_110] : memref<9x128x32xf32, #tpu.memory_space<vmem>>, vector<1x128x32xf32>
    %191 = vector.shape_cast %190 : vector<1x128x32xf32> to vector<128x32xf32>
    %cst_111 = arith.constant dense<0.000000e+00> : vector<32x32xf32>
    %192 = tpu.matmul %146, %191, %cst_111 {dimension_numbers = #tpu.dot_dimension_numbers<[1], [0], [0], [1], [0, 0, 1, 1], [], []>} : vector<32x128xf32>, vector<128x32xf32>, vector<32x32xf32> -> vector<32x32xf32>
    %cst_112 = arith.constant dense<0.000000e+00> : vector<32x32xf32>
    %193 = tpu.matmul %189, %192, %cst_112 {dimension_numbers = #tpu.dot_dimension_numbers<[1], [0], [0], [1], [0, 0, 1, 1], [], []>} : vector<32x32xf32>, vector<32x32xf32>, vector<32x32xf32> -> vector<32x32xf32>
    %194 = arith.addf %187, %193 : vector<32x32xf32>
    %c7_113 = arith.constant 7 : index
    %c0_114 = arith.constant 0 : index
    %c0_115 = arith.constant 0 : index
    %195 = vector.load %arg13[%c7_113, %c0_114, %c0_115] : memref<9x32x32xf32, #tpu.memory_space<vmem>>, vector<1x32x32xf32>
    %196 = vector.shape_cast %195 : vector<1x32x32xf32> to vector<32x32xf32>
    %c7_116 = arith.constant 7 : index
    %c0_117 = arith.constant 0 : index
    %c0_118 = arith.constant 0 : index
    %197 = vector.load %arg19[%c7_116, %c0_117, %c0_118] : memref<9x128x32xf32, #tpu.memory_space<vmem>>, vector<1x128x32xf32>
    %198 = vector.shape_cast %197 : vector<1x128x32xf32> to vector<128x32xf32>
    %cst_119 = arith.constant dense<0.000000e+00> : vector<32x32xf32>
    %199 = tpu.matmul %146, %198, %cst_119 {dimension_numbers = #tpu.dot_dimension_numbers<[1], [0], [0], [1], [0, 0, 1, 1], [], []>} : vector<32x128xf32>, vector<128x32xf32>, vector<32x32xf32> -> vector<32x32xf32>
    %cst_120 = arith.constant dense<0.000000e+00> : vector<32x32xf32>
    %200 = tpu.matmul %196, %199, %cst_120 {dimension_numbers = #tpu.dot_dimension_numbers<[1], [0], [0], [1], [0, 0, 1, 1], [], []>} : vector<32x32xf32>, vector<32x32xf32>, vector<32x32xf32> -> vector<32x32xf32>
    %201 = arith.addf %194, %200 : vector<32x32xf32>
    %c8_121 = arith.constant 8 : index
    %c0_122 = arith.constant 0 : index
    %c0_123 = arith.constant 0 : index
    %202 = vector.load %arg13[%c8_121, %c0_122, %c0_123] : memref<9x32x32xf32, #tpu.memory_space<vmem>>, vector<1x32x32xf32>
    %203 = vector.shape_cast %202 : vector<1x32x32xf32> to vector<32x32xf32>
    %c8_124 = arith.constant 8 : index
    %c0_125 = arith.constant 0 : index
    %c0_126 = arith.constant 0 : index
    %204 = vector.load %arg19[%c8_124, %c0_125, %c0_126] : memref<9x128x32xf32, #tpu.memory_space<vmem>>, vector<1x128x32xf32>
    %205 = vector.shape_cast %204 : vector<1x128x32xf32> to vector<128x32xf32>
    %cst_127 = arith.constant dense<0.000000e+00> : vector<32x32xf32>
    %206 = tpu.matmul %146, %205, %cst_127 {dimension_numbers = #tpu.dot_dimension_numbers<[1], [0], [0], [1], [0, 0, 1, 1], [], []>} : vector<32x128xf32>, vector<128x32xf32>, vector<32x32xf32> -> vector<32x32xf32>
    %cst_128 = arith.constant dense<0.000000e+00> : vector<32x32xf32>
    %207 = tpu.matmul %203, %206, %cst_128 {dimension_numbers = #tpu.dot_dimension_numbers<[1], [0], [0], [1], [0, 0, 1, 1], [], []>} : vector<32x32xf32>, vector<32x32xf32>, vector<32x32xf32> -> vector<32x32xf32>
    %208 = arith.addf %201, %207 : vector<32x32xf32>
    %c0_129 = arith.constant 0 : index
    %c0_130 = arith.constant 0 : index
    %209 = vector.load %arg14[%c0_129, %c0_130] : memref<32x1xf32, #tpu.memory_space<vmem>>, vector<32x1xf32>
    %210 = vector.broadcast %209 : vector<32x1xf32> to vector<32x32xf32>
    %211 = arith.addf %208, %210 : vector<32x32xf32>
    %cst_131 = arith.constant 0.000000e+00 : f32
    %212 = vector.broadcast %cst_131 : f32 to vector<32x32xf32>
    %213 = arith.maximumf %211, %212 : vector<32x32xf32>
    %c0_132 = arith.constant 0 : index
    %c0_133 = arith.constant 0 : index
    %214 = vector.load %arg15[%c0_132, %c0_133] : memref<4x32xf32, #tpu.memory_space<vmem>>, vector<4x32xf32>
    %cst_134 = arith.constant dense<0.000000e+00> : vector<4x32xf32>
    %215 = tpu.matmul %214, %213, %cst_134 {dimension_numbers = #tpu.dot_dimension_numbers<[1], [0], [0], [1], [0, 0, 1, 1], [], []>} : vector<4x32xf32>, vector<32x32xf32>, vector<4x32xf32> -> vector<4x32xf32>
    %c0_135 = arith.constant 0 : index
    %c0_136 = arith.constant 0 : index
    %216 = vector.load %arg16[%c0_135, %c0_136] : memref<4x1xf32, #tpu.memory_space<vmem>>, vector<4x1xf32>
    %217 = vector.broadcast %216 : vector<4x1xf32> to vector<4x32xf32>
    %218 = arith.addf %215, %217 : vector<4x32xf32>
    %c0_137 = arith.constant 0 : index
    %c0_138 = arith.constant 0 : index
    %219 = vector.load %arg17[%c0_137, %c0_138] : memref<4x4xf32, #tpu.memory_space<vmem>>, vector<4x4xf32>
    %220 = vector.extract_strided_slice %219 {offsets = [0, 0], sizes = [4, 1], strides = [1, 1]} : vector<4x4xf32> to vector<4x1xf32>
    %221 = vector.extract_strided_slice %117 {offsets = [0, 0], sizes = [1, 128], strides = [1, 1]} : vector<4x128xf32> to vector<1x128xf32>
    %222 = vector.broadcast %220 : vector<4x1xf32> to vector<4x128xf32>
    %223 = vector.broadcast %221 : vector<1x128xf32> to vector<4x128xf32>
    %224 = arith.mulf %222, %223 : vector<4x128xf32>
    %225 = vector.extract_strided_slice %219 {offsets = [0, 1], sizes = [4, 1], strides = [1, 1]} : vector<4x4xf32> to vector<4x1xf32>
    %226 = vector.extract_strided_slice %117 {offsets = [1, 0], sizes = [1, 128], strides = [1, 1]} : vector<4x128xf32> to vector<1x128xf32>
    %227 = vector.broadcast %225 : vector<4x1xf32> to vector<4x128xf32>
    %228 = vector.broadcast %226 : vector<1x128xf32> to vector<4x128xf32>
    %229 = arith.mulf %227, %228 : vector<4x128xf32>
    %230 = arith.addf %224, %229 : vector<4x128xf32>
    %231 = vector.extract_strided_slice %219 {offsets = [0, 2], sizes = [4, 1], strides = [1, 1]} : vector<4x4xf32> to vector<4x1xf32>
    %232 = vector.extract_strided_slice %117 {offsets = [2, 0], sizes = [1, 128], strides = [1, 1]} : vector<4x128xf32> to vector<1x128xf32>
    %233 = vector.broadcast %231 : vector<4x1xf32> to vector<4x128xf32>
    %234 = vector.broadcast %232 : vector<1x128xf32> to vector<4x128xf32>
    %235 = arith.mulf %233, %234 : vector<4x128xf32>
    %236 = arith.addf %230, %235 : vector<4x128xf32>
    %237 = vector.extract_strided_slice %219 {offsets = [0, 3], sizes = [4, 1], strides = [1, 1]} : vector<4x4xf32> to vector<4x1xf32>
    %238 = vector.extract_strided_slice %117 {offsets = [3, 0], sizes = [1, 128], strides = [1, 1]} : vector<4x128xf32> to vector<1x128xf32>
    %239 = vector.broadcast %237 : vector<4x1xf32> to vector<4x128xf32>
    %240 = vector.broadcast %238 : vector<1x128xf32> to vector<4x128xf32>
    %241 = arith.mulf %239, %240 : vector<4x128xf32>
    %242 = arith.addf %236, %241 : vector<4x128xf32>
    %c0_139 = arith.constant 0 : index
    %c0_140 = arith.constant 0 : index
    %243 = vector.load %arg20[%c0_139, %c0_140] : memref<128x32xf32, #tpu.memory_space<vmem>>, vector<128x32xf32>
    %cst_141 = arith.constant dense<0.000000e+00> : vector<4x32xf32>
    %244 = tpu.matmul %242, %243, %cst_141 {dimension_numbers = #tpu.dot_dimension_numbers<[1], [0], [0], [1], [0, 0, 1, 1], [], []>} : vector<4x128xf32>, vector<128x32xf32>, vector<4x32xf32> -> vector<4x32xf32>
    %c0_142 = arith.constant 0 : index
    %c0_143 = arith.constant 0 : index
    %245 = vector.load %arg18[%c0_142, %c0_143] : memref<4x1xf32, #tpu.memory_space<vmem>>, vector<4x1xf32>
    %246 = vector.broadcast %245 : vector<4x1xf32> to vector<4x32xf32>
    %247 = arith.addf %244, %246 : vector<4x32xf32>
    %248 = arith.addf %218, %247 : vector<4x32xf32>
    %cst_144 = arith.constant 0.000000e+00 : f32
    %249 = vector.broadcast %cst_144 : f32 to vector<4x32xf32>
    %250 = arith.maximumf %248, %249 : vector<4x32xf32>
    %c0_145 = arith.constant 0 : index
    %c0_146 = arith.constant 0 : index
    %251 = vector.load %arg21[%c0_145, %c0_146] : memref<32x4xf32, #tpu.memory_space<vmem>>, vector<32x4xf32>
    %252 = vector.extract_strided_slice %251 {offsets = [0, 0], sizes = [32, 1], strides = [1, 1]} : vector<32x4xf32> to vector<32x1xf32>
    %253 = vector.extract_strided_slice %250 {offsets = [0, 0], sizes = [1, 32], strides = [1, 1]} : vector<4x32xf32> to vector<1x32xf32>
    %254 = vector.broadcast %252 : vector<32x1xf32> to vector<32x32xf32>
    %255 = vector.broadcast %253 : vector<1x32xf32> to vector<32x32xf32>
    %256 = arith.mulf %254, %255 : vector<32x32xf32>
    %257 = vector.extract_strided_slice %251 {offsets = [0, 1], sizes = [32, 1], strides = [1, 1]} : vector<32x4xf32> to vector<32x1xf32>
    %258 = vector.extract_strided_slice %250 {offsets = [1, 0], sizes = [1, 32], strides = [1, 1]} : vector<4x32xf32> to vector<1x32xf32>
    %259 = vector.broadcast %257 : vector<32x1xf32> to vector<32x32xf32>
    %260 = vector.broadcast %258 : vector<1x32xf32> to vector<32x32xf32>
    %261 = arith.mulf %259, %260 : vector<32x32xf32>
    %262 = arith.addf %256, %261 : vector<32x32xf32>
    %263 = vector.extract_strided_slice %251 {offsets = [0, 2], sizes = [32, 1], strides = [1, 1]} : vector<32x4xf32> to vector<32x1xf32>
    %264 = vector.extract_strided_slice %250 {offsets = [2, 0], sizes = [1, 32], strides = [1, 1]} : vector<4x32xf32> to vector<1x32xf32>
    %265 = vector.broadcast %263 : vector<32x1xf32> to vector<32x32xf32>
    %266 = vector.broadcast %264 : vector<1x32xf32> to vector<32x32xf32>
    %267 = arith.mulf %265, %266 : vector<32x32xf32>
    %268 = arith.addf %262, %267 : vector<32x32xf32>
    %269 = vector.extract_strided_slice %251 {offsets = [0, 3], sizes = [32, 1], strides = [1, 1]} : vector<32x4xf32> to vector<32x1xf32>
    %270 = vector.extract_strided_slice %250 {offsets = [3, 0], sizes = [1, 32], strides = [1, 1]} : vector<4x32xf32> to vector<1x32xf32>
    %271 = vector.broadcast %269 : vector<32x1xf32> to vector<32x32xf32>
    %272 = vector.broadcast %270 : vector<1x32xf32> to vector<32x32xf32>
    %273 = arith.mulf %271, %272 : vector<32x32xf32>
    %274 = arith.addf %268, %273 : vector<32x32xf32>
    %c0_147 = arith.constant 0 : index
    %c0_148 = arith.constant 0 : index
    %275 = vector.load %arg22[%c0_147, %c0_148] : memref<32x1xf32, #tpu.memory_space<vmem>>, vector<32x1xf32>
    %276 = vector.broadcast %275 : vector<32x1xf32> to vector<32x32xf32>
    %277 = arith.addf %274, %276 : vector<32x32xf32>
    %cst_149 = arith.constant 0.000000e+00 : f32
    %278 = vector.broadcast %cst_149 : f32 to vector<32x32xf32>
    %279 = arith.maximumf %277, %278 : vector<32x32xf32>
    %c0_150 = arith.constant 0 : index
    %c0_151 = arith.constant 0 : index
    %c0_152 = arith.constant 0 : index
    %280 = vector.load %arg23[%c0_150, %c0_151, %c0_152] : memref<9x32x32xf32, #tpu.memory_space<vmem>>, vector<1x32x32xf32>
    %281 = vector.shape_cast %280 : vector<1x32x32xf32> to vector<32x32xf32>
    %c0_153 = arith.constant 0 : index
    %c0_154 = arith.constant 0 : index
    %c0_155 = arith.constant 0 : index
    %282 = vector.load %arg29[%c0_153, %c0_154, %c0_155] : memref<9x32x8xf32, #tpu.memory_space<vmem>>, vector<1x32x8xf32>
    %283 = vector.shape_cast %282 : vector<1x32x8xf32> to vector<32x8xf32>
    %cst_156 = arith.constant dense<0.000000e+00> : vector<32x8xf32>
    %284 = tpu.matmul %279, %283, %cst_156 {dimension_numbers = #tpu.dot_dimension_numbers<[1], [0], [0], [1], [0, 0, 1, 1], [], []>} : vector<32x32xf32>, vector<32x8xf32>, vector<32x8xf32> -> vector<32x8xf32>
    %cst_157 = arith.constant dense<0.000000e+00> : vector<32x8xf32>
    %285 = tpu.matmul %281, %284, %cst_157 {dimension_numbers = #tpu.dot_dimension_numbers<[1], [0], [0], [1], [0, 0, 1, 1], [], []>} : vector<32x32xf32>, vector<32x8xf32>, vector<32x8xf32> -> vector<32x8xf32>
    %c1_158 = arith.constant 1 : index
    %c0_159 = arith.constant 0 : index
    %c0_160 = arith.constant 0 : index
    %286 = vector.load %arg23[%c1_158, %c0_159, %c0_160] : memref<9x32x32xf32, #tpu.memory_space<vmem>>, vector<1x32x32xf32>
    %287 = vector.shape_cast %286 : vector<1x32x32xf32> to vector<32x32xf32>
    %c1_161 = arith.constant 1 : index
    %c0_162 = arith.constant 0 : index
    %c0_163 = arith.constant 0 : index
    %288 = vector.load %arg29[%c1_161, %c0_162, %c0_163] : memref<9x32x8xf32, #tpu.memory_space<vmem>>, vector<1x32x8xf32>
    %289 = vector.shape_cast %288 : vector<1x32x8xf32> to vector<32x8xf32>
    %cst_164 = arith.constant dense<0.000000e+00> : vector<32x8xf32>
    %290 = tpu.matmul %279, %289, %cst_164 {dimension_numbers = #tpu.dot_dimension_numbers<[1], [0], [0], [1], [0, 0, 1, 1], [], []>} : vector<32x32xf32>, vector<32x8xf32>, vector<32x8xf32> -> vector<32x8xf32>
    %cst_165 = arith.constant dense<0.000000e+00> : vector<32x8xf32>
    %291 = tpu.matmul %287, %290, %cst_165 {dimension_numbers = #tpu.dot_dimension_numbers<[1], [0], [0], [1], [0, 0, 1, 1], [], []>} : vector<32x32xf32>, vector<32x8xf32>, vector<32x8xf32> -> vector<32x8xf32>
    %292 = arith.addf %285, %291 : vector<32x8xf32>
    %c2_166 = arith.constant 2 : index
    %c0_167 = arith.constant 0 : index
    %c0_168 = arith.constant 0 : index
    %293 = vector.load %arg23[%c2_166, %c0_167, %c0_168] : memref<9x32x32xf32, #tpu.memory_space<vmem>>, vector<1x32x32xf32>
    %294 = vector.shape_cast %293 : vector<1x32x32xf32> to vector<32x32xf32>
    %c2_169 = arith.constant 2 : index
    %c0_170 = arith.constant 0 : index
    %c0_171 = arith.constant 0 : index
    %295 = vector.load %arg29[%c2_169, %c0_170, %c0_171] : memref<9x32x8xf32, #tpu.memory_space<vmem>>, vector<1x32x8xf32>
    %296 = vector.shape_cast %295 : vector<1x32x8xf32> to vector<32x8xf32>
    %cst_172 = arith.constant dense<0.000000e+00> : vector<32x8xf32>
    %297 = tpu.matmul %279, %296, %cst_172 {dimension_numbers = #tpu.dot_dimension_numbers<[1], [0], [0], [1], [0, 0, 1, 1], [], []>} : vector<32x32xf32>, vector<32x8xf32>, vector<32x8xf32> -> vector<32x8xf32>
    %cst_173 = arith.constant dense<0.000000e+00> : vector<32x8xf32>
    %298 = tpu.matmul %294, %297, %cst_173 {dimension_numbers = #tpu.dot_dimension_numbers<[1], [0], [0], [1], [0, 0, 1, 1], [], []>} : vector<32x32xf32>, vector<32x8xf32>, vector<32x8xf32> -> vector<32x8xf32>
    %299 = arith.addf %292, %298 : vector<32x8xf32>
    %c3_174 = arith.constant 3 : index
    %c0_175 = arith.constant 0 : index
    %c0_176 = arith.constant 0 : index
    %300 = vector.load %arg23[%c3_174, %c0_175, %c0_176] : memref<9x32x32xf32, #tpu.memory_space<vmem>>, vector<1x32x32xf32>
    %301 = vector.shape_cast %300 : vector<1x32x32xf32> to vector<32x32xf32>
    %c3_177 = arith.constant 3 : index
    %c0_178 = arith.constant 0 : index
    %c0_179 = arith.constant 0 : index
    %302 = vector.load %arg29[%c3_177, %c0_178, %c0_179] : memref<9x32x8xf32, #tpu.memory_space<vmem>>, vector<1x32x8xf32>
    %303 = vector.shape_cast %302 : vector<1x32x8xf32> to vector<32x8xf32>
    %cst_180 = arith.constant dense<0.000000e+00> : vector<32x8xf32>
    %304 = tpu.matmul %279, %303, %cst_180 {dimension_numbers = #tpu.dot_dimension_numbers<[1], [0], [0], [1], [0, 0, 1, 1], [], []>} : vector<32x32xf32>, vector<32x8xf32>, vector<32x8xf32> -> vector<32x8xf32>
    %cst_181 = arith.constant dense<0.000000e+00> : vector<32x8xf32>
    %305 = tpu.matmul %301, %304, %cst_181 {dimension_numbers = #tpu.dot_dimension_numbers<[1], [0], [0], [1], [0, 0, 1, 1], [], []>} : vector<32x32xf32>, vector<32x8xf32>, vector<32x8xf32> -> vector<32x8xf32>
    %306 = arith.addf %299, %305 : vector<32x8xf32>
    %c4_182 = arith.constant 4 : index
    %c0_183 = arith.constant 0 : index
    %c0_184 = arith.constant 0 : index
    %307 = vector.load %arg23[%c4_182, %c0_183, %c0_184] : memref<9x32x32xf32, #tpu.memory_space<vmem>>, vector<1x32x32xf32>
    %308 = vector.shape_cast %307 : vector<1x32x32xf32> to vector<32x32xf32>
    %c4_185 = arith.constant 4 : index
    %c0_186 = arith.constant 0 : index
    %c0_187 = arith.constant 0 : index
    %309 = vector.load %arg29[%c4_185, %c0_186, %c0_187] : memref<9x32x8xf32, #tpu.memory_space<vmem>>, vector<1x32x8xf32>
    %310 = vector.shape_cast %309 : vector<1x32x8xf32> to vector<32x8xf32>
    %cst_188 = arith.constant dense<0.000000e+00> : vector<32x8xf32>
    %311 = tpu.matmul %279, %310, %cst_188 {dimension_numbers = #tpu.dot_dimension_numbers<[1], [0], [0], [1], [0, 0, 1, 1], [], []>} : vector<32x32xf32>, vector<32x8xf32>, vector<32x8xf32> -> vector<32x8xf32>
    %cst_189 = arith.constant dense<0.000000e+00> : vector<32x8xf32>
    %312 = tpu.matmul %308, %311, %cst_189 {dimension_numbers = #tpu.dot_dimension_numbers<[1], [0], [0], [1], [0, 0, 1, 1], [], []>} : vector<32x32xf32>, vector<32x8xf32>, vector<32x8xf32> -> vector<32x8xf32>
    %313 = arith.addf %306, %312 : vector<32x8xf32>
    %c5_190 = arith.constant 5 : index
    %c0_191 = arith.constant 0 : index
    %c0_192 = arith.constant 0 : index
    %314 = vector.load %arg23[%c5_190, %c0_191, %c0_192] : memref<9x32x32xf32, #tpu.memory_space<vmem>>, vector<1x32x32xf32>
    %315 = vector.shape_cast %314 : vector<1x32x32xf32> to vector<32x32xf32>
    %c5_193 = arith.constant 5 : index
    %c0_194 = arith.constant 0 : index
    %c0_195 = arith.constant 0 : index
    %316 = vector.load %arg29[%c5_193, %c0_194, %c0_195] : memref<9x32x8xf32, #tpu.memory_space<vmem>>, vector<1x32x8xf32>
    %317 = vector.shape_cast %316 : vector<1x32x8xf32> to vector<32x8xf32>
    %cst_196 = arith.constant dense<0.000000e+00> : vector<32x8xf32>
    %318 = tpu.matmul %279, %317, %cst_196 {dimension_numbers = #tpu.dot_dimension_numbers<[1], [0], [0], [1], [0, 0, 1, 1], [], []>} : vector<32x32xf32>, vector<32x8xf32>, vector<32x8xf32> -> vector<32x8xf32>
    %cst_197 = arith.constant dense<0.000000e+00> : vector<32x8xf32>
    %319 = tpu.matmul %315, %318, %cst_197 {dimension_numbers = #tpu.dot_dimension_numbers<[1], [0], [0], [1], [0, 0, 1, 1], [], []>} : vector<32x32xf32>, vector<32x8xf32>, vector<32x8xf32> -> vector<32x8xf32>
    %320 = arith.addf %313, %319 : vector<32x8xf32>
    %c6_198 = arith.constant 6 : index
    %c0_199 = arith.constant 0 : index
    %c0_200 = arith.constant 0 : index
    %321 = vector.load %arg23[%c6_198, %c0_199, %c0_200] : memref<9x32x32xf32, #tpu.memory_space<vmem>>, vector<1x32x32xf32>
    %322 = vector.shape_cast %321 : vector<1x32x32xf32> to vector<32x32xf32>
    %c6_201 = arith.constant 6 : index
    %c0_202 = arith.constant 0 : index
    %c0_203 = arith.constant 0 : index
    %323 = vector.load %arg29[%c6_201, %c0_202, %c0_203] : memref<9x32x8xf32, #tpu.memory_space<vmem>>, vector<1x32x8xf32>
    %324 = vector.shape_cast %323 : vector<1x32x8xf32> to vector<32x8xf32>
    %cst_204 = arith.constant dense<0.000000e+00> : vector<32x8xf32>
    %325 = tpu.matmul %279, %324, %cst_204 {dimension_numbers = #tpu.dot_dimension_numbers<[1], [0], [0], [1], [0, 0, 1, 1], [], []>} : vector<32x32xf32>, vector<32x8xf32>, vector<32x8xf32> -> vector<32x8xf32>
    %cst_205 = arith.constant dense<0.000000e+00> : vector<32x8xf32>
    %326 = tpu.matmul %322, %325, %cst_205 {dimension_numbers = #tpu.dot_dimension_numbers<[1], [0], [0], [1], [0, 0, 1, 1], [], []>} : vector<32x32xf32>, vector<32x8xf32>, vector<32x8xf32> -> vector<32x8xf32>
    %327 = arith.addf %320, %326 : vector<32x8xf32>
    %c7_206 = arith.constant 7 : index
    %c0_207 = arith.constant 0 : index
    %c0_208 = arith.constant 0 : index
    %328 = vector.load %arg23[%c7_206, %c0_207, %c0_208] : memref<9x32x32xf32, #tpu.memory_space<vmem>>, vector<1x32x32xf32>
    %329 = vector.shape_cast %328 : vector<1x32x32xf32> to vector<32x32xf32>
    %c7_209 = arith.constant 7 : index
    %c0_210 = arith.constant 0 : index
    %c0_211 = arith.constant 0 : index
    %330 = vector.load %arg29[%c7_209, %c0_210, %c0_211] : memref<9x32x8xf32, #tpu.memory_space<vmem>>, vector<1x32x8xf32>
    %331 = vector.shape_cast %330 : vector<1x32x8xf32> to vector<32x8xf32>
    %cst_212 = arith.constant dense<0.000000e+00> : vector<32x8xf32>
    %332 = tpu.matmul %279, %331, %cst_212 {dimension_numbers = #tpu.dot_dimension_numbers<[1], [0], [0], [1], [0, 0, 1, 1], [], []>} : vector<32x32xf32>, vector<32x8xf32>, vector<32x8xf32> -> vector<32x8xf32>
    %cst_213 = arith.constant dense<0.000000e+00> : vector<32x8xf32>
    %333 = tpu.matmul %329, %332, %cst_213 {dimension_numbers = #tpu.dot_dimension_numbers<[1], [0], [0], [1], [0, 0, 1, 1], [], []>} : vector<32x32xf32>, vector<32x8xf32>, vector<32x8xf32> -> vector<32x8xf32>
    %334 = arith.addf %327, %333 : vector<32x8xf32>
    %c8_214 = arith.constant 8 : index
    %c0_215 = arith.constant 0 : index
    %c0_216 = arith.constant 0 : index
    %335 = vector.load %arg23[%c8_214, %c0_215, %c0_216] : memref<9x32x32xf32, #tpu.memory_space<vmem>>, vector<1x32x32xf32>
    %336 = vector.shape_cast %335 : vector<1x32x32xf32> to vector<32x32xf32>
    %c8_217 = arith.constant 8 : index
    %c0_218 = arith.constant 0 : index
    %c0_219 = arith.constant 0 : index
    %337 = vector.load %arg29[%c8_217, %c0_218, %c0_219] : memref<9x32x8xf32, #tpu.memory_space<vmem>>, vector<1x32x8xf32>
    %338 = vector.shape_cast %337 : vector<1x32x8xf32> to vector<32x8xf32>
    %cst_220 = arith.constant dense<0.000000e+00> : vector<32x8xf32>
    %339 = tpu.matmul %279, %338, %cst_220 {dimension_numbers = #tpu.dot_dimension_numbers<[1], [0], [0], [1], [0, 0, 1, 1], [], []>} : vector<32x32xf32>, vector<32x8xf32>, vector<32x8xf32> -> vector<32x8xf32>
    %cst_221 = arith.constant dense<0.000000e+00> : vector<32x8xf32>
    %340 = tpu.matmul %336, %339, %cst_221 {dimension_numbers = #tpu.dot_dimension_numbers<[1], [0], [0], [1], [0, 0, 1, 1], [], []>} : vector<32x32xf32>, vector<32x8xf32>, vector<32x8xf32> -> vector<32x8xf32>
    %341 = arith.addf %334, %340 : vector<32x8xf32>
    %c0_222 = arith.constant 0 : index
    %c0_223 = arith.constant 0 : index
    %342 = vector.load %arg24[%c0_222, %c0_223] : memref<32x1xf32, #tpu.memory_space<vmem>>, vector<32x1xf32>
    %343 = vector.broadcast %342 : vector<32x1xf32> to vector<32x8xf32>
    %344 = arith.addf %341, %343 : vector<32x8xf32>
    %cst_224 = arith.constant 0.000000e+00 : f32
    %345 = vector.broadcast %cst_224 : f32 to vector<32x8xf32>
    %346 = arith.maximumf %344, %345 : vector<32x8xf32>
    %c0_225 = arith.constant 0 : index
    %c0_226 = arith.constant 0 : index
    %347 = vector.load %arg25[%c0_225, %c0_226] : memref<4x32xf32, #tpu.memory_space<vmem>>, vector<4x32xf32>
    %cst_227 = arith.constant dense<0.000000e+00> : vector<4x8xf32>
    %348 = tpu.matmul %347, %346, %cst_227 {dimension_numbers = #tpu.dot_dimension_numbers<[1], [0], [0], [1], [0, 0, 1, 1], [], []>} : vector<4x32xf32>, vector<32x8xf32>, vector<4x8xf32> -> vector<4x8xf32>
    %c0_228 = arith.constant 0 : index
    %c0_229 = arith.constant 0 : index
    %349 = vector.load %arg26[%c0_228, %c0_229] : memref<4x1xf32, #tpu.memory_space<vmem>>, vector<4x1xf32>
    %350 = vector.broadcast %349 : vector<4x1xf32> to vector<4x8xf32>
    %351 = arith.addf %348, %350 : vector<4x8xf32>
    %c0_230 = arith.constant 0 : index
    %c0_231 = arith.constant 0 : index
    %352 = vector.load %arg27[%c0_230, %c0_231] : memref<4x4xf32, #tpu.memory_space<vmem>>, vector<4x4xf32>
    %353 = vector.extract_strided_slice %352 {offsets = [0, 0], sizes = [4, 1], strides = [1, 1]} : vector<4x4xf32> to vector<4x1xf32>
    %354 = vector.extract_strided_slice %250 {offsets = [0, 0], sizes = [1, 32], strides = [1, 1]} : vector<4x32xf32> to vector<1x32xf32>
    %355 = vector.broadcast %353 : vector<4x1xf32> to vector<4x32xf32>
    %356 = vector.broadcast %354 : vector<1x32xf32> to vector<4x32xf32>
    %357 = arith.mulf %355, %356 : vector<4x32xf32>
    %358 = vector.extract_strided_slice %352 {offsets = [0, 1], sizes = [4, 1], strides = [1, 1]} : vector<4x4xf32> to vector<4x1xf32>
    %359 = vector.extract_strided_slice %250 {offsets = [1, 0], sizes = [1, 32], strides = [1, 1]} : vector<4x32xf32> to vector<1x32xf32>
    %360 = vector.broadcast %358 : vector<4x1xf32> to vector<4x32xf32>
    %361 = vector.broadcast %359 : vector<1x32xf32> to vector<4x32xf32>
    %362 = arith.mulf %360, %361 : vector<4x32xf32>
    %363 = arith.addf %357, %362 : vector<4x32xf32>
    %364 = vector.extract_strided_slice %352 {offsets = [0, 2], sizes = [4, 1], strides = [1, 1]} : vector<4x4xf32> to vector<4x1xf32>
    %365 = vector.extract_strided_slice %250 {offsets = [2, 0], sizes = [1, 32], strides = [1, 1]} : vector<4x32xf32> to vector<1x32xf32>
    %366 = vector.broadcast %364 : vector<4x1xf32> to vector<4x32xf32>
    %367 = vector.broadcast %365 : vector<1x32xf32> to vector<4x32xf32>
    %368 = arith.mulf %366, %367 : vector<4x32xf32>
    %369 = arith.addf %363, %368 : vector<4x32xf32>
    %370 = vector.extract_strided_slice %352 {offsets = [0, 3], sizes = [4, 1], strides = [1, 1]} : vector<4x4xf32> to vector<4x1xf32>
    %371 = vector.extract_strided_slice %250 {offsets = [3, 0], sizes = [1, 32], strides = [1, 1]} : vector<4x32xf32> to vector<1x32xf32>
    %372 = vector.broadcast %370 : vector<4x1xf32> to vector<4x32xf32>
    %373 = vector.broadcast %371 : vector<1x32xf32> to vector<4x32xf32>
    %374 = arith.mulf %372, %373 : vector<4x32xf32>
    %375 = arith.addf %369, %374 : vector<4x32xf32>
    %c0_232 = arith.constant 0 : index
    %c0_233 = arith.constant 0 : index
    %376 = vector.load %arg30[%c0_232, %c0_233] : memref<32x8xf32, #tpu.memory_space<vmem>>, vector<32x8xf32>
    %cst_234 = arith.constant dense<0.000000e+00> : vector<4x8xf32>
    %377 = tpu.matmul %375, %376, %cst_234 {dimension_numbers = #tpu.dot_dimension_numbers<[1], [0], [0], [1], [0, 0, 1, 1], [], []>} : vector<4x32xf32>, vector<32x8xf32>, vector<4x8xf32> -> vector<4x8xf32>
    %c0_235 = arith.constant 0 : index
    %c0_236 = arith.constant 0 : index
    %378 = vector.load %arg28[%c0_235, %c0_236] : memref<4x1xf32, #tpu.memory_space<vmem>>, vector<4x1xf32>
    %379 = vector.broadcast %378 : vector<4x1xf32> to vector<4x8xf32>
    %380 = arith.addf %377, %379 : vector<4x8xf32>
    %381 = arith.addf %351, %380 : vector<4x8xf32>
    %cst_237 = arith.constant 0.000000e+00 : f32
    %382 = vector.broadcast %cst_237 : f32 to vector<4x8xf32>
    %383 = arith.maximumf %381, %382 : vector<4x8xf32>
    %c0_238 = arith.constant 0 : index
    %c0_239 = arith.constant 0 : index
    %384 = vector.load %arg31[%c0_238, %c0_239] : memref<8x32xf32, #tpu.memory_space<vmem>>, vector<8x32xf32>
    %385 = vector.extract_strided_slice %383 {offsets = [0, 0], sizes = [4, 1], strides = [1, 1]} : vector<4x8xf32> to vector<4x1xf32>
    %386 = vector.extract_strided_slice %384 {offsets = [0, 0], sizes = [1, 32], strides = [1, 1]} : vector<8x32xf32> to vector<1x32xf32>
    %387 = vector.broadcast %385 : vector<4x1xf32> to vector<4x32xf32>
    %388 = vector.broadcast %386 : vector<1x32xf32> to vector<4x32xf32>
    %389 = arith.mulf %387, %388 : vector<4x32xf32>
    %390 = vector.extract_strided_slice %383 {offsets = [0, 1], sizes = [4, 1], strides = [1, 1]} : vector<4x8xf32> to vector<4x1xf32>
    %391 = vector.extract_strided_slice %384 {offsets = [1, 0], sizes = [1, 32], strides = [1, 1]} : vector<8x32xf32> to vector<1x32xf32>
    %392 = vector.broadcast %390 : vector<4x1xf32> to vector<4x32xf32>
    %393 = vector.broadcast %391 : vector<1x32xf32> to vector<4x32xf32>
    %394 = arith.mulf %392, %393 : vector<4x32xf32>
    %395 = arith.addf %389, %394 : vector<4x32xf32>
    %396 = vector.extract_strided_slice %383 {offsets = [0, 2], sizes = [4, 1], strides = [1, 1]} : vector<4x8xf32> to vector<4x1xf32>
    %397 = vector.extract_strided_slice %384 {offsets = [2, 0], sizes = [1, 32], strides = [1, 1]} : vector<8x32xf32> to vector<1x32xf32>
    %398 = vector.broadcast %396 : vector<4x1xf32> to vector<4x32xf32>
    %399 = vector.broadcast %397 : vector<1x32xf32> to vector<4x32xf32>
    %400 = arith.mulf %398, %399 : vector<4x32xf32>
    %401 = arith.addf %395, %400 : vector<4x32xf32>
    %402 = vector.extract_strided_slice %383 {offsets = [0, 3], sizes = [4, 1], strides = [1, 1]} : vector<4x8xf32> to vector<4x1xf32>
    %403 = vector.extract_strided_slice %384 {offsets = [3, 0], sizes = [1, 32], strides = [1, 1]} : vector<8x32xf32> to vector<1x32xf32>
    %404 = vector.broadcast %402 : vector<4x1xf32> to vector<4x32xf32>
    %405 = vector.broadcast %403 : vector<1x32xf32> to vector<4x32xf32>
    %406 = arith.mulf %404, %405 : vector<4x32xf32>
    %407 = arith.addf %401, %406 : vector<4x32xf32>
    %408 = vector.extract_strided_slice %383 {offsets = [0, 4], sizes = [4, 1], strides = [1, 1]} : vector<4x8xf32> to vector<4x1xf32>
    %409 = vector.extract_strided_slice %384 {offsets = [4, 0], sizes = [1, 32], strides = [1, 1]} : vector<8x32xf32> to vector<1x32xf32>
    %410 = vector.broadcast %408 : vector<4x1xf32> to vector<4x32xf32>
    %411 = vector.broadcast %409 : vector<1x32xf32> to vector<4x32xf32>
    %412 = arith.mulf %410, %411 : vector<4x32xf32>
    %413 = arith.addf %407, %412 : vector<4x32xf32>
    %414 = vector.extract_strided_slice %383 {offsets = [0, 5], sizes = [4, 1], strides = [1, 1]} : vector<4x8xf32> to vector<4x1xf32>
    %415 = vector.extract_strided_slice %384 {offsets = [5, 0], sizes = [1, 32], strides = [1, 1]} : vector<8x32xf32> to vector<1x32xf32>
    %416 = vector.broadcast %414 : vector<4x1xf32> to vector<4x32xf32>
    %417 = vector.broadcast %415 : vector<1x32xf32> to vector<4x32xf32>
    %418 = arith.mulf %416, %417 : vector<4x32xf32>
    %419 = arith.addf %413, %418 : vector<4x32xf32>
    %420 = vector.extract_strided_slice %383 {offsets = [0, 6], sizes = [4, 1], strides = [1, 1]} : vector<4x8xf32> to vector<4x1xf32>
    %421 = vector.extract_strided_slice %384 {offsets = [6, 0], sizes = [1, 32], strides = [1, 1]} : vector<8x32xf32> to vector<1x32xf32>
    %422 = vector.broadcast %420 : vector<4x1xf32> to vector<4x32xf32>
    %423 = vector.broadcast %421 : vector<1x32xf32> to vector<4x32xf32>
    %424 = arith.mulf %422, %423 : vector<4x32xf32>
    %425 = arith.addf %419, %424 : vector<4x32xf32>
    %426 = vector.extract_strided_slice %383 {offsets = [0, 7], sizes = [4, 1], strides = [1, 1]} : vector<4x8xf32> to vector<4x1xf32>
    %427 = vector.extract_strided_slice %384 {offsets = [7, 0], sizes = [1, 32], strides = [1, 1]} : vector<8x32xf32> to vector<1x32xf32>
    %428 = vector.broadcast %426 : vector<4x1xf32> to vector<4x32xf32>
    %429 = vector.broadcast %427 : vector<1x32xf32> to vector<4x32xf32>
    %430 = arith.mulf %428, %429 : vector<4x32xf32>
    %431 = arith.addf %425, %430 : vector<4x32xf32>
    %432 = arith.addf %431, %250 : vector<4x32xf32>
    %c0_240 = arith.constant 0 : index
    %c0_241 = arith.constant 0 : index
    %433 = vector.load %arg32[%c0_240, %c0_241] : memref<32x128xf32, #tpu.memory_space<vmem>>, vector<32x128xf32>
    %cst_242 = arith.constant dense<0.000000e+00> : vector<4x128xf32>
    %434 = tpu.matmul %432, %433, %cst_242 {dimension_numbers = #tpu.dot_dimension_numbers<[1], [0], [0], [1], [0, 0, 1, 1], [], []>} : vector<4x32xf32>, vector<32x128xf32>, vector<4x128xf32> -> vector<4x128xf32>
    %435 = arith.addf %434, %117 : vector<4x128xf32>
    %c0_243 = arith.constant 0 : index
    %c0_244 = arith.constant 0 : index
    %436 = vector.load %arg33[%c0_243, %c0_244] : memref<128x512xf32, #tpu.memory_space<vmem>>, vector<128x512xf32>
    %cst_245 = arith.constant dense<0.000000e+00> : vector<4x512xf32>
    %437 = tpu.matmul %435, %436, %cst_245 {dimension_numbers = #tpu.dot_dimension_numbers<[1], [0], [0], [1], [0, 0, 1, 1], [], []>} : vector<4x128xf32>, vector<128x512xf32>, vector<4x512xf32> -> vector<4x512xf32>
    %438 = arith.addf %437, %0 : vector<4x512xf32>
    %c0_246 = arith.constant 0 : index
    %c0_247 = arith.constant 0 : index
    %439 = vector.load %arg34[%c0_246, %c0_247] : memref<4x4xf32, #tpu.memory_space<vmem>>, vector<4x4xf32>
    %440 = vector.extract_strided_slice %439 {offsets = [0, 0], sizes = [4, 1], strides = [1, 1]} : vector<4x4xf32> to vector<4x1xf32>
    %441 = vector.extract_strided_slice %438 {offsets = [0, 0], sizes = [1, 512], strides = [1, 1]} : vector<4x512xf32> to vector<1x512xf32>
    %442 = vector.broadcast %440 : vector<4x1xf32> to vector<4x512xf32>
    %443 = vector.broadcast %441 : vector<1x512xf32> to vector<4x512xf32>
    %444 = arith.mulf %442, %443 : vector<4x512xf32>
    %445 = vector.extract_strided_slice %439 {offsets = [0, 1], sizes = [4, 1], strides = [1, 1]} : vector<4x4xf32> to vector<4x1xf32>
    %446 = vector.extract_strided_slice %438 {offsets = [1, 0], sizes = [1, 512], strides = [1, 1]} : vector<4x512xf32> to vector<1x512xf32>
    %447 = vector.broadcast %445 : vector<4x1xf32> to vector<4x512xf32>
    %448 = vector.broadcast %446 : vector<1x512xf32> to vector<4x512xf32>
    %449 = arith.mulf %447, %448 : vector<4x512xf32>
    %450 = arith.addf %444, %449 : vector<4x512xf32>
    %451 = vector.extract_strided_slice %439 {offsets = [0, 2], sizes = [4, 1], strides = [1, 1]} : vector<4x4xf32> to vector<4x1xf32>
    %452 = vector.extract_strided_slice %438 {offsets = [2, 0], sizes = [1, 512], strides = [1, 1]} : vector<4x512xf32> to vector<1x512xf32>
    %453 = vector.broadcast %451 : vector<4x1xf32> to vector<4x512xf32>
    %454 = vector.broadcast %452 : vector<1x512xf32> to vector<4x512xf32>
    %455 = arith.mulf %453, %454 : vector<4x512xf32>
    %456 = arith.addf %450, %455 : vector<4x512xf32>
    %457 = vector.extract_strided_slice %439 {offsets = [0, 3], sizes = [4, 1], strides = [1, 1]} : vector<4x4xf32> to vector<4x1xf32>
    %458 = vector.extract_strided_slice %438 {offsets = [3, 0], sizes = [1, 512], strides = [1, 1]} : vector<4x512xf32> to vector<1x512xf32>
    %459 = vector.broadcast %457 : vector<4x1xf32> to vector<4x512xf32>
    %460 = vector.broadcast %458 : vector<1x512xf32> to vector<4x512xf32>
    %461 = arith.mulf %459, %460 : vector<4x512xf32>
    %462 = arith.addf %456, %461 : vector<4x512xf32>
    %c0_248 = arith.constant 0 : index
    %c0_249 = arith.constant 0 : index
    %463 = vector.load %arg37[%c0_248, %c0_249] : memref<4x512xf32, #tpu.memory_space<vmem>>, vector<4x512xf32>
    tpu.vector_store %arg37[%c0_248, %c0_249], %462 {strides = array<i32>} : memref<4x512xf32, #tpu.memory_space<vmem>>, vector<4x512xf32>,
    %c0_250 = arith.constant 0 : index
    %c0_251 = arith.constant 0 : index
    %464 = vector.load %arg35[%c0_250, %c0_251] : memref<4x4xf32, #tpu.memory_space<vmem>>, vector<4x4xf32>
    %465 = vector.extract_strided_slice %464 {offsets = [0, 0], sizes = [4, 1], strides = [1, 1]} : vector<4x4xf32> to vector<4x1xf32>
    %466 = vector.extract_strided_slice %438 {offsets = [0, 0], sizes = [1, 512], strides = [1, 1]} : vector<4x512xf32> to vector<1x512xf32>
    %467 = vector.broadcast %465 : vector<4x1xf32> to vector<4x512xf32>
    %468 = vector.broadcast %466 : vector<1x512xf32> to vector<4x512xf32>
    %469 = arith.mulf %467, %468 : vector<4x512xf32>
    %470 = vector.extract_strided_slice %464 {offsets = [0, 1], sizes = [4, 1], strides = [1, 1]} : vector<4x4xf32> to vector<4x1xf32>
    %471 = vector.extract_strided_slice %438 {offsets = [1, 0], sizes = [1, 512], strides = [1, 1]} : vector<4x512xf32> to vector<1x512xf32>
    %472 = vector.broadcast %470 : vector<4x1xf32> to vector<4x512xf32>
    %473 = vector.broadcast %471 : vector<1x512xf32> to vector<4x512xf32>
    %474 = arith.mulf %472, %473 : vector<4x512xf32>
    %475 = arith.addf %469, %474 : vector<4x512xf32>
    %476 = vector.extract_strided_slice %464 {offsets = [0, 2], sizes = [4, 1], strides = [1, 1]} : vector<4x4xf32> to vector<4x1xf32>
    %477 = vector.extract_strided_slice %438 {offsets = [2, 0], sizes = [1, 512], strides = [1, 1]} : vector<4x512xf32> to vector<1x512xf32>
    %478 = vector.broadcast %476 : vector<4x1xf32> to vector<4x512xf32>
    %479 = vector.broadcast %477 : vector<1x512xf32> to vector<4x512xf32>
    %480 = arith.mulf %478, %479 : vector<4x512xf32>
    %481 = arith.addf %475, %480 : vector<4x512xf32>
    %482 = vector.extract_strided_slice %464 {offsets = [0, 3], sizes = [4, 1], strides = [1, 1]} : vector<4x4xf32> to vector<4x1xf32>
    %483 = vector.extract_strided_slice %438 {offsets = [3, 0], sizes = [1, 512], strides = [1, 1]} : vector<4x512xf32> to vector<1x512xf32>
    %484 = vector.broadcast %482 : vector<4x1xf32> to vector<4x512xf32>
    %485 = vector.broadcast %483 : vector<1x512xf32> to vector<4x512xf32>
    %486 = arith.mulf %484, %485 : vector<4x512xf32>
    %487 = arith.addf %481, %486 : vector<4x512xf32>
    %488 = arith.addf %487, %0 : vector<4x512xf32>
    %c0_252 = arith.constant 0 : index
    %c0_253 = arith.constant 0 : index
    %489 = vector.load %arg36[%c0_252, %c0_253] : memref<4x512xf32, #tpu.memory_space<vmem>>, vector<4x512xf32>
    tpu.vector_store %arg36[%c0_252, %c0_253], %488 {strides = array<i32>} : memref<4x512xf32, #tpu.memory_space<vmem>>, vector<4x512xf32>,
    return
  }
}

</mosaic_0001>

<bundles_post_ra>
// kernel: hourglass_module_forward.1
= control target key start
LH: loop header
LB: loop body
LE: loop exit
PB: predicated region body
PF: predicated region fallthrough
CT: control target
= control target key end

     0   :  { %s12056_s6 = smov 1   ;;  %s12057_s10 = smov 2   ;;  %s14591_s0 = inlined_call_operand.smem [shape: u32[38], index: -1, kind: input, shape index: {}] }
   0x1   :  { %s12121_s5 = sld [smem:[%s14591_s0]]   ;;  %s12058_s14 = smov 3  }
   0x2   :  { %s12126_s9 = sld [smem:[%s14591_s0 + %s12056_s6]]   ;;  %s12059_s18 = smov 4  }
   0x3   :  { %s12131_s13 = sld [smem:[%s14591_s0 + %s12057_s10]]   ;;  %s12060_s22 = smov 5  }
   0x4   :  { %s12136_s17 = sld [smem:[%s14591_s0 + %s12058_s14]]   ;;  %s12061_s26 = smov 6  }
   0x5   :  { %s12141_s21 = sld [smem:[%s14591_s0 + %s12059_s18]]   ;;  %s12062_s30 = smov 7  }
   0x6   :  { %s12146_s25 = sld [smem:[%s14591_s0 + %s12060_s22]]   ;;  %s12063_s4 = smov 8  }
   0x7   :  { %s12151_s29 = sld [smem:[%s14591_s0 + %s12061_s26]]   ;;  %s12064_s10 = smov 9  }
   0x8   :  { %s12156_s3 = sld [smem:[%s14591_s0 + %s12062_s30]]   ;;  %s12065_s15 = smov 10  }
   0x9   :  { %s12161_s8 = sld [smem:[%s14591_s0 + %s12063_s4]]   ;;  %s12066_s20 = smov 11  }
   0xa   :  { %s12166_s14 = sld [smem:[%s14591_s0 + %s12064_s10]]   ;;  %s12067_s26 = smov 12  }
   0xb   :  { %s12171_s19 = sld [smem:[%s14591_s0 + %s12065_s15]]   ;;  %s12068_s1 = smov 13  }
   0xc   :  { %14684 = sst [smem:[#allocation13_spill]] %s12146_s25  ;;  %s12069_s7 = smov 14  }
   0xd   :  { %s12176_s24 = sld [smem:[%s14591_s0 + %s12066_s20]]   ;;  %s12070_s15 = smov 15  }
   0xe   :  { %s12181_s30 = sld [smem:[%s14591_s0 + %s12067_s26]]   ;;  %s12071_s22 = smov 16  }
   0xf   :  { %s12186_s6 = sld [smem:[%s14591_s0 + %s12068_s1]]   ;;  %s12072_s28 = smov 17  }
  0x10   :  { %s12191_s12 = sld [smem:[%s14591_s0 + %s12069_s7]]   ;;  %s12073_s7 = smov 18  }
  0x11   :  { %s12196_s20 = sld [smem:[%s14591_s0 + %s12070_s15]]   ;;  %s12074_s15 = smov 19  }
  0x12   :  { %s12201_s27 = sld [smem:[%s14591_s0 + %s12071_s22]]   ;;  %s12075_s22 = smov 20  }
  0x13   :  { %14685 = sst [smem:[#allocation14_spill]] %s12176_s24 }
  0x14   :  { %14686 = sst [smem:[#allocation15_spill]] %s12181_s30 }
  0x15   :  { %14687 = sst [smem:[#allocation16_spill]] %s12186_s6 }
  0x16   :  { %14688 = sst [smem:[#allocation17_spill]] %s12191_s12 }
  0x17   :  { %14689 = sst [smem:[#allocation18_spill]] %s12196_s20 }
  0x18   :  { %14690 = sst [smem:[#allocation19_spill]] %s12201_s27 }
  0x19   :  { %s12206_s4 = sld [smem:[%s14591_s0 + %s12072_s28]]   ;;  %s12076_s28 = smov 21  }
  0x1a   :  { %s12211_s6 = sld [smem:[%s14591_s0 + %s12073_s7]]   ;;  %s12077_s7 = smov 22  }
  0x1b   :  { %s12216_s20 = sld [smem:[%s14591_s0 + %s12074_s15]]   ;;  %s12078_s15 = smov 23  }
  0x1c   :  { %s12221_s27 = sld [smem:[%s14591_s0 + %s12075_s22]]   ;;  %s12079_s22 = smov 24  }
  0x1d   :  { %s12226_s25 = sld [smem:[%s14591_s0 + %s12076_s28]]   ;;  %s12080_s28 = smov 25  }
  0x1f   :  { %14691 = sst [smem:[#allocation20_spill]] %s12206_s4 }
  0x20   :  { %14692 = sst [smem:[#allocation21_spill]] %s12211_s6 }
  0x21   :  { %14693 = sst [smem:[#allocation22_spill]] %s12216_s20 }
  0x22   :  { %s12231_s6 = sld [smem:[%s14591_s0 + %s12077_s7]]   ;;  %s12081_s7 = smov 26  }
  0x23   :  { %14694 = sst [smem:[#allocation23_spill]] %s12226_s25 }
  0x24   :  { %s12236_s20 = sld [smem:[%s14591_s0 + %s12078_s15]]   ;;  %s12082_s15 = smov 27  }
  0x25   :  { %s12241_s4 = sld [smem:[%s14591_s0 + %s12079_s22]]   ;;  %s12083_s22 = smov 28  }
  0x26   :  { %s12246_s25 = sld [smem:[%s14591_s0 + %s12080_s28]]   ;;  %s12084_s28 = smov 29  }
  0x28   :  { %14695 = sst [smem:[#allocation24_spill]] %s12231_s6 }
  0x29   :  { %s12251_s6 = sld [smem:[%s14591_s0 + %s12081_s7]]   ;;  %s12085_s7 = smov 30  }
  0x2a   :  { %14696 = sst [smem:[#allocation25_spill]] %s12236_s20 }
  0x2b   :  { %14697 = sst [smem:[#allocation26_spill]] %s12241_s4 }
  0x2c   :  { %14698 = sst [smem:[#allocation27_spill]] %s12246_s25 }
  0x2d   :  { %s12256_s20 = sld [smem:[%s14591_s0 + %s12082_s15]]   ;;  %s12086_s15 = smov 31  }
  0x2e   :  { %s12261_s4 = sld [smem:[%s14591_s0 + %s12083_s22]]   ;;  %s12087_s22 = smov 32  }
  0x2f   :  { %14699 = sst [smem:[#allocation28_spill]] %s12251_s6 }
  0x30   :  { %s12266_s25 = sld [smem:[%s14591_s0 + %s12084_s28]]   ;;  %s12088_s28 = smov 33  }
  0x31   :  { %s12271_s6 = sld [smem:[%s14591_s0 + %s12085_s7]]   ;;  %s12089_s7 = smov 34  }
  0x32   :  { %s12286_s12 = sld [smem:[%s14591_s0 + %s12088_s28]]   ;;  %s12092_s28 = smov 37  }
  0x33   :  { %14700 = sst [smem:[#allocation29_spill]] %s12256_s20 }
  0x34   :  { %14701 = sst [smem:[#allocation30_spill]] %s12261_s4 }
  0x35   :  { %s12276_s20 = sld [smem:[%s14591_s0 + %s12086_s15]]   ;;  %s12090_s15 = smov 35  }
  0x36   :  { %s12281_s4 = sld [smem:[%s14591_s0 + %s12087_s22]]   ;;  %s12091_s22 = smov 36  }
  0x37   :  { %14702 = sst [smem:[#allocation31_spill]] %s12271_s6 }
  0x38   :  { %s12291_s6 = sld [smem:[%s14591_s0 + %s12089_s7]]  }
  0x39   :  { %s12301_s30 = sld [smem:[%s14591_s0 + %s12091_s22]]  }
  0x3a   :  { %s12306_s24 = sld [smem:[%s14591_s0 + %s12092_s28]]  }
  0x3b   :  { %14703 = sst [smem:[#allocation32_spill]] %s12276_s20 }
  0x3c   :  { %s12296_s20 = sld [smem:[%s14591_s0 + %s12090_s15]]  }
  0x3d   :  { %81 = vsyncpa [#allocation3], 0 }
  0x3e   :  { %82 = vsyncpa [#allocation5], 0 }
  0x3f   :  { %83 = vsyncpa [#allocation8], 0  ;;  %s12093_s7 = smov [#allocation4]   ;;  %s12094_s11 = smov [#allocation7]  }
  0x40   :  { %s139_s10 = sshll.u32 %s12093_s7, 4  ;;  %s183_s15 = sshll.u32 %s12094_s11, 4  ;;  %s140_s10 = int_to_ptr.vmem [resolvable:$true] %s139_s10  ;;  %s12308_s15 = int_to_ptr.vmem [resolvable:$true] %s183_s15 }
  0x41   :  { %s11940_s16 = scalar_lea.hbm %s12221_s27, 2048 }
  0x42   :  { %p11941_p0 = scmp.ne.s32.totalorder %s12221_s27, %s11940_s16  ;;  %p11944_p1 = scmp.lt.u32.totalorder %s11940_s16, %s12221_s27 }
  0x44   :  { %p11946_p2 = pnand %p11944_p1, %p11941_p0 }
  0x46   :  { %11949 = shalt.err (!%p11946_p2)
}
  0x47   :  { %s11950_s0 = scalar_lea.vmem %s140_s10, 2048  ;;  %p11955_p4 = scmp.lt.s32.totalorder %s140_s10, %s140_s10 }
  0x48   :  { %p11951_p3 = scmp.ne.s32.totalorder %s140_s10, %s11950_s0  ;;  %p11956_p5 = scmp.lt.s32.totalorder %s11950_s0, %s11950_s0 }
  0x4a   :  { %p11957_p6 = por %p11956_p5, %p11955_p4 }
  0x4c   :  { %p11958_p7 = pnand %p11957_p6, %p11951_p3 }
  0x4e   :  { %11961 = shalt.err (!%p11958_p7)
}
  0x4f   :  { %s12095_s18 = smov 128   ;;  %s12096_s22 = smov 8  }
  0x50   :  { %145 = dma.hbm_to_vmem [thread:$0]  %s12221_s27, 2048, %s140_s10, [#allocation5], %s12095_s18, %s12095_s18, %s12096_s22  }
  0x51   :  { %s11962_s23 = scalar_lea.hbm %s12281_s4, 512 }
  0x52   :  { %p11963_p8 = scmp.ne.s32.totalorder %s12281_s4, %s11962_s23  ;;  %p11966_p9 = scmp.lt.u32.totalorder %s11962_s23, %s12281_s4 }
  0x54   :  { %p11968_p10 = pnand %p11966_p9, %p11963_p8 }
  0x56   :  { %11971 = shalt.err (!%p11968_p10)
}
  0x57   :  { %s11972_s26 = scalar_lea.vmem %s12308_s15, 512  ;;  %p11977_p12 = scmp.lt.s32.totalorder %s12308_s15, %s12308_s15 }
  0x58   :  { %p11973_p11 = scmp.ne.s32.totalorder %s12308_s15, %s11972_s26  ;;  %p11978_p13 = scmp.lt.s32.totalorder %s11972_s26, %s11972_s26 }
  0x5a   :  { %p11979_p0 = por %p11978_p13, %p11977_p12 }
  0x5c   :  { %p11980_p1 = pnand %p11979_p0, %p11973_p11 }
  0x5e   :  { %11983 = shalt.err (!%p11980_p1)
}
  0x5f   :  { %189 = dma.hbm_to_vmem [thread:$0]  %s12281_s4, 512, %s12308_s15, [#allocation8], %s12095_s18, %s12095_s18, %s12096_s22  }
  0x60   :  { %s12097_s27 = smov [#allocation2]   ;;  %s12098_s1 = smov [#allocation6]  }
  0x61   :  { %s109_s28 = sshll.u32 %s12097_s27, 4  ;;  %s167_s2 = sshll.u32 %s12098_s1, 4  ;;  %s110_s28 = int_to_ptr.vmem [resolvable:$true] %s109_s28  ;;  %s12329_s2 = int_to_ptr.vmem [resolvable:$true] %s167_s2 }
  0x62   :  { %s11984_s7 = scalar_lea.hbm %s12171_s19, 8192 }
  0x63   :  { %p11985_p2 = scmp.ne.s32.totalorder %s12171_s19, %s11984_s7  ;;  %p11988_p3 = scmp.lt.u32.totalorder %s11984_s7, %s12171_s19 }
  0x65   :  { %p11990_p4 = pnand %p11988_p3, %p11985_p2 }
  0x67   :  { %11993 = shalt.err (!%p11990_p4)
}
  0x68   :  { %s11994_s10 = scalar_lea.vmem %s110_s28, 8192  ;;  %p11999_p6 = scmp.lt.s32.totalorder %s110_s28, %s110_s28 }
  0x69   :  { %p11995_p5 = scmp.ne.s32.totalorder %s110_s28, %s11994_s10  ;;  %p12000_p7 = scmp.lt.s32.totalorder %s11994_s10, %s11994_s10 }
  0x6b   :  { %p12001_p8 = por %p12000_p7, %p11999_p6 }
  0x6d   :  { %p12002_p9 = pnand %p12001_p8, %p11995_p5 }
  0x6f   :  { %12005 = shalt.err (!%p12002_p9)
}
  0x70   :  { %115 = dma.hbm_to_vmem [thread:$0]  %s12171_s19, 8192, %s110_s28, [#allocation3], %s12095_s18, %s12095_s18, %s12096_s22  }
  0x71   :  { %s12006_s4 = scalar_lea.hbm %s12266_s25, 4608 }
  0x72   :  { %p12007_p10 = scmp.ne.s32.totalorder %s12266_s25, %s12006_s4  ;;  %p12010_p11 = scmp.lt.u32.totalorder %s12006_s4, %s12266_s25 }
  0x74   :  { %p12012_p12 = pnand %p12010_p11, %p12007_p10 }
  0x76   :  { %12015 = shalt.err (!%p12012_p12)
}
  0x77   :  { %s12016_s11 = scalar_lea.vmem %s12329_s2, 4608  ;;  %p12021_p0 = scmp.lt.s32.totalorder %s12329_s2, %s12329_s2 }
  0x78   :  { %p12017_p13 = scmp.ne.s32.totalorder %s12329_s2, %s12016_s11  ;;  %p12022_p1 = scmp.lt.s32.totalorder %s12016_s11, %s12016_s11 }
  0x7a   :  { %p12023_p2 = por %p12022_p1, %p12021_p0 }
  0x7c   :  { %p12024_p3 = pnand %p12023_p2, %p12017_p13 }
  0x7e   :  { %12027 = shalt.err (!%p12024_p3)
}
  0x7f   :  { %173 = dma.hbm_to_vmem [thread:$0]  %s12266_s25, 4608, %s12329_s2, [#allocation5], %s12095_s18, %s12095_s18, %s12096_s22  }
  0x80   :  { %s12099_s19 = smov [#allocation9]   ;;  %s12028_s16 = scalar_lea.hbm %s12286_s12, 8192 }
  0x81   :  { %s195_s15 = sshll.u32 %s12099_s19, 4  ;;  %p12029_p4 = scmp.ne.s32.totalorder %s12286_s12, %s12028_s16  ;;  %s196_s15 = int_to_ptr.vmem [resolvable:$true] %s195_s15 }
  0x82   :  { %p12032_p5 = scmp.lt.u32.totalorder %s12028_s16, %s12286_s12 }
  0x84   :  { %p12034_p6 = pnand %p12032_p5, %p12029_p4 }
  0x86   :  { %12037 = shalt.err (!%p12034_p6)
}
  0x87   :  { %s12038_s0 = scalar_lea.vmem %s196_s15, 8192  ;;  %p12043_p8 = scmp.lt.s32.totalorder %s196_s15, %s196_s15 }
  0x88   :  { %p12039_p7 = scmp.ne.s32.totalorder %s196_s15, %s12038_s0  ;;  %p12044_p9 = scmp.lt.s32.totalorder %s12038_s0, %s12038_s0 }
  0x8a   :  { %p12045_p10 = por %p12044_p9, %p12043_p8 }
  0x8c   :  { %p12046_p11 = pnand %p12045_p10, %p12039_p7 }
  0x8e   :  { %12049 = shalt.err (!%p12046_p11)
}
  0x8f   :  { %s12100_s23 = smov 512   ;;  %s12101_s26 = smov 32  }
  0x90   :  { %201 = dma.hbm_to_vmem [thread:$0]  %s12286_s12, 8192, %s196_s15, [#allocation8], %s12100_s23, %s12100_s23, %s12101_s26  }
  0x91   :  { %12050 = dma.done.wait [#allocation3], 8192  }
  0x92   :  { %12051 = vsyncadd [#allocation3], 4294959104 }
  0x93   :  { %12052 = dma.done.wait [#allocation5], 6656  }
  0x94   :  { %12053 = vsyncadd [#allocation5], 4294960640 }
  0x95   :  { %12054 = dma.done.wait [#allocation8], 8704  }
  0x96   :  { %12055 = vsyncadd [#allocation8], 4294958592  ;;  %v14608_v0 = vmov 2   ;;  %v14602_v1 = vmov 0   ;;  %v223_v2 = vld [vmem:[%s12126_s9] sm:$0xff]  ;;  %v610_v3 = vld [vmem:[%s12166_s14 + $0x8] sm:$0xff] }
  0x97   :  { %11863 = vset.pattern.permute.xlu1 %v14608_v0  ;;  %11861 = vset.pattern.permute.xlu0 %v14602_v1  ;;  %v619_v4 = vld [vmem:[%s12166_s14 + $0x50] sm:$0xff]  ;;  %v14604_v5 = vmov 3   ;;  %v14606_v6 = vmov 1   ;;  %v612_v8 = vld [vmem:[%s12166_s14 + $0x18] sm:$0xff]  ;;  %v621_v9 = vld [vmem:[%s12166_s14 + $0x60] sm:$0xff]  ;;  %vm2076_vm0 = vcmask 261120  }
  0x98   :  { %386 = vperm.xlu1 %11863, %v223_v2   ;;  %229 = vperm.xlu0 %11861, %v223_v2   ;;  %v10334_v7 = vpack.c.bf16 %v619_v4, %v610_v3  ;;  %v609_v10 = vld [vmem:[%s12166_s14] sm:$0xff]  ;;  %v10462_v12 = vpack.c.bf16 %v621_v9, %v612_v8  ;;  %v618_v13 = vld [vmem:[%s12166_s14 + $0x48] sm:$0xff]  ;;  %v611_v14 = vld [vmem:[%s12166_s14 + $0x10] sm:$0xff]  ;;  %vm12107_vm1 = vmmov 0   ;;  %s14848_s25 = sld [smem:[#allocation13_spill]]  ;;  %s14859_s12 = sld [smem:[#allocation23_spill]] }
  0x99   :  { %v553_v11 = vld [vmem:[%s12131_s13] sm:$0xff]  ;;  %v620_v15 = vld [vmem:[%s12166_s14 + $0x58] sm:$0xff]  ;;  %v10336_v16 = vpack.c.bf16 %v618_v13, %v609_v10  ;;  %v630_v20 = vld [vmem:[%s12166_s14 + $0xa8] sm:$0xff]  ;;  %s14860_s18 = sld [smem:[#allocation24_spill]]  ;;  %s14861_s22 = sld [smem:[#allocation26_spill]] }
  0x9a   :  { %10335 = vmatprep.subr.bf16.mxu0 %v10334_v7  ;;  %v10464_v17 = vpack.c.bf16 %v620_v15, %v611_v14  ;;  %v628_v18 = vld [vmem:[%s12166_s14 + $0x98] sm:$0xff]  ;;  %v637_v19 = vld [vmem:[%s12166_s14 + $0xe0] sm:$0xff]  ;;  %v12372_v21 = vld [vmem:[%s12126_s9 + $0x8] sm:$0xff]  ;;  %10463 = vmatprep.subr.bf16.mxu1 %v10462_v12  ;;  %s14862_s27 = sld [smem:[#allocation29_spill]]  ;;  %s14863_s28 = sld [smem:[#allocation18_spill]] }
  0x9b   :  { %v10338_v22 = vpack.c.bf16 %v637_v19, %v628_v18  ;;  %v639_v23 = vld [vmem:[%s12166_s14 + $0xf0] sm:$0xff]  ;;  %v636_v25 = vld [vmem:[%s12166_s14 + $0xd8] sm:$0xff]  ;;  %10337 = vmatpush1.bf16.msra.mxu0 %v10336_v16  ;;  %v629_v28 = vld [vmem:[%s12166_s14 + $0xa0] sm:$0xff]  ;;  %s14864_s1 = sld [smem:[#allocation25_spill]]  ;;  %s14865_s2 = sld [smem:[#allocation28_spill]] }
  0x9c   :  { %11864 = vset.pattern.permute.xlu1 %v14604_v5  ;;  %11862 = vset.pattern.permute.xlu0 %v14606_v6  ;;  %v627_v24 = vld [vmem:[%s12166_s14 + $0x90] sm:$0xff]  ;;  %v10466_v26 = vpack.c.bf16 %v639_v23, %v630_v20  ;;  %v638_v29 = vld [vmem:[%s12166_s14 + $0xe8] sm:$0xff]  ;;  %v648_v33 = vld [vmem:[%s12166_s14 + $0x138] sm:$0xff]  ;;  %s14866_s7 = sld [smem:[#allocation30_spill]]  ;;  %s14867_s10 = sld [smem:[#allocation31_spill]] }
  0x9d   :  { %470 = vperm.xlu1 %11864, %v223_v2   ;;  %302 = vperm.xlu0 %11862, %v223_v2   ;;  %v10340_v27 = vpack.c.bf16 %v636_v25, %v627_v24  ;;  %v646_v30 = vld [vmem:[%s12166_s14 + $0x128] sm:$0xff]  ;;  %v10468_v31 = vpack.c.bf16 %v638_v29, %v629_v28  ;;  %v655_v32 = vld [vmem:[%s12166_s14 + $0x170] sm:$0xff]  ;;  %v657_v34 = vld [vmem:[%s12166_s14 + $0x180] sm:$0xff]  ;;  %s14868_s4 = sld [smem:[#allocation27_spill]]  ;;  %s14869_s11 = sld [smem:[#allocation32_spill]] }
  0x9e   :  { %10465 = vmatpush1.bf16.msra.mxu1 %v10464_v17  ;;  %v10342_v35 = vpack.c.bf16 %v655_v32, %v646_v30  ;;  %v10470_v36 = vpack.c.bf16 %v657_v34, %v648_v33  ;;  %v645_v37 = vld [vmem:[%s12166_s14 + $0x120] sm:$0xff]  ;;  %v654_v38 = vld [vmem:[%s12166_s14 + $0x168] sm:$0xff]  ;;  %v647_v39 = vld [vmem:[%s12166_s14 + $0x130] sm:$0xff]  ;;  %10339 = vmatprep.subr.bf16.mxu0 %v10338_v22 }
  0x9f   :  { %10467 = vmatprep.subr.bf16.mxu1 %v10466_v26  ;;  %v656_v40 = vld [vmem:[%s12166_s14 + $0x178] sm:$0xff]  ;;  %v673_v42 = vld [vmem:[%s12166_s14 + $0x200] sm:$0xff]  ;;  %v12393_v43 = vld [vmem:[%s12126_s9 + $0x10] sm:$0xff]  ;;  %10341 = vmatpush1.bf16.msra.mxu0 %v10340_v27  ;;  %v10344_v44 = vpack.c.bf16 %v654_v38, %v645_v37 }
  0xa0   :  { %v664_v41 = vld [vmem:[%s12166_s14 + $0x1b8] sm:$0xff]  ;;  %v10472_v45 = vpack.c.bf16 %v656_v40, %v647_v39  ;;  %v666_v46 = vld [vmem:[%s12166_s14 + $0x1c8] sm:$0xff]  ;;  %v675_v47 = vld [vmem:[%s12166_s14 + $0x210] sm:$0xff]  ;;  %10343 = vmatprep.subr.bf16.mxu0 %v10342_v35 }
  0xa1   :  { %11865 = vset.pattern.permute.xlu1 %v14602_v1  ;;  %11866 = vset.pattern.permute.xlu0 %v14602_v1  ;;  %v10346_v48 = vpack.c.bf16 %v673_v42, %v664_v41  ;;  %v10474_v49 = vpack.c.bf16 %v675_v47, %v666_v46  ;;  %v663_v50 = vld [vmem:[%s12166_s14 + $0x1b0] sm:$0xff]  ;;  %v672_v51 = vld [vmem:[%s12166_s14 + $0x1f8] sm:$0xff]  ;;  %v665_v52 = vld [vmem:[%s12166_s14 + $0x1c0] sm:$0xff] }
  0xa2   :  { %559 = vperm.xlu1 %11865, %v553_v11   ;;  %234 = vperm.xlu0 %11866, %v12372_v21   ;;  %v674_v53 = vld [vmem:[%s12166_s14 + $0x208] sm:$0xff]  ;;  %v691_v55 = vld [vmem:[%s12166_s14 + $0x290] sm:$0xff]  ;;  %v684_v56 = vld [vmem:[%s12166_s14 + $0x258] sm:$0xff]  ;;  %v10348_v58 = vpack.c.bf16 %v672_v51, %v663_v50 }
  0xa3   :  { %10469 = vmatpush1.bf16.msra.mxu1 %v10468_v31  ;;  %v682_v54 = vld [vmem:[%s12166_s14 + $0x248] sm:$0xff]  ;;  %v693_v57 = vld [vmem:[%s12166_s14 + $0x2a0] sm:$0xff]  ;;  %10345 = vmatpush1.bf16.msra.mxu0 %v10344_v44  ;;  %v10476_v59 = vpack.c.bf16 %v674_v53, %v665_v52  ;;  %v683_v2 = vld [vmem:[%s12166_s14 + $0x250] sm:$0xff] }
  0xa4   :  { %10471 = vmatprep.subr.bf16.mxu1 %v10470_v36  ;;  %10347 = vmatprep.subr.bf16.mxu0 %v10346_v48  ;;  %v10350_v60 = vpack.c.bf16 %v691_v55, %v682_v54  ;;  %v10478_v61 = vpack.c.bf16 %v693_v57, %v684_v56  ;;  %v681_v62 = vld [vmem:[%s12166_s14 + $0x240] sm:$0xff]  ;;  %v690_v63 = vld [vmem:[%s12166_s14 + $0x288] sm:$0xff]  ;;  %v692_v3 = vld [vmem:[%s12166_s14 + $0x298] sm:$0xff] }
  0xa5   :  { %v700_v4 = vld [vmem:[%s12166_s14 + $0x2d8] sm:$0xff]  ;;  %v709_v7 = vld [vmem:[%s12166_s14 + $0x320] sm:$0xff]  ;;  %v702_v8 = vld [vmem:[%s12166_s14 + $0x2e8] sm:$0xff]  ;;  %v10352_v10 = vpack.c.bf16 %v690_v63, %v681_v62  ;;  %v10480_v12 = vpack.c.bf16 %v692_v3, %v683_v2 }
  0xa6   :  { %11867 = vset.pattern.permute.xlu1 %v14606_v6  ;;  %239 = vperm.xlu0 %11866, %v12393_v43   ;;  %v711_v9 = vld [vmem:[%s12166_s14 + $0x330] sm:$0xff]  ;;  %v12421_v11 = vld [vmem:[%s12126_s9 + $0x18] sm:$0xff]  ;;  %v10354_v13 = vpack.c.bf16 %v709_v7, %v700_v4  ;;  %v701_v17 = vld [vmem:[%s12166_s14 + $0x2e0] sm:$0xff]  ;;  %s14837_s9 = sld [smem:[#allocation14_spill]] }
  0xa7   :  { %306 = vperm.xlu1 %11867, %v12372_v21   ;;  %10473 = vmatpush1.bf16.msra.mxu1 %v10472_v45  ;;  %v10482_v14 = vpack.c.bf16 %v711_v9, %v702_v8  ;;  %v699_v15 = vld [vmem:[%s12166_s14 + $0x2d0] sm:$0xff]  ;;  %v708_v16 = vld [vmem:[%s12166_s14 + $0x318] sm:$0xff]  ;;  %v710_v18 = vld [vmem:[%s12166_s14 + $0x328] sm:$0xff] }
  0xa8   :  { %10475 = vmatprep.subr.bf16.mxu1 %v10474_v49  ;;  %10349 = vmatpush1.bf16.msra.mxu0 %v10348_v58  ;;  %v718_v19 = vld [vmem:[%s12166_s14 + $0x368] sm:$0xff]  ;;  %v727_v20 = vld [vmem:[%s12166_s14 + $0x3b0] sm:$0xff]  ;;  %v729_v22 = vld [vmem:[%s12166_s14 + $0x3c0] sm:$0xff]  ;;  %v10356_v23 = vpack.c.bf16 %v708_v16, %v699_v15  ;;  %v10484_v24 = vpack.c.bf16 %v710_v18, %v701_v17 }
  0xa9   :  { %10351 = vmatprep.subr.bf16.mxu0 %v10350_v60  ;;  %v10358_v25 = vpack.c.bf16 %v727_v20, %v718_v19  ;;  %v717_v27 = vld [vmem:[%s12166_s14 + $0x360] sm:$0xff]  ;;  %v726_v28 = vld [vmem:[%s12166_s14 + $0x3a8] sm:$0xff]  ;;  %v719_v29 = vld [vmem:[%s12166_s14 + $0x370] sm:$0xff] }
  0xaa   :  { %11870 = vset.pattern.permute.xlu0 %v14604_v5  ;;  %v728_v30 = vld [vmem:[%s12166_s14 + $0x3b8] sm:$0xff]  ;;  %v745_v32 = vld [vmem:[%s12166_s14 + $0x440] sm:$0xff]  ;;  %v738_v33 = vld [vmem:[%s12166_s14 + $0x408] sm:$0xff]  ;;  %v10360_v36 = vpack.c.bf16 %v726_v28, %v717_v27 }
  0xab   :  { %11868 = vset.pattern.permute.xlu1 %v14608_v0  ;;  %474 = vperm.xlu0 %11870, %v12372_v21   ;;  %v736_v31 = vld [vmem:[%s12166_s14 + $0x3f8] sm:$0xff]  ;;  %v747_v34 = vld [vmem:[%s12166_s14 + $0x450] sm:$0xff]  ;;  %v10488_v37 = vpack.c.bf16 %v728_v30, %v719_v29  ;;  %v737_v42 = vld [vmem:[%s12166_s14 + $0x400] sm:$0xff] }
  0xac   :  { %390 = vperm.xlu1 %11868, %v12372_v21   ;;  %10477 = vmatpush1.bf16.msra.mxu1 %v10476_v59  ;;  %v720_v21 = vld [vmem:[%s12166_s14 + $0x378] sm:$0xff]  ;;  %v10362_v38 = vpack.c.bf16 %v745_v32, %v736_v31  ;;  %v735_v39 = vld [vmem:[%s12166_s14 + $0x3f0] sm:$0xff]  ;;  %v10490_v41 = vpack.c.bf16 %v747_v34, %v738_v33  ;;  %v746_v44 = vld [vmem:[%s12166_s14 + $0x448] sm:$0xff] }
  0xad   :  { %10479 = vmatprep.subr.bf16.mxu1 %v10478_v61  ;;  %10353 = vmatpush1.bf16.msra.mxu0 %v10352_v10  ;;  %v10486_v26 = vpack.c.bf16 %v729_v22, %v720_v21  ;;  %v556_v35 = vld [vmem:[%s12131_s13 + $0x18] sm:$0xff]  ;;  %v754_v45 = vld [vmem:[%s12166_s14 + $0x488] sm:$0xff]  ;;  %v763_v46 = vld [vmem:[%s12166_s14 + $0x4d0] sm:$0xff]  ;;  %v10492_v51 = vpack.c.bf16 %v746_v44, %v737_v42 }
  0xae   :  { %10355 = vmatprep.subr.bf16.mxu0 %v10354_v13  ;;  %v744_v40 = vld [vmem:[%s12166_s14 + $0x438] sm:$0xff]  ;;  %v765_v48 = vld [vmem:[%s12166_s14 + $0x4e0] sm:$0xff]  ;;  %v3015_v49 = vld [vmem:[%s12141_s21 + $0x10] sm:$0xff]  ;;  %v10366_v54 = vpack.c.bf16 %v763_v46, %v754_v45 }
  0xaf   :  { %11873 = vset.pattern.permute.xlu0 %v14606_v6  ;;  %v756_v47 = vld [vmem:[%s12166_s14 + $0x498] sm:$0xff]  ;;  %v10364_v50 = vpack.c.bf16 %v744_v40, %v735_v39  ;;  %v753_v52 = vld [vmem:[%s12166_s14 + $0x480] sm:$0xff]  ;;  %v762_v53 = vld [vmem:[%s12166_s14 + $0x4c8] sm:$0xff] }
  0xb0   :  { %11869 = vset.pattern.permute.xlu1 %v14606_v6  ;;  %314 = vperm.xlu0 %11873, %v12421_v11   ;;  %v10494_v55 = vpack.c.bf16 %v765_v48, %v756_v47  ;;  %v755_v56 = vld [vmem:[%s12166_s14 + $0x490] sm:$0xff]  ;;  %v764_v57 = vld [vmem:[%s12166_s14 + $0x4d8] sm:$0xff]  ;;  %v781_v59 = vld [vmem:[%s12166_s14 + $0x560] sm:$0xff]  ;;  %v10368_v61 = vpack.c.bf16 %v762_v53, %v753_v52 }
  0xb1   :  { %310 = vperm.xlu1 %11869, %v12393_v43   ;;  %10481 = vmatpush1.bf16.msra.mxu1 %v10480_v12  ;;  %v772_v58 = vld [vmem:[%s12166_s14 + $0x518] sm:$0xff]  ;;  %v12468_v60 = vld [vmem:[%s12156_s3] sm:$0xf]  ;;  %v774_v62 = vld [vmem:[%s12166_s14 + $0x528] sm:$0xff]  ;;  %v10496_v2 = vpack.c.bf16 %v764_v57, %v755_v56  ;;  %s14856_s3 = sld [smem:[#allocation16_spill]] }
  0xb2   :  { %10483 = vmatprep.subr.bf16.mxu1 %v10482_v14  ;;  %10357 = vmatpush1.bf16.msra.mxu0 %v10356_v23  ;;  %v783_v63 = vld [vmem:[%s12166_s14 + $0x570] sm:$0xff]  ;;  %v780_v4 = vld [vmem:[%s12166_s14 + $0x558] sm:$0xff]  ;;  %v773_v7 = vld [vmem:[%s12166_s14 + $0x520] sm:$0xff]  ;;  %v10370_v8 = vpack.c.bf16 %v781_v59, %v772_v58 }
  0xb3   :  { %10359 = vmatprep.subr.bf16.mxu0 %v10358_v25  ;;  %v771_v3 = vld [vmem:[%s12166_s14 + $0x510] sm:$0xff]  ;;  %v782_v9 = vld [vmem:[%s12166_s14 + $0x568] sm:$0xff]  ;;  %v792_v14 = vld [vmem:[%s12166_s14 + $0x5b8] sm:$0xff] }
  0xb4   :  { %11876 = vset.pattern.permute.xlu0 %v14608_v0  ;;  %v790_v10 = vld [vmem:[%s12166_s14 + $0x5a8] sm:$0xff]  ;;  %v799_v12 = vld [vmem:[%s12166_s14 + $0x5f0] sm:$0xff]  ;;  %v801_v15 = vld [vmem:[%s12166_s14 + $0x600] sm:$0xff]  ;;  %v10372_v16 = vpack.c.bf16 %v780_v4, %v771_v3  ;;  %v10500_v17 = vpack.c.bf16 %v782_v9, %v773_v7 }
  0xb5   :  { %11871 = vset.pattern.permute.xlu1 %v14608_v0  ;;  %398 = vperm.xlu0 %11876, %v12421_v11   ;;  %v554_v13 = vld [vmem:[%s12131_s13 + $0x8] sm:$0xff]  ;;  %v10374_v18 = vpack.c.bf16 %v799_v12, %v790_v10  ;;  %v789_v19 = vld [vmem:[%s12166_s14 + $0x5a0] sm:$0xff]  ;;  %v791_v21 = vld [vmem:[%s12166_s14 + $0x5b0] sm:$0xff]  ;;  %v10502_v22 = vpack.c.bf16 %v801_v15, %v792_v14 }
  0xb6   :  { %394 = vperm.xlu1 %11871, %v12393_v43   ;;  %10485 = vmatpush1.bf16.msra.mxu1 %v10484_v24  ;;  %v798_v20 = vld [vmem:[%s12166_s14 + $0x5e8] sm:$0xff]  ;;  %v800_v23 = vld [vmem:[%s12166_s14 + $0x5f8] sm:$0xff]  ;;  %v817_v25 = vld [vmem:[%s12166_s14 + $0x680] sm:$0xff] }
  0xb7   :  { %10487 = vmatprep.subr.bf16.mxu1 %v10486_v26  ;;  %10361 = vmatpush1.bf16.msra.mxu0 %v10360_v36  ;;  %v808_v24 = vld [vmem:[%s12166_s14 + $0x638] sm:$0xff]  ;;  %v810_v26 = vld [vmem:[%s12166_s14 + $0x648] sm:$0xff]  ;;  %v819_v27 = vld [vmem:[%s12166_s14 + $0x690] sm:$0xff]  ;;  %v10376_v28 = vpack.c.bf16 %v798_v20, %v789_v19  ;;  %v10504_v29 = vpack.c.bf16 %v800_v23, %v791_v21 }
  0xb8   :  { %10363 = vmatprep.subr.bf16.mxu0 %v10362_v38  ;;  %v10378_v30 = vpack.c.bf16 %v817_v25, %v808_v24  ;;  %v807_v31 = vld [vmem:[%s12166_s14 + $0x630] sm:$0xff]  ;;  %v816_v32 = vld [vmem:[%s12166_s14 + $0x678] sm:$0xff]  ;;  %v809_v33 = vld [vmem:[%s12166_s14 + $0x640] sm:$0xff]  ;;  %v10506_v34 = vpack.c.bf16 %v819_v27, %v810_v26 }
  0xb9   :  { %11879 = vset.pattern.permute.xlu0 %v14602_v1  ;;  %v826_v36 = vld [vmem:[%s12166_s14 + $0x6c8] sm:$0xff]  ;;  %v828_v38 = vld [vmem:[%s12166_s14 + $0x6d8] sm:$0xff]  ;;  %v837_v39 = vld [vmem:[%s12166_s14 + $0x720] sm:$0xff] }
  0xba   :  { %11872 = vset.pattern.permute.xlu1 %v14602_v1  ;;  %574 = vperm.xlu0 %11879, %v556_v35   ;;  %v818_v35 = vld [vmem:[%s12166_s14 + $0x688] sm:$0xff]  ;;  %v555_v40 = vld [vmem:[%s12131_s13 + $0x10] sm:$0xff]  ;;  %v825_v45 = vld [vmem:[%s12166_s14 + $0x6c0] sm:$0xff]  ;;  %v10510_v48 = vpack.c.bf16 %v837_v39, %v828_v38  ;;  %s14840_s13 = sld [smem:[#allocation15_spill]] }
  0xbb   :  { %244 = vperm.xlu1 %11872, %v12421_v11   ;;  %10489 = vmatpush1.bf16.msra.mxu1 %v10488_v37  ;;  %v835_v37 = vld [vmem:[%s12166_s14 + $0x710] sm:$0xff]  ;;  %v10508_v42 = vpack.c.bf16 %v818_v35, %v809_v33  ;;  %v834_v46 = vld [vmem:[%s12166_s14 + $0x708] sm:$0xff]  ;;  %v3013_v53 = vld [vmem:[%s12141_s21] sm:$0xff] }
  0xbc   :  { %10491 = vmatprep.subr.bf16.mxu1 %v10490_v41  ;;  %10365 = vmatpush1.bf16.msra.mxu0 %v10364_v50  ;;  %v10380_v41 = vpack.c.bf16 %v816_v32, %v807_v31  ;;  %v10382_v44 = vpack.c.bf16 %v835_v37, %v826_v36  ;;  %v827_v47 = vld [vmem:[%s12166_s14 + $0x6d0] sm:$0xff]  ;;  %v853_v50 = vld [vmem:[%s12166_s14 + $0x7a0] sm:$0xff]  ;;  %v852_v58 = vld [vmem:[%s12166_s14 + $0x798] sm:$0xff]  ;;  %v249_v37 = vlaneseq }
  0xbd   :  { %10367 = vmatprep.subr.bf16.mxu0 %v10366_v54  ;;  %v855_v52 = vld [vmem:[%s12166_s14 + $0x7b0] sm:$0xff]  ;;  %v10384_v54 = vpack.c.bf16 %v834_v46, %v825_v45  ;;  %v845_v59 = vld [vmem:[%s12166_s14 + $0x760] sm:$0xff]  ;;  %v864_v3 = vld [vmem:[%s12166_s14 + $0x7f8] sm:$0xff] }
  0xbe   :  { %3029 = vperm.xlu0 %11879, %v3015_v49   ;;  %v844_v49 = vld [vmem:[%s12166_s14 + $0x758] sm:$0xff]  ;;  %v843_v57 = vld [vmem:[%s12166_s14 + $0x750] sm:$0xff]  ;;  %v873_v4 = vld [vmem:[%s12166_s14 + $0x840] sm:$0xff]  ;;  %v250_v38 = vshrl.u32 %v249_v37, 7 }
  0xbf   :  { %11874 = vset.pattern.permute.xlu1 %v14604_v5  ;;  %10493 = vmatpush1.bf16.msra.mxu1 %v10492_v51  ;;  %v846_v51 = vld [vmem:[%s12166_s14 + $0x768] sm:$0xff]  ;;  %v10386_v56 = vpack.c.bf16 %v853_v50, %v844_v49  ;;  %v861_v12 = vld [vmem:[%s12166_s14 + $0x7e0] sm:$0xff]  ;;  %v10518_v14 = vpack.c.bf16 %v873_v4, %v864_v3  ;;  %v872_v15 = vld [vmem:[%s12166_s14 + $0x838] sm:$0xff] }
  0xc0   :  { %478 = vperm.xlu1 %11874, %v12393_v43   ;;  %10495 = vmatprep.subr.bf16.mxu1 %v10494_v55  ;;  %v10498_v43 = vpack.c.bf16 %v783_v63, %v774_v62  ;;  %v854_v62 = vld [vmem:[%s12166_s14 + $0x7a8] sm:$0xff]  ;;  %v891_v19 = vld [vmem:[%s12166_s14 + $0x8d0] sm:$0xff]  ;;  %v3016_v21 = vld [vmem:[%s12141_s21 + $0x18] sm:$0xff]  ;;  %v12547_v39 = vsub.s32 0, %v250_v38  ;;  %v12556_v45 = vsub.s32 2, %v250_v38  ;;  %v12558_v46 = vsub.s32 3, %v250_v38 }
  0xc1   :  { %10369 = vmatpush1.bf16.msra.mxu0 %v10368_v61  ;;  %v10514_v61 = vpack.c.bf16 %v855_v52, %v846_v51  ;;  %v862_v63 = vld [vmem:[%s12166_s14 + $0x7e8] sm:$0xff]  ;;  %v10516_v9 = vpack.c.bf16 %v854_v62, %v845_v59  ;;  %v879_v24 = vld [vmem:[%s12166_s14 + $0x870] sm:$0xff]  ;;  %v888_v25 = vld [vmem:[%s12166_s14 + $0x8b8] sm:$0xff] }
  0xc2   :  { %3128 = vperm.xlu0 %11879, %v12468_v60   ;;  %10371 = vmatprep.subr.bf16.mxu0 %v10370_v8  ;;  %v3014_v7 = vld [vmem:[%s12141_s21 + $0x8] sm:$0xff]  ;;  %v10388_v8 = vpack.c.bf16 %v852_v58, %v843_v57  ;;  %v881_v27 = vld [vmem:[%s12166_s14 + $0x880] sm:$0xff]  ;;  %v900_v31 = vld [vmem:[%s12166_s14 + $0x918] sm:$0xff]  ;;  %v10396_v33 = vpack.c.bf16 %v888_v25, %v879_v24  ;;  %14704 = vst [vmem:[#allocation33_spill] sm:$0xff] %v12547_v39  ;;  %s14844_s21 = sld [smem:[#allocation20_spill]] }
  0xc3   :  { %10497 = vmatpush1.bf16.msra.mxu1 %v10496_v2  ;;  %v871_v2 = vld [vmem:[%s12166_s14 + $0x830] sm:$0xff]  ;;  %v909_v32 = vld [vmem:[%s12166_s14 + $0x960] sm:$0xff]  ;;  %14708 = vst [vmem:[#allocation37_spill] sm:$0xff] %v12556_v45  ;;  %14709 = vst [vmem:[#allocation38_spill] sm:$0xff] %v12558_v46 }
  0xc4   :  { %11875 = vset.pattern.permute.xlu1 %v14602_v1  ;;  %10499 = vmatprep.subr.bf16.mxu1 %v10498_v43  ;;  %v10390_v10 = vpack.c.bf16 %v871_v2, %v862_v63  ;;  %v863_v43 = vld [vmem:[%s12166_s14 + $0x7f0] sm:$0xff]  ;;  %v10526_v36 = vpack.c.bf16 %v909_v32, %v900_v31  ;;  %v897_v32 = vld [vmem:[%s12166_s14 + $0x900] sm:$0xff] }
  0xc5   :  { %564 = vperm.xlu1 %11875, %v554_v13   ;;  %10373 = vmatpush1.bf16.msra.mxu0 %v10372_v16  ;;  %v870_v13 = vld [vmem:[%s12166_s14 + $0x828] sm:$0xff]  ;;  %v880_v16 = vld [vmem:[%s12166_s14 + $0x878] sm:$0xff] }
  0xc6   :  { %11881 = vset.pattern.permute.xlu0 %v14608_v0  ;;  %10375 = vmatprep.subr.bf16.mxu0 %v10374_v18  ;;  %v882_v18 = vld [vmem:[%s12166_s14 + $0x888] sm:$0xff]  ;;  %v10392_v20 = vpack.c.bf16 %v870_v13, %v861_v12  ;;  %v12759_v0 = vld [vmem:[%s12166_s14 + $0xcb0] sm:$0xff] }
  0xc7   :  { %3148 = vperm.xlu0 %11881, %v12468_v60   ;;  %10501 = vmatpush1.bf16.msra.mxu1 %v10500_v17  ;;  %v889_v17 = vld [vmem:[%s12166_s14 + $0x8c0] sm:$0xff]  ;;  %v10522_v26 = vpack.c.bf16 %v891_v19, %v882_v18 }
  0xc8   :  { %10503 = vmatprep.subr.bf16.mxu1 %v10502_v22  ;;  %v10520_v22 = vpack.c.bf16 %v872_v15, %v863_v43  ;;  %v10394_v23 = vpack.c.bf16 %v889_v17, %v880_v16 }
  0xc9   :  { %11877 = vset.pattern.permute.xlu1 %v14604_v5  ;;  %10377 = vmatpush1.bf16.msra.mxu0 %v10376_v28  ;;  %v890_v28 = vld [vmem:[%s12166_s14 + $0x8c8] sm:$0xff] }
  0xca   :  { %482 = vperm.xlu1 %11877, %v12421_v11   ;;  %10379 = vmatprep.subr.bf16.mxu0 %v10378_v30  ;;  %v836_v11 = vld [vmem:[%s12166_s14 + $0x718] sm:$0xff]  ;;  %v907_v30 = vld [vmem:[%s12166_s14 + $0x950] sm:$0xff] }
  0xcb   :  { %10505 = vmatpush1.bf16.msra.mxu1 %v10504_v29  ;;  %11884 = vset.pattern.permute.xlu0 %v14602_v1  ;;  %v10512_v55 = vpack.c.bf16 %v836_v11, %v827_v47  ;;  %v898_v29 = vld [vmem:[%s12166_s14 + $0x908] sm:$0xff] }
  0xcc   :  { %10507 = vmatprep.subr.bf16.mxu1 %v10506_v34  ;;  %v10524_v34 = vpack.c.bf16 %v890_v28, %v881_v27  ;;  %v10398_v35 = vpack.c.bf16 %v907_v30, %v898_v29  ;;  %v12561_v47 = vld [vmem:[%s12121_s5 + $0x8] sm:$0xff] }
  0xcd   :  { %10381 = vmatpush1.bf16.msra.mxu0 %v10380_v41  ;;  %v12551_v41 = vsub.s32 1, %v250_v38  ;;  %v260_v50 = vrot.slane %v12561_v47, %v12547_v39 }
  0xce   :  { %11878 = vset.pattern.permute.xlu1 %v14602_v1  ;;  %10383 = vmatprep.subr.bf16.mxu0 %v10382_v44  ;;  %v12554_v44 = vsub.s32 5, %v250_v38 }
  0xcf   :  { %569 = vperm.xlu1 %11878, %v555_v40   ;;  %10509 = vmatpush1.bf16.msra.mxu1 %v10508_v42  ;;  %v12549_v40 = vsub.s32 4, %v250_v38  ;;  %14706 = vst [vmem:[#allocation35_spill] sm:$0xff] %v12551_v41  ;;  %v221_v42 = vld [vmem:[%s12121_s5] sm:$0xff]  ;;  %v12590_v63 = vrot.slane %v260_v50, %v12547_v39 }
  0xd0   :  { %10511 = vmatprep.subr.bf16.mxu1 %v10510_v48  ;;  %14707 = vst [vmem:[#allocation36_spill] sm:$0xff] %v12554_v44  ;;  %v12565_v48 = vsub.s32 7, %v250_v38  ;;  %v252_v11 = vrot.slane %v221_v42, %v12547_v39  ;;  %v320_v51 = vrot.slane %v221_v42, %v12551_v41  ;;  %v324_v52 = vrot.slane %v221_v42, %v12554_v44 }
  0xd1   :  { %10385 = vmatpush1.bf16.msra.mxu0 %v10384_v54  ;;  %14705 = vst [vmem:[#allocation34_spill] sm:$0xff] %v12549_v40  ;;  %v256_v49 = vrot.slane %v221_v42, %v12549_v40  ;;  %v404_v54 = vrot.slane %v221_v42, %v12556_v45 }
  0xd2   :  { %10387 = vmatprep.subr.bf16.mxu0 %v10386_v56  ;;  %14711 = vst [vmem:[#allocation40_spill] sm:$0xff] %v12565_v48  ;;  %v488_v56 = vrot.slane %v221_v42, %v12558_v46  ;;  %v492_v59 = vrot.slane %v221_v42, %v12565_v48  ;;  %v12593_v2 = vrot.slane %v320_v51, %v12551_v41 }
  0xd3   :  { %3019 = vperm.xlu1 %11878, %v3013_v53   ;;  %10513 = vmatpush1.bf16.msra.mxu1 %v10512_v55  ;;  %v328_v53 = vrot.slane %v12561_v47, %v12551_v41  ;;  %v12587_v62 = vrot.slane %v256_v49, %v12547_v39  ;;  %v12596_v3 = vrot.slane %v324_v52, %v12551_v41  ;;  %v927_v49 = vld [vmem:[%s12166_s14 + $0x9f0] sm:$0xff] }
  0xd4   :  { %10515 = vmatprep.subr.bf16.mxu1 %v10514_v61  ;;  %v12584_v61 = vrot.slane %v252_v11, %v12547_v39  ;;  %14714 = vst [vmem:[#allocation43_spill] sm:$0xff] %v12593_v2  ;;  %v918_v11 = vld [vmem:[%s12166_s14 + $0x9a8] sm:$0xff] }
  0xd5   :  { %10389 = vmatpush1.bf16.msra.mxu0 %v10388_v8  ;;  %14713 = vst [vmem:[#allocation42_spill] sm:$0xff] %v12587_v62  ;;  %14715 = vst [vmem:[#allocation44_spill] sm:$0xff] %v12596_v3  ;;  %v12599_v4 = vrot.slane %v328_v53, %v12551_v41 }
  0xd6   :  { %10391 = vmatprep.subr.bf16.mxu0 %v10390_v10  ;;  %14712 = vst [vmem:[#allocation41_spill] sm:$0xff] %v12584_v61  ;;  %v12611_v10 = vrot.slane %v492_v59, %v12558_v46  ;;  %v924_v59 = vld [vmem:[%s12166_s14 + $0x9d8] sm:$0xff] }
  0xd7   :  { %3024 = vperm.xlu1 %11878, %v3014_v7   ;;  %10517 = vmatpush1.bf16.msra.mxu1 %v10516_v9  ;;  %14716 = vst [vmem:[#allocation45_spill] sm:$0xff] %v12599_v4  ;;  %v12602_v7 = vrot.slane %v404_v54, %v12556_v45  ;;  %v12608_v9 = vrot.slane %v488_v56, %v12558_v46  ;;  %v915_v56 = vld [vmem:[%s12166_s14 + $0x990] sm:$0xff] }
  0xd8   :  { %10519 = vmatprep.subr.bf16.mxu1 %v10518_v14  ;;  %14720 = vst [vmem:[#allocation49_spill] sm:$0xff] %v12611_v10 }
  0xd9   :  { %10393 = vmatpush1.bf16.msra.mxu0 %v10392_v20  ;;  %14717 = vst [vmem:[#allocation46_spill] sm:$0xff] %v12602_v7  ;;  %14719 = vst [vmem:[#allocation48_spill] sm:$0xff] %v12608_v9 }
  0xda   :  { %10395 = vmatprep.subr.bf16.mxu0 %v10394_v23 }
  0xdb   :  { %3034 = vperm.xlu1 %11878, %v3016_v21   ;;  %10521 = vmatpush1.bf16.msra.mxu1 %v10520_v22 }
  0xdc   :  { %10523 = vmatprep.subr.bf16.mxu1 %v10522_v26 }
  0xdd   :  { %10397 = vmatpush1.bf16.msra.mxu0 %v10396_v33  ;;  %v906_v33 = vld [vmem:[%s12166_s14 + $0x948] sm:$0xff] }
  0xde   :  { %10399 = vmatprep.subr.bf16.mxu0 %v10398_v35  ;;  %v908_v35 = vld [vmem:[%s12166_s14 + $0x958] sm:$0xff]  ;;  %v10400_v54 = vpack.c.bf16 %v906_v33, %v897_v32  ;;  %v935_v32 = vld [vmem:[%s12166_s14 + $0xa30] sm:$0xff] }
  0xdf   :  { %11880 = vset.pattern.permute.xlu1 %v14606_v6  ;;  %10525 = vmatpush1.bf16.msra.mxu1 %v10524_v34  ;;  %v899_v34 = vld [vmem:[%s12166_s14 + $0x910] sm:$0xff]  ;;  %v944_v33 = vld [vmem:[%s12166_s14 + $0xa78] sm:$0xff] }
  0xe0   :  { %3136 = vperm.xlu1 %11880, %v12468_v60   ;;  %10527 = vmatprep.subr.bf16.mxu1 %v10526_v36  ;;  %v916_v36 = vld [vmem:[%s12166_s14 + $0x998] sm:$0xff] }
  0xe1   :  { %v12742_v6 = vld [vmem:[%s12166_s14 + $0xc18] sm:$0xff] }
  0xe4   :  { %11882 = vset.pattern.permute.xlu1 %v14604_v5  ;;  %v12739_v5 = vld [vmem:[%s12166_s14 + $0xbd0] sm:$0xff] }
  0xe5   :  { %3160 = vperm.xlu1 %11882, %v12468_v60   ;;  %v12563_v60 = vsub.s32 6, %v250_v38 }
  0xe7   :  { %14710 = vst [vmem:[#allocation39_spill] sm:$0xff] %v12563_v60  ;;  %v408_v55 = vrot.slane %v221_v42, %v12563_v60  ;;  %v925_v42 = vld [vmem:[%s12166_s14 + $0x9e0] sm:$0xff] }
  0xe9   :  { %11883 = vset.pattern.permute.xlu1 %v14602_v1  ;;  %v12605_v8 = vrot.slane %v408_v55, %v12556_v45  ;;  %v10528_v55 = vpack.c.bf16 %v908_v35, %v899_v34  ;;  %v952_v34 = vld [vmem:[%s12166_s14 + $0xab8] sm:$0xff]  ;;  %v961_v35 = vld [vmem:[%s12166_s14 + $0xb00] sm:$0xff]  ;;  %v12736_v1 = vld [vmem:[%s12166_s14 + $0xc30] sm:$0xff] }
  0xeb   :  { %14718 = vst [vmem:[#allocation47_spill] sm:$0xff] %v12605_v8 }
 0x117   :  { %v12578_v57 = vpop.permute.xlu0 %229  ;;  %v12580_v58 = vpop.permute.xlu1 %386 }
 0x118   :  { %v285_v12 = vmul.f32 %v12584_v61, %v12578_v57  ;;  %v286_v13 = vmul.f32 %v12587_v62, %v12578_v57  ;;  %v287_v15 = vmul.f32 %v12590_v63, %v12578_v57  ;;  %v437_v19 = vmul.f32 %v12602_v7, %v12580_v58 }
 0x119   :  { %v438_v20 = vmul.f32 %v12605_v8, %v12580_v58 }
 0x11c   :  { %v12617_v43 = vpop.permute.xlu0 %302  ;;  %v12619_v14 = vpop.permute.xlu1 %470 }
 0x11d   :  { %14721 = vst [vmem:[#allocation50_spill] sm:$0xff] %v12619_v14  ;;  %v353_v16 = vmul.f32 %v12593_v2, %v12617_v43  ;;  %v354_v17 = vmul.f32 %v12596_v3, %v12617_v43  ;;  %v355_v18 = vmul.f32 %v12599_v4, %v12617_v43  ;;  %v521_v21 = vmul.f32 %v12608_v9, %v12619_v14 }
 0x11e   :  { %v522_v25 = vmul.f32 %v12611_v10, %v12619_v14  ;;  %v12831_v14 = vld [vmem:[%s12166_s14 + $0xd48] sm:$0xff] }
 0x11f   :  { %v369_v22 = vadd.f32 %v353_v16, %v285_v12  ;;  %v370_v23 = vadd.f32 %v354_v17, %v286_v13  ;;  %v12635_v24 = vadd.f32 %v355_v18, %v287_v15  ;;  %v10402_v12 = vpack.c.bf16 %v925_v42, %v916_v36  ;;  %v917_v15 = vld [vmem:[%s12166_s14 + $0x9a0] sm:$0xff]  ;;  %v926_v16 = vld [vmem:[%s12166_s14 + $0x9e8] sm:$0xff]  ;;  %v943_v18 = vld [vmem:[%s12166_s14 + $0xa70] sm:$0xff] }
 0x120   :  { %v10530_v13 = vpack.c.bf16 %v927_v49, %v918_v11  ;;  %v934_v17 = vld [vmem:[%s12166_s14 + $0xa28] sm:$0xff]  ;;  %v10536_v42 = vpack.c.bf16 %v944_v33, %v935_v32  ;;  %v12686_v11 = vld [vmem:[%s12166_s14 + $0xab0] sm:$0xff]  ;;  %v960_v49 = vld [vmem:[%s12166_s14 + $0xaf8] sm:$0xff]  ;;  %v496_v32 = vrot.slane %v12561_v47, %v12558_v46 }
 0x121   :  { %14722 = vst [vmem:[#allocation51_spill] sm:$0xff] %v12635_v24  ;;  %v453_v26 = vadd.f32 %v437_v19, %v369_v22  ;;  %v454_v27 = vadd.f32 %v438_v20, %v370_v23  ;;  %v12639_v28 = vpop.permute.xlu0 %234  ;;  %v12641_v29 = vpop.permute.xlu1 %559  ;;  %v936_v19 = vld [vmem:[%s12166_s14 + $0xa38] sm:$0xff]  ;;  %v945_v20 = vld [vmem:[%s12166_s14 + $0xa80] sm:$0xff]  ;;  %v10532_v22 = vpack.c.bf16 %v926_v16, %v917_v15  ;;  %v954_v36 = vld [vmem:[%s12166_s14 + $0xac8] sm:$0xff]  ;;  %v10412_v33 = vpack.c.bf16 %v960_v49, %v12686_v11 }
 0x122   :  { %14723 = vst [vmem:[#allocation52_spill] sm:$0xff] %v12639_v28  ;;  %14724 = vst [vmem:[#allocation53_spill] sm:$0xff] %v12641_v29  ;;  %v962_v15 = vld [vmem:[%s12166_s14 + $0xb08] sm:$0xff]  ;;  %v12750_v49 = vld [vmem:[%s12166_s14 + $0xbe0] sm:$0xff] }
 0x123   :  { %v537_v30 = vadd.f32 %v521_v21, %v453_v26  ;;  %v538_v31 = vadd.f32 %v522_v25, %v454_v27  ;;  %v10404_v21 = vpack.c.bf16 %v924_v59, %v915_v56  ;;  %v933_v25 = vld [vmem:[%s12166_s14 + $0xa20] sm:$0xff]  ;;  %v942_v26 = vld [vmem:[%s12166_s14 + $0xa68] sm:$0xff]  ;;  %v10410_v59 = vpack.c.bf16 %v961_v35, %v952_v34  ;;  %v12727_v35 = vld [vmem:[%s12166_s14 + $0xbd8] sm:$0xff] }
 0x124   :  { %v970_v16 = vld [vmem:[%s12166_s14 + $0xb48] sm:$0xff] }
 0x125   :  { %v577_v37 = vadd.f32 %v12641_v29, %v537_v30  ;;  %v578_v38 = vadd.f32 %v12641_v29, %v538_v31  ;;  %v12653_v50 = vpop.permute.xlu0 %239  ;;  %v10406_v30 = vpack.c.bf16 %v943_v18, %v934_v17  ;;  %v10534_v31 = vpack.c.bf16 %v945_v20, %v936_v19  ;;  %v979_v20 = vld [vmem:[%s12166_s14 + $0xb90] sm:$0xff] }
 0x126   :  { %14725 = vst [vmem:[#allocation54_spill] sm:$0xff] %v12653_v50  ;;  %v12655_v51 = vpop.permute.xlu1 %306  ;;  %v412_v17 = vrot.slane %v12561_v47, %v12556_v45  ;;  %v416_v18 = vrot.slane %v12561_v47, %v12563_v60  ;;  %v332_v19 = vrot.slane %v12561_v47, %v12554_v44  ;;  %v10414_v11 = vpack.c.bf16 %v979_v20, %v970_v16  ;;  %v12778_v20 = vld [vmem:[%s12166_s14 + $0xcc0] sm:$0xff] }
 0x127   :  { %14726 = vst [vmem:[#allocation55_spill] sm:$0xff] %v12655_v51  ;;  %v12657_v52 = vmax.f32 %v577_v37, 0.0  ;;  %v12659_v53 = vmax.f32 %v578_v38, 0.0  ;;  %v963_v37 = vld [vmem:[%s12166_s14 + $0xb10] sm:$0xff]  ;;  %v10408_v38 = vpack.c.bf16 %v942_v26, %v933_v25  ;;  %v12712_v25 = vld [vmem:[%s12166_s14 + $0xb40] sm:$0xff]  ;;  %v12715_v26 = vld [vmem:[%s12166_s14 + $0xb88] sm:$0xff]  ;;  %v12815_v29 = vrot.slane %v496_v32, %v12558_v46 }
 0x128   :  { %v12765_v60 = vrot.slane %v412_v17, %v12556_v45  ;;  %v12784_v17 = vld [vmem:[%s12166_s14 + $0xca8] sm:$0xff]  ;;  %v10416_v4 = vpack.c.bf16 %v12715_v26, %v12712_v25 }
 0x129   :  { %14727 = vst [vmem:[#allocation56_spill] sm:$0xff] %v12657_v52  ;;  %14728 = vst [vmem:[#allocation57_spill] sm:$0xff] %v12659_v53  ;;  %1249 = vmatprep.mubr.f32.mxu0 %v12659_v53  ;;  %1427 = vmatprep.mubr.f32.mxu1 %v12659_v53  ;;  %v12812_v53 = vld [vmem:[%s12166_s14 + $0xd50] sm:$0xff]  ;;  %v12834_v32 = vld [vmem:[%s12166_s14 + $0xd88] sm:$0xff] }
 0x12a   :  { %1250 = vmatmul.mubr.f32.vlgmr.msra.gmra.mrb[0].mxu0 %v12657_v52  ;;  %1428 = vmatmul.mubr.f32.vlgmr.msra.gmra.mrb[0].mxu1 %v12657_v52  ;;  %v12677_v27 = vpop.permute.xlu0 %474  ;;  %14732 = vst [vmem:[#allocation61_spill] sm:$0xff] %v12765_v60  ;;  %v12809_v52 = vld [vmem:[%s12166_s14 + $0xd08] sm:$0xff]  ;;  %14733 = vst [vmem:[#allocation62_spill] sm:$0xff] %v12815_v29  ;;  %v12828_v60 = vld [vmem:[%s12166_s14 + $0xd00] sm:$0xff] }
 0x12b   :  { %10401 = vmatpush1.bf16.msra.mxu0 %v10400_v54  ;;  %10529 = vmatpush1.bf16.msra.mxu1 %v10528_v55  ;;  %v12673_v23 = vpop.permute.xlu1 %390  ;;  %14730 = vst [vmem:[#allocation59_spill] sm:$0xff] %v12677_v27  ;;  %v264_v55 = vrot.slane %v12561_v47, %v12549_v40  ;;  %v12797_v40 = vld [vmem:[%s12166_s14 + $0xc70] sm:$0xff]  ;;  %v12852_v29 = vld [vmem:[%s12166_s14 + $0xde0] sm:$0xff] }
 0x12c   :  { %14729 = vst [vmem:[#allocation58_spill] sm:$0xff] %v12673_v23  ;;  %10403 = vmatprep.subr.bf16.mxu0 %v10402_v12  ;;  %10531 = vmatprep.subr.bf16.mxu1 %v10530_v13  ;;  %v10538_v12 = vpack.c.bf16 %v963_v37, %v954_v36  ;;  %v953_v13 = vld [vmem:[%s12166_s14 + $0xac0] sm:$0xff]  ;;  %v12733_v37 = vld [vmem:[%s12166_s14 + $0xbe8] sm:$0xff] }
 0x12d   :  { %v10540_v34 = vpack.c.bf16 %v962_v15, %v953_v13  ;;  %v12730_v36 = vld [vmem:[%s12166_s14 + $0xc20] sm:$0xff]  ;;  %v12753_v13 = vld [vmem:[%s12166_s14 + $0xc28] sm:$0xff]  ;;  %v10546_v26 = vpack.c.bf16 %v12736_v1, %v12733_v37  ;;  %v12869_v37 = vld [vmem:[%s12166_s14 + $0xd90] sm:$0xff] }
 0x12e   :  { %v12756_v15 = vld [vmem:[%s12166_s14 + $0xc68] sm:$0xff]  ;;  %v10418_v25 = vpack.c.bf16 %v12730_v36, %v12727_v35  ;;  %14734 = vst [vmem:[#allocation63_spill] sm:$0xff] %v12869_v37  ;;  %v12939_v37 = vld [vmem:[%s12166_s14 + $0xeb8] sm:$0xff] }
 0x12f   :  { %10405 = vmatpush1.bf16.msra.mxu0 %v10404_v21  ;;  %10533 = vmatpush1.bf16.msra.mxu1 %v10532_v22  ;;  %v12689_v54 = vpop.permute.xlu0 %314  ;;  %v12706_v21 = vld [vmem:[%s12166_s14 + $0xb58] sm:$0xff]  ;;  %v12709_v22 = vld [vmem:[%s12166_s14 + $0xba0] sm:$0xff]  ;;  %v10422_v35 = vpack.c.bf16 %v12759_v0, %v12756_v15  ;;  %v12866_v36 = vld [vmem:[%s12166_s14 + $0xdc8] sm:$0xff]  ;;  %v442_v0 = vmul.f32 %v12605_v8, %v12673_v23 }
 0x130   :  { %10407 = vmatprep.subr.bf16.mxu0 %v10406_v30  ;;  %10535 = vmatprep.subr.bf16.mxu1 %v10534_v31  ;;  %v12693_v56 = vpop.permute.xlu1 %310  ;;  %v12718_v30 = vld [vmem:[%s12166_s14 + $0xb50] sm:$0xff]  ;;  %v12721_v31 = vld [vmem:[%s12166_s14 + $0xb98] sm:$0xff]  ;;  %v10542_v16 = vpack.c.bf16 %v12709_v22, %v12706_v21  ;;  %v289_v21 = vmul.f32 %v12584_v61, %v12639_v28  ;;  %v290_v22 = vmul.f32 %v12587_v62, %v12639_v28 }
 0x131   :  { %14731 = vst [vmem:[#allocation60_spill] sm:$0xff] %v12693_v56  ;;  %v10544_v24 = vpack.c.bf16 %v12721_v31, %v12718_v30  ;;  %v12822_v28 = vld [vmem:[%s12166_s14 + $0xcf0] sm:$0xff]  ;;  %v10420_v30 = vpack.c.bf16 %v12742_v6, %v12739_v5  ;;  %v12863_v6 = vld [vmem:[%s12166_s14 + $0xd80] sm:$0xff] }
 0x132   :  { %v12846_v31 = vld [vmem:[%s12166_s14 + $0xdd0] sm:$0xff]  ;;  %v12886_v5 = vld [vmem:[%s12166_s14 + $0xe60] sm:$0xff] }
 0x133   :  { %10409 = vmatpush1.bf16.msra.mxu0 %v10408_v38  ;;  %10537 = vmatpush1.bf16.msra.mxu1 %v10536_v42  ;;  %v12745_v38 = vrot.slane %v264_v55, %v12547_v39  ;;  %v500_v42 = vrot.slane %v12561_v47, %v12565_v48  ;;  %v12762_v55 = vld [vmem:[%s12166_s14 + $0xc78] sm:$0xff]  ;;  %v12768_v47 = vrot.slane %v416_v18, %v12556_v45  ;;  %v12781_v48 = vld [vmem:[%s12166_s14 + $0xc60] sm:$0xff] }
 0x134   :  { %10411 = vmatprep.subr.bf16.mxu0 %v10410_v59  ;;  %10539 = vmatprep.subr.bf16.mxu1 %v10538_v12  ;;  %v12771_v59 = vrot.slane %v332_v19, %v12551_v41  ;;  %v12786_v44 = vpop.permute.xlu0 %398  ;;  %v357_v18 = vmul.f32 %v12593_v2, %v12655_v51  ;;  %v358_v19 = vmul.f32 %v12596_v3, %v12655_v51  ;;  %v12800_v45 = vld [vmem:[%s12166_s14 + $0xcb8] sm:$0xff]  ;;  %v12806_v41 = vld [vmem:[%s12166_s14 + $0xd40] sm:$0xff] }
 0x135   :  { %v12773_v12 = vpop.permute.xlu1 %394  ;;  %v12803_v39 = vld [vmem:[%s12166_s14 + $0xcf8] sm:$0xff]  ;;  %v10550_v1 = vpack.c.bf16 %v12778_v20, %v12762_v55 }
 0x136   :  { %v12825_v51 = vld [vmem:[%s12166_s14 + $0xd38] sm:$0xff]  ;;  %v374_v15 = vadd.f32 %v358_v19, %v290_v22  ;;  %v10554_v19 = vpack.c.bf16 %v12812_v53, %v12809_v52  ;;  %v525_v52 = vmul.f32 %v12608_v9, %v12677_v27  ;;  %v526_v53 = vmul.f32 %v12611_v10, %v12677_v27  ;;  %v12936_v22 = vld [vmem:[%s12166_s14 + $0xef0] sm:$0xff] }
 0x137   :  { %10413 = vmatpush1.bf16.msra.mxu0 %v10412_v33  ;;  %10541 = vmatpush1.bf16.msra.mxu1 %v10540_v34  ;;  %v12837_v33 = vrot.slane %v500_v42, %v12558_v46  ;;  %v12849_v34 = vld [vmem:[%s12166_s14 + $0xd98] sm:$0xff]  ;;  %v10548_v42 = vpack.c.bf16 %v12753_v13, %v12750_v49  ;;  %v441_v49 = vmul.f32 %v12602_v7, %v12673_v23 }
 0x138   :  { %10415 = vmatprep.subr.bf16.mxu0 %v10414_v11  ;;  %10543 = vmatprep.subr.bf16.mxu1 %v10542_v16  ;;  %v373_v13 = vadd.f32 %v357_v18, %v289_v21  ;;  %v12880_v16 = vld [vmem:[%s12166_s14 + $0xdd8] sm:$0xff]  ;;  %v10552_v46 = vpack.c.bf16 %v12800_v45, %v12797_v40  ;;  %v10426_v18 = vpack.c.bf16 %v12806_v41, %v12803_v39  ;;  %v12895_v21 = vld [vmem:[%s12166_s14 + $0xe28] sm:$0xff]  ;;  %v12904_v39 = vld [vmem:[%s12166_s14 + $0xe70] sm:$0xff] }
 0x139   :  { %v12871_v11 = vpop.permute.xlu0 %574  ;;  %v12883_v20 = vld [vmem:[%s12166_s14 + $0xe18] sm:$0xff]  ;;  %14737 = vst [vmem:[#allocation66_spill] sm:$0xff] %v12895_v21  ;;  %v12907_v41 = vld [vmem:[%s12166_s14 + $0xe10] sm:$0xff]  ;;  %v12924_v40 = vld [vmem:[%s12166_s14 + $0xe68] sm:$0xff]  ;;  %v356_v27 = vmul.f32 %v12771_v59, %v12617_v43  ;;  %v14742_v43 = vpack.c.bf16 %v12784_v17, %v12781_v48 }
 0x13a   :  { %14735 = vst [vmem:[#allocation64_spill] sm:$0xff] %v12871_v11  ;;  %v12877_v55 = vpop.permute.xlu1 %244  ;;  %14736 = vst [vmem:[#allocation65_spill] sm:$0xff] %v12883_v20  ;;  %v12910_v45 = vld [vmem:[%s12166_s14 + $0xe58] sm:$0xff]  ;;  %v457_v23 = vadd.f32 %v441_v49, %v373_v13  ;;  %v458_v11 = vadd.f32 %v442_v0, %v374_v15  ;;  %v361_v20 = vmul.f32 %v12593_v2, %v12693_v56 }
 0x13b   :  { %10417 = vmatpush1.bf16.msra.mxu0 %v10416_v4  ;;  %10545 = vmatpush1.bf16.msra.mxu1 %v10544_v24  ;;  %v12927_v24 = vld [vmem:[%s12166_s14 + $0xea8] sm:$0xff]  ;;  %v298_v13 = vmul.f32 %v12587_v62, %v12877_v55  ;;  %v366_v15 = vmul.f32 %v12596_v3, %v12689_v54  ;;  %v294_v0 = vmul.f32 %v12587_v62, %v12653_v50 }
 0x13c   :  { %10419 = vmatprep.subr.bf16.mxu0 %v10418_v25  ;;  %10547 = vmatprep.subr.bf16.mxu1 %v10546_v26  ;;  %v12921_v26 = vld [vmem:[%s12166_s14 + $0xe20] sm:$0xff]  ;;  %v12976_v62 = vld [vmem:[%s12166_s14 + $0xee8] sm:$0xff]  ;;  %v297_v21 = vmul.f32 %v12584_v61, %v12877_v55 }
 0x13d   :  { %14738 = vst [vmem:[#allocation67_spill] sm:$0xff] %v12921_v26  ;;  %v12929_v4 = vpop.permute.xlu0 %3029  ;;  %v12942_v25 = vld [vmem:[%s12166_s14 + $0xf00] sm:$0xff]  ;;  %v542_v26 = vadd.f32 %v526_v53, %v458_v11  ;;  %v12992_v11 = vld [vmem:[%s12166_s14 + $0xf38] sm:$0xff]  ;;  %v382_v48 = vadd.f32 %v366_v15, %v298_v13  ;;  %v13020_v13 = vld [vmem:[%s12166_s14 + $0xf48] sm:$0xff] }
 0x13e   :  { %14739 = vst [vmem:[#allocation68_spill] sm:$0xff] %v12929_v4  ;;  %v293_v4 = vmul.f32 %v12584_v61, %v12653_v50  ;;  %v14769_v61 = vld [vmem:[#allocation52_spill] sm:$0xff] }
 0x13f   :  { %10421 = vmatpush1.bf16.msra.mxu0 %v10420_v30  ;;  %10549 = vmatpush1.bf16.msra.mxu1 %v10548_v42  ;;  %v12948_v49 = vpop.permute.xlu1 %478  ;;  %v362_v42 = vmul.f32 %v12596_v3, %v12693_v56  ;;  %v541_v30 = vadd.f32 %v525_v52, %v457_v23  ;;  %v365_v3 = vmul.f32 %v12593_v2, %v12689_v54  ;;  %v12973_v56 = vld [vmem:[%s12166_s14 + $0xea0] sm:$0xff]  ;;  %v12989_v23 = vld [vmem:[%s12166_s14 + $0xef8] sm:$0xff] }
 0x140   :  { %14740 = vst [vmem:[#allocation69_spill] sm:$0xff] %v12948_v49  ;;  %10423 = vmatprep.subr.bf16.mxu0 %v10422_v35  ;;  %10551 = vmatprep.subr.bf16.mxu1 %v10550_v1  ;;  %v12979_v1 = vld [vmem:[%s12166_s14 + $0xeb0] sm:$0xff]  ;;  %v377_v35 = vadd.f32 %v361_v20, %v293_v4  ;;  %v12995_v52 = vld [vmem:[%s12166_s14 + $0xf80] sm:$0xff]  ;;  %v445_v20 = vmul.f32 %v12602_v7, %v12773_v12 }
 0x141   :  { %v12981_v50 = vpop.permute.xlu0 %3128  ;;  %v378_v17 = vadd.f32 %v362_v42, %v294_v0  ;;  %v14748_v42 = vpack.c.bf16 %v12831_v14, %v12828_v60  ;;  %v449_v0 = vmul.f32 %v12602_v7, %v12786_v44  ;;  %v14750_v60 = vpack.c.bf16 %v12852_v29, %v12849_v34  ;;  %v13070_v34 = vld [vmem:[%s12166_s14 + $0xfd8] sm:$0xff]  ;;  %v14753_v7 = vld [vmem:[#allocation50_spill] sm:$0xff] }
 0x142   :  { %14741 = vst [vmem:[#allocation70_spill] sm:$0xff] %v12981_v50  ;;  %v12999_v53 = vmul.f32 %v12981_v50, %v12590_v63  ;;  %v288_v50 = vmul.f32 %v12745_v38, %v12578_v57  ;;  %v14747_v57 = vpack.c.bf16 %v12825_v51, %v12822_v28  ;;  %v14749_v28 = vpack.c.bf16 %v12846_v31, %v12834_v32  ;;  %v13050_v51 = vld [vmem:[%s12166_s14 + $0xf40] sm:$0xff]  ;;  %v13067_v31 = vld [vmem:[%s12166_s14 + $0x1010] sm:$0xff] }
 0x143   :  { %10425 = vmatpush1.bf16.msra.mxu0 %v14742_v43  ;;  %10553 = vmatpush1.bf16.msra.mxu1 %v10552_v46  ;;  %v450_v46 = vmul.f32 %v12605_v8, %v12786_v44  ;;  %v446_v43 = vmul.f32 %v12605_v8, %v12773_v12  ;;  %v530_v32 = vmul.f32 %v12611_v10, %v12948_v49 }
 0x144   :  { %14743 = vst [vmem:[#allocation71_spill] sm:$0xff] %v12999_v53  ;;  %v13003_v4 = vpop.permute.xlu1 %564  ;;  %10427 = vmatprep.subr.bf16.mxu0 %v10426_v18  ;;  %10555 = vmatprep.subr.bf16.mxu1 %v10554_v19  ;;  %v13035_v19 = vld [vmem:[%s12166_s14 + $0xf90] sm:$0xff] }
 0x145   :  { %14744 = vst [vmem:[#allocation72_spill] sm:$0xff] %v13003_v4  ;;  %v581_v53 = vadd.f32 %v13003_v4, %v541_v30  ;;  %v582_v2 = vadd.f32 %v13003_v4, %v542_v26  ;;  %v381_v30 = vadd.f32 %v365_v3, %v297_v21  ;;  %v13038_v18 = vld [vmem:[%s12166_s14 + $0xf30] sm:$0xff]  ;;  %v461_v3 = vadd.f32 %v445_v20, %v377_v35  ;;  %v13053_v21 = vld [vmem:[%s12166_s14 + $0xf88] sm:$0xff]  ;;  %v13073_v35 = vld [vmem:[%s12166_s14 + $0x1020] sm:$0xff] }
 0x146   :  { %v466_v14 = vadd.f32 %v450_v46, %v382_v48  ;;  %v440_v20 = vmul.f32 %v12768_v47, %v12580_v58  ;;  %v13102_v46 = vld [vmem:[%s12166_s14 + $0x1018] sm:$0xff] }
 0x147   :  { %v13022_v15 = vmax.f32 %v581_v53, 0.0  ;;  %v13024_v26 = vmax.f32 %v582_v2, 0.0  ;;  %10429 = vmatpush1.bf16.msra.mxu0 %v14747_v57  ;;  %10557 = vmatpush1.bf16.msra.mxu1 %v14748_v42  ;;  %v13041_v53 = vld [vmem:[%s12166_s14 + $0xf78] sm:$0xff]  ;;  %v372_v2 = vadd.f32 %v356_v27, %v288_v50  ;;  %v13056_v57 = vld [vmem:[%s12166_s14 + $0xfc8] sm:$0xff]  ;;  %v462_v50 = vadd.f32 %v446_v43, %v378_v17  ;;  %v13085_v43 = vld [vmem:[%s12166_s14 + $0xfc0] sm:$0xff] }
 0x148   :  { %10431 = vmatprep.subr.bf16.mxu0 %v14749_v28  ;;  %10559 = vmatprep.subr.bf16.mxu1 %v14750_v60  ;;  %v529_v27 = vmul.f32 %v12608_v9, %v12948_v49  ;;  %v13088_v42 = vld [vmem:[%s12166_s14 + $0x1008] sm:$0xff]  ;;  %v13091_v28 = vld [vmem:[%s12166_s14 + $0xfd0] sm:$0xff]  ;;  %v13105_v4 = vld [vmem:[%s12166_s14 + $0x1058] sm:$0xff] }
 0x149   :  { %14745 = vst [vmem:[#allocation73_spill] sm:$0xff] %v13022_v15  ;;  %14746 = vst [vmem:[#allocation74_spill] sm:$0xff] %v13024_v26  ;;  %1255 = vmatprep.mubr.f32.mxu0 %v13024_v26  ;;  %1433 = vmatprep.mubr.f32.mxu1 %v13024_v26  ;;  %v13064_v29 = vpop.permute.xlu1 %482  ;;  %v465_v26 = vadd.f32 %v449_v0, %v381_v30  ;;  %v13108_v49 = vld [vmem:[%s12166_s14 + $0x10a0] sm:$0xff]  ;;  %v456_v8 = vadd.f32 %v440_v20, %v372_v2 }
 0x14a   :  { %14751 = vst [vmem:[#allocation75_spill] sm:$0xff] %v13064_v29  ;;  %v534_v48 = vmul.f32 %v12611_v10, %v13064_v29  ;;  %1256 = vmatmul.mubr.f32.gmra.mrb[2].mxu0 %v13022_v15  ;;  %v533_v60 = vmul.f32 %v12608_v9, %v13064_v29  ;;  %v14752_v10 = vpack.c.bf16 %v12866_v36, %v12863_v6  ;;  %v14754_v6 = vld [vmem:[#allocation63_spill] sm:$0xff]  ;;  %v14756_v36 = vld [vmem:[#allocation65_spill] sm:$0xff]  ;;  %v14758_v9 = vld [vmem:[#allocation66_spill] sm:$0xff] }
 0x14b   :  { %1434 = vmatmul.mubr.f32.gmra.mrb[2].mxu1 %v13022_v15  ;;  %v524_v0 = vmul.f32 %v12837_v33, %v14753_v7  ;;  %v14757_v30 = vpack.c.bf16 %v12886_v5, %v14756_v36  ;;  %v14759_v15 = vpack.c.bf16 %v12904_v39, %v14758_v9  ;;  %v545_v2 = vadd.f32 %v529_v27, %v461_v3  ;;  %v13138_v3 = vld [vmem:[%s12166_s14 + $0x10b0] sm:$0xff]  ;;  %v13144_v27 = vld [vmem:[%s12166_s14 + $0x1098] sm:$0xff]  ;;  %v13154_v39 = vld [vmem:[%s12166_s14 + $0x1060] sm:$0xff] }
 0x14c   :  { %10433 = vmatpush1.bf16.msra.mxu0 %v14752_v10  ;;  %v14755_v10 = vpack.c.bf16 %v12880_v16, %v14754_v6  ;;  %v550_v17 = vadd.f32 %v534_v48, %v466_v14  ;;  %v546_v20 = vadd.f32 %v530_v32, %v462_v50  ;;  %v13126_v6 = vld [vmem:[%s12166_s14 + $0x1068] sm:$0xff]  ;;  %v13141_v50 = vld [vmem:[%s12166_s14 + $0x1050] sm:$0xff]  ;;  %14763 = vst [vmem:[#allocation65_spill] sm:$0xff] %v13144_v27  ;;  %v14764_v32 = vld [vmem:[#allocation61_spill] sm:$0xff] }
 0x14d   :  { %10435 = vmatprep.subr.bf16.mxu0 %v14757_v30  ;;  %14762 = vst [vmem:[#allocation63_spill] sm:$0xff] %v13141_v50  ;;  %v439_v48 = vmul.f32 %v14764_v32, %v12580_v58  ;;  %v14765_v30 = vpack.c.bf16 %v12910_v45, %v12907_v41  ;;  %14766 = vst [vmem:[#allocation66_spill] sm:$0xff] %v13154_v39  ;;  %v13157_v9 = vld [vmem:[%s12166_s14 + $0x10a8] sm:$0xff]  ;;  %v540_v16 = vadd.f32 %v524_v0, %v456_v8  ;;  %v14768_v29 = vld [vmem:[#allocation55_spill] sm:$0xff] }
 0x14e   :  { %10561 = vmatpush1.bf16.msra.mxu1 %v14755_v10  ;;  %v13128_v5 = vpop.permute.xlu1 %569  ;;  %v14761_v10 = vld [vmem:[#allocation64_spill] sm:$0xff]  ;;  %14767 = vst [vmem:[#allocation61_spill] sm:$0xff] %v13157_v9  ;;  %v360_v58 = vmul.f32 %v12771_v59, %v14768_v29  ;;  %v14772_v41 = vpack.c.bf16 %v12936_v22, %v12927_v24  ;;  %v13170_v45 = vld [vmem:[%s12166_s14 + $0x10e8] sm:$0xff]  ;;  %v13184_v22 = vld [vmem:[%s12166_s14 + $0x1130] sm:$0xff] }
 0x14f   :  { %10563 = vmatprep.subr.bf16.mxu1 %v14759_v15  ;;  %14760 = vst [vmem:[#allocation50_spill] sm:$0xff] %v13128_v5  ;;  %v590_v14 = vadd.f32 %v14761_v10, %v550_v17  ;;  %v585_v17 = vadd.f32 %v13128_v5, %v545_v2  ;;  %v586_v36 = vadd.f32 %v13128_v5, %v546_v20  ;;  %v14770_v20 = vld [vmem:[#allocation67_spill] sm:$0xff]  ;;  %v13187_v0 = vld [vmem:[%s12166_s14 + $0x10f8] sm:$0xff]  ;;  %v13205_v24 = vld [vmem:[%s12166_s14 + $0x1128] sm:$0xff] }
 0x150   :  { %10437 = vmatpush1.bf16.msra.mxu0 %v14765_v30  ;;  %v549_v15 = vadd.f32 %v533_v60, %v465_v26  ;;  %v292_v2 = vmul.f32 %v12745_v38, %v14769_v61  ;;  %v14771_v5 = vpack.c.bf16 %v12924_v40, %v14770_v20  ;;  %v14775_v60 = vpack.c.bf16 %v12942_v25, %v12939_v37  ;;  %v14777_v37 = vld [vmem:[#allocation62_spill] sm:$0xff]  ;;  %v13208_v40 = vld [vmem:[%s12166_s14 + $0x10f0] sm:$0xff]  ;;  %v13223_v39 = vld [vmem:[%s12166_s14 + $0x1178] sm:$0xff] }
 0x151   :  { %10439 = vmatprep.subr.bf16.mxu0 %v14772_v41  ;;  %v13172_v8 = vmax.f32 %v585_v17, 0.0  ;;  %v13174_v26 = vmax.f32 %v586_v36, 0.0  ;;  %v14776_v17 = vld [vmem:[#allocation51_spill] sm:$0xff]  ;;  %v523_v25 = vmul.f32 %v14777_v37, %v14753_v7  ;;  %v13195_v30 = vmax.f32 %v590_v14, 0.0  ;;  %v13220_v41 = vld [vmem:[%s12166_s14 + $0x1138] sm:$0xff]  ;;  %v13226_v9 = vld [vmem:[%s12166_s14 + $0x11c0] sm:$0xff] }
 0x152   :  { %10565 = vmatpush1.bf16.msra.mxu1 %v14771_v5  ;;  %v13190_v5 = vld [vmem:[%s12166_s14 + $0x1140] sm:$0xff]  ;;  %v455_v36 = vadd.f32 %v439_v48, %v14776_v17  ;;  %v13197_v20 = vpop.permute.xlu1 %3019  ;;  %v291_v7 = vmul.f32 %v12590_v63, %v14769_v61  ;;  %v589_v14 = vadd.f32 %v14761_v10, %v549_v15  ;;  %14781 = vst [vmem:[#allocation51_spill] sm:$0xff] %v13223_v39  ;;  %14782 = vst [vmem:[#allocation62_spill] sm:$0xff] %v13226_v9  ;;  %v14784_v27 = vld [vmem:[#allocation58_spill] sm:$0xff] }
 0x153   :  { %14773 = vst [vmem:[#allocation55_spill] sm:$0xff] %v13172_v8  ;;  %14774 = vst [vmem:[#allocation52_spill] sm:$0xff] %v13174_v26  ;;  %10567 = vmatprep.subr.bf16.mxu1 %v14775_v60  ;;  %v13202_v60 = vld [vmem:[%s12166_s14 + $0x10e0] sm:$0xff]  ;;  %1261 = vmatprep.mubr.f32.mxu0 %v13174_v26  ;;  %v444_v61 = vmul.f32 %v12768_v47, %v14784_v27  ;;  %v376_v15 = vadd.f32 %v360_v58, %v292_v2  ;;  %v13250_v58 = vld [vmem:[%s12166_s14 + $0x1170] sm:$0xff] }
 0x154   :  { %14778 = vst [vmem:[#allocation67_spill] sm:$0xff] %v13197_v20  ;;  %v14779_v48 = vld [vmem:[#allocation45_spill] sm:$0xff]  ;;  %v14780_v20 = vpack.c.bf16 %v12976_v62, %v12973_v56  ;;  %v14785_v62 = vpack.c.bf16 %v12989_v23, %v12979_v1  ;;  %1439 = vmatprep.mubr.f32.mxu1 %v13174_v26  ;;  %v13236_v56 = vld [vmem:[%s12166_s14 + $0x1188] sm:$0xff]  ;;  %1262 = vmatmul.mubr.f32.gmra.mrb[4].mxu0 %v13172_v8  ;;  %v13253_v2 = vld [vmem:[%s12166_s14 + $0x11b8] sm:$0xff] }
 0x155   :  { %v359_v17 = vmul.f32 %v14779_v48, %v14768_v29  ;;  %v14783_v29 = vld [vmem:[#allocation53_spill] sm:$0xff]  ;;  %1440 = vmatmul.mubr.f32.gmra.mrb[4].mxu1 %v13172_v8  ;;  %1267 = vmatprep.mubr.f32.mxu0 %v13195_v30  ;;  %v14786_v8 = vpack.c.bf16 %v12995_v52, %v12992_v11  ;;  %v13269_v10 = vld [vmem:[%s12166_s14 + $0x11c8] sm:$0xff]  ;;  %v13276_v52 = vmax.f32 %v589_v14, 0.0  ;;  %v13285_v1 = vld [vmem:[%s12166_s14 + $0x70] sm:$0xff]  ;;  %v14790_v14 = vpack.c.bf16 %v13041_v53, %v13038_v18 }
 0x156   :  { %10441 = vmatpush1.bf16.msra.mxu0 %v14780_v20  ;;  %v580_v50 = vadd.f32 %v14783_v29, %v540_v16  ;;  %10569 = vmatpush1.bf16.msra.mxu1 %v14785_v62  ;;  %v13239_v20 = vld [vmem:[%s12166_s14 + $0x11d0] sm:$0xff]  ;;  %v539_v62 = vadd.f32 %v523_v25, %v455_v36  ;;  %v13259_v16 = vpop.permute.xlu1 %3024  ;;  %v13266_v26 = vld [vmem:[%s12166_s14 + $0x1180] sm:$0xff]  ;;  %v13272_v36 = vld [vmem:[%s12166_s14 + $0x28] sm:$0xff]  ;;  %v443_v25 = vmul.f32 %v14764_v32, %v14784_v27 }
 0x157   :  { %10443 = vmatprep.subr.bf16.mxu0 %v14786_v8  ;;  %14787 = vst [vmem:[#allocation45_spill] sm:$0xff] %v13259_v16  ;;  %v375_v11 = vadd.f32 %v359_v17, %v291_v7  ;;  %1445 = vmatprep.mubr.f32.mxu1 %v13195_v30  ;;  %v14788_v8 = vpack.c.bf16 %v13035_v19, %v13020_v13  ;;  %v13288_v16 = vld [vmem:[%s12166_s14 + $0x38] sm:$0xff]  ;;  %v13291_v39 = vld [vmem:[%s12166_s14 + $0x80] sm:$0xff]  ;;  %v14789_v17 = vld [vmem:[#allocation59_spill] sm:$0xff] }
 0x158   :  { %v13293_v9 = vmax.f32 %v580_v50, 0.0  ;;  %v460_v27 = vadd.f32 %v444_v61, %v376_v15  ;;  %v528_v7 = vmul.f32 %v12837_v33, %v14789_v17  ;;  %v14791_v19 = vpack.c.bf16 %v13053_v21, %v13050_v51  ;;  %v14793_v50 = vld [vmem:[#allocation54_spill] sm:$0xff]  ;;  %1268 = vmatmul.mubr.f32.gmra.mrb[6].mxu0 %v13276_v52  ;;  %v14811_v13 = vld [vmem:[#allocation44_spill] sm:$0xff] }
 0x159   :  { %10571 = vmatprep.subr.bf16.mxu1 %v14788_v8  ;;  %v14792_v8 = vld [vmem:[#allocation60_spill] sm:$0xff]  ;;  %v296_v61 = vmul.f32 %v12745_v38, %v14793_v50  ;;  %1446 = vmatmul.mubr.f32.gmra.mrb[6].mxu1 %v13276_v52  ;;  %v13314_v53 = vadd.f32 %v14783_v29, %v539_v62  ;;  %v14794_v51 = vpack.c.bf16 %v13067_v31, %v13056_v57 }
 0x15a   :  { %10445 = vmatpush1.bf16.msra.mxu0 %v14790_v14  ;;  %10573 = vmatpush1.bf16.msra.mxu1 %v14791_v19  ;;  %v364_v23 = vmul.f32 %v12771_v59, %v14792_v8  ;;  %v13320_v21 = vpop.permute.xlu1 %3034  ;;  %v295_v19 = vmul.f32 %v12590_v63, %v14793_v50  ;;  %v13328_v18 = vadd.f32 %v443_v25, %v375_v11  ;;  %v14802_v50 = vld [vmem:[#allocation42_spill] sm:$0xff] }
 0x15b   :  { %10447 = vmatprep.subr.bf16.mxu0 %v14794_v51  ;;  %1338 = vmatprep.mubr.f32.mxu0 %v13293_v9  ;;  %v527_v29 = vmul.f32 %v14777_v37, %v14789_v17  ;;  %v14795_v57 = vpack.c.bf16 %v13073_v35, %v13070_v34  ;;  %v363_v31 = vmul.f32 %v14779_v48, %v14792_v8  ;;  %v3149_v17 = vpop.permute.xlu0 %3148 }
 0x15c   :  { %1516 = vmatprep.mubr.f32.mxu1 %v13293_v9  ;;  %v544_v62 = vadd.f32 %v528_v7, %v460_v27  ;;  %v367_v51 = vmul.f32 %v14779_v48, %v12689_v54  ;;  %v14796_v25 = vpack.c.bf16 %v13088_v42, %v13085_v43  ;;  %v14797_v11 = vpack.c.bf16 %v13102_v46, %v13091_v28  ;;  %v14800_v28 = vld [vmem:[#allocation41_spill] sm:$0xff] }
 0x15d   :  { %10575 = vmatprep.subr.bf16.mxu1 %v14795_v57  ;;  %v380_v34 = vadd.f32 %v364_v23, %v296_v61  ;;  %v300_v35 = vmul.f32 %v12745_v38, %v12877_v55  ;;  %v368_v8 = vmul.f32 %v12771_v59, %v12689_v54  ;;  %v14798_v27 = vpack.c.bf16 %v13108_v49, %v13105_v4  ;;  %v14801_v23 = vld [vmem:[#allocation70_spill] sm:$0xff] }
 0x15e   :  { %10449 = vmatpush1.bf16.msra.mxu0 %v14796_v25  ;;  %10577 = vmatpush1.bf16.msra.mxu1 %v14797_v11  ;;  %v14799_v43 = vpack.c.bf16 %v13138_v3, %v13126_v6  ;;  %v448_v46 = vmul.f32 %v12768_v47, %v12773_v12  ;;  %v452_v42 = vmul.f32 %v12768_v47, %v12786_v44  ;;  %v14803_v3 = vld [vmem:[#allocation46_spill] sm:$0xff]  ;;  %v14804_v25 = vld [vmem:[#allocation65_spill] sm:$0xff]  ;;  %v14805_v11 = vld [vmem:[#allocation63_spill] sm:$0xff] }
 0x15f   :  { %10451 = vmatprep.subr.bf16.mxu0 %v14798_v27  ;;  %v3131_v7 = vmul.f32 %v14801_v23, %v14800_v28  ;;  %v3132_v54 = vmul.f32 %v14801_v23, %v14802_v50  ;;  %v299_v49 = vmul.f32 %v12590_v63, %v12877_v55  ;;  %v3134_v4 = vmul.f32 %v14801_v23, %v12745_v38  ;;  %v3137_v6 = vpop.permute.xlu1 %3136  ;;  %v14808_v28 = vld [vmem:[#allocation66_spill] sm:$0xff]  ;;  %v14810_v50 = vld [vmem:[#allocation43_spill] sm:$0xff] }
 0x160   :  { %10579 = vmatprep.subr.bf16.mxu1 %v14799_v43  ;;  %v3151_v61 = vmul.f32 %v3149_v17, %v14803_v3  ;;  %v3153_v57 = vmul.f32 %v3149_v17, %v14764_v32  ;;  %v14806_v27 = vpack.c.bf16 %v14804_v25, %v14805_v11  ;;  %v14807_v43 = vld [vmem:[#allocation61_spill] sm:$0xff]  ;;  %v3139_v15 = vmul.f32 %v3137_v6, %v14810_v50  ;;  %v14814_v11 = vld [vmem:[#allocation47_spill] sm:$0xff] }
 0x161   :  { %v14809_v14 = vpack.c.bf16 %v14807_v43, %v14808_v28  ;;  %v3140_v63 = vmul.f32 %v3137_v6, %v14811_v13  ;;  %v3141_v55 = vmul.f32 %v3137_v6, %v14779_v48  ;;  %v384_v38 = vadd.f32 %v368_v8, %v300_v35  ;;  %v14815_v13 = vld [vmem:[#allocation71_spill] sm:$0xff] }
 0x162   :  { %10453 = vmatpush1.bf16.msra.mxu0 %v14806_v27  ;;  %v3142_v23 = vmul.f32 %v3137_v6, %v12771_v59  ;;  %v14812_v3 = vpack.c.bf16 %v13184_v22, %v13170_v45  ;;  %v14813_v25 = vpack.c.bf16 %v13190_v5, %v13187_v0  ;;  %v3143_v27 = vadd.f32 %v3139_v15, %v3131_v7  ;;  %v14816_v5 = vld [vmem:[#allocation69_spill] sm:$0xff] }
 0x163   :  { %10581 = vmatpush1.bf16.msra.mxu1 %v14809_v14  ;;  %v3152_v14 = vmul.f32 %v3149_v17, %v14814_v11  ;;  %v3145_v43 = vadd.f32 %v3141_v55, %v14815_v13  ;;  %v3154_v48 = vmul.f32 %v3149_v17, %v12768_v47  ;;  %v3144_v35 = vadd.f32 %v3140_v63, %v3132_v54  ;;  %v615_v17 = vld [vmem:[%s12166_s14 + $0x30] sm:$0xff]  ;;  %v14819_v54 = vld [vmem:[#allocation62_spill] sm:$0xff] }
 0x164   :  { %10455 = vmatprep.subr.bf16.mxu0 %v14812_v3  ;;  %10583 = vmatprep.subr.bf16.mxu1 %v14813_v25  ;;  %v379_v59 = vadd.f32 %v363_v31, %v295_v19  ;;  %v447_v45 = vmul.f32 %v14764_v32, %v12773_v12  ;;  %v464_v22 = vadd.f32 %v448_v46, %v380_v34  ;;  %v613_v12 = vld [vmem:[%s12166_s14 + $0x20] sm:$0xff]  ;;  %v622_v31 = vld [vmem:[%s12166_s14 + $0x68] sm:$0xff]  ;;  %v643_v55 = vld [vmem:[%s12166_s14 + $0x110] sm:$0xff]  ;;  %v13436_v3 = vmax.f32 %v13314_v53, 0.0 }
 0x165   :  { %v3146_v0 = vadd.f32 %v3142_v23, %v3134_v4  ;;  %v532_v8 = vmul.f32 %v12837_v33, %v14816_v5  ;;  %v13393_v6 = vadd.f32 %v3151_v61, %v3143_v27  ;;  %v13395_v15 = vadd.f32 %v3153_v57, %v3145_v43  ;;  %v14820_v4 = vld [vmem:[#allocation51_spill] sm:$0xff]  ;;  %v14823_v57 = vld [vmem:[#allocation72_spill] sm:$0xff]  ;;  %v634_v63 = vld [vmem:[%s12166_s14 + $0xc8] sm:$0xff] }
 0x166   :  { %v14817_v47 = vpack.c.bf16 %v13205_v24, %v13202_v60  ;;  %v14818_v19 = vpack.c.bf16 %v13220_v41, %v13208_v40  ;;  %v383_v34 = vadd.f32 %v367_v51, %v299_v49  ;;  %v451_v46 = vmul.f32 %v14764_v32, %v12786_v44  ;;  %v624_v40 = vld [vmem:[%s12166_s14 + $0x78] sm:$0xff]  ;;  %v641_v60 = vld [vmem:[%s12166_s14 + $0x100] sm:$0xff]  ;;  %v14824_v51 = vld [vmem:[#allocation75_spill] sm:$0xff] }
 0x167   :  { %v468_v7 = vadd.f32 %v452_v42, %v384_v38  ;;  %v14821_v61 = vpack.c.bf16 %v14819_v54, %v14820_v4  ;;  %v14822_v24 = vpack.c.bf16 %v13239_v20, %v13236_v56  ;;  %v632_v41 = vld [vmem:[%s12166_s14 + $0xb8] sm:$0xff]  ;;  %v584_v28 = vadd.f32 %v14823_v57, %v544_v62  ;;  %v14829_v27 = vld [vmem:[#allocation50_spill] sm:$0xff]  ;;  %v651_v54 = vld [vmem:[%s12166_s14 + $0x150] sm:$0xff] }
 0x168   :  { %10457 = vmatpush1.bf16.msra.mxu0 %v14817_v47  ;;  %10585 = vmatpush1.bf16.msra.mxu1 %v14818_v19  ;;  %v536_v49 = vmul.f32 %v12837_v33, %v14824_v51  ;;  %v13420_v50 = vadd.f32 %v3152_v14, %v3144_v35  ;;  %v13422_v44 = vadd.f32 %v3154_v48, %v3146_v0  ;;  %v640_v53 = vld [vmem:[%s12166_s14 + $0xf8] sm:$0xff]  ;;  %v633_v35 = vld [vmem:[%s12166_s14 + $0xc0] sm:$0xff] }
 0x169   :  { %10459 = vmatprep.subr.bf16.mxu0 %v14821_v61  ;;  %10587 = vmatprep.subr.bf16.mxu1 %v14822_v24  ;;  %v463_v32 = vadd.f32 %v447_v45, %v379_v59  ;;  %v543_v42 = vadd.f32 %v527_v29, %v13328_v18  ;;  %v531_v56 = vmul.f32 %v14777_v37, %v14816_v5  ;;  %v13449_v14 = vmax.f32 %v584_v28, 0.0  ;;  %v642_v59 = vld [vmem:[%s12166_s14 + $0x108] sm:$0xff]  ;;  %v649_v19 = vld [vmem:[%s12166_s14 + $0x140] sm:$0xff]  ;;  %v660_v4 = vld [vmem:[%s12166_s14 + $0x198] sm:$0xff] }
 0x16a   :  { %v10592_v20 = vpack.c.bf16 %v622_v31, %v613_v12  ;;  %v548_v38 = vadd.f32 %v532_v8, %v464_v22  ;;  %v14825_v62 = vpack.c.bf16 %v13253_v2, %v13250_v58  ;;  %v14826_v23 = vpack.c.bf16 %v13269_v10, %v13266_v26  ;;  %v631_v26 = vld [vmem:[%s12166_s14 + $0xb0] sm:$0xff]  ;;  %v650_v45 = vld [vmem:[%s12166_s14 + $0x148] sm:$0xff]  ;;  %v668_v61 = vld [vmem:[%s12166_s14 + $0x1d8] sm:$0xff] }
 0x16b   :  { %v10720_v18 = vpack.c.bf16 %v624_v40, %v615_v17  ;;  %v10594_v29 = vpack.c.bf16 %v641_v60, %v632_v41  ;;  %v583_v25 = vadd.f32 %v14823_v57, %v543_v42  ;;  %v535_v11 = vmul.f32 %v14777_v37, %v14824_v51  ;;  %v658_v12 = vld [vmem:[%s12166_s14 + $0x188] sm:$0xff]  ;;  %v14830_v17 = vld [vmem:[#allocation64_spill] sm:$0xff]  ;;  %v677_v24 = vld [vmem:[%s12166_s14 + $0x220] sm:$0xff] }
 0x16c   :  { %10461 = vmatpush1.bf16.msra.mxu0 %v14825_v62  ;;  %10589 = vmatpush1.bf16.msra.mxu1 %v14826_v23  ;;  %v467_v58 = vadd.f32 %v451_v46, %v383_v34  ;;  %v14827_v2 = vpack.c.bf16 %v13285_v1, %v13272_v36  ;;  %v14828_v10 = vpack.c.bf16 %v13291_v39, %v13288_v16  ;;  %v659_v39 = vld [vmem:[%s12166_s14 + $0x190] sm:$0xff]  ;;  %v652_v16 = vld [vmem:[%s12166_s14 + $0x158] sm:$0xff]  ;;  %v661_v36 = vld [vmem:[%s12166_s14 + $0x1a0] sm:$0xff] }
 0x16d   :  { %v588_v13 = vadd.f32 %v14829_v27, %v548_v38  ;;  %v552_v43 = vadd.f32 %v536_v49, %v468_v7  ;;  %v10722_v48 = vpack.c.bf16 %v643_v55, %v634_v63  ;;  %v547_v1 = vadd.f32 %v531_v56, %v463_v32  ;;  %v670_v40 = vld [vmem:[%s12166_s14 + $0x1e8] sm:$0xff]  ;;  %v679_v41 = vld [vmem:[%s12166_s14 + $0x230] sm:$0xff]  ;;  %v676_v32 = vld [vmem:[%s12166_s14 + $0x218] sm:$0xff] }
 0x16e   :  { %10591 = vmatprep.subr.bf16.mxu0 %v14827_v2  ;;  %10719 = vmatprep.subr.bf16.mxu1 %v14828_v10  ;;  %v10596_v22 = vpack.c.bf16 %v640_v53, %v631_v26  ;;  %v13462_v0 = vmax.f32 %v583_v25, 0.0  ;;  %v551_v8 = vadd.f32 %v535_v11, %v467_v58  ;;  %v10724_v47 = vpack.c.bf16 %v642_v59, %v633_v35  ;;  %v667_v49 = vld [vmem:[%s12166_s14 + $0x1d0] sm:$0xff]  ;;  %v669_v63 = vld [vmem:[%s12166_s14 + $0x1e0] sm:$0xff]  ;;  %v678_v55 = vld [vmem:[%s12166_s14 + $0x228] sm:$0xff] }
 0x16f   :  { %1339 = vmatmul.mubr.f32.vlgmr.msra.gmra.mrb[0].mxu0 %v13436_v3  ;;  %1517 = vmatmul.mubr.f32.vlgmr.msra.gmra.mrb[0].mxu1 %v13436_v3  ;;  %v587_v5 = vadd.f32 %v14829_v27, %v547_v1  ;;  %v13467_v31 = vmax.f32 %v588_v13, 0.0  ;;  %v592_v34 = vadd.f32 %v14830_v17, %v552_v43  ;;  %v10598_v46 = vpack.c.bf16 %v659_v39, %v650_v45  ;;  %v686_v38 = vld [vmem:[%s12166_s14 + $0x268] sm:$0xff]  ;;  %v695_v62 = vld [vmem:[%s12166_s14 + $0x2b0] sm:$0xff]  ;;  %v688_v23 = vld [vmem:[%s12166_s14 + $0x278] sm:$0xff] }
 0x170   :  { %1344 = vmatprep.mubr.f32.mxu0 %v13449_v14  ;;  %1522 = vmatprep.mubr.f32.mxu1 %v13449_v14  ;;  %v10726_v7 = vpack.c.bf16 %v661_v36, %v652_v16  ;;  %v591_v57 = vadd.f32 %v14830_v17, %v551_v8  ;;  %v10600_v28 = vpack.c.bf16 %v658_v12, %v649_v19  ;;  %v685_v58 = vld [vmem:[%s12166_s14 + $0x260] sm:$0xff]  ;;  %v694_v2 = vld [vmem:[%s12166_s14 + $0x2a8] sm:$0xff]  ;;  %v687_v53 = vld [vmem:[%s12166_s14 + $0x270] sm:$0xff] }
 0x171   :  { %10593 = vmatpush1.bf16.msra.mxu0 %v10592_v20  ;;  %10721 = vmatpush1.bf16.msra.mxu1 %v10720_v18  ;;  %v13480_v60 = vmax.f32 %v587_v5, 0.0  ;;  %v10728_v51 = vpack.c.bf16 %v660_v4, %v651_v54  ;;  %v13485_v42 = vmax.f32 %v592_v34, 0.0  ;;  %v10602_v56 = vpack.c.bf16 %v677_v24, %v668_v61  ;;  %v697_v18 = vld [vmem:[%s12166_s14 + $0x2c0] sm:$0xff]  ;;  %v696_v27 = vld [vmem:[%s12166_s14 + $0x2b8] sm:$0xff]  ;;  %v715_v35 = vld [vmem:[%s12166_s14 + $0x350] sm:$0xff] }
 0x172   :  { %10595 = vmatprep.subr.bf16.mxu0 %v10594_v29  ;;  %10723 = vmatprep.subr.bf16.mxu1 %v10722_v48  ;;  %v10730_v20 = vpack.c.bf16 %v679_v41, %v670_v40  ;;  %v13497_v29 = vmax.f32 %v591_v57, 0.0  ;;  %v10604_v25 = vpack.c.bf16 %v676_v32, %v667_v49  ;;  %v10732_v11 = vpack.c.bf16 %v678_v55, %v669_v63  ;;  %v704_v13 = vld [vmem:[%s12166_s14 + $0x2f8] sm:$0xff]  ;;  %v713_v43 = vld [vmem:[%s12166_s14 + $0x340] sm:$0xff]  ;;  %v706_v48 = vld [vmem:[%s12166_s14 + $0x308] sm:$0xff] }
 0x173   :  { %1345 = vmatmul.mubr.f32.gmra.mrb[2].mxu0 %v13462_v0  ;;  %1523 = vmatmul.mubr.f32.gmra.mrb[2].mxu1 %v13462_v0  ;;  %v10606_v10 = vpack.c.bf16 %v695_v62, %v686_v38  ;;  %v10734_v26 = vpack.c.bf16 %v697_v18, %v688_v23  ;;  %v14831_v59 = vld [vmem:[#allocation57_spill] sm:$0xff]  ;;  %v10608_v45 = vpack.c.bf16 %v694_v2, %v685_v58  ;;  %v703_v39 = vld [vmem:[%s12166_s14 + $0x2f0] sm:$0xff]  ;;  %v712_v16 = vld [vmem:[%s12166_s14 + $0x338] sm:$0xff] }
 0x174   :  { %1350 = vmatprep.mubr.f32.mxu0 %v13467_v31  ;;  %1528 = vmatprep.mubr.f32.mxu1 %v13467_v31  ;;  %v10736_v1 = vpack.c.bf16 %v696_v27, %v687_v53  ;;  %v10610_v36 = vpack.c.bf16 %v713_v43, %v704_v13  ;;  %v705_v5 = vld [vmem:[%s12166_s14 + $0x300] sm:$0xff]  ;;  %v714_v8 = vld [vmem:[%s12166_s14 + $0x348] sm:$0xff]  ;;  %v731_v19 = vld [vmem:[%s12166_s14 + $0x3d0] sm:$0xff]  ;;  %v10612_v34 = vpack.c.bf16 %v712_v16, %v703_v39 }
 0x175   :  { %10597 = vmatpush1.bf16.msra.mxu0 %v10596_v22  ;;  %10725 = vmatpush1.bf16.msra.mxu1 %v10724_v47  ;;  %v10738_v22 = vpack.c.bf16 %v715_v35, %v706_v48  ;;  %v722_v47 = vld [vmem:[%s12166_s14 + $0x388] sm:$0xff]  ;;  %v724_v12 = vld [vmem:[%s12166_s14 + $0x398] sm:$0xff]  ;;  %v733_v17 = vld [vmem:[%s12166_s14 + $0x3e0] sm:$0xff] }
 0x176   :  { %10599 = vmatprep.subr.bf16.mxu0 %v10598_v46  ;;  %10727 = vmatprep.subr.bf16.mxu1 %v10726_v7  ;;  %v10740_v46 = vpack.c.bf16 %v714_v8, %v705_v5  ;;  %v721_v7 = vld [vmem:[%s12166_s14 + $0x380] sm:$0xff]  ;;  %v730_v54 = vld [vmem:[%s12166_s14 + $0x3c8] sm:$0xff]  ;;  %v10614_v4 = vpack.c.bf16 %v731_v19, %v722_v47  ;;  %v10742_v61 = vpack.c.bf16 %v733_v17, %v724_v12  ;;  %v723_v24 = vld [vmem:[%s12166_s14 + $0x390] sm:$0xff] }
 0x177   :  { %1351 = vmatmul.mubr.f32.gmra.mrb[4].mxu0 %v13480_v60  ;;  %1529 = vmatmul.mubr.f32.gmra.mrb[4].mxu1 %v13480_v60  ;;  %v732_v40 = vld [vmem:[%s12166_s14 + $0x3d8] sm:$0xff]  ;;  %v749_v57 = vld [vmem:[%s12166_s14 + $0x460] sm:$0xff]  ;;  %v10616_v49 = vpack.c.bf16 %v730_v54, %v721_v7  ;;  %v750_v62 = vld [vmem:[%s12166_s14 + $0x468] sm:$0xff] }
 0x178   :  { %1356 = vmatprep.mubr.f32.mxu0 %v13485_v42  ;;  %1534 = vmatprep.mubr.f32.mxu1 %v13485_v42  ;;  %v740_v41 = vld [vmem:[%s12166_s14 + $0x418] sm:$0xff]  ;;  %v10744_v32 = vpack.c.bf16 %v732_v40, %v723_v24  ;;  %v741_v38 = vld [vmem:[%s12166_s14 + $0x420] sm:$0xff]  ;;  %v758_v23 = vld [vmem:[%s12166_s14 + $0x4a8] sm:$0xff] }
 0x179   :  { %10601 = vmatpush1.bf16.msra.mxu0 %v10600_v28  ;;  %10729 = vmatpush1.bf16.msra.mxu1 %v10728_v51  ;;  %v742_v28 = vld [vmem:[%s12166_s14 + $0x428] sm:$0xff]  ;;  %v751_v51 = vld [vmem:[%s12166_s14 + $0x470] sm:$0xff]  ;;  %v10618_v63 = vpack.c.bf16 %v749_v57, %v740_v41  ;;  %v10748_v2 = vpack.c.bf16 %v750_v62, %v741_v38  ;;  %v768_v43 = vld [vmem:[%s12166_s14 + $0x4f8] sm:$0xff] }
 0x17a   :  { %10603 = vmatprep.subr.bf16.mxu0 %v10602_v56  ;;  %10731 = vmatprep.subr.bf16.mxu1 %v10730_v20  ;;  %v739_v56 = vld [vmem:[%s12166_s14 + $0x410] sm:$0xff]  ;;  %v748_v20 = vld [vmem:[%s12166_s14 + $0x458] sm:$0xff]  ;;  %v10746_v55 = vpack.c.bf16 %v751_v51, %v742_v28  ;;  %v785_v35 = vld [vmem:[%s12166_s14 + $0x580] sm:$0xff] }
 0x17b   :  { %1357 = vmatmul.mubr.f32.gmra.mrb[6].mxu0 %v13497_v29  ;;  %1535 = vmatmul.mubr.f32.gmra.mrb[6].mxu1 %v13497_v29  ;;  %v767_v18 = vld [vmem:[%s12166_s14 + $0x4f0] sm:$0xff]  ;;  %v10620_v58 = vpack.c.bf16 %v748_v20, %v739_v56  ;;  %v776_v48 = vld [vmem:[%s12166_s14 + $0x538] sm:$0xff]  ;;  %v777_v47 = vld [vmem:[%s12166_s14 + $0x540] sm:$0xff] }
 0x17c   :  { %1605 = vmatprep.mubr.f32.mxu0 %v14831_v59  ;;  %1783 = vmatprep.mubr.f32.mxu1 %v14831_v59  ;;  %v10622_v53 = vpack.c.bf16 %v767_v18, %v758_v23  ;;  %v759_v13 = vld [vmem:[%s12166_s14 + $0x4b0] sm:$0xff]  ;;  %v10626_v5 = vpack.c.bf16 %v785_v35, %v776_v48  ;;  %v786_v19 = vld [vmem:[%s12166_s14 + $0x588] sm:$0xff]  ;;  %v804_v57 = vld [vmem:[%s12166_s14 + $0x618] sm:$0xff] }
 0x17d   :  { %10605 = vmatpush1.bf16.msra.mxu0 %v10604_v25  ;;  %10733 = vmatpush1.bf16.msra.mxu1 %v10732_v11  ;;  %v760_v25 = vld [vmem:[%s12166_s14 + $0x4b8] sm:$0xff]  ;;  %v769_v11 = vld [vmem:[%s12166_s14 + $0x500] sm:$0xff]  ;;  %v10752_v16 = vpack.c.bf16 %v768_v43, %v759_v13  ;;  %v794_v12 = vld [vmem:[%s12166_s14 + $0x5c8] sm:$0xff]  ;;  %v10756_v54 = vpack.c.bf16 %v786_v19, %v777_v47 }
 0x17e   :  { %10607 = vmatprep.subr.bf16.mxu0 %v10606_v10  ;;  %10735 = vmatprep.subr.bf16.mxu1 %v10734_v26  ;;  %v757_v10 = vld [vmem:[%s12166_s14 + $0x4a0] sm:$0xff]  ;;  %v766_v26 = vld [vmem:[%s12166_s14 + $0x4e8] sm:$0xff]  ;;  %v10750_v27 = vpack.c.bf16 %v769_v11, %v760_v25  ;;  %v803_v17 = vld [vmem:[%s12166_s14 + $0x610] sm:$0xff] }
 0x17f   :  { %v10624_v39 = vpack.c.bf16 %v766_v26, %v757_v10  ;;  %v10630_v24 = vpack.c.bf16 %v803_v17, %v794_v12  ;;  %v795_v41 = vld [vmem:[%s12166_s14 + $0x5d0] sm:$0xff]  ;;  %v812_v28 = vld [vmem:[%s12166_s14 + $0x658] sm:$0xff]  ;;  %v821_v51 = vld [vmem:[%s12166_s14 + $0x6a0] sm:$0xff] }
 0x180   :  { %v10760_v20 = vpack.c.bf16 %v804_v57, %v795_v41  ;;  %v10634_v38 = vpack.c.bf16 %v821_v51, %v812_v28  ;;  %v813_v23 = vld [vmem:[%s12166_s14 + $0x660] sm:$0xff]  ;;  %v822_v18 = vld [vmem:[%s12166_s14 + $0x6a8] sm:$0xff]  ;;  %v839_v11 = vld [vmem:[%s12166_s14 + $0x730] sm:$0xff] }
 0x181   :  { %10609 = vmatpush1.bf16.msra.mxu0 %v10608_v45  ;;  %10737 = vmatpush1.bf16.msra.mxu1 %v10736_v1  ;;  %v778_v45 = vld [vmem:[%s12166_s14 + $0x548] sm:$0xff]  ;;  %v787_v1 = vld [vmem:[%s12166_s14 + $0x590] sm:$0xff]  ;;  %v10764_v26 = vpack.c.bf16 %v822_v18, %v813_v23  ;;  %v840_v35 = vld [vmem:[%s12166_s14 + $0x738] sm:$0xff] }
 0x182   :  { %10611 = vmatprep.subr.bf16.mxu0 %v10610_v36  ;;  %10739 = vmatprep.subr.bf16.mxu1 %v10738_v22  ;;  %v775_v36 = vld [vmem:[%s12166_s14 + $0x530] sm:$0xff]  ;;  %v784_v22 = vld [vmem:[%s12166_s14 + $0x578] sm:$0xff]  ;;  %v10754_v8 = vpack.c.bf16 %v787_v1, %v778_v45  ;;  %v830_v25 = vld [vmem:[%s12166_s14 + $0x6e8] sm:$0xff] }
 0x183   :  { %v10628_v7 = vpack.c.bf16 %v784_v22, %v775_v36  ;;  %v10638_v13 = vpack.c.bf16 %v839_v11, %v830_v25  ;;  %v831_v48 = vld [vmem:[%s12166_s14 + $0x6f0] sm:$0xff]  ;;  %v848_v45 = vld [vmem:[%s12166_s14 + $0x778] sm:$0xff]  ;;  %v857_v1 = vld [vmem:[%s12166_s14 + $0x7c0] sm:$0xff] }
 0x184   :  { %v10768_v22 = vpack.c.bf16 %v840_v35, %v831_v48  ;;  %v10642_v47 = vpack.c.bf16 %v857_v1, %v848_v45  ;;  %v849_v12 = vld [vmem:[%s12166_s14 + $0x780] sm:$0xff]  ;;  %v858_v17 = vld [vmem:[%s12166_s14 + $0x7c8] sm:$0xff]  ;;  %v867_v28 = vld [vmem:[%s12166_s14 + $0x810] sm:$0xff] }
 0x185   :  { %10613 = vmatpush1.bf16.msra.mxu0 %v10612_v34  ;;  %10741 = vmatpush1.bf16.msra.mxu1 %v10740_v46  ;;  %v796_v34 = vld [vmem:[%s12166_s14 + $0x5d8] sm:$0xff]  ;;  %v805_v46 = vld [vmem:[%s12166_s14 + $0x620] sm:$0xff]  ;;  %v894_v11 = vld [vmem:[%s12166_s14 + $0x8e8] sm:$0xff] }
 0x186   :  { %10615 = vmatprep.subr.bf16.mxu0 %v10614_v4  ;;  %10743 = vmatprep.subr.bf16.mxu1 %v10742_v61  ;;  %v793_v4 = vld [vmem:[%s12166_s14 + $0x5c0] sm:$0xff]  ;;  %v802_v61 = vld [vmem:[%s12166_s14 + $0x608] sm:$0xff]  ;;  %v10758_v40 = vpack.c.bf16 %v805_v46, %v796_v34  ;;  %v875_v46 = vld [vmem:[%s12166_s14 + $0x850] sm:$0xff] }
 0x187   :  { %v10632_v56 = vpack.c.bf16 %v802_v61, %v793_v4  ;;  %v866_v34 = vld [vmem:[%s12166_s14 + $0x808] sm:$0xff]  ;;  %v10772_v61 = vpack.c.bf16 %v858_v17, %v849_v12  ;;  %v876_v51 = vld [vmem:[%s12166_s14 + $0x858] sm:$0xff]  ;;  %v885_v25 = vld [vmem:[%s12166_s14 + $0x8a0] sm:$0xff] }
 0x188   :  { %v10646_v41 = vpack.c.bf16 %v875_v46, %v866_v34  ;;  %v901_v48 = vld [vmem:[%s12166_s14 + $0x920] sm:$0xff]  ;;  %v910_v35 = vld [vmem:[%s12166_s14 + $0x968] sm:$0xff]  ;;  %v903_v45 = vld [vmem:[%s12166_s14 + $0x930] sm:$0xff] }
 0x189   :  { %10617 = vmatpush1.bf16.msra.mxu0 %v10616_v49  ;;  %10745 = vmatpush1.bf16.msra.mxu1 %v10744_v32  ;;  %v814_v49 = vld [vmem:[%s12166_s14 + $0x668] sm:$0xff]  ;;  %v823_v32 = vld [vmem:[%s12166_s14 + $0x6b0] sm:$0xff]  ;;  %v912_v1 = vld [vmem:[%s12166_s14 + $0x978] sm:$0xff] }
 0x18a   :  { %10619 = vmatprep.subr.bf16.mxu0 %v10618_v63  ;;  %10747 = vmatprep.subr.bf16.mxu1 %v10746_v55  ;;  %v811_v63 = vld [vmem:[%s12166_s14 + $0x650] sm:$0xff]  ;;  %v820_v55 = vld [vmem:[%s12166_s14 + $0x698] sm:$0xff]  ;;  %v10762_v62 = vpack.c.bf16 %v823_v32, %v814_v49  ;;  %v893_v32 = vld [vmem:[%s12166_s14 + $0x8e0] sm:$0xff] }
 0x18b   :  { %v10636_v10 = vpack.c.bf16 %v820_v55, %v811_v63  ;;  %v884_v49 = vld [vmem:[%s12166_s14 + $0x898] sm:$0xff]  ;;  %v10776_v55 = vpack.c.bf16 %v876_v51, %v867_v28  ;;  %v921_v34 = vld [vmem:[%s12166_s14 + $0x9c0] sm:$0xff]  ;;  %v930_v46 = vld [vmem:[%s12166_s14 + $0xa08] sm:$0xff] }
 0x18c   :  { %v10650_v23 = vpack.c.bf16 %v893_v32, %v884_v49  ;;  %v937_v28 = vld [vmem:[%s12166_s14 + $0xa40] sm:$0xff]  ;;  %v946_v51 = vld [vmem:[%s12166_s14 + $0xa88] sm:$0xff] }
 0x18d   :  { %10621 = vmatpush1.bf16.msra.mxu0 %v10620_v58  ;;  %10749 = vmatpush1.bf16.msra.mxu1 %v10748_v2  ;;  %v832_v58 = vld [vmem:[%s12166_s14 + $0x6f8] sm:$0xff]  ;;  %v841_v2 = vld [vmem:[%s12166_s14 + $0x740] sm:$0xff] }
 0x18e   :  { %10623 = vmatprep.subr.bf16.mxu0 %v10622_v53  ;;  %10751 = vmatprep.subr.bf16.mxu1 %v10750_v27  ;;  %v829_v53 = vld [vmem:[%s12166_s14 + $0x6e0] sm:$0xff]  ;;  %v838_v27 = vld [vmem:[%s12166_s14 + $0x728] sm:$0xff]  ;;  %v10766_v43 = vpack.c.bf16 %v841_v2, %v832_v58  ;;  %v911_v2 = vld [vmem:[%s12166_s14 + $0x970] sm:$0xff] }
 0x18f   :  { %v10640_v36 = vpack.c.bf16 %v838_v27, %v829_v53  ;;  %v902_v58 = vld [vmem:[%s12166_s14 + $0x928] sm:$0xff]  ;;  %v10780_v27 = vpack.c.bf16 %v894_v11, %v885_v25  ;;  %v10664_v25 = vpack.c.bf16 %v946_v51, %v937_v28 }
 0x190   :  { %v1002_v28 = vld [vmem:[%s12166_s14 + $0xc48] sm:$0xff] }
 0x191   :  { %10625 = vmatpush1.bf16.msra.mxu0 %v10624_v39  ;;  %10753 = vmatpush1.bf16.msra.mxu1 %v10752_v16  ;;  %v850_v39 = vld [vmem:[%s12166_s14 + $0x788] sm:$0xff]  ;;  %v859_v16 = vld [vmem:[%s12166_s14 + $0x7d0] sm:$0xff] }
 0x192   :  { %10627 = vmatprep.subr.bf16.mxu0 %v10626_v5  ;;  %10755 = vmatprep.subr.bf16.mxu1 %v10754_v8  ;;  %v847_v5 = vld [vmem:[%s12166_s14 + $0x770] sm:$0xff]  ;;  %v856_v8 = vld [vmem:[%s12166_s14 + $0x7b8] sm:$0xff]  ;;  %v10770_v19 = vpack.c.bf16 %v859_v16, %v850_v39  ;;  %v929_v16 = vld [vmem:[%s12166_s14 + $0xa00] sm:$0xff] }
 0x193   :  { %v10644_v4 = vpack.c.bf16 %v856_v8, %v847_v5  ;;  %v920_v39 = vld [vmem:[%s12166_s14 + $0x9b8] sm:$0xff]  ;;  %v10656_v5 = vpack.c.bf16 %v910_v35, %v901_v48  ;;  %v10784_v8 = vpack.c.bf16 %v912_v1, %v903_v45  ;;  %v983_v48 = vld [vmem:[%s12166_s14 + $0xbb0] sm:$0xff]  ;;  %v985_v45 = vld [vmem:[%s12166_s14 + $0xbc0] sm:$0xff] }
 0x194   :  { %v10658_v12 = vpack.c.bf16 %v929_v16, %v920_v39  ;;  %v976_v35 = vld [vmem:[%s12166_s14 + $0xb78] sm:$0xff]  ;;  %v973_v16 = vld [vmem:[%s12166_s14 + $0xb60] sm:$0xff]  ;;  %v1010_v51 = vld [vmem:[%s12166_s14 + $0xc88] sm:$0xff] }
 0x195   :  { %10629 = vmatpush1.bf16.msra.mxu0 %v10628_v7  ;;  %10757 = vmatpush1.bf16.msra.mxu1 %v10756_v54  ;;  %v868_v7 = vld [vmem:[%s12166_s14 + $0x818] sm:$0xff]  ;;  %v877_v54 = vld [vmem:[%s12166_s14 + $0x860] sm:$0xff] }
 0x196   :  { %10631 = vmatprep.subr.bf16.mxu0 %v10630_v24  ;;  %10759 = vmatprep.subr.bf16.mxu1 %v10758_v40  ;;  %v865_v24 = vld [vmem:[%s12166_s14 + $0x800] sm:$0xff]  ;;  %v874_v40 = vld [vmem:[%s12166_s14 + $0x848] sm:$0xff]  ;;  %v10774_v57 = vpack.c.bf16 %v877_v54, %v868_v7  ;;  %v14832_v54 = vld [vmem:[#allocation56_spill] sm:$0xff] }
 0x197   :  { %v10648_v63 = vpack.c.bf16 %v874_v40, %v865_v24  ;;  %v938_v7 = vld [vmem:[%s12166_s14 + $0xa48] sm:$0xff]  ;;  %v949_v24 = vld [vmem:[%s12166_s14 + $0xaa0] sm:$0xff] }
 0x198   :  { %v14833_v40 = vld [vmem:[#allocation74_spill] sm:$0xff] }
 0x199   :  { %10633 = vmatpush1.bf16.msra.mxu0 %v10632_v56  ;;  %10761 = vmatpush1.bf16.msra.mxu1 %v10760_v20  ;;  %v886_v56 = vld [vmem:[%s12166_s14 + $0x8a8] sm:$0xff]  ;;  %v895_v20 = vld [vmem:[%s12166_s14 + $0x8f0] sm:$0xff] }
 0x19a   :  { %10635 = vmatprep.subr.bf16.mxu0 %v10634_v38  ;;  %10763 = vmatprep.subr.bf16.mxu1 %v10762_v62  ;;  %v883_v38 = vld [vmem:[%s12166_s14 + $0x890] sm:$0xff]  ;;  %v892_v62 = vld [vmem:[%s12166_s14 + $0x8d8] sm:$0xff]  ;;  %v10778_v18 = vpack.c.bf16 %v895_v20, %v886_v56 }
 0x19b   :  { %v10652_v53 = vpack.c.bf16 %v892_v62, %v883_v38  ;;  %v939_v56 = vld [vmem:[%s12166_s14 + $0xa50] sm:$0xff]  ;;  %v948_v20 = vld [vmem:[%s12166_s14 + $0xa98] sm:$0xff]  ;;  %v965_v38 = vld [vmem:[%s12166_s14 + $0xb20] sm:$0xff] }
 0x19c   :  { %v958_v62 = vld [vmem:[%s12166_s14 + $0xae8] sm:$0xff]  ;;  %v10792_v11 = vpack.c.bf16 %v948_v20, %v939_v56  ;;  %v1021_v56 = vld [vmem:[%s12166_s14 + $0xce0] sm:$0xff] }
 0x19d   :  { %10637 = vmatpush1.bf16.msra.mxu0 %v10636_v10  ;;  %10765 = vmatpush1.bf16.msra.mxu1 %v10764_v26  ;;  %v904_v10 = vld [vmem:[%s12166_s14 + $0x938] sm:$0xff]  ;;  %v913_v26 = vld [vmem:[%s12166_s14 + $0x980] sm:$0xff] }
 0x19e   :  { %10639 = vmatprep.subr.bf16.mxu0 %v10638_v13  ;;  %10767 = vmatprep.subr.bf16.mxu1 %v10766_v43  ;;  %v10654_v13 = vpack.c.bf16 %v911_v2, %v902_v58  ;;  %v10782_v43 = vpack.c.bf16 %v913_v26, %v904_v10  ;;  %v955_v58 = vld [vmem:[%s12166_s14 + $0xad0] sm:$0xff]  ;;  %v964_v2 = vld [vmem:[%s12166_s14 + $0xb18] sm:$0xff] }
 0x19f   :  { %v10668_v1 = vpack.c.bf16 %v964_v2, %v955_v58  ;;  %v1020_v58 = vld [vmem:[%s12166_s14 + $0xcd8] sm:$0xff] }
 0x1a0   :  { %v1028_v2 = vld [vmem:[%s12166_s14 + $0xd18] sm:$0xff] }
 0x1a1   :  { %10641 = vmatpush1.bf16.msra.mxu0 %v10640_v36  ;;  %10769 = vmatpush1.bf16.msra.mxu1 %v10768_v22  ;;  %v922_v36 = vld [vmem:[%s12166_s14 + $0x9c8] sm:$0xff]  ;;  %v931_v22 = vld [vmem:[%s12166_s14 + $0xa10] sm:$0xff] }
 0x1a2   :  { %10643 = vmatprep.subr.bf16.mxu0 %v10642_v47  ;;  %10771 = vmatprep.subr.bf16.mxu1 %v10770_v19  ;;  %v919_v47 = vld [vmem:[%s12166_s14 + $0x9b0] sm:$0xff]  ;;  %v928_v19 = vld [vmem:[%s12166_s14 + $0x9f8] sm:$0xff]  ;;  %v10786_v17 = vpack.c.bf16 %v931_v22, %v922_v36  ;;  %v982_v36 = vld [vmem:[%s12166_s14 + $0xba8] sm:$0xff] }
 0x1a3   :  { %v975_v22 = vld [vmem:[%s12166_s14 + $0xb70] sm:$0xff] }
 0x1a5   :  { %10645 = vmatpush1.bf16.msra.mxu0 %v10644_v4  ;;  %10773 = vmatpush1.bf16.msra.mxu1 %v10772_v61  ;;  %v947_v4 = vld [vmem:[%s12166_s14 + $0xa90] sm:$0xff]  ;;  %v940_v61 = vld [vmem:[%s12166_s14 + $0xa58] sm:$0xff] }
 0x1a6   :  { %10647 = vmatprep.subr.bf16.mxu0 %v10646_v41  ;;  %10775 = vmatprep.subr.bf16.mxu1 %v10774_v57  ;;  %v10660_v41 = vpack.c.bf16 %v928_v19, %v919_v47  ;;  %v10788_v57 = vpack.c.bf16 %v930_v46, %v921_v34  ;;  %v10662_v49 = vpack.c.bf16 %v947_v4, %v938_v7  ;;  %v984_v47 = vld [vmem:[%s12166_s14 + $0xbb8] sm:$0xff]  ;;  %v1003_v34 = vld [vmem:[%s12166_s14 + $0xc50] sm:$0xff] }
 0x1a7   :  { %v10790_v32 = vpack.c.bf16 %v949_v24, %v940_v61  ;;  %v992_v19 = vld [vmem:[%s12166_s14 + $0xbf8] sm:$0xff]  ;;  %v10672_v46 = vpack.c.bf16 %v982_v36, %v973_v16  ;;  %v10800_v7 = vpack.c.bf16 %v984_v47, %v975_v22  ;;  %v991_v61 = vld [vmem:[%s12166_s14 + $0xbf0] sm:$0xff]  ;;  %v1038_v16 = vld [vmem:[%s12166_s14 + $0xd68] sm:$0xff] }
 0x1a8   :  { %v1000_v24 = vld [vmem:[%s12166_s14 + $0xc38] sm:$0xff]  ;;  %v1046_v36 = vld [vmem:[%s12166_s14 + $0xda8] sm:$0xff]  ;;  %v1055_v22 = vld [vmem:[%s12166_s14 + $0xdf0] sm:$0xff] }
 0x1a9   :  { %10649 = vmatpush1.bf16.msra.mxu0 %v10648_v63  ;;  %10777 = vmatpush1.bf16.msra.mxu1 %v10776_v55  ;;  %v956_v63 = vld [vmem:[%s12166_s14 + $0xad8] sm:$0xff]  ;;  %v14834_v55 = vld [vmem:[#allocation73_spill] sm:$0xff]  ;;  %v10676_v20 = vpack.c.bf16 %v1000_v24, %v991_v61 }
 0x1aa   :  { %10651 = vmatprep.subr.bf16.mxu0 %v10650_v23  ;;  %10779 = vmatprep.subr.bf16.mxu1 %v10778_v18  ;;  %v967_v23 = vld [vmem:[%s12166_s14 + $0xb30] sm:$0xff]  ;;  %v14835_v18 = vld [vmem:[#allocation52_spill] sm:$0xff]  ;;  %v10666_v10 = vpack.c.bf16 %v965_v38, %v956_v63  ;;  %v1073_v24 = vld [vmem:[%s12166_s14 + $0xe80] sm:$0xff] }
 0x1ab   :  { %v10794_v26 = vpack.c.bf16 %v967_v23, %v958_v62  ;;  %v1009_v62 = vld [vmem:[%s12166_s14 + $0xc80] sm:$0xff]  ;;  %v1018_v23 = vld [vmem:[%s12166_s14 + $0xcc8] sm:$0xff]  ;;  %v1064_v61 = vld [vmem:[%s12166_s14 + $0xe38] sm:$0xff] }
 0x1ad   :  { %10653 = vmatpush1.bf16.msra.mxu0 %v10652_v53  ;;  %10781 = vmatpush1.bf16.msra.mxu1 %v10780_v27  ;;  %v957_v53 = vld [vmem:[%s12166_s14 + $0xae0] sm:$0xff]  ;;  %v966_v27 = vld [vmem:[%s12166_s14 + $0xb28] sm:$0xff] }
 0x1ae   :  { %10655 = vmatprep.subr.bf16.mxu0 %v10654_v13  ;;  %10783 = vmatprep.subr.bf16.mxu1 %v10782_v43  ;;  %v974_v13 = vld [vmem:[%s12166_s14 + $0xb68] sm:$0xff]  ;;  %v14836_v43 = vld [vmem:[#allocation55_spill] sm:$0xff]  ;;  %v10796_v39 = vpack.c.bf16 %v966_v27, %v957_v53  ;;  %v10680_v27 = vpack.c.bf16 %v1018_v23, %v1009_v62 }
 0x1af   :  { %v1039_v53 = vld [vmem:[%s12166_s14 + $0xd70] sm:$0xff]  ;;  %v1082_v62 = vld [vmem:[%s12166_s14 + $0xec8] sm:$0xff] }
 0x1b0   :  { %1606 = vmatmul.mubr.f32.vlgmr.msra.gmra.mrb[8].mxu0 %v14832_v54  ;;  %1784 = vmatmul.mubr.f32.vlgmr.msra.gmra.mrb[8].mxu1 %v14832_v54  ;;  %v1091_v23 = vld [vmem:[%s12166_s14 + $0xf10] sm:$0xff] }
 0x1b1   :  { %1611 = vmatprep.mubr.f32.mxu0 %v14833_v40  ;;  %10657 = vmatpush1.bf16.msra.mxu0 %v10656_v5  ;;  %v10670_v5 = vpack.c.bf16 %v983_v48, %v974_v13 }
 0x1b2   :  { %1789 = vmatprep.mubr.f32.mxu1 %v14833_v40  ;;  %10785 = vmatpush1.bf16.msra.mxu1 %v10784_v8  ;;  %v10798_v8 = vpack.c.bf16 %v985_v45, %v976_v35  ;;  %v1027_v35 = vld [vmem:[%s12166_s14 + $0xd10] sm:$0xff]  ;;  %v1036_v45 = vld [vmem:[%s12166_s14 + $0xd58] sm:$0xff] }
 0x1b3   :  { %10659 = vmatprep.subr.bf16.mxu0 %v10658_v12  ;;  %10787 = vmatprep.subr.bf16.mxu1 %v10786_v17  ;;  %v1001_v12 = vld [vmem:[%s12166_s14 + $0xc40] sm:$0xff]  ;;  %v994_v17 = vld [vmem:[%s12166_s14 + $0xc08] sm:$0xff]  ;;  %v10684_v47 = vpack.c.bf16 %v1036_v45, %v1027_v35  ;;  %v1100_v35 = vld [vmem:[%s12166_s14 + $0xf58] sm:$0xff] }
 0x1b4   :  { %1612 = vmatmul.mubr.f32.gmra.mrb[10].mxu0 %v14834_v55  ;;  %1790 = vmatmul.mubr.f32.gmra.mrb[10].mxu1 %v14834_v55  ;;  %v10674_v4 = vpack.c.bf16 %v1001_v12, %v992_v19  ;;  %v10686_v12 = vpack.c.bf16 %v1055_v22, %v1046_v36  ;;  %v1109_v45 = vld [vmem:[%s12166_s14 + $0xfa0] sm:$0xff] }
 0x1b5   :  { %1617 = vmatprep.mubr.f32.mxu0 %v14835_v18  ;;  %10661 = vmatpush1.bf16.msra.mxu0 %v10660_v41  ;;  %v993_v41 = vld [vmem:[%s12166_s14 + $0xc00] sm:$0xff]  ;;  %v10698_v22 = vpack.c.bf16 %v1109_v45, %v1100_v35 }
 0x1b6   :  { %1795 = vmatprep.mubr.f32.mxu1 %v14835_v18  ;;  %10789 = vmatpush1.bf16.msra.mxu1 %v10788_v57  ;;  %v10802_v57 = vpack.c.bf16 %v1003_v34, %v994_v17  ;;  %v10804_v63 = vpack.c.bf16 %v1002_v28, %v993_v41  ;;  %v1045_v17 = vld [vmem:[%s12166_s14 + $0xda0] sm:$0xff]  ;;  %v1054_v34 = vld [vmem:[%s12166_s14 + $0xde8] sm:$0xff] }
 0x1b7   :  { %10663 = vmatprep.subr.bf16.mxu0 %v10662_v49  ;;  %10791 = vmatprep.subr.bf16.mxu1 %v10790_v32  ;;  %v1019_v49 = vld [vmem:[%s12166_s14 + $0xcd0] sm:$0xff]  ;;  %v1012_v32 = vld [vmem:[%s12166_s14 + $0xc98] sm:$0xff]  ;;  %v1066_v41 = vld [vmem:[%s12166_s14 + $0xe48] sm:$0xff]  ;;  %v10688_v28 = vpack.c.bf16 %v1054_v34, %v1045_v17 }
 0x1b8   :  { %1618 = vmatmul.mubr.f32.gmra.mrb[12].mxu0 %v14836_v43  ;;  %1796 = vmatmul.mubr.f32.gmra.mrb[12].mxu1 %v14836_v43  ;;  %v10678_v38 = vpack.c.bf16 %v1019_v49, %v1010_v51  ;;  %v10690_v49 = vpack.c.bf16 %v1073_v24, %v1064_v61  ;;  %v1118_v17 = vld [vmem:[%s12166_s14 + $0xfe8] sm:$0xff]  ;;  %v1127_v34 = vld [vmem:[%s12166_s14 + $0x1030] sm:$0xff] }
 0x1b9   :  { %1623 = vmatprep.mubr.f32.mxu0 %v13195_v30  ;;  %10665 = vmatpush1.bf16.msra.mxu0 %v10664_v25  ;;  %v1011_v25 = vld [vmem:[%s12166_s14 + $0xc90] sm:$0xff]  ;;  %v10702_v24 = vpack.c.bf16 %v1127_v34, %v1118_v17 }
 0x1ba   :  { %1801 = vmatprep.mubr.f32.mxu1 %v13195_v30  ;;  %10793 = vmatpush1.bf16.msra.mxu1 %v10792_v11  ;;  %v10806_v11 = vpack.c.bf16 %v1021_v56, %v1012_v32  ;;  %v10808_v13 = vpack.c.bf16 %v1020_v58, %v1011_v25  ;;  %v1063_v32 = vld [vmem:[%s12166_s14 + $0xe30] sm:$0xff]  ;;  %v1072_v56 = vld [vmem:[%s12166_s14 + $0xe78] sm:$0xff] }
 0x1bb   :  { %10667 = vmatprep.subr.bf16.mxu0 %v10666_v10  ;;  %10795 = vmatprep.subr.bf16.mxu1 %v10794_v26  ;;  %v1037_v10 = vld [vmem:[%s12166_s14 + $0xd60] sm:$0xff]  ;;  %v1030_v26 = vld [vmem:[%s12166_s14 + $0xd28] sm:$0xff]  ;;  %v1084_v25 = vld [vmem:[%s12166_s14 + $0xed8] sm:$0xff]  ;;  %v10692_v58 = vpack.c.bf16 %v1072_v56, %v1063_v32 }
 0x1bc   :  { %1624 = vmatmul.mubr.f32.gmra.mrb[14].mxu0 %v13276_v52  ;;  %1802 = vmatmul.mubr.f32.gmra.mrb[14].mxu1 %v13276_v52  ;;  %v10682_v48 = vpack.c.bf16 %v1037_v10, %v1028_v2  ;;  %v10694_v10 = vpack.c.bf16 %v1091_v23, %v1082_v62  ;;  %v1136_v32 = vld [vmem:[%s12166_s14 + $0x1078] sm:$0xff]  ;;  %v1145_v56 = vld [vmem:[%s12166_s14 + $0x10c0] sm:$0xff] }
 0x1bd   :  { %10669 = vmatpush1.bf16.msra.mxu0 %v10668_v1  ;;  %1694 = vmatprep.mubr.f32.mxu0 %v13293_v9  ;;  %v1029_v1 = vld [vmem:[%s12166_s14 + $0xd20] sm:$0xff]  ;;  %v10706_v23 = vpack.c.bf16 %v1145_v56, %v1136_v32 }
 0x1be   :  { %10797 = vmatpush1.bf16.msra.mxu1 %v10796_v39  ;;  %1872 = vmatprep.mubr.f32.mxu1 %v13293_v9  ;;  %v10810_v39 = vpack.c.bf16 %v1039_v53, %v1030_v26  ;;  %v10812_v19 = vpack.c.bf16 %v1038_v16, %v1029_v1  ;;  %v1081_v26 = vld [vmem:[%s12166_s14 + $0xec0] sm:$0xff]  ;;  %v1090_v53 = vld [vmem:[%s12166_s14 + $0xf08] sm:$0xff] }
 0x1bf   :  { %10671 = vmatprep.subr.bf16.mxu0 %v10670_v5  ;;  %10799 = vmatprep.subr.bf16.mxu1 %v10798_v8  ;;  %v1048_v5 = vld [vmem:[%s12166_s14 + $0xdb8] sm:$0xff]  ;;  %v1057_v8 = vld [vmem:[%s12166_s14 + $0xe00] sm:$0xff]  ;;  %v1102_v1 = vld [vmem:[%s12166_s14 + $0xf68] sm:$0xff]  ;;  %v10696_v16 = vpack.c.bf16 %v1090_v53, %v1081_v26 }
 0x1c0   :  { %v1154_v26 = vld [vmem:[%s12166_s14 + $0x1108] sm:$0xff]  ;;  %v1163_v53 = vld [vmem:[%s12166_s14 + $0x1150] sm:$0xff] }
 0x1c1   :  { %10673 = vmatpush1.bf16.msra.mxu0 %v10672_v46  ;;  %v1047_v46 = vld [vmem:[%s12166_s14 + $0xdb0] sm:$0xff]  ;;  %v10710_v45 = vpack.c.bf16 %v1163_v53, %v1154_v26 }
 0x1c2   :  { %10801 = vmatpush1.bf16.msra.mxu1 %v10800_v7  ;;  %10675 = vmatprep.subr.bf16.mxu0 %v10674_v4  ;;  %v10814_v7 = vpack.c.bf16 %v1057_v8, %v1048_v5  ;;  %v1056_v4 = vld [vmem:[%s12166_s14 + $0xdf8] sm:$0xff]  ;;  %v1099_v5 = vld [vmem:[%s12166_s14 + $0xf50] sm:$0xff] }
 0x1c3   :  { %10803 = vmatprep.subr.bf16.mxu1 %v10802_v57  ;;  %v1075_v57 = vld [vmem:[%s12166_s14 + $0xe90] sm:$0xff]  ;;  %v10816_v51 = vpack.c.bf16 %v1056_v4, %v1047_v46  ;;  %v1108_v8 = vld [vmem:[%s12166_s14 + $0xf98] sm:$0xff] }
 0x1c4   :  { %v1120_v46 = vld [vmem:[%s12166_s14 + $0xff8] sm:$0xff]  ;;  %v10700_v4 = vpack.c.bf16 %v1108_v8, %v1099_v5  ;;  %v1181_v8 = vld [vmem:[%s12166_s14 + $0x11e0] sm:$0xff] }
 0x1c5   :  { %10677 = vmatpush1.bf16.msra.mxu0 %v10676_v20  ;;  %v1065_v20 = vld [vmem:[%s12166_s14 + $0xe40] sm:$0xff]  ;;  %v1172_v5 = vld [vmem:[%s12166_s14 + $0x1198] sm:$0xff] }
 0x1c6   :  { %10805 = vmatpush1.bf16.msra.mxu1 %v10804_v63  ;;  %10679 = vmatprep.subr.bf16.mxu0 %v10678_v38  ;;  %v10818_v63 = vpack.c.bf16 %v1075_v57, %v1066_v41  ;;  %v1074_v38 = vld [vmem:[%s12166_s14 + $0xe88] sm:$0xff]  ;;  %v1117_v41 = vld [vmem:[%s12166_s14 + $0xfe0] sm:$0xff]  ;;  %v10714_v34 = vpack.c.bf16 %v1181_v8, %v1172_v5 }
 0x1c7   :  { %10807 = vmatprep.subr.bf16.mxu1 %v10806_v11  ;;  %v1093_v11 = vld [vmem:[%s12166_s14 + $0xf20] sm:$0xff]  ;;  %v10820_v2 = vpack.c.bf16 %v1074_v38, %v1065_v20  ;;  %v1126_v57 = vld [vmem:[%s12166_s14 + $0x1028] sm:$0xff] }
 0x1c8   :  { %v1138_v20 = vld [vmem:[%s12166_s14 + $0x1088] sm:$0xff]  ;;  %v10704_v38 = vpack.c.bf16 %v1126_v57, %v1117_v41  ;;  %v761_v41 = vld [vmem:[%s12166_s14 + $0x4c0] sm:$0xff] }
 0x1c9   :  { %10681 = vmatpush1.bf16.msra.mxu0 %v10680_v27  ;;  %v1083_v27 = vld [vmem:[%s12166_s14 + $0xed0] sm:$0xff]  ;;  %v770_v57 = vld [vmem:[%s12166_s14 + $0x508] sm:$0xff] }
 0x1ca   :  { %10809 = vmatpush1.bf16.msra.mxu1 %v10808_v13  ;;  %10683 = vmatprep.subr.bf16.mxu0 %v10682_v48  ;;  %v10822_v13 = vpack.c.bf16 %v1093_v11, %v1084_v25  ;;  %v1092_v48 = vld [vmem:[%s12166_s14 + $0xf18] sm:$0xff]  ;;  %v1135_v25 = vld [vmem:[%s12166_s14 + $0x1070] sm:$0xff]  ;;  %v10846_v56 = vpack.c.bf16 %v770_v57, %v761_v41 }
 0x1cb   :  { %10811 = vmatprep.subr.bf16.mxu1 %v10810_v39  ;;  %v1111_v39 = vld [vmem:[%s12166_s14 + $0xfb0] sm:$0xff]  ;;  %v10824_v36 = vpack.c.bf16 %v1092_v48, %v1083_v27  ;;  %v1144_v11 = vld [vmem:[%s12166_s14 + $0x10b8] sm:$0xff] }
 0x1cc   :  { %v1156_v27 = vld [vmem:[%s12166_s14 + $0x1118] sm:$0xff]  ;;  %v10708_v48 = vpack.c.bf16 %v1144_v11, %v1135_v25  ;;  %v779_v25 = vld [vmem:[%s12166_s14 + $0x550] sm:$0xff] }
 0x1cd   :  { %10685 = vmatpush1.bf16.msra.mxu0 %v10684_v47  ;;  %v1101_v47 = vld [vmem:[%s12166_s14 + $0xf60] sm:$0xff]  ;;  %v788_v11 = vld [vmem:[%s12166_s14 + $0x598] sm:$0xff] }
 0x1ce   :  { %10813 = vmatpush1.bf16.msra.mxu1 %v10812_v19  ;;  %10687 = vmatprep.subr.bf16.mxu0 %v10686_v12  ;;  %v10826_v19 = vpack.c.bf16 %v1111_v39, %v1102_v1  ;;  %v1110_v12 = vld [vmem:[%s12166_s14 + $0xfa8] sm:$0xff]  ;;  %v1153_v1 = vld [vmem:[%s12166_s14 + $0x1100] sm:$0xff]  ;;  %v10850_v53 = vpack.c.bf16 %v788_v11, %v779_v25 }
 0x1cf   :  { %10815 = vmatprep.subr.bf16.mxu1 %v10814_v7  ;;  %v1129_v7 = vld [vmem:[%s12166_s14 + $0x1040] sm:$0xff]  ;;  %v10828_v61 = vpack.c.bf16 %v1110_v12, %v1101_v47  ;;  %v1162_v39 = vld [vmem:[%s12166_s14 + $0x1148] sm:$0xff] }
 0x1d0   :  { %v1174_v47 = vld [vmem:[%s12166_s14 + $0x11a8] sm:$0xff]  ;;  %v10712_v12 = vpack.c.bf16 %v1162_v39, %v1153_v1  ;;  %v797_v1 = vld [vmem:[%s12166_s14 + $0x5e0] sm:$0xff] }
 0x1d1   :  { %10689 = vmatpush1.bf16.msra.mxu0 %v10688_v28  ;;  %v1119_v28 = vld [vmem:[%s12166_s14 + $0xff0] sm:$0xff]  ;;  %v806_v39 = vld [vmem:[%s12166_s14 + $0x628] sm:$0xff] }
 0x1d2   :  { %10817 = vmatpush1.bf16.msra.mxu1 %v10816_v51  ;;  %10691 = vmatprep.subr.bf16.mxu0 %v10690_v49  ;;  %v10830_v51 = vpack.c.bf16 %v1129_v7, %v1120_v46  ;;  %v1128_v49 = vld [vmem:[%s12166_s14 + $0x1038] sm:$0xff]  ;;  %v1171_v46 = vld [vmem:[%s12166_s14 + $0x1190] sm:$0xff]  ;;  %v10854_v8 = vpack.c.bf16 %v806_v39, %v797_v1 }
 0x1d3   :  { %10819 = vmatprep.subr.bf16.mxu1 %v10818_v63  ;;  %v1147_v63 = vld [vmem:[%s12166_s14 + $0x10d0] sm:$0xff]  ;;  %v10832_v62 = vpack.c.bf16 %v1128_v49, %v1119_v28  ;;  %v1180_v7 = vld [vmem:[%s12166_s14 + $0x11d8] sm:$0xff]  ;;  %v1049_v28 = vld [vmem:[%s12166_s14 + $0xdc0] sm:$0xff] }
 0x1d4   :  { %v10716_v49 = vpack.c.bf16 %v1180_v7, %v1171_v46  ;;  %v815_v46 = vld [vmem:[%s12166_s14 + $0x670] sm:$0xff]  ;;  %v824_v7 = vld [vmem:[%s12166_s14 + $0x6b8] sm:$0xff] }
 0x1d5   :  { %10693 = vmatpush1.bf16.msra.mxu0 %v10692_v58  ;;  %v1137_v58 = vld [vmem:[%s12166_s14 + $0x1080] sm:$0xff]  ;;  %v10858_v57 = vpack.c.bf16 %v824_v7, %v815_v46  ;;  %v734_v7 = vld [vmem:[%s12166_s14 + $0x3e8] sm:$0xff] }
 0x1d6   :  { %10821 = vmatpush1.bf16.msra.mxu1 %v10820_v2  ;;  %10695 = vmatprep.subr.bf16.mxu0 %v10694_v10  ;;  %v10834_v2 = vpack.c.bf16 %v1147_v63, %v1138_v20  ;;  %v1146_v10 = vld [vmem:[%s12166_s14 + $0x10c8] sm:$0xff]  ;;  %v617_v63 = vld [vmem:[%s12166_s14 + $0x40] sm:$0xff] }
 0x1d7   :  { %10823 = vmatprep.subr.bf16.mxu1 %v10822_v13  ;;  %v1165_v13 = vld [vmem:[%s12166_s14 + $0x1160] sm:$0xff]  ;;  %v10836_v35 = vpack.c.bf16 %v1146_v10, %v1137_v58  ;;  %v1067_v58 = vld [vmem:[%s12166_s14 + $0xe50] sm:$0xff] }
 0x1d8   :  { %v725_v46 = vld [vmem:[%s12166_s14 + $0x3a0] sm:$0xff] }
 0x1d9   :  { %10697 = vmatpush1.bf16.msra.mxu0 %v10696_v16  ;;  %v1155_v16 = vld [vmem:[%s12166_s14 + $0x1110] sm:$0xff] }
 0x1da   :  { %10825 = vmatpush1.bf16.msra.mxu1 %v10824_v36  ;;  %10699 = vmatprep.subr.bf16.mxu0 %v10698_v22  ;;  %v10838_v36 = vpack.c.bf16 %v1165_v13, %v1156_v27  ;;  %v1164_v22 = vld [vmem:[%s12166_s14 + $0x1158] sm:$0xff]  ;;  %v635_v27 = vld [vmem:[%s12166_s14 + $0xd0] sm:$0xff] }
 0x1db   :  { %10827 = vmatprep.subr.bf16.mxu1 %v10826_v19  ;;  %v1183_v19 = vld [vmem:[%s12166_s14 + $0x11f0] sm:$0xff]  ;;  %v10840_v17 = vpack.c.bf16 %v1164_v22, %v1155_v16  ;;  %v644_v13 = vld [vmem:[%s12166_s14 + $0x118] sm:$0xff]  ;;  %v1085_v16 = vld [vmem:[%s12166_s14 + $0xee0] sm:$0xff] }
 0x1dc   :  { %v10852_v22 = vpack.c.bf16 %v644_v13, %v635_v27  ;;  %v851_v27 = vld [vmem:[%s12166_s14 + $0x790] sm:$0xff]  ;;  %v860_v13 = vld [vmem:[%s12166_s14 + $0x7d8] sm:$0xff] }
 0x1dd   :  { %10701 = vmatpush1.bf16.msra.mxu0 %v10700_v4  ;;  %v1173_v4 = vld [vmem:[%s12166_s14 + $0x11a0] sm:$0xff]  ;;  %v10866_v39 = vpack.c.bf16 %v860_v13, %v851_v27 }
 0x1de   :  { %10829 = vmatpush1.bf16.msra.mxu1 %v10828_v61  ;;  %10703 = vmatprep.subr.bf16.mxu0 %v10702_v24  ;;  %v10842_v61 = vpack.c.bf16 %v1183_v19, %v1174_v47  ;;  %v1182_v24 = vld [vmem:[%s12166_s14 + $0x11e8] sm:$0xff]  ;;  %v653_v47 = vld [vmem:[%s12166_s14 + $0x160] sm:$0xff] }
 0x1df   :  { %10831 = vmatprep.subr.bf16.mxu1 %v10830_v51  ;;  %v1058_v51 = vld [vmem:[%s12166_s14 + $0xe08] sm:$0xff]  ;;  %v10844_v32 = vpack.c.bf16 %v1182_v24, %v1173_v4  ;;  %v1103_v4 = vld [vmem:[%s12166_s14 + $0xf70] sm:$0xff] }
 0x1e0   :  { %v10878_v20 = vpack.c.bf16 %v1058_v51, %v1049_v28  ;;  %v662_v19 = vld [vmem:[%s12166_s14 + $0x1a8] sm:$0xff]  ;;  %v671_v28 = vld [vmem:[%s12166_s14 + $0x1f0] sm:$0xff]  ;;  %v680_v51 = vld [vmem:[%s12166_s14 + $0x238] sm:$0xff] }
 0x1e1   :  { %10705 = vmatpush1.bf16.msra.mxu0 %v10704_v38  ;;  %v626_v38 = vld [vmem:[%s12166_s14 + $0x88] sm:$0xff]  ;;  %v10856_v24 = vpack.c.bf16 %v662_v19, %v653_v47 }
 0x1e2   :  { %10833 = vmatpush1.bf16.msra.mxu1 %v10832_v62  ;;  %10707 = vmatprep.subr.bf16.mxu0 %v10706_v23  ;;  %v905_v62 = vld [vmem:[%s12166_s14 + $0x940] sm:$0xff]  ;;  %v914_v23 = vld [vmem:[%s12166_s14 + $0x988] sm:$0xff]  ;;  %v10848_v10 = vpack.c.bf16 %v626_v38, %v617_v63 }
 0x1e3   :  { %10835 = vmatprep.subr.bf16.mxu1 %v10834_v2  ;;  %v1076_v2 = vld [vmem:[%s12166_s14 + $0xe98] sm:$0xff]  ;;  %v10880_v26 = vpack.c.bf16 %v914_v23, %v905_v62  ;;  %v842_v63 = vld [vmem:[%s12166_s14 + $0x748] sm:$0xff]  ;;  %v1121_v38 = vld [vmem:[%s12166_s14 + $0x1000] sm:$0xff]  ;;  %v10860_v23 = vpack.c.bf16 %v680_v51, %v671_v28 }
 0x1e4   :  { %v1130_v62 = vld [vmem:[%s12166_s14 + $0x1048] sm:$0xff]  ;;  %v1175_v28 = vld [vmem:[%s12166_s14 + $0x11b0] sm:$0xff]  ;;  %v1184_v51 = vld [vmem:[%s12166_s14 + $0x11f8] sm:$0xff] }
 0x1e5   :  { %10709 = vmatpush1.bf16.msra.mxu0 %v10708_v48  ;;  %v923_v48 = vld [vmem:[%s12166_s14 + $0x9d0] sm:$0xff]  ;;  %v878_v47 = vld [vmem:[%s12166_s14 + $0x868] sm:$0xff] }
 0x1e6   :  { %10837 = vmatpush1.bf16.msra.mxu1 %v10836_v35  ;;  %10711 = vmatprep.subr.bf16.mxu0 %v10710_v45  ;;  %v10882_v35 = vpack.c.bf16 %v1076_v2, %v1067_v58  ;;  %v932_v45 = vld [vmem:[%s12166_s14 + $0xa18] sm:$0xff]  ;;  %v689_v58 = vld [vmem:[%s12166_s14 + $0x280] sm:$0xff]  ;;  %v698_v2 = vld [vmem:[%s12166_s14 + $0x2c8] sm:$0xff] }
 0x1e7   :  { %10839 = vmatprep.subr.bf16.mxu1 %v10838_v36  ;;  %v1094_v36 = vld [vmem:[%s12166_s14 + $0xf28] sm:$0xff]  ;;  %v10884_v5 = vpack.c.bf16 %v932_v45, %v923_v48  ;;  %v1139_v48 = vld [vmem:[%s12166_s14 + $0x1090] sm:$0xff]  ;;  %v10864_v45 = vpack.c.bf16 %v698_v2, %v689_v58 }
 0x1e8   :  { %v1166_v19 = vld [vmem:[%s12166_s14 + $0x1168] sm:$0xff] }
 0x1e9   :  { %10713 = vmatpush1.bf16.msra.mxu0 %v10712_v12  ;;  %v941_v12 = vld [vmem:[%s12166_s14 + $0xa60] sm:$0xff] }
 0x1ea   :  { %10841 = vmatpush1.bf16.msra.mxu1 %v10840_v17  ;;  %10715 = vmatprep.subr.bf16.mxu0 %v10714_v34  ;;  %v10886_v17 = vpack.c.bf16 %v1094_v36, %v1085_v16  ;;  %v950_v34 = vld [vmem:[%s12166_s14 + $0xaa8] sm:$0xff]  ;;  %v707_v16 = vld [vmem:[%s12166_s14 + $0x310] sm:$0xff]  ;;  %v716_v36 = vld [vmem:[%s12166_s14 + $0x358] sm:$0xff] }
 0x1eb   :  { %10843 = vmatprep.subr.bf16.mxu1 %v10842_v61  ;;  %v1112_v61 = vld [vmem:[%s12166_s14 + $0xfb8] sm:$0xff]  ;;  %v10888_v41 = vpack.c.bf16 %v950_v34, %v941_v12  ;;  %v10868_v12 = vpack.c.bf16 %v716_v36, %v707_v16  ;;  %v8359_v16 = vld [vmem:[%s12136_s17 + $0x30] sm:$0xff] }
 0x1ec   :  { %v8360_v36 = vld [vmem:[%s12136_s17 + $0x38] sm:$0xff] }
 0x1ed   :  { %10717 = vmatpush1.bf16.msra.mxu0 %v10716_v49  ;;  %v959_v49 = vld [vmem:[%s12166_s14 + $0xaf0] sm:$0xff] }
 0x1ee   :  { %10845 = vmatpush1.bf16.msra.mxu1 %v10844_v32  ;;  %10847 = vmatprep.subr.bf16.mxu0 %v10846_v56  ;;  %v10890_v32 = vpack.c.bf16 %v1112_v61, %v1103_v4  ;;  %v968_v56 = vld [vmem:[%s12166_s14 + $0xb38] sm:$0xff]  ;;  %v1013_v4 = vld [vmem:[%s12166_s14 + $0xca0] sm:$0xff] }
 0x1ef   :  { %10879 = vmatprep.subr.bf16.mxu1 %v10878_v20  ;;  %v833_v20 = vld [vmem:[%s12166_s14 + $0x700] sm:$0xff]  ;;  %v10892_v25 = vpack.c.bf16 %v968_v56, %v959_v49  ;;  %v10872_v49 = vpack.c.bf16 %v734_v7, %v725_v46  ;;  %v8379_v46 = vld [vmem:[%s12136_s17 + $0x70] sm:$0xff]  ;;  %v8380_v7 = vld [vmem:[%s12136_s17 + $0x78] sm:$0xff] }
 0x1f0   :  { %1695 = vmatmul.mubr.f32.vlgmr.msra.gmra.mrb[8].mxu0 %v13436_v3  ;;  %v10862_v11 = vpack.c.bf16 %v842_v63, %v833_v20  ;;  %v743_v20 = vld [vmem:[%s12166_s14 + $0x430] sm:$0xff]  ;;  %v752_v63 = vld [vmem:[%s12166_s14 + $0x478] sm:$0xff] }
 0x1f1   :  { %1873 = vmatmul.mubr.f32.vlgmr.msra.gmra.mrb[8].mxu1 %v13436_v3  ;;  %1700 = vmatprep.mubr.f32.mxu0 %v13449_v14 }
 0x1f2   :  { %1878 = vmatprep.mubr.f32.mxu1 %v13449_v14  ;;  %10849 = vmatpush3.bf16.msra.mxu0 %v10848_v10  ;;  %v977_v10 = vld [vmem:[%s12166_s14 + $0xb80] sm:$0xff] }
 0x1f3   :  { %10881 = vmatpush3.bf16.msra.mxu1 %v10880_v26  ;;  %10851 = vmatprep.subr.bf16.mxu0 %v10850_v53  ;;  %v10894_v26 = vpack.c.bf16 %v1130_v62, %v1121_v38  ;;  %v986_v53 = vld [vmem:[%s12166_s14 + $0xbc8] sm:$0xff]  ;;  %v10906_v38 = vpack.c.bf16 %v1184_v51, %v1175_v28  ;;  %v1031_v62 = vld [vmem:[%s12166_s14 + $0xd30] sm:$0xff] }
 0x1f4   :  { %1701 = vmatmul.mubr.f32.gmra.mrb[10].mxu0 %v13462_v0  ;;  %10883 = vmatprep.subr.bf16.mxu1 %v10882_v35  ;;  %v1148_v35 = vld [vmem:[%s12166_s14 + $0x10d8] sm:$0xff]  ;;  %v10896_v1 = vpack.c.bf16 %v986_v53, %v977_v10 }
 0x1f5   :  { %1879 = vmatmul.mubr.f32.gmra.mrb[10].mxu1 %v13462_v0  ;;  %1706 = vmatprep.mubr.f32.mxu0 %v13467_v31 }
 0x1f6   :  { %1884 = vmatprep.mubr.f32.mxu1 %v13467_v31  ;;  %10853 = vmatpush3.bf16.msra.mxu0 %v10852_v22  ;;  %v995_v22 = vld [vmem:[%s12166_s14 + $0xc10] sm:$0xff] }
 0x1f7   :  { %10885 = vmatpush3.bf16.msra.mxu1 %v10884_v5  ;;  %10855 = vmatprep.subr.bf16.mxu0 %v10854_v8  ;;  %v1004_v5 = vld [vmem:[%s12166_s14 + $0xc58] sm:$0xff]  ;;  %v869_v8 = vld [vmem:[%s12166_s14 + $0x820] sm:$0xff] }
 0x1f8   :  { %1707 = vmatmul.mubr.f32.gmra.mrb[12].mxu0 %v13480_v60  ;;  %10887 = vmatprep.subr.bf16.mxu1 %v10886_v17  ;;  %v10900_v17 = vpack.c.bf16 %v1004_v5, %v995_v22  ;;  %v10870_v34 = vpack.c.bf16 %v878_v47, %v869_v8  ;;  %v2067_v22 = vld [vmem:[%s12136_s17] sm:$0xff]  ;;  %v2069_v5 = vld [vmem:[%s12136_s17 + $0x10] sm:$0xff]  ;;  %v2070_v8 = vld [vmem:[%s12136_s17 + $0x18] sm:$0xff] }
 0x1f9   :  { %1885 = vmatmul.mubr.f32.gmra.mrb[12].mxu1 %v13480_v60  ;;  %1712 = vmatprep.mubr.f32.mxu0 %v13485_v42  ;;  %v8369_v47 = vld [vmem:[%s12136_s17 + $0x40] sm:$0xff] }
 0x1fa   :  { %1890 = vmatprep.mubr.f32.mxu1 %v13485_v42  ;;  %10857 = vmatpush3.bf16.msra.mxu0 %v10856_v24  ;;  %v1022_v24 = vld [vmem:[%s12166_s14 + $0xce8] sm:$0xff] }
 0x1fb   :  { %10889 = vmatpush3.bf16.msra.mxu1 %v10888_v41  ;;  %10859 = vmatprep.subr.bf16.mxu0 %v10858_v57  ;;  %v887_v41 = vld [vmem:[%s12166_s14 + $0x8b0] sm:$0xff]  ;;  %v896_v57 = vld [vmem:[%s12166_s14 + $0x8f8] sm:$0xff] }
 0x1fc   :  { %1713 = vmatmul.mubr.f32.gmra.mrb[14].mxu0 %v13497_v29  ;;  %10891 = vmatprep.subr.bf16.mxu1 %v10890_v32  ;;  %v10904_v32 = vpack.c.bf16 %v1022_v24, %v1013_v4  ;;  %v10874_v56 = vpack.c.bf16 %v896_v57, %v887_v41  ;;  %v8385_v4 = vld [vmem:[%s12136_s17 + $0x80] sm:$0xff] }
 0x1fd   :  { %1891 = vmatmul.mubr.f32.gmra.mrb[14].mxu1 %v13497_v29  ;;  %1961 = vmatprep.mubr.f32.mxu0 %v14831_v59  ;;  %v10898_v59 = vpack.c.bf16 %v1148_v35, %v1139_v48 }
 0x1fe   :  { %10861 = vmatpush3.bf16.msra.mxu0 %v10860_v23  ;;  %2046 = vmatprep.mubr.f32.mxu1 %v13293_v9  ;;  %v1157_v9 = vld [vmem:[%s12166_s14 + $0x1120] sm:$0xff]  ;;  %v1040_v23 = vld [vmem:[%s12166_s14 + $0xd78] sm:$0xff]  ;;  %s14858_s14 = sld [smem:[#allocation21_spill]] }
 0x1ff   :  { %10893 = vmatpush3.bf16.msra.mxu1 %v10892_v25  ;;  %10863 = vmatprep.subr.bf16.mxu0 %v10862_v11  ;;  %v10902_v61 = vpack.c.bf16 %v1166_v19, %v1157_v9  ;;  %v10876_v25 = vpack.c.bf16 %v752_v63, %v743_v20  ;;  %v10908_v11 = vpack.c.bf16 %v1040_v23, %v1031_v62  ;;  %v8370_v9 = vld [vmem:[%s12136_s17 + $0x48] sm:$0xff]  ;;  %v8371_v19 = vld [vmem:[%s12136_s17 + $0x50] sm:$0xff] }
 0x200   :  { %10895 = vmatprep.subr.bf16.mxu1 %v10894_v26 }
 0x202   :  { %10865 = vmatpush3.bf16.msra.mxu0 %v10864_v45 }
 0x203   :  { %10897 = vmatpush3.bf16.msra.mxu1 %v10896_v1  ;;  %10867 = vmatprep.subr.bf16.mxu0 %v10866_v39  ;;  %v8358_v39 = vld [vmem:[%s12136_s17 + $0x28] sm:$0xff] }
 0x204   :  { %10899 = vmatprep.subr.bf16.mxu1 %v10898_v59  ;;  %v2068_v59 = vld [vmem:[%s12136_s17 + $0x8] sm:$0xff] }
 0x206   :  { %10869 = vmatpush3.bf16.msra.mxu0 %v10868_v12  ;;  %v8372_v12 = vld [vmem:[%s12136_s17 + $0x58] sm:$0xff] }
 0x207   :  { %10901 = vmatpush3.bf16.msra.mxu1 %v10900_v17  ;;  %10871 = vmatprep.subr.bf16.mxu0 %v10870_v34  ;;  %v8377_v17 = vld [vmem:[%s12136_s17 + $0x60] sm:$0xff]  ;;  %v8378_v34 = vld [vmem:[%s12136_s17 + $0x68] sm:$0xff] }
 0x208   :  { %10903 = vmatprep.subr.bf16.mxu1 %v10902_v61 }
 0x20a   :  { %10873 = vmatpush3.bf16.msra.mxu0 %v10872_v49 }
 0x20b   :  { %10905 = vmatpush3.bf16.msra.mxu1 %v10904_v32  ;;  %10875 = vmatprep.subr.bf16.mxu0 %v10874_v56 }
 0x20c   :  { %10907 = vmatprep.subr.bf16.mxu1 %v10906_v38 }
 0x20e   :  { %10877 = vmatpush3.bf16.msra.mxu0 %v10876_v25 }
 0x20f   :  { %10909 = vmatpush3.bf16.msra.mxu1 %v10908_v11 }
 0x211   :  { %1962 = vmatmul.mubr.f32.vlgmr.msra.gmra.mrb[16].mxu0 %v14832_v54 }
 0x212   :  { %2047 = vmatmul.mubr.f32.vlgmr.msra.gmra.mrb[16].mxu1 %v13436_v3  ;;  %1966 = vmatprep.mubr.f32.mxu0 %v14833_v40  ;;  %v8357_v3 = vld [vmem:[%s12136_s17 + $0x20] sm:$0xff] }
 0x213   :  { %2051 = vmatprep.mubr.f32.mxu1 %v13449_v14 }
 0x215   :  { %1967 = vmatmul.mubr.f32.gmra.mrb[18].mxu0 %v14834_v55 }
 0x216   :  { %2052 = vmatmul.mubr.f32.gmra.mrb[18].mxu1 %v13462_v0  ;;  %1971 = vmatprep.mubr.f32.mxu0 %v14835_v18 }
 0x217   :  { %2056 = vmatprep.mubr.f32.mxu1 %v13467_v31 }
 0x219   :  { %1972 = vmatmul.mubr.f32.gmra.mrb[20].mxu0 %v14836_v43 }
 0x21a   :  { %2057 = vmatmul.mubr.f32.gmra.mrb[20].mxu1 %v13480_v60  ;;  %1976 = vmatprep.mubr.f32.mxu0 %v13195_v30 }
 0x21b   :  { %2061 = vmatprep.mubr.f32.mxu1 %v13485_v42 }
 0x21d   :  { %1977 = vmatmul.mubr.f32.gmra.mrb[22].mxu0 %v13276_v52 }
 0x21e   :  { %2062 = vmatmul.mubr.f32.gmra.mrb[22].mxu1 %v13497_v29  ;;  %9406 = vmatprep.mubr.msk.f32.mxu0 %vm2076_vm0, %v8357_v3 }
 0x242   :  { %v1340_v14 = vpop.f32.mrb[0].mxu0  ;;  %v1518_v0 = vpop.f32.mrb[0].mxu1 }
 0x243   :  { %v1342_v54 = vpop.f32.mrb[1].mxu0  ;;  %v1520_v31 = vpop.f32.mrb[1].mxu1 }
 0x246   :  { %v1346_v40 = vpop.f32.mrb[2].mxu0  ;;  %v1524_v55 = vpop.f32.mrb[2].mxu1 }
 0x247   :  { %v10918_v18 = vpack.c.bf16 %v1346_v40, %v1340_v14  ;;  %v10926_v60 = vpack.c.bf16 %v1524_v55, %v1518_v0  ;;  %v1348_v43 = vpop.f32.mrb[3].mxu0  ;;  %v1526_v30 = vpop.f32.mrb[3].mxu1 }
 0x248   :  { %v10910_v58 = vpack.c.bf16 %v1348_v43, %v1342_v54  ;;  %v10934_v42 = vpack.c.bf16 %v1526_v30, %v1520_v31  ;;  %v8387_v43 = vld [vmem:[%s12136_s17 + $0x90] sm:$0xff]  ;;  %v8388_v30 = vld [vmem:[%s12136_s17 + $0x98] sm:$0xff] }
 0x24a   :  { %v1352_v2 = vpop.f32.mrb[4].mxu0  ;;  %v1530_v10 = vpop.f32.mrb[4].mxu1  ;;  %10911 = vmatprep.subr.bf16.mxu0 %v10910_v58 }
 0x24b   :  { %v1354_v52 = vpop.f32.mrb[5].mxu0  ;;  %v1532_v29 = vpop.f32.mrb[5].mxu1  ;;  %10913 = vmatpush3.bf16.msra.mxu0 %v10910_v58  ;;  %v8393_v58 = vld [vmem:[%s12136_s17 + $0xa0] sm:$0xff] }
 0x24e   :  { %v1358_v26 = vpop.f32.mrb[6].mxu0  ;;  %v1536_v53 = vpop.f32.mrb[6].mxu1 }
 0x24f   :  { %v10922_v27 = vpack.c.bf16 %v1358_v26, %v1352_v2  ;;  %v10930_v13 = vpack.c.bf16 %v1536_v53, %v1530_v10  ;;  %v1360_v48 = vpop.f32.mrb[7].mxu0  ;;  %v1538_v35 = vpop.f32.mrb[7].mxu1  ;;  %v8395_v2 = vld [vmem:[%s12136_s17 + $0xb0] sm:$0xff]  ;;  %v8396_v10 = vld [vmem:[%s12136_s17 + $0xb8] sm:$0xff] }
 0x250   :  { %v10914_v45 = vpack.c.bf16 %v1360_v48, %v1354_v52  ;;  %v10938_v1 = vpack.c.bf16 %v1538_v35, %v1532_v29  ;;  %v8401_v52 = vld [vmem:[%s12136_s17 + $0xc0] sm:$0xff]  ;;  %v8402_v29 = vld [vmem:[%s12136_s17 + $0xc8] sm:$0xff]  ;;  %v8403_v53 = vld [vmem:[%s12136_s17 + $0xd0] sm:$0xff] }
 0x252   :  { %10915 = vmatprep.subr.bf16.mxu0 %v10914_v45 }
 0x253   :  { %10917 = vmatpush3.bf16.msra.mxu0 %v10914_v45 }
 0x254   :  { %10919 = vmatprep.subr.bf16.mxu0 %v10918_v18 }
 0x256   :  { %9407 = vmatmul.mubr.msk.f32.vlgmr.msra.gmra.mrb[24].mxu0 %vm2076_vm0, %v8358_v39 }
 0x257   :  { %10921 = vmatpush3.bf16.msra.mxu0 %v10918_v18  ;;  %9409 = vmatprep.mubr.msk.f32.mxu0 %vm2076_vm0, %v8359_v16  ;;  %v8409_v16 = vld [vmem:[%s12136_s17 + $0xe0] sm:$0xff] }
 0x258   :  { %10923 = vmatprep.subr.bf16.mxu0 %v10922_v27 }
 0x25a   :  { %9410 = vmatmul.mubr.msk.f32.gmra.mrb[26].mxu0 %vm2076_vm0, %v8360_v36 }
 0x25b   :  { %10925 = vmatpush3.bf16.msra.mxu0 %v10922_v27  ;;  %9420 = vmatprep.mubr.msk.f32.mxu0 %vm2076_vm0, %v2067_v22 }
 0x25c   :  { %10927 = vmatprep.subr.bf16.mxu0 %v10926_v60 }
 0x25e   :  { %9421 = vmatmul.mubr.msk.f32.vlgmr.msra.gmra.mrb[24].mxu0 %vm2076_vm0, %v2068_v59 }
 0x25f   :  { %10929 = vmatpush3.bf16.msra.mxu0 %v10926_v60  ;;  %9423 = vmatprep.mubr.msk.f32.mxu0 %vm2076_vm0, %v2069_v5  ;;  %v8386_v60 = vld [vmem:[%s12136_s17 + $0x88] sm:$0xff] }
 0x260   :  { %10931 = vmatprep.subr.bf16.mxu0 %v10930_v13 }
 0x262   :  { %9424 = vmatmul.mubr.msk.f32.gmra.mrb[26].mxu0 %vm2076_vm0, %v2070_v8 }
 0x263   :  { %10933 = vmatpush3.bf16.msra.mxu0 %v10930_v13  ;;  %9434 = vmatprep.mubr.msk.f32.mxu0 %vm2076_vm0, %v8369_v47 }
 0x264   :  { %10935 = vmatprep.subr.bf16.mxu0 %v10934_v42 }
 0x266   :  { %9435 = vmatmul.mubr.msk.f32.vlgmr.msra.gmra.mrb[24].mxu0 %vm2076_vm0, %v8370_v9  ;;  %v8410_v9 = vld [vmem:[%s12136_s17 + $0xe8] sm:$0xff] }
 0x267   :  { %10937 = vmatpush3.bf16.msra.mxu0 %v10934_v42  ;;  %9437 = vmatprep.mubr.msk.f32.mxu0 %vm2076_vm0, %v8371_v19  ;;  %v8394_v42 = vld [vmem:[%s12136_s17 + $0xa8] sm:$0xff] }
 0x268   :  { %10939 = vmatprep.subr.bf16.mxu0 %v10938_v1 }
 0x26a   :  { %9438 = vmatmul.mubr.msk.f32.gmra.mrb[26].mxu0 %vm2076_vm0, %v8372_v12  ;;  %v8411_v12 = vld [vmem:[%s12136_s17 + $0xf0] sm:$0xff] }
 0x26b   :  { %10941 = vmatpush3.bf16.msra.mxu0 %v10938_v1  ;;  %9448 = vmatprep.mubr.msk.f32.mxu0 %vm2076_vm0, %v8377_v17  ;;  %v8404_v1 = vld [vmem:[%s12136_s17 + $0xd8] sm:$0xff] }
 0x26e   :  { %9449 = vmatmul.mubr.msk.f32.vlgmr.msra.gmra.mrb[24].mxu0 %vm2076_vm0, %v8378_v34 }
 0x26f   :  { %9451 = vmatprep.mubr.msk.f32.mxu0 %vm2076_vm0, %v8379_v46 }
 0x272   :  { %9452 = vmatmul.mubr.msk.f32.gmra.mrb[26].mxu0 %vm2076_vm0, %v8380_v7 }
 0x273   :  { %9462 = vmatprep.mubr.msk.f32.mxu0 %vm2076_vm0, %v8385_v4 }
 0x2c3   :  { %v1696_v61 = vpop.f32.mrb[8].mxu0 }
 0x2c4   :  { %v1874_v24 = vpop.f32.mrb[8].mxu1  ;;  %v1698_v41 = vpop.f32.mrb[9].mxu0 }
 0x2c5   :  { %v1876_v57 = vpop.f32.mrb[9].mxu1 }
 0x2c7   :  { %v1702_v28 = vpop.f32.mrb[10].mxu0 }
 0x2c8   :  { %v10942_v51 = vpack.c.bf16 %v1702_v28, %v1696_v61  ;;  %v1880_v49 = vpop.f32.mrb[10].mxu1  ;;  %v1704_v32 = vpop.f32.mrb[11].mxu0 }
 0x2c9   :  { %v10958_v56 = vpack.c.bf16 %v1880_v49, %v1874_v24  ;;  %v10950_v20 = vpack.c.bf16 %v1704_v32, %v1698_v41  ;;  %v1882_v63 = vpop.f32.mrb[11].mxu1  ;;  %v8417_v32 = vld [vmem:[%s12136_s17 + $0x100] sm:$0xff] }
 0x2ca   :  { %v10966_v38 = vpack.c.bf16 %v1882_v63, %v1876_v57  ;;  %10943 = vmatprep.subr.bf16.mxu0 %v10942_v51  ;;  %v8412_v57 = vld [vmem:[%s12136_s17 + $0xf8] sm:$0xff] }
 0x2cb   :  { %v1708_v62 = vpop.f32.mrb[12].mxu0  ;;  %10945 = vmatpush3.bf16.msra.mxu0 %v10942_v51 }
 0x2cc   :  { %v1886_v23 = vpop.f32.mrb[12].mxu1  ;;  %v1710_v25 = vpop.f32.mrb[13].mxu0 }
 0x2cd   :  { %v1888_v11 = vpop.f32.mrb[13].mxu1 }
 0x2cf   :  { %v1714_v3 = vpop.f32.mrb[14].mxu0 }
 0x2d0   :  { %v10946_v14 = vpack.c.bf16 %v1714_v3, %v1708_v62  ;;  %v1892_v0 = vpop.f32.mrb[14].mxu1  ;;  %v1716_v54 = vpop.f32.mrb[15].mxu0  ;;  %v12106_v3 = vmov 0.0|0.0  }
 0x2d1   :  { %v10962_v31 = vpack.c.bf16 %v1892_v0, %v1886_v23  ;;  %v10954_v40 = vpack.c.bf16 %v1716_v54, %v1710_v25  ;;  %v1894_v55 = vpop.f32.mrb[15].mxu1  ;;  %v8418_v23 = vld [vmem:[%s12136_s17 + $0x108] sm:$0xff]  ;;  %v8419_v25 = vld [vmem:[%s12136_s17 + $0x110] sm:$0xff]  ;;  %10982 = vmatprep.subr.bf16.mxu1 %v12106_v3  ;;  %v3235_v0 = vld [vmem:[%s12161_s8] sm:$0xf]  ;;  %s14857_s8 = sld [smem:[#allocation19_spill]] }
 0x2d2   :  { %v10970_v18 = vpack.c.bf16 %v1894_v55, %v1888_v11  ;;  %10947 = vmatprep.subr.bf16.mxu0 %v10946_v14  ;;  %v8420_v11 = vld [vmem:[%s12136_s17 + $0x118] sm:$0xff]  ;;  %3238 = vperm.xlu1 %11883, %v3235_v0   ;;  %v3046_v54 = vld [vmem:[%s12151_s29] sm:$0xf]  ;;  %v14839_v55 = vmov 1   ;;  %s14843_s17 = sld [smem:[#allocation17_spill]]  ;;  %v3193_v0 = vld [vmem:[#allocation2 + $0xb0] sm:$0xff] }
 0x2d3   :  { %10949 = vmatpush3.bf16.msra.mxu0 %v10946_v14  ;;  %v12108_v14 = vmov 0.0   ;;  %3049 = vperm.xlu0 %11884, %v3046_v54   ;;  %v3194_v54 = vld [vmem:[#allocation2 + $0xb8] sm:$0xff]  ;;  %s14851_s29 = sld [smem:[#allocation22_spill]] }
 0x2d4   :  { %10951 = vmatprep.subr.bf16.mxu0 %v10950_v20  ;;  %9532 = vmatprep.mubr.msk.f32.mxu1 %vm12107_vm1, %v12108_v14 }
 0x2d6   :  { %9463 = vmatmul.mubr.msk.f32.vlgmr.msra.gmra.mrb[24].mxu0 %vm2076_vm0, %v8386_v60  ;;  %v14841_v60 = vmov 3  }
 0x2d7   :  { %10953 = vmatpush3.bf16.msra.mxu0 %v10950_v20  ;;  %9465 = vmatprep.mubr.msk.f32.mxu0 %vm2076_vm0, %v8387_v43  ;;  %v14842_v43 = vmov 0  }
 0x2d8   :  { %10955 = vmatprep.subr.bf16.mxu0 %v10954_v40 }
 0x2da   :  { %9466 = vmatmul.mubr.msk.f32.gmra.mrb[26].mxu0 %vm2076_vm0, %v8388_v30  ;;  %v3385_v30 = vld [vmem:[%s14837_s9 + $0x10] sm:$0xff] }
 0x2db   :  { %10957 = vmatpush3.bf16.msra.mxu0 %v10954_v40  ;;  %9476 = vmatprep.mubr.msk.f32.mxu0 %vm2076_vm0, %v8393_v58  ;;  %v14838_v40 = vmov 2   ;;  %v3386_v58 = vld [vmem:[%s14837_s9 + $0x18] sm:$0xff] }
 0x2dc   :  { %10959 = vmatprep.subr.bf16.mxu0 %v10958_v56  ;;  %11886 = vset.pattern.permute.xlu0 %v14838_v40 }
 0x2de   :  { %9477 = vmatmul.mubr.msk.f32.vlgmr.msra.gmra.mrb[24].mxu0 %vm2076_vm0, %v8394_v42  ;;  %v3499_v42 = vld [vmem:[%s14840_s13] sm:$0xff] }
 0x2df   :  { %10961 = vmatpush3.bf16.msra.mxu0 %v10958_v56  ;;  %9479 = vmatprep.mubr.msk.f32.mxu0 %vm2076_vm0, %v8395_v2  ;;  %v3500_v2 = vld [vmem:[%s14840_s13 + $0x8] sm:$0xff] }
 0x2e0   :  { %10963 = vmatprep.subr.bf16.mxu0 %v10962_v31 }
 0x2e2   :  { %9480 = vmatmul.mubr.msk.f32.gmra.mrb[26].mxu0 %vm2076_vm0, %v8396_v10  ;;  %v3502_v10 = vld [vmem:[%s14840_s13 + $0x18] sm:$0xff] }
 0x2e3   :  { %10965 = vmatpush3.bf16.msra.mxu0 %v10962_v31  ;;  %9490 = vmatprep.mubr.msk.f32.mxu0 %vm2076_vm0, %v8401_v52  ;;  %v3383_v31 = vld [vmem:[%s14837_s9] sm:$0xff]  ;;  %v5395_v52 = vld [vmem:[%s14843_s17 + $0x10] sm:$0xff] }
 0x2e4   :  { %v8762_v26 = vpop.f32.mrb[16].mxu0  ;;  %10967 = vmatprep.subr.bf16.mxu0 %v10966_v38  ;;  %3389 = vperm.xlu1 %11883, %v3383_v31  }
 0x2e5   :  { %v8806_v27 = vpop.f32.mrb[16].mxu1  ;;  %v8763_v13 = vpop.f32.mrb[17].mxu0  ;;  %3444 = vperm.xlu0 %11886, %v3383_v31  }
 0x2e6   :  { %v8764_v48 = vadd.f32 %v8763_v13, %v8762_v26  ;;  %v8807_v35 = vpop.f32.mrb[17].mxu1  ;;  %9491 = vmatmul.mubr.msk.f32.vlgmr.msra.gmra.mrb[24].mxu0 %vm2076_vm0, %v8402_v29  ;;  %v13930_v29 = vld [vmem:[%s14844_s21] sm:$0xf] }
 0x2e7   :  { %v8808_v45 = vadd.f32 %v8807_v35, %v8806_v27  ;;  %10969 = vmatpush3.bf16.msra.mxu0 %v10966_v38  ;;  %9493 = vmatprep.mubr.msk.f32.mxu0 %vm2076_vm0, %v8403_v53  ;;  %v14845_v53 = vld [vmem:[#allocation45_spill] sm:$0xff] }
 0x2e8   :  { %v8765_v39 = vpop.f32.mrb[18].mxu0  ;;  %10971 = vmatprep.subr.bf16.mxu0 %v10970_v18  ;;  %11885 = vset.pattern.permute.xlu1 %v14839_v55 }
 0x2e9   :  { %v2049_v36 = vadd.f32 %v8808_v45, %v8764_v48  ;;  %v8809_v22 = vpop.f32.mrb[18].mxu1  ;;  %v8766_v59 = vpop.f32.mrb[19].mxu0  ;;  %3416 = vperm.xlu1 %11885, %v3383_v31   ;;  %11889 = vset.pattern.permute.xlu0 %v14841_v60  ;;  %v14846_v48 = vld [vmem:[#allocation67_spill] sm:$0xff] }
 0x2ea   :  { %v8767_v5 = vadd.f32 %v8766_v59, %v8765_v39  ;;  %v8810_v8 = vpop.f32.mrb[19].mxu1  ;;  %9494 = vmatmul.mubr.msk.f32.gmra.mrb[26].mxu0 %vm2076_vm0, %v8404_v1  ;;  %v14847_v59 = vld [vmem:[#allocation68_spill] sm:$0xff] }
 0x2eb   :  { %v8811_v47 = vadd.f32 %v8810_v8, %v8809_v22  ;;  %10973 = vmatpush3.bf16.msra.mxu0 %v10970_v18  ;;  %9504 = vmatprep.mubr.msk.f32.mxu0 %vm2076_vm0, %v8409_v16  ;;  %v3384_v18 = vld [vmem:[%s14837_s9 + $0x8] sm:$0xff]  ;;  %v3187_v8 = vld [vmem:[#allocation2 + $0x80] sm:$0xff] }
 0x2ec   :  { %v8768_v19 = vpop.f32.mrb[20].mxu0  ;;  %3476 = vperm.xlu0 %11889, %v3384_v18  }
 0x2ed   :  { %v2054_v17 = vadd.f32 %v8811_v47, %v8767_v5  ;;  %v8812_v34 = vpop.f32.mrb[20].mxu1  ;;  %v8769_v46 = vpop.f32.mrb[21].mxu0  ;;  %3420 = vperm.xlu1 %11885, %v3384_v18   ;;  %v3188_v47 = vld [vmem:[#allocation2 + $0x88] sm:$0xff] }
 0x2ee   :  { %v8770_v7 = vadd.f32 %v8769_v46, %v8768_v19  ;;  %v8813_v4 = vpop.f32.mrb[21].mxu1  ;;  %9505 = vmatmul.mubr.msk.f32.vlgmr.msra.gmra.mrb[24].mxu0 %vm2076_vm0, %v8410_v9  ;;  %v13942_v9 = vpop.permute.xlu1 %3160 }
 0x2ef   :  { %v8814_v61 = vadd.f32 %v8813_v4, %v8812_v34  ;;  %v10974_v24 = vpack.c.bf16 %v2054_v17, %v2049_v36  ;;  %9507 = vmatprep.mubr.msk.f32.mxu0 %vm2076_vm0, %v8411_v12  ;;  %v10988_v17 = vpack.c.bf16 %v3188_v47, %v3187_v8  ;;  %v3172_v34 = vld [vmem:[#allocation2 + $0x8] sm:$0xff]  ;;  %v3201_v47 = vld [vmem:[#allocation2 + $0xf0] sm:$0xff] }
 0x2f0   :  { %v8771_v41 = vpop.f32.mrb[22].mxu0  ;;  %11890 = vset.pattern.permute.xlu0 %v14842_v43  ;;  %v3184_v8 = vld [vmem:[#allocation2 + $0x68] sm:$0xff] }
 0x2f1   :  { %v2059_v28 = vadd.f32 %v8814_v61, %v8770_v7  ;;  %v8815_v51 = vpop.f32.mrb[22].mxu1  ;;  %10975 = vmatprep.subr.bf16.mxu0 %v10974_v24  ;;  %v8772_v49 = vpop.f32.mrb[23].mxu0  ;;  %3394 = vperm.xlu0 %11890, %v3384_v18   ;;  %v14849_v7 = vld [vmem:[#allocation49_spill] sm:$0xff]  ;;  %v3189_v61 = vld [vmem:[#allocation2 + $0x90] sm:$0xff] }
 0x2f2   :  { %v8773_v56 = vadd.f32 %v8772_v49, %v8771_v41  ;;  %v8816_v20 = vpop.f32.mrb[23].mxu1  ;;  %10977 = vmatpush3.bf16.msra.mxu0 %v10974_v24  ;;  %11887 = vset.pattern.permute.xlu1 %v14838_v40  ;;  %v3164_v4 = vmul.f32 %v13942_v9, %v14849_v7  ;;  %v3190_v24 = vld [vmem:[#allocation2 + $0x98] sm:$0xff]  ;;  %v3501_v41 = vld [vmem:[%s14840_s13 + $0x10] sm:$0xff]  ;;  %v3220_v7 = vld [vmem:[#allocation2 + $0x188] sm:$0xff] }
 0x2f3   :  { %v8817_v63 = vadd.f32 %v8816_v20, %v8815_v51  ;;  %9508 = vmatmul.mubr.msk.f32.gmra.mrb[26].mxu0 %vm2076_vm0, %v8412_v57  ;;  %3448 = vperm.xlu1 %11887, %v3384_v18   ;;  %v3045_v57 = vld [vmem:[%s14848_s25] sm:$0xf]  ;;  %v10992_v51 = vpack.c.bf16 %v3190_v24, %v3189_v61  ;;  %v3173_v49 = vld [vmem:[#allocation2 + $0x10] sm:$0xff]  ;;  %v14850_v61 = vld [vmem:[#allocation48_spill] sm:$0xff] }
 0x2f4   :  { %9518 = vmatprep.mubr.msk.f32.mxu0 %vm2076_vm0, %v8417_v32  ;;  %v3174_v32 = vld [vmem:[#allocation2 + $0x18] sm:$0xff]  ;;  %v3191_v20 = vld [vmem:[#allocation2 + $0xa0] sm:$0xff]  ;;  %v3163_v24 = vmul.f32 %v13942_v9, %v14850_v61 }
 0x2f5   :  { %v2064_v38 = vadd.f32 %v8817_v63, %v8773_v56  ;;  %3399 = vperm.xlu0 %11890, %v3385_v30   ;;  %v3168_v56 = vadd.f32 %v3164_v4, %v13420_v50  ;;  %v3192_v63 = vld [vmem:[#allocation2 + $0xa8] sm:$0xff]  ;;  %v11000_v50 = vpack.c.bf16 %v3194_v54, %v3193_v0  ;;  %v3207_v0 = vld [vmem:[#allocation2 + $0x120] sm:$0xff] }
 0x2f6   :  { %v3208_v54 = vld [vmem:[#allocation2 + $0x128] sm:$0xff]  ;;  %v3535_v61 = vld [vmem:[%s14851_s29] sm:$0xff] }
 0x2f7   :  { %v10978_v62 = vpack.c.bf16 %v2064_v38, %v2059_v28  ;;  %11888 = vset.pattern.permute.xlu1 %v14841_v60  ;;  %v5393_v38 = vld [vmem:[%s14843_s17] sm:$0xff] }
 0x2f8   :  { %3472 = vperm.xlu1 %11888, %v3383_v31   ;;  %v5394_v31 = vld [vmem:[%s14843_s17 + $0x8] sm:$0xff] }
 0x2f9   :  { %10979 = vmatprep.subr.bf16.mxu0 %v10978_v62  ;;  %11894 = vset.pattern.permute.xlu0 %v14839_v55 }
 0x2fa   :  { %10981 = vmatpush3.bf16.msra.mxu0 %v10978_v62  ;;  %3428 = vperm.xlu0 %11894, %v3386_v58   ;;  %v10994_v62 = vpack.c.bf16 %v3174_v32, %v3173_v49  ;;  %v3222_v49 = vld [vmem:[#allocation2 + $0x198] sm:$0xff] }
 0x2fc   :  { %11891 = vset.pattern.permute.xlu1 %v14842_v43 }
 0x2fd   :  { %9519 = vmatmul.mubr.msk.f32.vlgmr.msra.gmra.mrb[24].mxu0 %vm2076_vm0, %v8418_v23  ;;  %3505 = vperm.xlu1 %11891, %v3499_v42   ;;  %v10996_v23 = vpack.c.bf16 %v3192_v63, %v3191_v20  ;;  %v3195_v42 = vld [vmem:[#allocation2 + $0xc0] sm:$0xff]  ;;  %v3205_v63 = vld [vmem:[#allocation2 + $0x110] sm:$0xff] }
 0x2fe   :  { %9521 = vmatprep.mubr.msk.f32.mxu0 %vm2076_vm0, %v8419_v25  ;;  %11896 = vset.pattern.permute.xlu0 %v14841_v60  ;;  %v3175_v25 = vld [vmem:[#allocation2 + $0x20] sm:$0xff] }
 0x2ff   :  { %3480 = vperm.xlu0 %11896, %v3385_v30  }
 0x301   :  { %9522 = vmatmul.mubr.msk.f32.gmra.mrb[26].mxu0 %vm2076_vm0, %v8420_v11  ;;  %3510 = vperm.xlu1 %11891, %v3500_v2   ;;  %v3176_v11 = vld [vmem:[#allocation2 + $0x28] sm:$0xff] }
 0x302   :  { %v10998_v18 = vpack.c.bf16 %v3176_v11, %v3175_v25  ;;  %v3196_v2 = vld [vmem:[#allocation2 + $0xc8] sm:$0xff] }
 0x303   :  { %11899 = vset.pattern.permute.xlu0 %v14842_v43  ;;  %v3224_v25 = vld [vmem:[#allocation2 + $0x1a8] sm:$0xff] }
 0x304   :  { %3520 = vperm.xlu0 %11899, %v3502_v10   ;;  %v5396_v10 = vld [vmem:[%s14843_s17 + $0x18] sm:$0xff] }
 0x305   :  { %11892 = vset.pattern.permute.xlu1 %v14839_v55 }
 0x306   :  { %3424 = vperm.xlu1 %11892, %v3385_v30  }
 0x308   :  { %5409 = vperm.xlu0 %11899, %v5395_v52  }
 0x30a   :  { %11893 = vset.pattern.permute.xlu1 %v14842_v43 }
 0x30b   :  { %3404 = vperm.xlu1 %11893, %v3386_v58  }
 0x30c   :  { %5508 = vperm.xlu0 %11899, %v13930_v29  }
 0x30f   :  { %11895 = vset.pattern.permute.xlu1 %v14838_v40 }
 0x310   :  { %3452 = vperm.xlu1 %11895, %v3385_v30   ;;  %11901 = vset.pattern.permute.xlu0 %v14838_v40  ;;  %v3177_v30 = vld [vmem:[#allocation2 + $0x30] sm:$0xff] }
 0x311   :  { %5519 = vperm.xlu0 %11901, %v13930_v29  }
 0x314   :  { %3456 = vperm.xlu1 %11895, %v3386_v58  }
 0x315   :  { %11904 = vset.pattern.permute.xlu0 %v14842_v43 }
 0x318   :  { %11897 = vset.pattern.permute.xlu1 %v14841_v60 }
 0x319   :  { %3484 = vperm.xlu1 %11897, %v3386_v58   ;;  %v3178_v58 = vld [vmem:[#allocation2 + $0x38] sm:$0xff] }
 0x31a   :  { %v11002_v52 = vpack.c.bf16 %v3178_v58, %v3177_v30  ;;  %v3209_v30 = vld [vmem:[#allocation2 + $0x130] sm:$0xff]  ;;  %v3210_v58 = vld [vmem:[#allocation2 + $0x138] sm:$0xff] }
 0x31d   :  { %11898 = vset.pattern.permute.xlu1 %v14842_v43 }
 0x31e   :  { %3515 = vperm.xlu1 %11898, %v3501_v41  }
 0x322   :  { %5399 = vperm.xlu1 %11898, %v5393_v38   ;;  %v3206_v38 = vld [vmem:[#allocation2 + $0x118] sm:$0xff] }
 0x323   :  { %v11026_v11 = vpack.c.bf16 %v3206_v38, %v3205_v63  ;;  %v3540_v63 = vld [vmem:[%s14851_s29 + $0x28] sm:$0xff] }
 0x326   :  { %5404 = vperm.xlu1 %11898, %v5394_v31   ;;  %v3225_v31 = vld [vmem:[#allocation2 + $0x1b0] sm:$0xff] }
 0x32a   :  { %5414 = vperm.xlu1 %11898, %v5396_v10  }
 0x32e   :  { %11900 = vset.pattern.permute.xlu1 %v14839_v55 }
 0x32f   :  { %5513 = vperm.xlu1 %11900, %v13930_v29  }
 0x333   :  { %11902 = vset.pattern.permute.xlu1 %v14841_v60 }
 0x334   :  { %5525 = vperm.xlu1 %11902, %v13930_v29   ;;  %v3166_v29 = vmul.f32 %v13942_v9, %v12837_v33 }
 0x338   :  { %11903 = vset.pattern.permute.xlu1 %v14842_v43 }
 0x3d0   :  { %v9520_v26 = vpop.f32.mrb[24].mxu0 }
 0x3d1   :  { %v3038_v27 = vadd.f32 %v9520_v26, %v14845_v53  ;;  %v2990_v13 = vpop.f32.mrb[25].mxu0  ;;  %v11004_v26 = vpack.c.bf16 %v3196_v2, %v3195_v42  ;;  %v3179_v53 = vld [vmem:[#allocation2 + $0x40] sm:$0xff]  ;;  %v11034_v2 = vpack.c.bf16 %v3210_v58, %v3209_v30  ;;  %v8440_v58 = vld [vmem:[%s14851_s29 + $0xd0] sm:$0xff] }
 0x3d2   :  { %v3037_v35 = vadd.f32 %v14846_v48, %v2990_v13  ;;  %v3197_v13 = vld [vmem:[#allocation2 + $0xd0] sm:$0xff]  ;;  %v3198_v48 = vld [vmem:[#allocation2 + $0xd8] sm:$0xff]  ;;  %v3227_v42 = vld [vmem:[#allocation2 + $0x1c0] sm:$0xff] }
 0x3d3   :  { %v3042_v45 = vmax.f32 %v3038_v27, 0.0  ;;  %v3180_v27 = vld [vmem:[#allocation2 + $0x48] sm:$0xff] }
 0x3d4   :  { %v3041_v1 = vmax.f32 %v3037_v35, 0.0  ;;  %v9523_v39 = vpop.f32.mrb[26].mxu0  ;;  %v11006_v35 = vpack.c.bf16 %v3180_v27, %v3179_v53  ;;  %v3229_v53 = vld [vmem:[#allocation2 + $0x1d0] sm:$0xff]  ;;  %v3230_v27 = vld [vmem:[#allocation2 + $0x1d8] sm:$0xff] }
 0x3d5   :  { %v3040_v16 = vadd.f32 %v9523_v39, %v13320_v21  ;;  %v3000_v36 = vpop.f32.mrb[27].mxu0  ;;  %v3171_v21 = vld [vmem:[#allocation2] sm:$0xff]  ;;  %v3182_v39 = vld [vmem:[#allocation2 + $0x58] sm:$0xff] }
 0x3d6   :  { %v10983_v22 = vpack.c.bf16 %v3042_v45, %v3041_v1  ;;  %v3039_v5 = vadd.f32 %v14847_v59, %v3000_v36  ;;  %v10990_v28 = vpack.c.bf16 %v3172_v34, %v3171_v21  ;;  %v11008_v45 = vpack.c.bf16 %v3198_v48, %v3197_v13  ;;  %v3181_v1 = vld [vmem:[#allocation2 + $0x50] sm:$0xff]  ;;  %v3200_v36 = vld [vmem:[#allocation2 + $0xe8] sm:$0xff]  ;;  %v3186_v34 = vld [vmem:[#allocation2 + $0x78] sm:$0xff] }
 0x3d7   :  { %v3044_v19 = vmax.f32 %v3040_v16, 0.0  ;;  %v3199_v16 = vld [vmem:[#allocation2 + $0xe0] sm:$0xff]  ;;  %v3185_v21 = vld [vmem:[#allocation2 + $0x70] sm:$0xff]  ;;  %v11040_v48 = vpack.c.bf16 %v3230_v27, %v3229_v53  ;;  %v8443_v53 = vld [vmem:[%s14851_s29 + $0xe8] sm:$0xff] }
 0x3d8   :  { %v3043_v12 = vmax.f32 %v3039_v5, 0.0  ;;  %10984 = vmatpush3.bf16.msra.mxu1 %v10983_v22  ;;  %v11010_v22 = vpack.c.bf16 %v3182_v39, %v3181_v1  ;;  %v11012_v59 = vpack.c.bf16 %v3200_v36, %v3199_v16  ;;  %v3183_v5 = vld [vmem:[#allocation2 + $0x60] sm:$0xff]  ;;  %v11018_v4 = vpack.c.bf16 %v3186_v34, %v3185_v21  ;;  %v3232_v39 = vld [vmem:[#allocation2 + $0x1e8] sm:$0xff] }
 0x3d9   :  { %10985 = vmatprep.subr.bf16.mxu1 %v12106_v3  ;;  %v3231_v1 = vld [vmem:[#allocation2 + $0x1e0] sm:$0xff]  ;;  %v3165_v34 = vmul.f32 %v13942_v9, %v14777_v37  ;;  %v3538_v37 = vld [vmem:[%s14851_s29 + $0x18] sm:$0xff] }
 0x3da   :  { %v10986_v46 = vpack.c.bf16 %v3044_v19, %v3043_v12  ;;  %v3202_v19 = vld [vmem:[#allocation2 + $0xf8] sm:$0xff]  ;;  %v11014_v12 = vpack.c.bf16 %v3184_v8, %v3183_v5  ;;  %v11044_v36 = vpack.c.bf16 %v3232_v39, %v3231_v1  ;;  %v3233_v5 = vld [vmem:[#allocation2 + $0x1f0] sm:$0xff] }
 0x3db   :  { %v3234_v8 = vld [vmem:[#allocation2 + $0x1f8] sm:$0xff] }
 0x3dc   :  { %10987 = vmatpush3.bf16.msra.mxu1 %v10986_v46  ;;  %v3219_v46 = vld [vmem:[#allocation2 + $0x180] sm:$0xff]  ;;  %v8445_v1 = vld [vmem:[%s14851_s29 + $0xf8] sm:$0xff] }
 0x3dd   :  { %10989 = vmatprep.subr.bf16.mxu1 %v10988_v17  ;;  %v11016_v17 = vpack.c.bf16 %v3202_v19, %v3201_v47  ;;  %v11020_v41 = vpack.c.bf16 %v3220_v7, %v3219_v46  ;;  %v11048_v19 = vpack.c.bf16 %v3234_v8, %v3233_v5  ;;  %v3169_v46 = vadd.f32 %v3165_v34, %v13395_v15  ;;  %v8430_v7 = vld [vmem:[%s14851_s29 + $0x80] sm:$0xff]  ;;  %v8459_v5 = vld [vmem:[%s14851_s29 + $0x108] sm:$0xff] }
 0x3de   :  { %v8434_v15 = vld [vmem:[%s14851_s29 + $0xa0] sm:$0xff] }
 0x3df   :  { %9533 = vmatmul.mubr.msk.f32.vlgmr.msra.gmra.mrb[24].mxu1 %vm2076_vm0, %v3045_v57  ;;  %v3203_v57 = vld [vmem:[#allocation2 + $0x100] sm:$0xff] }
 0x3e0   :  { %10991 = vmatpush3.bf16.msra.mxu1 %v10990_v28  ;;  %3305 = vmatprep.mubr.f32.mxu1 %v3168_v56  ;;  %v3204_v28 = vld [vmem:[#allocation2 + $0x108] sm:$0xff]  ;;  %v3167_v56 = vadd.f32 %v3163_v24, %v13393_v6  ;;  %v11030_v6 = vpack.c.bf16 %v3208_v54, %v3207_v0  ;;  %v8438_v54 = vld [vmem:[%s14851_s29 + $0xc0] sm:$0xff] }
 0x3e1   :  { %10993 = vmatprep.subr.bf16.mxu1 %v10992_v51  ;;  %v3221_v51 = vld [vmem:[#allocation2 + $0x190] sm:$0xff]  ;;  %v11022_v32 = vpack.c.bf16 %v3204_v28, %v3203_v57  ;;  %v8433_v28 = vld [vmem:[%s14851_s29 + $0x98] sm:$0xff] }
 0x3e2   :  { %v11024_v20 = vpack.c.bf16 %v3222_v49, %v3221_v51  ;;  %v8432_v57 = vld [vmem:[%s14851_s29 + $0x90] sm:$0xff] }
 0x3e3   :  { %v11088_v51 = vpack.c.bf16 %v8433_v28, %v8432_v57  ;;  %v3537_v49 = vld [vmem:[%s14851_s29 + $0x10] sm:$0xff] }
 0x3e4   :  { %10995 = vmatpush3.bf16.msra.mxu1 %v10994_v62  ;;  %v3170_v62 = vadd.f32 %v3166_v29, %v13422_v44  ;;  %v3228_v44 = vld [vmem:[#allocation2 + $0x1c8] sm:$0xff]  ;;  %v11056_v9 = vpack.c.bf16 %v3538_v37, %v3537_v49 }
 0x3e5   :  { %10997 = vmatprep.subr.bf16.mxu1 %v10996_v23  ;;  %v3223_v23 = vld [vmem:[#allocation2 + $0x1a0] sm:$0xff]  ;;  %v11036_v10 = vpack.c.bf16 %v3228_v44, %v3227_v42  ;;  %v8441_v42 = vld [vmem:[%s14851_s29 + $0xd8] sm:$0xff] }
 0x3e6   :  { %v11028_v33 = vpack.c.bf16 %v3224_v25, %v3223_v23  ;;  %v8437_v23 = vld [vmem:[%s14851_s29 + $0xb8] sm:$0xff]  ;;  %v11104_v44 = vpack.c.bf16 %v8441_v42, %v8440_v58 }
 0x3e8   :  { %10999 = vmatpush3.bf16.msra.mxu1 %v10998_v18  ;;  %v3226_v18 = vld [vmem:[#allocation2 + $0x1b8] sm:$0xff] }
 0x3e9   :  { %11001 = vmatprep.subr.bf16.mxu1 %v11000_v50  ;;  %v11032_v50 = vpack.c.bf16 %v3226_v18, %v3225_v31  ;;  %v8439_v31 = vld [vmem:[%s14851_s29 + $0xc8] sm:$0xff] }
 0x3ea   :  { %v11100_v18 = vpack.c.bf16 %v8439_v31, %v8438_v54 }
 0x3ec   :  { %11003 = vmatpush3.bf16.msra.mxu1 %v11002_v52  ;;  %v3211_v52 = vld [vmem:[#allocation2 + $0x140] sm:$0xff] }
 0x3ed   :  { %11005 = vmatprep.subr.bf16.mxu1 %v11004_v26  ;;  %v3212_v26 = vld [vmem:[#allocation2 + $0x148] sm:$0xff] }
 0x3ee   :  { %v11038_v13 = vpack.c.bf16 %v3212_v26, %v3211_v52  ;;  %v8442_v26 = vld [vmem:[%s14851_s29 + $0xe0] sm:$0xff] }
 0x3ef   :  { %v11108_v27 = vpack.c.bf16 %v8443_v53, %v8442_v26 }
 0x3f0   :  { %11007 = vmatpush3.bf16.msra.mxu1 %v11006_v35  ;;  %v3213_v35 = vld [vmem:[#allocation2 + $0x150] sm:$0xff] }
 0x3f1   :  { %11009 = vmatprep.subr.bf16.mxu1 %v11008_v45  ;;  %v3214_v45 = vld [vmem:[#allocation2 + $0x158] sm:$0xff] }
 0x3f2   :  { %v11042_v16 = vpack.c.bf16 %v3214_v45, %v3213_v35  ;;  %v8444_v45 = vld [vmem:[%s14851_s29 + $0xf0] sm:$0xff] }
 0x3f3   :  { %v11112_v39 = vpack.c.bf16 %v8445_v1, %v8444_v45 }
 0x3f4   :  { %11011 = vmatpush3.bf16.msra.mxu1 %v11010_v22  ;;  %v3215_v22 = vld [vmem:[#allocation2 + $0x160] sm:$0xff] }
 0x3f5   :  { %11013 = vmatprep.subr.bf16.mxu1 %v11012_v59  ;;  %v3216_v59 = vld [vmem:[#allocation2 + $0x168] sm:$0xff] }
 0x3f6   :  { %v11046_v47 = vpack.c.bf16 %v3216_v59, %v3215_v22  ;;  %v8458_v59 = vld [vmem:[%s14851_s29 + $0x100] sm:$0xff] }
 0x3f7   :  { %v14004_v8 = vpack.c.bf16 %v8459_v5, %v8458_v59 }
 0x3f8   :  { %11015 = vmatpush3.bf16.msra.mxu1 %v11014_v12  ;;  %v3217_v12 = vld [vmem:[#allocation2 + $0x170] sm:$0xff] }
 0x3f9   :  { %11017 = vmatprep.subr.bf16.mxu1 %v11016_v17  ;;  %v3218_v17 = vld [vmem:[#allocation2 + $0x178] sm:$0xff] }
 0x3fa   :  { %v11050_v21 = vpack.c.bf16 %v3218_v17, %v3217_v12 }
 0x3fc   :  { %11019 = vmatpush3.bf16.msra.mxu1 %v11018_v4  ;;  %v8431_v4 = vld [vmem:[%s14851_s29 + $0x88] sm:$0xff] }
 0x3fd   :  { %11021 = vmatprep.subr.bf16.mxu1 %v11020_v41  ;;  %v11084_v24 = vpack.c.bf16 %v8431_v4, %v8430_v7  ;;  %v3536_v41 = vld [vmem:[%s14851_s29 + $0x8] sm:$0xff] }
 0x3fe   :  { %v11052_v29 = vpack.c.bf16 %v3536_v41, %v3535_v61 }
 0x3ff   :  { %3306 = vmatmul.mubr.f32.vlgmr.msra.gmra.mrb[26].mxu1 %v3167_v56 }
 0x400   :  { %11023 = vmatpush3.bf16.msra.mxu1 %v11022_v32  ;;  %3375 = vmatprep.mubr.f32.mxu1 %v3170_v62  ;;  %v8435_v32 = vld [vmem:[%s14851_s29 + $0xa8] sm:$0xff]  ;;  %v8436_v62 = vld [vmem:[%s14851_s29 + $0xb0] sm:$0xff] }
 0x401   :  { %11025 = vmatprep.subr.bf16.mxu1 %v11024_v20  ;;  %11053 = vmatprep.subr.bf16.mxu0 %v11052_v29  ;;  %v11092_v56 = vpack.c.bf16 %v8435_v32, %v8434_v15  ;;  %v3539_v20 = vld [vmem:[%s14851_s29 + $0x20] sm:$0xff]  ;;  %v11096_v25 = vpack.c.bf16 %v8437_v23, %v8436_v62 }
 0x402   :  { %11055 = vmatpush3.bf16.msra.mxu0 %v11052_v29  ;;  %v11060_v38 = vpack.c.bf16 %v3540_v63, %v3539_v20 }
 0x403   :  { %11057 = vmatprep.subr.bf16.mxu0 %v11056_v9 }
 0x404   :  { %11027 = vmatpush3.bf16.msra.mxu1 %v11026_v11  ;;  %v3541_v11 = vld [vmem:[%s14851_s29 + $0x30] sm:$0xff] }
 0x405   :  { %11029 = vmatprep.subr.bf16.mxu1 %v11028_v33  ;;  %v3542_v33 = vld [vmem:[%s14851_s29 + $0x38] sm:$0xff] }
 0x406   :  { %11059 = vmatpush3.bf16.msra.mxu0 %v11056_v9  ;;  %v11064_v0 = vpack.c.bf16 %v3542_v33, %v3541_v11 }
 0x407   :  { %11061 = vmatprep.subr.bf16.mxu0 %v11060_v38 }
 0x408   :  { %11031 = vmatpush3.bf16.msra.mxu1 %v11030_v6  ;;  %v3543_v6 = vld [vmem:[%s14851_s29 + $0x40] sm:$0xff] }
 0x409   :  { %11033 = vmatprep.subr.bf16.mxu1 %v11032_v50  ;;  %v3544_v50 = vld [vmem:[%s14851_s29 + $0x48] sm:$0xff] }
 0x40a   :  { %11063 = vmatpush3.bf16.msra.mxu0 %v11060_v38  ;;  %v11068_v30 = vpack.c.bf16 %v3544_v50, %v3543_v6 }
 0x40b   :  { %11065 = vmatprep.subr.bf16.mxu0 %v11064_v0 }
 0x40c   :  { %11035 = vmatpush3.bf16.msra.mxu1 %v11034_v2  ;;  %v3545_v2 = vld [vmem:[%s14851_s29 + $0x50] sm:$0xff] }
 0x40d   :  { %11037 = vmatprep.subr.bf16.mxu1 %v11036_v10  ;;  %v3546_v10 = vld [vmem:[%s14851_s29 + $0x58] sm:$0xff] }
 0x40e   :  { %11067 = vmatpush3.bf16.msra.mxu0 %v11064_v0  ;;  %v11072_v52 = vpack.c.bf16 %v3546_v10, %v3545_v2  ;;  %v14852_v2 = vld [vmem:[#allocation35_spill] sm:$0xff] }
 0x40f   :  { %11069 = vmatprep.subr.bf16.mxu0 %v11068_v30 }
 0x410   :  { %11039 = vmatpush3.bf16.msra.mxu1 %v11038_v13  ;;  %v3547_v13 = vld [vmem:[%s14851_s29 + $0x60] sm:$0xff] }
 0x411   :  { %11041 = vmatprep.subr.bf16.mxu1 %v11040_v48  ;;  %v3548_v48 = vld [vmem:[%s14851_s29 + $0x68] sm:$0xff] }
 0x412   :  { %11071 = vmatpush3.bf16.msra.mxu0 %v11068_v30  ;;  %v11076_v35 = vpack.c.bf16 %v3548_v48, %v3547_v13 }
 0x413   :  { %11073 = vmatprep.subr.bf16.mxu0 %v11072_v52 }
 0x414   :  { %11043 = vmatpush3.bf16.msra.mxu1 %v11042_v16  ;;  %v3549_v16 = vld [vmem:[%s14851_s29 + $0x70] sm:$0xff] }
 0x415   :  { %11045 = vmatprep.subr.bf16.mxu1 %v11044_v36  ;;  %v3550_v36 = vld [vmem:[%s14851_s29 + $0x78] sm:$0xff] }
 0x416   :  { %11075 = vmatpush3.bf16.msra.mxu0 %v11072_v52  ;;  %v11080_v22 = vpack.c.bf16 %v3550_v36, %v3549_v16  ;;  %v14853_v52 = vld [vmem:[#allocation33_spill] sm:$0xff] }
 0x417   :  { %11077 = vmatprep.subr.bf16.mxu0 %v11076_v35 }
 0x418   :  { %11047 = vmatpush3.bf16.msra.mxu1 %v11046_v47  ;;  %v3239_v47 = vpop.permute.xlu1 %3238 }
 0x419   :  { %11049 = vmatprep.subr.bf16.mxu1 %v11048_v19 }
 0x41a   :  { %11079 = vmatpush3.bf16.msra.mxu0 %v11076_v35 }
 0x41b   :  { %11081 = vmatprep.subr.bf16.mxu0 %v11080_v22 }
 0x41c   :  { %11051 = vmatpush3.bf16.msra.mxu1 %v11050_v21  ;;  %v3390_v19 = vpop.permute.xlu1 %3389 }
 0x41d   :  { %11085 = vmatprep.subr.bf16.mxu1 %v11084_v24 }
 0x41e   :  { %11083 = vmatpush3.bf16.msra.mxu0 %v11080_v22 }
 0x41f   :  { %3376 = vmatmul.mubr.f32.vlgmr.msra.gmra.mrb[28].mxu1 %v3169_v46 }
 0x420   :  { %11087 = vmatpush3.bf16.msra.mxu1 %v11084_v24  ;;  %v3417_v12 = vpop.permute.xlu1 %3416  ;;  %v3050_v24 = vpop.permute.xlu0 %3049 }
 0x421   :  { %11089 = vmatprep.subr.bf16.mxu1 %v11088_v51 }
 0x424   :  { %11091 = vmatpush3.bf16.msra.mxu1 %v11088_v51  ;;  %v3421_v17 = vpop.permute.xlu1 %3420  ;;  %v3445_v57 = vpop.permute.xlu0 %3444 }
 0x425   :  { %11093 = vmatprep.subr.bf16.mxu1 %v11092_v56 }
 0x428   :  { %11095 = vmatpush3.bf16.msra.mxu1 %v11092_v56  ;;  %v3449_v21 = vpop.permute.xlu1 %3448  ;;  %v3477_v29 = vpop.permute.xlu0 %3476 }
 0x429   :  { %11097 = vmatprep.subr.bf16.mxu1 %v11096_v25 }
 0x42c   :  { %11099 = vmatpush3.bf16.msra.mxu1 %v11096_v25  ;;  %v3473_v7 = vpop.permute.xlu1 %3472  ;;  %v3395_v15 = vpop.permute.xlu0 %3394 }
 0x42d   :  { %11101 = vmatprep.subr.bf16.mxu1 %v11100_v18 }
 0x430   :  { %11103 = vmatpush3.bf16.msra.mxu1 %v11100_v18  ;;  %v14007_v4 = vpop.permute.xlu1 %3505  ;;  %v3400_v56 = vpop.permute.xlu0 %3399 }
 0x431   :  { %11105 = vmatprep.subr.bf16.mxu1 %v11104_v44 }
 0x434   :  { %11107 = vmatpush3.bf16.msra.mxu1 %v11104_v44  ;;  %v14009_v61 = vpop.permute.xlu1 %3510  ;;  %v3429_v63 = vpop.permute.xlu0 %3428 }
 0x435   :  { %11109 = vmatprep.subr.bf16.mxu1 %v11108_v27 }
 0x438   :  { %11111 = vmatpush3.bf16.msra.mxu1 %v11108_v27  ;;  %v3425_v41 = vpop.permute.xlu1 %3424  ;;  %v3481_v62 = vpop.permute.xlu0 %3480  ;;  %v14854_v27 = vld [vmem:[#allocation37_spill] sm:$0xff] }
 0x439   :  { %11113 = vmatprep.subr.bf16.mxu1 %v11112_v39 }
 0x43c   :  { %11115 = vmatpush3.bf16.msra.mxu1 %v11112_v39  ;;  %v3405_v28 = vpop.permute.xlu1 %3404  ;;  %v3521_v25 = vpop.permute.xlu0 %3520 }
 0x43d   :  { %11133 = vmatprep.subr.bf16.mxu1 %v14004_v8 }
 0x440   :  { %v3453_v37 = vpop.permute.xlu1 %3452  ;;  %v14015_v18 = vpop.permute.xlu0 %5409 }
 0x444   :  { %v3457_v32 = vpop.permute.xlu1 %3456  ;;  %v5509_v44 = vpop.permute.xlu0 %5508 }
 0x448   :  { %v3485_v20 = vpop.permute.xlu1 %3484 }
 0x44c   :  { %v3516_v38 = vpop.permute.xlu1 %3515 }
 0x450   :  { %v14011_v23 = vpop.permute.xlu1 %5399 }
 0x454   :  { %v14013_v11 = vpop.permute.xlu1 %5404 }
 0x458   :  { %v14017_v30 = vpop.permute.xlu1 %5414 }
 0x45c   :  { %v5514_v53 = vpop.permute.xlu1 %5513 }
 0x4b2   :  { %v3121_v34 = vpop.f32.mrb[24].mxu1 }
 0x4b3   :  { %v9534_v46 = vpop.f32.mrb[25].mxu1  ;;  %v3122_v6 = vadd.f32 %v3121_v34, %v3050_v24 }
 0x4d2   :  { %v8927_v51 = vpop.f32.mrb[26].mxu1 }
 0x4d3   :  { %v8928_v49 = vpop.f32.mrb[27].mxu1 }
 0x4d4   :  { %v8929_v9 = vadd.f32 %v8928_v49, %v8927_v51  ;;  %v5520_v49 = vpop.permute.xlu0 %5519 }
 0x4d6   :  { %v3308_v54 = vadd.f32 %v8929_v9, %v3239_v47  ;;  %v14855_v47 = vld [vmem:[#allocation38_spill] sm:$0xff] }
 0x4f2   :  { %v8962_v33 = vpop.f32.mrb[28].mxu1 }
 0x4f3   :  { %v8963_v0 = vpop.f32.mrb[29].mxu1 }
 0x4f4   :  { %v8964_v31 = vadd.f32 %v8963_v0, %v8962_v33  ;;  %v5526_v0 = vpop.permute.xlu1 %5525 }
 0x4f6   :  { %v3378_v50 = vadd.f32 %v8964_v31, %v3308_v54 }
 0x4f8   :  { %v3381_v58 = vadd.f32 %v3378_v50, %v3122_v6 }
 0x4fa   :  { %v14019_v42 = vmax.f32 %v3381_v58, 0.0 }
 0x4fc   :  { %v3434_v10 = vrot.slane %v14019_v42, %v14852_v2  ;;  %v3410_v26 = vrot.slane %v14019_v42, %v14853_v52  ;;  %v3462_v13 = vrot.slane %v14019_v42, %v14854_v27  ;;  %v3490_v34 = vrot.slane %v14019_v42, %v14855_v47 }
 0x4fe   :  { %v3435_v48 = vmul.f32 %v3434_v10, %v3417_v12  ;;  %v3436_v35 = vmul.f32 %v3434_v10, %v3421_v17  ;;  %v3437_v45 = vmul.f32 %v3434_v10, %v3425_v41  ;;  %v3438_v1 = vmul.f32 %v3434_v10, %v3429_v63 }
 0x4ff   :  { %v5516_v39 = vmul.f32 %v5514_v53, %v3434_v10  ;;  %v3411_v16 = vmul.f32 %v3410_v26, %v3390_v19  ;;  %v3412_v36 = vmul.f32 %v3410_v26, %v3395_v15  ;;  %v3413_v22 = vmul.f32 %v3410_v26, %v3400_v56 }
 0x500   :  { %v3414_v59 = vmul.f32 %v3410_v26, %v3405_v28  ;;  %v5511_v5 = vmul.f32 %v5509_v44, %v3410_v26  ;;  %v3463_v12 = vmul.f32 %v3462_v13, %v3445_v57  ;;  %v3464_v17 = vmul.f32 %v3462_v13, %v3449_v21 }
 0x501   :  { %v3439_v46 = vadd.f32 %v3435_v48, %v3411_v16  ;;  %v3440_v24 = vadd.f32 %v3436_v35, %v3412_v36  ;;  %v3441_v51 = vadd.f32 %v3437_v45, %v3413_v22  ;;  %v3465_v41 = vmul.f32 %v3462_v13, %v3453_v37  ;;  %v8465_v16 = vld [vmem:[%s14851_s29 + $0x138] sm:$0xff]  ;;  %v8466_v36 = vld [vmem:[%s14851_s29 + $0x140] sm:$0xff]  ;;  %v8467_v22 = vld [vmem:[%s14851_s29 + $0x148] sm:$0xff] }
 0x502   :  { %v3442_v9 = vadd.f32 %v3438_v1, %v3414_v59  ;;  %v5517_v33 = vadd.f32 %v5516_v39, %v5511_v5  ;;  %v3466_v63 = vmul.f32 %v3462_v13, %v3457_v32  ;;  %v3491_v54 = vmul.f32 %v3490_v34, %v3473_v7  ;;  %v8463_v39 = vld [vmem:[%s14851_s29 + $0x128] sm:$0xff]  ;;  %v8468_v5 = vld [vmem:[%s14851_s29 + $0x150] sm:$0xff] }
 0x503   :  { %v3492_v19 = vmul.f32 %v3490_v34, %v3477_v29  ;;  %v3493_v15 = vmul.f32 %v3490_v34, %v3481_v62  ;;  %v5522_v56 = vmul.f32 %v5520_v49, %v3462_v13  ;;  %v3467_v28 = vadd.f32 %v3463_v12, %v3439_v46  ;;  %v8460_v62 = vld [vmem:[%s14851_s29 + $0x110] sm:$0xff]  ;;  %v8461_v13 = vld [vmem:[%s14851_s29 + $0x118] sm:$0xff]  ;;  %v8506_v12 = vld [vmem:[%s14851_s29 + $0x200] sm:$0xff] }
 0x504   :  { %v3468_v31 = vadd.f32 %v3464_v17, %v3440_v24  ;;  %v3469_v6 = vadd.f32 %v3465_v41, %v3441_v51  ;;  %v3470_v50 = vadd.f32 %v3466_v63, %v3442_v9  ;;  %v3494_v58 = vmul.f32 %v3490_v34, %v3485_v20  ;;  %v8470_v24 = vld [vmem:[%s14851_s29 + $0x160] sm:$0xff]  ;;  %v8471_v51 = vld [vmem:[%s14851_s29 + $0x168] sm:$0xff]  ;;  %v8472_v9 = vld [vmem:[%s14851_s29 + $0x170] sm:$0xff] }
 0x505   :  { %v5528_v44 = vmul.f32 %v5526_v0, %v3490_v34  ;;  %v5523_v10 = vadd.f32 %v5522_v56, %v5517_v33  ;;  %v3495_v26 = vadd.f32 %v3491_v54, %v3467_v28  ;;  %v11136_v45 = vpack.c.bf16 %v8461_v13, %v8460_v62  ;;  %v8469_v34 = vld [vmem:[%s14851_s29 + $0x158] sm:$0xff]  ;;  %v8507_v17 = vld [vmem:[%s14851_s29 + $0x208] sm:$0xff]  ;;  %v8508_v63 = vld [vmem:[%s14851_s29 + $0x210] sm:$0xff] }
 0x506   :  { %v3496_v53 = vadd.f32 %v3492_v19, %v3468_v31  ;;  %v3497_v57 = vadd.f32 %v3493_v15, %v3469_v6  ;;  %v3498_v21 = vadd.f32 %v3494_v58, %v3470_v50  ;;  %v11148_v59 = vpack.c.bf16 %v8467_v22, %v8466_v36  ;;  %v8473_v33 = vld [vmem:[%s14851_s29 + $0x178] sm:$0xff]  ;;  %v8510_v15 = vld [vmem:[%s14851_s29 + $0x220] sm:$0xff]  ;;  %v8511_v56 = vld [vmem:[%s14851_s29 + $0x228] sm:$0xff] }
 0x507   :  { %v14029_v37 = vadd.f32 %v5528_v44, %v5523_v10  ;;  %v3523_v7 = vadd.f32 %v14007_v4, %v3495_v26  ;;  %v8462_v4 = vld [vmem:[%s14851_s29 + $0x120] sm:$0xff]  ;;  %v11152_v46 = vpack.c.bf16 %v8469_v34, %v8468_v5  ;;  %v11156_v49 = vpack.c.bf16 %v8471_v51, %v8470_v24  ;;  %v8509_v54 = vld [vmem:[%s14851_s29 + $0x218] sm:$0xff]  ;;  %v8512_v31 = vld [vmem:[%s14851_s29 + $0x230] sm:$0xff] }
 0x508   :  { %v3524_v29 = vadd.f32 %v14009_v61, %v3496_v53  ;;  %v3525_v32 = vadd.f32 %v3516_v38, %v3497_v57  ;;  %v3526_v35 = vadd.f32 %v3521_v25, %v3498_v21  ;;  %v11140_v38 = vpack.c.bf16 %v8463_v39, %v8462_v4  ;;  %v8464_v25 = vld [vmem:[%s14851_s29 + $0x130] sm:$0xff]  ;;  %v8513_v6 = vld [vmem:[%s14851_s29 + $0x238] sm:$0xff]  ;;  %v8514_v58 = vld [vmem:[%s14851_s29 + $0x240] sm:$0xff] }
 0x509   :  { %v14035_v48 = vmax.f32 %v3523_v7, 0.0  ;;  %v11160_v0 = vpack.c.bf16 %v8473_v33, %v8472_v9  ;;  %v11212_v41 = vpack.c.bf16 %v8507_v17, %v8506_v12  ;;  %v11216_v19 = vpack.c.bf16 %v8509_v54, %v8508_v63  ;;  %v8515_v44 = vld [vmem:[%s14851_s29 + $0x248] sm:$0xff]  ;;  %v8516_v26 = vld [vmem:[%s14851_s29 + $0x250] sm:$0xff]  ;;  %v8517_v53 = vld [vmem:[%s14851_s29 + $0x258] sm:$0xff] }
 0x50a   :  { %v14037_v20 = vmax.f32 %v3524_v29, 0.0  ;;  %v14039_v1 = vmax.f32 %v3525_v32, 0.0  ;;  %v14049_v61 = vmax.f32 %v3526_v35, 0.0  ;;  %v11220_v28 = vpack.c.bf16 %v8511_v56, %v8510_v15  ;;  %v8518_v21 = vld [vmem:[%s14851_s29 + $0x260] sm:$0xff]  ;;  %v8519_v7 = vld [vmem:[%s14851_s29 + $0x268] sm:$0xff]  ;;  %v8520_v32 = vld [vmem:[%s14851_s29 + $0x270] sm:$0xff] }
 0x50b   :  { %9567 = vmatprep.mubr.f32.mxu0 %v14035_v48  ;;  %9605 = vmatprep.mubr.f32.mxu1 %v14035_v48  ;;  %v11224_v50 = vpack.c.bf16 %v8513_v6, %v8512_v31  ;;  %v11228_v10 = vpack.c.bf16 %v8515_v44, %v8514_v58  ;;  %v11232_v57 = vpack.c.bf16 %v8517_v53, %v8516_v26  ;;  %v8521_v62 = vld [vmem:[%s14851_s29 + $0x278] sm:$0xff]  ;;  %v8530_v35 = vld [vmem:[%s14851_s29 + $0x280] sm:$0xff]  ;;  %v8532_v39 = vld [vmem:[%s14851_s29 + $0x290] sm:$0xff] }
 0x50c   :  { %9568 = vmatmul.mubr.f32.vlgmr.msra.gmra.mrb[28].mxu0 %v14037_v20  ;;  %9606 = vmatmul.mubr.f32.vlgmr.msra.gmra.mrb[30].mxu1 %v14037_v20  ;;  %v11236_v29 = vpack.c.bf16 %v8519_v7, %v8518_v21  ;;  %v11240_v13 = vpack.c.bf16 %v8521_v62, %v8520_v32  ;;  %v8536_v22 = vld [vmem:[%s14851_s29 + $0x2b0] sm:$0xff]  ;;  %v8538_v34 = vld [vmem:[%s14851_s29 + $0x2c0] sm:$0xff]  ;;  %v8583_v58 = vld [vmem:[%s14851_s29 + $0x3a8] sm:$0xff] }
 0x50d   :  { %11135 = vmatpush3.bf16.msra.mxu1 %v14004_v8  ;;  %9570 = vmatprep.mubr.f32.mxu0 %v14039_v1  ;;  %v11144_v8 = vpack.c.bf16 %v8465_v16, %v8464_v25  ;;  %v8534_v16 = vld [vmem:[%s14851_s29 + $0x2a0] sm:$0xff]  ;;  %v8540_v51 = vld [vmem:[%s14851_s29 + $0x2d0] sm:$0xff]  ;;  %v8585_v26 = vld [vmem:[%s14851_s29 + $0x3b8] sm:$0xff] }
 0x50e   :  { %9608 = vmatprep.mubr.f32.mxu1 %v14039_v1  ;;  %11137 = vmatprep.subr.bf16.mxu1 %v11136_v45  ;;  %v8542_v33 = vld [vmem:[%s14851_s29 + $0x2e0] sm:$0xff]  ;;  %v8544_v17 = vld [vmem:[%s14851_s29 + $0x2f0] sm:$0xff]  ;;  %v8587_v21 = vld [vmem:[%s14851_s29 + $0x3c8] sm:$0xff] }
 0x50f   :  { %v8578_v54 = vld [vmem:[%s14851_s29 + $0x380] sm:$0xff]  ;;  %v8580_v56 = vld [vmem:[%s14851_s29 + $0x390] sm:$0xff]  ;;  %v8589_v32 = vld [vmem:[%s14851_s29 + $0x3d8] sm:$0xff] }
 0x510   :  { %9571 = vmatmul.mubr.f32.gmra.mrb[30].mxu0 %v14049_v61  ;;  %9609 = vmatmul.mubr.f32.gmra.mrb[32].mxu1 %v14049_v61  ;;  %v8426_v31 = vld [vmem:[%s14856_s3 + $0x20] sm:$0xff] }
 0x511   :  { %11139 = vmatpush3.bf16.msra.mxu1 %v11136_v45  ;;  %9671 = vmatprep.mubr.f32.mxu1 %v14035_v48  ;;  %v8531_v45 = vld [vmem:[%s14851_s29 + $0x288] sm:$0xff] }
 0x512   :  { %11141 = vmatprep.subr.bf16.mxu1 %v11140_v38  ;;  %v11252_v4 = vpack.c.bf16 %v8531_v45, %v8530_v35  ;;  %9619 = vmatprep.mubr.msk.f32.mxu0 %vm2076_vm0, %v8426_v31  ;;  %v8591_v35 = vld [vmem:[%s14851_s29 + $0x3e8] sm:$0xff] }
 0x513   :  { %v8483_v31 = vld [vmem:[%s14851_s29 + $0x188] sm:$0xff] }
 0x515   :  { %11143 = vmatpush3.bf16.msra.mxu1 %v11140_v38  ;;  %v8533_v38 = vld [vmem:[%s14851_s29 + $0x298] sm:$0xff] }
 0x516   :  { %11145 = vmatprep.subr.bf16.mxu1 %v11144_v8  ;;  %v11256_v25 = vpack.c.bf16 %v8533_v38, %v8532_v39  ;;  %v8593_v39 = vld [vmem:[%s14851_s29 + $0x3f8] sm:$0xff] }
 0x519   :  { %11147 = vmatpush3.bf16.msra.mxu1 %v11144_v8  ;;  %v8535_v8 = vld [vmem:[%s14851_s29 + $0x2a8] sm:$0xff] }
 0x51a   :  { %11149 = vmatprep.subr.bf16.mxu1 %v11148_v59  ;;  %v11260_v36 = vpack.c.bf16 %v8535_v8, %v8534_v16 }
 0x51d   :  { %11151 = vmatpush3.bf16.msra.mxu1 %v11148_v59  ;;  %v8537_v59 = vld [vmem:[%s14851_s29 + $0x2b8] sm:$0xff] }
 0x51e   :  { %11153 = vmatprep.subr.bf16.mxu1 %v11152_v46  ;;  %v11264_v5 = vpack.c.bf16 %v8537_v59, %v8536_v22 }
 0x521   :  { %11155 = vmatpush3.bf16.msra.mxu1 %v11152_v46  ;;  %v8539_v46 = vld [vmem:[%s14851_s29 + $0x2c8] sm:$0xff] }
 0x522   :  { %11157 = vmatprep.subr.bf16.mxu1 %v11156_v49  ;;  %v11268_v24 = vpack.c.bf16 %v8539_v46, %v8538_v34 }
 0x525   :  { %11159 = vmatpush3.bf16.msra.mxu1 %v11156_v49  ;;  %v8541_v49 = vld [vmem:[%s14851_s29 + $0x2d8] sm:$0xff] }
 0x526   :  { %11161 = vmatprep.subr.bf16.mxu1 %v11160_v0  ;;  %v11272_v9 = vpack.c.bf16 %v8541_v49, %v8540_v51 }
 0x529   :  { %11163 = vmatpush3.bf16.msra.mxu1 %v11160_v0  ;;  %v8543_v0 = vld [vmem:[%s14851_s29 + $0x2e8] sm:$0xff] }
 0x52a   :  { %11213 = vmatprep.subr.bf16.mxu1 %v11212_v41  ;;  %v11276_v12 = vpack.c.bf16 %v8543_v0, %v8542_v33  ;;  %v8428_v33 = vld [vmem:[%s14856_s3 + $0x30] sm:$0xff]  ;;  %v8429_v0 = vld [vmem:[%s14856_s3 + $0x38] sm:$0xff] }
 0x52c   :  { %9672 = vmatmul.mubr.f32.vlgmr.msra.gmra.mrb[34].mxu1 %v14037_v20 }
 0x52d   :  { %9674 = vmatprep.mubr.f32.mxu1 %v14039_v1  ;;  %11215 = vmatpush3.bf16.msra.mxu1 %v11212_v41  ;;  %v8545_v41 = vld [vmem:[%s14851_s29 + $0x2f8] sm:$0xff] }
 0x52e   :  { %11217 = vmatprep.subr.bf16.mxu1 %v11216_v19  ;;  %v11280_v63 = vpack.c.bf16 %v8545_v41, %v8544_v17  ;;  %v3532_v17 = vld [vmem:[%s14856_s3 + $0x8] sm:$0xff]  ;;  %v3533_v41 = vld [vmem:[%s14856_s3 + $0x10] sm:$0xff] }
 0x530   :  { %9675 = vmatmul.mubr.f32.gmra.mrb[36].mxu1 %v14049_v61 }
 0x531   :  { %11219 = vmatpush3.bf16.msra.mxu1 %v11216_v19  ;;  %9775 = vmatprep.mubr.f32.mxu1 %v14035_v48  ;;  %v8579_v19 = vld [vmem:[%s14851_s29 + $0x388] sm:$0xff] }
 0x532   :  { %11221 = vmatprep.subr.bf16.mxu1 %v11220_v28  ;;  %v11332_v15 = vpack.c.bf16 %v8579_v19, %v8578_v54  ;;  %v8454_v54 = vld [vmem:[%s14856_s3 + $0x40] sm:$0xff] }
 0x535   :  { %11223 = vmatpush3.bf16.msra.mxu1 %v11220_v28  ;;  %v8581_v28 = vld [vmem:[%s14851_s29 + $0x398] sm:$0xff] }
 0x536   :  { %11225 = vmatprep.subr.bf16.mxu1 %v11224_v50  ;;  %v11336_v6 = vpack.c.bf16 %v8581_v28, %v8580_v56  ;;  %v8482_v28 = vld [vmem:[%s14851_s29 + $0x180] sm:$0xff] }
 0x539   :  { %11227 = vmatpush3.bf16.msra.mxu1 %v11224_v50  ;;  %v8582_v50 = vld [vmem:[%s14851_s29 + $0x3a0] sm:$0xff] }
 0x53a   :  { %11229 = vmatprep.subr.bf16.mxu1 %v11228_v10  ;;  %v11340_v44 = vpack.c.bf16 %v8583_v58, %v8582_v50 }
 0x53d   :  { %11231 = vmatpush3.bf16.msra.mxu1 %v11228_v10  ;;  %v8584_v10 = vld [vmem:[%s14851_s29 + $0x3b0] sm:$0xff] }
 0x53e   :  { %11233 = vmatprep.subr.bf16.mxu1 %v11232_v57  ;;  %v11344_v53 = vpack.c.bf16 %v8585_v26, %v8584_v10  ;;  %v8484_v10 = vld [vmem:[%s14851_s29 + $0x190] sm:$0xff]  ;;  %v8485_v26 = vld [vmem:[%s14851_s29 + $0x198] sm:$0xff] }
 0x541   :  { %11235 = vmatpush3.bf16.msra.mxu1 %v11232_v57  ;;  %v8586_v57 = vld [vmem:[%s14851_s29 + $0x3c0] sm:$0xff] }
 0x542   :  { %11237 = vmatprep.subr.bf16.mxu1 %v11236_v29  ;;  %v11348_v7 = vpack.c.bf16 %v8587_v21, %v8586_v57  ;;  %v8456_v57 = vld [vmem:[%s14856_s3 + $0x50] sm:$0xff]  ;;  %v11176_v21 = vpack.c.bf16 %v8485_v26, %v8484_v10 }
 0x545   :  { %11239 = vmatpush3.bf16.msra.mxu1 %v11236_v29  ;;  %v8588_v29 = vld [vmem:[%s14851_s29 + $0x3d0] sm:$0xff] }
 0x546   :  { %11241 = vmatprep.subr.bf16.mxu1 %v11240_v13  ;;  %v11352_v62 = vpack.c.bf16 %v8589_v32, %v8588_v29  ;;  %v8487_v29 = vld [vmem:[%s14851_s29 + $0x1a8] sm:$0xff]  ;;  %v8457_v32 = vld [vmem:[%s14856_s3 + $0x58] sm:$0xff] }
 0x549   :  { %11243 = vmatpush3.bf16.msra.mxu1 %v11240_v13  ;;  %v8590_v13 = vld [vmem:[%s14851_s29 + $0x3e0] sm:$0xff] }
 0x54a   :  { %11253 = vmatprep.subr.bf16.mxu1 %v11252_v4  ;;  %v11356_v45 = vpack.c.bf16 %v8591_v35, %v8590_v13  ;;  %v8488_v13 = vld [vmem:[%s14851_s29 + $0x1b0] sm:$0xff]  ;;  %v8489_v35 = vld [vmem:[%s14851_s29 + $0x1b8] sm:$0xff] }
 0x54c   :  { %9776 = vmatmul.mubr.f32.vlgmr.msra.gmra.mrb[38].mxu1 %v14037_v20 }
 0x54d   :  { %9778 = vmatprep.mubr.f32.mxu1 %v14039_v1  ;;  %11255 = vmatpush3.bf16.msra.mxu1 %v11252_v4  ;;  %v8592_v4 = vld [vmem:[%s14851_s29 + $0x3f0] sm:$0xff] }
 0x54e   :  { %11257 = vmatprep.subr.bf16.mxu1 %v11256_v25  ;;  %v11360_v38 = vpack.c.bf16 %v8593_v39, %v8592_v4  ;;  %v8490_v4 = vld [vmem:[%s14851_s29 + $0x1c0] sm:$0xff]  ;;  %v8491_v39 = vld [vmem:[%s14851_s29 + $0x1c8] sm:$0xff] }
 0x550   :  { %9779 = vmatmul.mubr.f32.gmra.mrb[40].mxu1 %v14049_v61 }
 0x551   :  { %11259 = vmatpush3.bf16.msra.mxu1 %v11256_v25  ;;  %9827 = vmatprep.mubr.f32.mxu1 %v14035_v48 }
 0x552   :  { %11261 = vmatprep.subr.bf16.mxu1 %v11260_v36 }
 0x555   :  { %11263 = vmatpush3.bf16.msra.mxu1 %v11260_v36 }
 0x556   :  { %11265 = vmatprep.subr.bf16.mxu1 %v11264_v5 }
 0x559   :  { %11267 = vmatpush3.bf16.msra.mxu1 %v11264_v5 }
 0x55a   :  { %11269 = vmatprep.subr.bf16.mxu1 %v11268_v24 }
 0x55d   :  { %11271 = vmatpush3.bf16.msra.mxu1 %v11268_v24 }
 0x55e   :  { %11273 = vmatprep.subr.bf16.mxu1 %v11272_v9 }
 0x561   :  { %11275 = vmatpush3.bf16.msra.mxu1 %v11272_v9  ;;  %v8427_v9 = vld [vmem:[%s14856_s3 + $0x28] sm:$0xff] }
 0x562   :  { %11277 = vmatprep.subr.bf16.mxu1 %v11276_v12 }
 0x565   :  { %11279 = vmatpush3.bf16.msra.mxu1 %v11276_v12  ;;  %v3531_v12 = vld [vmem:[%s14856_s3] sm:$0xff] }
 0x566   :  { %11281 = vmatprep.subr.bf16.mxu1 %v11280_v63 }
 0x569   :  { %11283 = vmatpush3.bf16.msra.mxu1 %v11280_v63  ;;  %v3534_v63 = vld [vmem:[%s14856_s3 + $0x18] sm:$0xff] }
 0x56a   :  { %11333 = vmatprep.subr.bf16.mxu1 %v11332_v15 }
 0x56c   :  { %9828 = vmatmul.mubr.f32.vlgmr.msra.gmra.mrb[42].mxu1 %v14037_v20 }
 0x56d   :  { %9830 = vmatprep.mubr.f32.mxu1 %v14039_v1  ;;  %11335 = vmatpush3.bf16.msra.mxu1 %v11332_v15 }
 0x56e   :  { %11337 = vmatprep.subr.bf16.mxu1 %v11336_v6 }
 0x570   :  { %9831 = vmatmul.mubr.f32.gmra.mrb[44].mxu1 %v14049_v61 }
 0x571   :  { %11339 = vmatpush3.bf16.msra.mxu1 %v11336_v6  ;;  %9931 = vmatprep.mubr.f32.mxu1 %v14035_v48 }
 0x572   :  { %11341 = vmatprep.subr.bf16.mxu1 %v11340_v44 }
 0x575   :  { %11343 = vmatpush3.bf16.msra.mxu1 %v11340_v44  ;;  %v11172_v44 = vpack.c.bf16 %v8483_v31, %v8482_v28 }
 0x576   :  { %11345 = vmatprep.subr.bf16.mxu1 %v11344_v53 }
 0x579   :  { %11347 = vmatpush3.bf16.msra.mxu1 %v11344_v53  ;;  %v8455_v53 = vld [vmem:[%s14856_s3 + $0x48] sm:$0xff] }
 0x57a   :  { %11349 = vmatprep.subr.bf16.mxu1 %v11348_v7 }
 0x57d   :  { %11351 = vmatpush3.bf16.msra.mxu1 %v11348_v7  ;;  %v8486_v7 = vld [vmem:[%s14851_s29 + $0x1a0] sm:$0xff] }
 0x57e   :  { %11353 = vmatprep.subr.bf16.mxu1 %v11352_v62 }
 0x581   :  { %11355 = vmatpush3.bf16.msra.mxu1 %v11352_v62  ;;  %v11180_v62 = vpack.c.bf16 %v8487_v29, %v8486_v7  ;;  %v8479_v7 = vld [vmem:[%s14856_s3 + $0x68] sm:$0xff]  ;;  %v8480_v29 = vld [vmem:[%s14856_s3 + $0x70] sm:$0xff] }
 0x582   :  { %11357 = vmatprep.subr.bf16.mxu1 %v11356_v45 }
 0x585   :  { %11359 = vmatpush3.bf16.msra.mxu1 %v11356_v45  ;;  %v11184_v45 = vpack.c.bf16 %v8489_v35, %v8488_v13  ;;  %v8503_v13 = vld [vmem:[%s14856_s3 + $0x88] sm:$0xff]  ;;  %v8504_v35 = vld [vmem:[%s14856_s3 + $0x90] sm:$0xff] }
 0x586   :  { %11361 = vmatprep.subr.bf16.mxu1 %v11360_v38 }
 0x589   :  { %11363 = vmatpush3.bf16.msra.mxu1 %v11360_v38  ;;  %v11188_v38 = vpack.c.bf16 %v8491_v39, %v8490_v4  ;;  %v8555_v4 = vld [vmem:[%s14851_s29 + $0x308] sm:$0xff]  ;;  %v8505_v39 = vld [vmem:[%s14856_s3 + $0x98] sm:$0xff] }
 0x58a   :  { %11412 = vmatprep.subr.bf16.mxu1 %v12106_v3 }
 0x58c   :  { %9932 = vmatmul.mubr.f32.vlgmr.msra.gmra.mrb[46].mxu1 %v14037_v20 }
 0x58d   :  { %9934 = vmatprep.mubr.f32.mxu1 %v14039_v1 }
 0x590   :  { %9935 = vmatmul.mubr.f32.gmra.mrb[48].mxu1 %v14049_v61 }
 0x591   :  { %10011 = vmatprep.mubr.msk.f32.mxu1 %vm12107_vm1, %v12108_v14 }
 0x5df   :  { %v9569_v25 = vpop.f32.mrb[28].mxu0  ;;  %v9607_v16 = vpop.f32.mrb[30].mxu1 }
 0x5e0   :  { %v3617_v8 = vpop.f32.mrb[29].mxu0  ;;  %v3724_v36 = vpop.f32.mrb[31].mxu1 }
 0x5e1   :  { %v11124_v22 = vpack.c.bf16 %v9569_v25, %v3617_v8  ;;  %v11116_v59 = vpack.c.bf16 %v9607_v16, %v3724_v36  ;;  %v8492_v25 = vld [vmem:[%s14851_s29 + $0x1d0] sm:$0xff]  ;;  %v8493_v16 = vld [vmem:[%s14851_s29 + $0x1d8] sm:$0xff]  ;;  %v8494_v36 = vld [vmem:[%s14851_s29 + $0x1e0] sm:$0xff] }
 0x5e2   :  { %v11192_v8 = vpack.c.bf16 %v8493_v16, %v8492_v25  ;;  %v8556_v16 = vld [vmem:[%s14851_s29 + $0x310] sm:$0xff] }
 0x5e3   :  { %v9572_v5 = vpop.f32.mrb[30].mxu0  ;;  %v9610_v34 = vpop.f32.mrb[32].mxu1  ;;  %11117 = vmatprep.subr.bf16.mxu0 %v11116_v59 }
 0x5e4   :  { %v3627_v46 = vpop.f32.mrb[31].mxu0  ;;  %v3734_v24 = vpop.f32.mrb[33].mxu1  ;;  %11119 = vmatpush3.bf16.msra.mxu0 %v11116_v59 }
 0x5e5   :  { %v11128_v51 = vpack.c.bf16 %v9572_v5, %v3627_v46  ;;  %v11120_v49 = vpack.c.bf16 %v9610_v34, %v3734_v24  ;;  %v8496_v5 = vld [vmem:[%s14851_s29 + $0x1f0] sm:$0xff]  ;;  %v8497_v34 = vld [vmem:[%s14851_s29 + $0x1f8] sm:$0xff] }
 0x5e7   :  { %11121 = vmatprep.subr.bf16.mxu0 %v11120_v49 }
 0x5e8   :  { %11123 = vmatpush3.bf16.msra.mxu0 %v11120_v49  ;;  %v11200_v49 = vpack.c.bf16 %v8497_v34, %v8496_v5  ;;  %v8558_v5 = vld [vmem:[%s14851_s29 + $0x320] sm:$0xff]  ;;  %v8559_v34 = vld [vmem:[%s14851_s29 + $0x328] sm:$0xff] }
 0x5e9   :  { %11125 = vmatprep.subr.bf16.mxu0 %v11124_v22 }
 0x5eb   :  { %9620 = vmatmul.mubr.msk.f32.vlgmr.msra.gmra.mrb[32].mxu0 %vm2076_vm0, %v8427_v9 }
 0x5ec   :  { %11127 = vmatpush3.bf16.msra.mxu0 %v11124_v22  ;;  %9622 = vmatprep.mubr.msk.f32.mxu0 %vm2076_vm0, %v8428_v33  ;;  %v8495_v22 = vld [vmem:[%s14851_s29 + $0x1e8] sm:$0xff] }
 0x5ed   :  { %11129 = vmatprep.subr.bf16.mxu0 %v11128_v51  ;;  %v11196_v59 = vpack.c.bf16 %v8495_v22, %v8494_v36  ;;  %v8527_v36 = vld [vmem:[%s14856_s3 + $0xa8] sm:$0xff]  ;;  %v8528_v22 = vld [vmem:[%s14856_s3 + $0xb0] sm:$0xff] }
 0x5ef   :  { %9623 = vmatmul.mubr.msk.f32.gmra.mrb[34].mxu0 %vm2076_vm0, %v8429_v0 }
 0x5f0   :  { %11131 = vmatpush3.bf16.msra.mxu0 %v11128_v51  ;;  %9633 = vmatprep.mubr.msk.f32.mxu0 %vm2076_vm0, %v3531_v12 }
 0x5f3   :  { %9634 = vmatmul.mubr.msk.f32.vlgmr.msra.gmra.mrb[32].mxu0 %vm2076_vm0, %v3532_v17 }
 0x5f4   :  { %9636 = vmatprep.mubr.msk.f32.mxu0 %vm2076_vm0, %v3533_v41 }
 0x5f7   :  { %9637 = vmatmul.mubr.msk.f32.gmra.mrb[34].mxu0 %vm2076_vm0, %v3534_v63 }
 0x5f8   :  { %9685 = vmatprep.mubr.msk.f32.mxu0 %vm2076_vm0, %v8454_v54 }
 0x5ff   :  { %v9673_v19 = vpop.f32.mrb[34].mxu1 }
 0x600   :  { %v4025_v15 = vpop.f32.mrb[35].mxu1 }
 0x601   :  { %v11164_v56 = vpack.c.bf16 %v9673_v19, %v4025_v15 }
 0x603   :  { %v9676_v6 = vpop.f32.mrb[36].mxu1  ;;  %11165 = vmatprep.subr.bf16.mxu0 %v11164_v56 }
 0x604   :  { %v4035_v50 = vpop.f32.mrb[37].mxu1  ;;  %11167 = vmatpush3.bf16.msra.mxu0 %v11164_v56 }
 0x605   :  { %v11168_v58 = vpack.c.bf16 %v9676_v6, %v4035_v50 }
 0x607   :  { %11169 = vmatprep.subr.bf16.mxu0 %v11168_v58 }
 0x608   :  { %11171 = vmatpush3.bf16.msra.mxu0 %v11168_v58  ;;  %v8478_v58 = vld [vmem:[%s14856_s3 + $0x60] sm:$0xff] }
 0x609   :  { %11173 = vmatprep.subr.bf16.mxu0 %v11172_v44 }
 0x60b   :  { %9686 = vmatmul.mubr.msk.f32.vlgmr.msra.gmra.mrb[32].mxu0 %vm2076_vm0, %v8455_v53 }
 0x60c   :  { %11175 = vmatpush3.bf16.msra.mxu0 %v11172_v44  ;;  %9688 = vmatprep.mubr.msk.f32.mxu0 %vm2076_vm0, %v8456_v57 }
 0x60d   :  { %11177 = vmatprep.subr.bf16.mxu0 %v11176_v21 }
 0x60f   :  { %9689 = vmatmul.mubr.msk.f32.gmra.mrb[34].mxu0 %vm2076_vm0, %v8457_v32  ;;  %v8481_v32 = vld [vmem:[%s14856_s3 + $0x78] sm:$0xff] }
 0x610   :  { %11179 = vmatpush3.bf16.msra.mxu0 %v11176_v21  ;;  %9723 = vmatprep.mubr.f32.mxu0 %v14035_v48 }
 0x611   :  { %11181 = vmatprep.subr.bf16.mxu0 %v11180_v62 }
 0x614   :  { %11183 = vmatpush3.bf16.msra.mxu0 %v11180_v62  ;;  %v8502_v62 = vld [vmem:[%s14856_s3 + $0x80] sm:$0xff] }
 0x615   :  { %11185 = vmatprep.subr.bf16.mxu0 %v11184_v45 }
 0x618   :  { %11187 = vmatpush3.bf16.msra.mxu0 %v11184_v45  ;;  %v8554_v45 = vld [vmem:[%s14851_s29 + $0x300] sm:$0xff] }
 0x619   :  { %11189 = vmatprep.subr.bf16.mxu0 %v11188_v38  ;;  %v11292_v25 = vpack.c.bf16 %v8555_v4, %v8554_v45  ;;  %v8604_v4 = vld [vmem:[%s14851_s29 + $0x410] sm:$0xff] }
 0x61c   :  { %11191 = vmatpush3.bf16.msra.mxu0 %v11188_v38  ;;  %v8526_v38 = vld [vmem:[%s14856_s3 + $0xa0] sm:$0xff] }
 0x61d   :  { %11193 = vmatprep.subr.bf16.mxu0 %v11192_v8 }
 0x61f   :  { %v9777_v46 = vpop.f32.mrb[38].mxu1 }
 0x620   :  { %11195 = vmatpush3.bf16.msra.mxu0 %v11192_v8  ;;  %v4441_v24 = vpop.f32.mrb[39].mxu1  ;;  %v8557_v8 = vld [vmem:[%s14851_s29 + $0x318] sm:$0xff] }
 0x621   :  { %v11244_v51 = vpack.c.bf16 %v9777_v46, %v4441_v24  ;;  %11197 = vmatprep.subr.bf16.mxu0 %v11196_v59  ;;  %v8529_v46 = vld [vmem:[%s14856_s3 + $0xb8] sm:$0xff]  ;;  %v11300_v24 = vpack.c.bf16 %v8559_v34, %v8558_v5  ;;  %v8610_v34 = vld [vmem:[%s14851_s29 + $0x440] sm:$0xff] }
 0x623   :  { %v9780_v9 = vpop.f32.mrb[40].mxu1 }
 0x624   :  { %11199 = vmatpush3.bf16.msra.mxu0 %v11196_v59  ;;  %v4451_v33 = vpop.f32.mrb[41].mxu1  ;;  %v11296_v59 = vpack.c.bf16 %v8557_v8, %v8556_v16  ;;  %v8606_v16 = vld [vmem:[%s14851_s29 + $0x420] sm:$0xff]  ;;  %v8607_v8 = vld [vmem:[%s14851_s29 + $0x428] sm:$0xff] }
 0x625   :  { %v11248_v0 = vpack.c.bf16 %v9780_v9, %v4451_v33  ;;  %11201 = vmatprep.subr.bf16.mxu0 %v11200_v49  ;;  %v8562_v33 = vld [vmem:[%s14851_s29 + $0x340] sm:$0xff] }
 0x628   :  { %11203 = vmatpush3.bf16.msra.mxu0 %v11200_v49  ;;  %v8561_v49 = vld [vmem:[%s14851_s29 + $0x338] sm:$0xff] }
 0x62b   :  { %9724 = vmatmul.mubr.f32.vlgmr.msra.gmra.mrb[36].mxu0 %v14037_v20 }
 0x62c   :  { %9726 = vmatprep.mubr.f32.mxu0 %v14039_v1 }
 0x62f   :  { %9727 = vmatmul.mubr.f32.gmra.mrb[38].mxu0 %v14049_v61 }
 0x630   :  { %9737 = vmatprep.mubr.msk.f32.mxu0 %vm2076_vm0, %v8478_v58  ;;  %v8550_v58 = vld [vmem:[%s14856_s3 + $0xc0] sm:$0xff] }
 0x63f   :  { %v9829_v12 = vpop.f32.mrb[42].mxu1 }
 0x640   :  { %v4649_v17 = vpop.f32.mrb[43].mxu1 }
 0x641   :  { %v11284_v41 = vpack.c.bf16 %v9829_v12, %v4649_v17  ;;  %v8564_v17 = vld [vmem:[%s14851_s29 + $0x350] sm:$0xff] }
 0x643   :  { %v9832_v63 = vpop.f32.mrb[44].mxu1 }
 0x644   :  { %v4659_v54 = vpop.f32.mrb[45].mxu1 }
 0x645   :  { %v11288_v19 = vpack.c.bf16 %v9832_v63, %v4659_v54  ;;  %v8566_v54 = vld [vmem:[%s14851_s29 + $0x360] sm:$0xff] }
 0x65f   :  { %v9933_v15 = vpop.f32.mrb[46].mxu1 }
 0x660   :  { %v5065_v56 = vpop.f32.mrb[47].mxu1 }
 0x661   :  { %v14175_v28 = vpack.c.bf16 %v9933_v15, %v5065_v56  ;;  %v8568_v56 = vld [vmem:[%s14851_s29 + $0x370] sm:$0xff] }
 0x663   :  { %v9936_v31 = vpop.f32.mrb[48].mxu1 }
 0x664   :  { %v5075_v6 = vpop.f32.mrb[49].mxu1 }
 0x665   :  { %v14177_v50 = vpack.c.bf16 %v9936_v31, %v5075_v6  ;;  %v8569_v31 = vld [vmem:[%s14851_s29 + $0x378] sm:$0xff] }
 0x666   :  { %v11320_v6 = vpack.c.bf16 %v8569_v31, %v8568_v56 }
 0x6fe   :  { %v9725_v44 = vpop.f32.mrb[36].mxu0 }
 0x6ff   :  { %v4233_v10 = vpop.f32.mrb[37].mxu0 }
 0x700   :  { %v11204_v26 = vpack.c.bf16 %v9725_v44, %v4233_v10 }
 0x702   :  { %v9728_v53 = vpop.f32.mrb[38].mxu0  ;;  %11205 = vmatprep.subr.bf16.mxu0 %v11204_v26 }
 0x703   :  { %v4243_v57 = vpop.f32.mrb[39].mxu0  ;;  %11207 = vmatpush3.bf16.msra.mxu0 %v11204_v26 }
 0x704   :  { %v11208_v21 = vpack.c.bf16 %v9728_v53, %v4243_v57 }
 0x706   :  { %11209 = vmatprep.subr.bf16.mxu0 %v11208_v21 }
 0x707   :  { %11211 = vmatpush3.bf16.msra.mxu0 %v11208_v21 }
 0x708   :  { %11245 = vmatprep.subr.bf16.mxu0 %v11244_v51 }
 0x70a   :  { %9738 = vmatmul.mubr.msk.f32.vlgmr.msra.gmra.mrb[32].mxu0 %vm2076_vm0, %v8479_v7  ;;  %v8551_v7 = vld [vmem:[%s14856_s3 + $0xc8] sm:$0xff] }
 0x70b   :  { %11247 = vmatpush3.bf16.msra.mxu0 %v11244_v51  ;;  %9740 = vmatprep.mubr.msk.f32.mxu0 %vm2076_vm0, %v8480_v29  ;;  %v8560_v51 = vld [vmem:[%s14851_s29 + $0x330] sm:$0xff] }
 0x70c   :  { %11249 = vmatprep.subr.bf16.mxu0 %v11248_v0  ;;  %v11304_v9 = vpack.c.bf16 %v8561_v49, %v8560_v51  ;;  %v8552_v29 = vld [vmem:[%s14856_s3 + $0xd0] sm:$0xff]  ;;  %v8613_v49 = vld [vmem:[%s14851_s29 + $0x458] sm:$0xff] }
 0x70d   :  { %v8612_v51 = vld [vmem:[%s14851_s29 + $0x450] sm:$0xff] }
 0x70e   :  { %9741 = vmatmul.mubr.msk.f32.gmra.mrb[34].mxu0 %vm2076_vm0, %v8481_v32  ;;  %v8602_v32 = vld [vmem:[%s14851_s29 + $0x400] sm:$0xff] }
 0x70f   :  { %11251 = vmatpush3.bf16.msra.mxu0 %v11248_v0  ;;  %9789 = vmatprep.mubr.msk.f32.mxu0 %vm2076_vm0, %v8502_v62  ;;  %v8563_v0 = vld [vmem:[%s14851_s29 + $0x348] sm:$0xff] }
 0x710   :  { %11285 = vmatprep.subr.bf16.mxu0 %v11284_v41  ;;  %v11308_v12 = vpack.c.bf16 %v8563_v0, %v8562_v33  ;;  %v8603_v62 = vld [vmem:[%s14851_s29 + $0x408] sm:$0xff]  ;;  %v8614_v33 = vld [vmem:[%s14851_s29 + $0x460] sm:$0xff] }
 0x711   :  { %v11372_v45 = vpack.c.bf16 %v8603_v62, %v8602_v32  ;;  %v8615_v0 = vld [vmem:[%s14851_s29 + $0x468] sm:$0xff]  ;;  %v7540_v32 = vld [vmem:[%s14861_s22 + $0x10] sm:$0xff]  ;;  %v7650_v62 = vld [vmem:[%s14862_s27] sm:$0xf] }
 0x712   :  { %9790 = vmatmul.mubr.msk.f32.vlgmr.msra.gmra.mrb[32].mxu0 %vm2076_vm0, %v8503_v13  ;;  %v8553_v13 = vld [vmem:[%s14856_s3 + $0xd8] sm:$0xff] }
 0x713   :  { %11287 = vmatpush3.bf16.msra.mxu0 %v11284_v41  ;;  %9792 = vmatprep.mubr.msk.f32.mxu0 %vm2076_vm0, %v8504_v35  ;;  %v8565_v41 = vld [vmem:[%s14851_s29 + $0x358] sm:$0xff]  ;;  %v8574_v35 = vld [vmem:[%s14856_s3 + $0xe0] sm:$0xff] }
 0x714   :  { %11289 = vmatprep.subr.bf16.mxu0 %v11288_v19  ;;  %v11312_v63 = vpack.c.bf16 %v8565_v41, %v8564_v17  ;;  %v8617_v17 = vld [vmem:[%s14851_s29 + $0x478] sm:$0xff] }
 0x716   :  { %9793 = vmatmul.mubr.msk.f32.gmra.mrb[34].mxu0 %vm2076_vm0, %v8505_v39  ;;  %v8605_v39 = vld [vmem:[%s14851_s29 + $0x418] sm:$0xff] }
 0x717   :  { %11291 = vmatpush3.bf16.msra.mxu0 %v11288_v19  ;;  %9841 = vmatprep.mubr.msk.f32.mxu0 %vm2076_vm0, %v8526_v38  ;;  %v8567_v19 = vld [vmem:[%s14851_s29 + $0x368] sm:$0xff]  ;;  %v8576_v38 = vld [vmem:[%s14856_s3 + $0xf0] sm:$0xff] }
 0x718   :  { %11293 = vmatprep.subr.bf16.mxu0 %v11292_v25  ;;  %v11316_v15 = vpack.c.bf16 %v8567_v19, %v8566_v54 }
 0x71a   :  { %9842 = vmatmul.mubr.msk.f32.vlgmr.msra.gmra.mrb[32].mxu0 %vm2076_vm0, %v8527_v36  ;;  %v8577_v36 = vld [vmem:[%s14856_s3 + $0xf8] sm:$0xff] }
 0x71b   :  { %11295 = vmatpush3.bf16.msra.mxu0 %v11292_v25  ;;  %9844 = vmatprep.mubr.msk.f32.mxu0 %vm2076_vm0, %v8528_v22  ;;  %v11376_v25 = vpack.c.bf16 %v8605_v39, %v8604_v4  ;;  %v8608_v22 = vld [vmem:[%s14851_s29 + $0x430] sm:$0xff]  ;;  %v7541_v4 = vld [vmem:[%s14861_s22 + $0x18] sm:$0xff] }
 0x71c   :  { %11297 = vmatprep.subr.bf16.mxu0 %v11296_v59 }
 0x71e   :  { %9845 = vmatmul.mubr.msk.f32.gmra.mrb[34].mxu0 %vm2076_vm0, %v8529_v46  ;;  %v8611_v46 = vld [vmem:[%s14851_s29 + $0x448] sm:$0xff] }
 0x71f   :  { %11299 = vmatpush3.bf16.msra.mxu0 %v11296_v59  ;;  %9879 = vmatprep.mubr.f32.mxu0 %v14035_v48  ;;  %v8609_v59 = vld [vmem:[%s14851_s29 + $0x438] sm:$0xff] }
 0x720   :  { %11301 = vmatprep.subr.bf16.mxu0 %v11300_v24  ;;  %v11384_v5 = vpack.c.bf16 %v8609_v59, %v8608_v22 }
 0x723   :  { %11303 = vmatpush3.bf16.msra.mxu0 %v11300_v24  ;;  %v11388_v24 = vpack.c.bf16 %v8611_v46, %v8610_v34 }
 0x724   :  { %11305 = vmatprep.subr.bf16.mxu0 %v11304_v9 }
 0x727   :  { %11307 = vmatpush3.bf16.msra.mxu0 %v11304_v9  ;;  %v11392_v9 = vpack.c.bf16 %v8613_v49, %v8612_v51  ;;  %v5425_v51 = vld [vmem:[%s14863_s28] sm:$0xf] }
 0x728   :  { %11309 = vmatprep.subr.bf16.mxu0 %v11308_v12 }
 0x72b   :  { %11311 = vmatpush3.bf16.msra.mxu0 %v11308_v12  ;;  %v8616_v12 = vld [vmem:[%s14851_s29 + $0x470] sm:$0xff] }
 0x72c   :  { %11313 = vmatprep.subr.bf16.mxu0 %v11312_v63  ;;  %v11400_v41 = vpack.c.bf16 %v8617_v17, %v8616_v12  ;;  %v5536_v12 = vld [vmem:[#allocation4 + $0x30] sm:$0xff]  ;;  %v5537_v17 = vld [vmem:[#allocation4 + $0x38] sm:$0xff] }
 0x72f   :  { %11315 = vmatpush3.bf16.msra.mxu0 %v11312_v63  ;;  %v8598_v63 = vld [vmem:[%s14856_s3 + $0x100] sm:$0xff] }
 0x730   :  { %11317 = vmatprep.subr.bf16.mxu0 %v11316_v15 }
 0x733   :  { %11319 = vmatpush3.bf16.msra.mxu0 %v11316_v15 }
 0x734   :  { %11321 = vmatprep.subr.bf16.mxu0 %v11320_v6 }
 0x737   :  { %11323 = vmatpush3.bf16.msra.mxu0 %v11320_v6  ;;  %v8601_v6 = vld [vmem:[%s14856_s3 + $0x118] sm:$0xff] }
 0x73a   :  { %9880 = vmatmul.mubr.f32.vlgmr.msra.gmra.mrb[40].mxu0 %v14037_v20 }
 0x73b   :  { %9882 = vmatprep.mubr.f32.mxu0 %v14039_v1 }
 0x73e   :  { %9883 = vmatmul.mubr.f32.gmra.mrb[42].mxu0 %v14049_v61 }
 0x73f   :  { %9893 = vmatprep.mubr.msk.f32.mxu0 %vm2076_vm0, %v8550_v58  ;;  %v5426_v58 = vld [vmem:[%s14857_s8] sm:$0xf] }
 0x740   :  { %5429 = vperm.xlu1 %11903, %v5426_v58   ;;  %v5545_v58 = vld [vmem:[#allocation4 + $0x78] sm:$0xff] }
 0x80d   :  { %v9881_v44 = vpop.f32.mrb[40].mxu0 }
 0x80e   :  { %v4857_v10 = vpop.f32.mrb[41].mxu0 }
 0x80f   :  { %v11324_v26 = vpack.c.bf16 %v9881_v44, %v4857_v10  ;;  %v5546_v44 = vld [vmem:[%s14858_s14] sm:$0xf] }
 0x810   :  { %v5624_v10 = vld [vmem:[%s14859_s12] sm:$0xff]  ;;  %5549 = vperm.xlu0 %11904, %v5546_v44  }
 0x811   :  { %v9884_v53 = vpop.f32.mrb[42].mxu0  ;;  %11325 = vmatprep.subr.bf16.mxu0 %v11324_v26  ;;  %5630 = vperm.xlu1 %11903, %v5624_v10  }
 0x812   :  { %v4867_v57 = vpop.f32.mrb[43].mxu0  ;;  %11327 = vmatpush3.bf16.msra.mxu0 %v11324_v26  ;;  %v5625_v26 = vld [vmem:[%s14859_s12 + $0x8] sm:$0xff] }
 0x813   :  { %v11328_v21 = vpack.c.bf16 %v9884_v53, %v4867_v57  ;;  %v5626_v53 = vld [vmem:[%s14859_s12 + $0x10] sm:$0xff]  ;;  %v5627_v57 = vld [vmem:[%s14859_s12 + $0x18] sm:$0xff] }
 0x814   :  { %5635 = vperm.xlu0 %11904, %v5625_v26  }
 0x815   :  { %11329 = vmatprep.subr.bf16.mxu0 %v11328_v21  ;;  %11905 = vset.pattern.permute.xlu1 %v14839_v55 }
 0x816   :  { %11331 = vmatpush3.bf16.msra.mxu0 %v11328_v21  ;;  %5657 = vperm.xlu1 %11905, %v5624_v10   ;;  %v5740_v21 = vld [vmem:[%s14860_s18] sm:$0xff] }
 0x817   :  { %11365 = vmatprep.subr.bf16.mxu0 %v14175_v28 }
 0x818   :  { %11908 = vset.pattern.permute.xlu0 %v14839_v55 }
 0x819   :  { %9894 = vmatmul.mubr.msk.f32.vlgmr.msra.gmra.mrb[32].mxu0 %vm2076_vm0, %v8551_v7  ;;  %5665 = vperm.xlu0 %11908, %v5626_v53   ;;  %v5742_v7 = vld [vmem:[%s14860_s18 + $0x10] sm:$0xff] }
 0x81a   :  { %11367 = vmatpush3.bf16.msra.mxu0 %v14175_v28  ;;  %9896 = vmatprep.mubr.msk.f32.mxu0 %vm2076_vm0, %v8552_v29  ;;  %v8575_v28 = vld [vmem:[%s14856_s3 + $0xe8] sm:$0xff]  ;;  %v7538_v29 = vld [vmem:[%s14861_s22] sm:$0xff] }
 0x81b   :  { %11369 = vmatprep.subr.bf16.mxu0 %v14177_v50  ;;  %5661 = vperm.xlu1 %11905, %v5625_v26  }
 0x81d   :  { %9897 = vmatmul.mubr.msk.f32.gmra.mrb[34].mxu0 %vm2076_vm0, %v8553_v13  ;;  %5669 = vperm.xlu0 %11908, %v5627_v57   ;;  %v5741_v13 = vld [vmem:[%s14860_s18 + $0x8] sm:$0xff] }
 0x81e   :  { %11371 = vmatpush3.bf16.msra.mxu0 %v14177_v50  ;;  %9945 = vmatprep.mubr.msk.f32.mxu0 %vm2076_vm0, %v8574_v35  ;;  %v11380_v50 = vpack.c.bf16 %v8607_v8, %v8606_v16  ;;  %v5743_v35 = vld [vmem:[%s14860_s18 + $0x18] sm:$0xff] }
 0x81f   :  { %11373 = vmatprep.subr.bf16.mxu0 %v11372_v45  ;;  %11906 = vset.pattern.permute.xlu1 %v14838_v40 }
 0x820   :  { %5689 = vperm.xlu1 %11906, %v5625_v26  }
 0x821   :  { %9946 = vmatmul.mubr.msk.f32.vlgmr.msra.gmra.mrb[32].mxu0 %vm2076_vm0, %v8575_v28  ;;  %11911 = vset.pattern.permute.xlu0 %v14838_v40 }
 0x822   :  { %11375 = vmatpush3.bf16.msra.mxu0 %v11372_v45  ;;  %9948 = vmatprep.mubr.msk.f32.mxu0 %vm2076_vm0, %v8576_v38  ;;  %v7539_v45 = vld [vmem:[%s14861_s22 + $0x8] sm:$0xff] }
 0x823   :  { %11377 = vmatprep.subr.bf16.mxu0 %v11376_v25  ;;  %5685 = vperm.xlu0 %11911, %v5624_v10  }
 0x824   :  { %11907 = vset.pattern.permute.xlu1 %v14842_v43 }
 0x825   :  { %9949 = vmatmul.mubr.msk.f32.gmra.mrb[34].mxu0 %vm2076_vm0, %v8577_v36  ;;  %5640 = vperm.xlu1 %11907, %v5626_v53  }
 0x826   :  { %11379 = vmatpush3.bf16.msra.mxu0 %v11376_v25  ;;  %9983 = vmatprep.mubr.f32.mxu0 %v14035_v48  ;;  %v11396_v48 = vpack.c.bf16 %v8615_v0, %v8614_v33  ;;  %v5533_v33 = vld [vmem:[#allocation4 + $0x18] sm:$0xff]  ;;  %v5535_v0 = vld [vmem:[#allocation4 + $0x28] sm:$0xff] }
 0x827   :  { %11381 = vmatprep.subr.bf16.mxu0 %v11380_v50  ;;  %5693 = vperm.xlu0 %11911, %v5626_v53  }
 0x829   :  { %11909 = vset.pattern.permute.xlu1 %v14841_v60 }
 0x82a   :  { %11383 = vmatpush3.bf16.msra.mxu0 %v11380_v50  ;;  %5713 = vperm.xlu1 %11909, %v5624_v10   ;;  %v5776_v10 = vld [vmem:[#allocation6] sm:$0xff] }
 0x82b   :  { %11385 = vmatprep.subr.bf16.mxu0 %v11384_v5  ;;  %11915 = vset.pattern.permute.xlu0 %v14842_v43 }
 0x82c   :  { %5746 = vperm.xlu0 %11915, %v5740_v21   ;;  %v5884_v21 = vld [vmem:[#allocation6 + $0x28] sm:$0xff] }
 0x82e   :  { %11387 = vmatpush3.bf16.msra.mxu0 %v11384_v5  ;;  %11910 = vset.pattern.permute.xlu1 %v14842_v43 }
 0x82f   :  { %11389 = vmatprep.subr.bf16.mxu0 %v11388_v24  ;;  %5645 = vperm.xlu1 %11910, %v5627_v57  }
 0x830   :  { %5756 = vperm.xlu0 %11915, %v5742_v7  }
 0x832   :  { %11391 = vmatpush3.bf16.msra.mxu0 %v11388_v24  ;;  %v5531_v24 = vld [vmem:[#allocation4 + $0x8] sm:$0xff] }
 0x833   :  { %11393 = vmatprep.subr.bf16.mxu0 %v11392_v9  ;;  %11912 = vset.pattern.permute.xlu1 %v14841_v60 }
 0x834   :  { %7544 = vperm.xlu0 %11915, %v7538_v29   ;;  %5717 = vperm.xlu1 %11912, %v5625_v26   ;;  %v5777_v26 = vld [vmem:[#allocation6 + $0x8] sm:$0xff]  ;;  %v5778_v29 = vld [vmem:[#allocation6 + $0x10] sm:$0xff] }
 0x836   :  { %11395 = vmatpush3.bf16.msra.mxu0 %v11392_v9  ;;  %v5532_v9 = vld [vmem:[#allocation4 + $0x10] sm:$0xff] }
 0x837   :  { %11397 = vmatprep.subr.bf16.mxu0 %v11396_v48 }
 0x838   :  { %7554 = vperm.xlu0 %11915, %v7540_v32   ;;  %11913 = vset.pattern.permute.xlu1 %v14838_v40  ;;  %v5779_v32 = vld [vmem:[#allocation6 + $0x18] sm:$0xff] }
 0x839   :  { %5697 = vperm.xlu1 %11913, %v5627_v57  }
 0x83a   :  { %11399 = vmatpush3.bf16.msra.mxu0 %v11396_v48 }
 0x83b   :  { %11401 = vmatprep.subr.bf16.mxu0 %v11400_v41 }
 0x83c   :  { %7653 = vperm.xlu0 %11915, %v7650_v62  }
 0x83d   :  { %11914 = vset.pattern.permute.xlu1 %v14841_v60 }
 0x83e   :  { %11403 = vmatpush3.bf16.msra.mxu0 %v11400_v41  ;;  %5721 = vperm.xlu1 %11914, %v5626_v53   ;;  %v11428_v41 = vpack.c.bf16 %v5537_v17, %v5536_v12  ;;  %v5883_v53 = vld [vmem:[#allocation6 + $0x20] sm:$0xff] }
 0x83f   :  { %v11450_v7 = vpack.c.bf16 %v5884_v21, %v5883_v53 }
 0x840   :  { %11918 = vset.pattern.permute.xlu0 %v14838_v40 }
 0x841   :  { %9984 = vmatmul.mubr.f32.vlgmr.msra.gmra.mrb[44].mxu0 %v14037_v20  ;;  %7664 = vperm.xlu0 %11918, %v7650_v62  }
 0x842   :  { %9986 = vmatprep.mubr.f32.mxu0 %v14039_v1  ;;  %v8599_v1 = vld [vmem:[%s14856_s3 + $0x108] sm:$0xff]  ;;  %5725 = vperm.xlu1 %11914, %v5627_v57   ;;  %v11442_v57 = vpack.c.bf16 %v5777_v26, %v5776_v10 }
 0x845   :  { %9987 = vmatmul.mubr.f32.gmra.mrb[46].mxu0 %v14049_v61  ;;  %v8600_v61 = vld [vmem:[%s14856_s3 + $0x110] sm:$0xff]  ;;  %11921 = vset.pattern.permute.xlu0 %v14842_v43 }
 0x846   :  { %9997 = vmatprep.mubr.msk.f32.mxu0 %vm2076_vm0, %v8598_v63  ;;  %11916 = vset.pattern.permute.xlu1 %v14842_v43  ;;  %v5538_v63 = vld [vmem:[#allocation4 + $0x40] sm:$0xff] }
 0x847   :  { %5751 = vperm.xlu1 %11916, %v5741_v13   ;;  %v11446_v13 = vpack.c.bf16 %v5779_v32, %v5778_v29 }
 0x84b   :  { %5761 = vperm.xlu1 %11916, %v5743_v35   ;;  %v5886_v35 = vld [vmem:[#allocation6 + $0x38] sm:$0xff] }
 0x84f   :  { %7549 = vperm.xlu1 %11916, %v7539_v45  }
 0x853   :  { %7559 = vperm.xlu1 %11916, %v7541_v4   ;;  %v6173_v4 = vld [vmem:[#allocation6 + $0x48] sm:$0xff] }
 0x857   :  { %11917 = vset.pattern.permute.xlu1 %v14839_v55 }
 0x858   :  { %7658 = vperm.xlu1 %11917, %v7650_v62  }
 0x85c   :  { %11919 = vset.pattern.permute.xlu1 %v14841_v60 }
 0x85d   :  { %7670 = vperm.xlu1 %11919, %v7650_v62   ;;  %v5885_v62 = vld [vmem:[#allocation6 + $0x30] sm:$0xff] }
 0x85e   :  { %v11454_v45 = vpack.c.bf16 %v5886_v35, %v5885_v62 }
 0x861   :  { %11920 = vset.pattern.permute.xlu1 %v14842_v43 }
 0x914   :  { %v9985_v54 = vpop.f32.mrb[44].mxu0 }
 0x915   :  { %v5273_v19 = vpop.f32.mrb[45].mxu0 }
 0x916   :  { %v11404_v15 = vpack.c.bf16 %v9985_v54, %v5273_v19  ;;  %v5539_v54 = vld [vmem:[#allocation4 + $0x48] sm:$0xff] }
 0x917   :  { %v11431_v19 = vpack.c.bf16 %v5539_v54, %v5538_v63 }
 0x918   :  { %v9988_v56 = vpop.f32.mrb[46].mxu0  ;;  %11405 = vmatprep.subr.bf16.mxu0 %v11404_v15 }
 0x919   :  { %v5283_v31 = vpop.f32.mrb[47].mxu0  ;;  %11407 = vmatpush3.bf16.msra.mxu0 %v11404_v15  ;;  %v5540_v15 = vld [vmem:[#allocation4 + $0x50] sm:$0xff] }
 0x91a   :  { %v11408_v20 = vpack.c.bf16 %v9988_v56, %v5283_v31  ;;  %v5541_v56 = vld [vmem:[#allocation4 + $0x58] sm:$0xff] }
 0x91b   :  { %v11434_v31 = vpack.c.bf16 %v5541_v56, %v5540_v15 }
 0x91c   :  { %11409 = vmatprep.subr.bf16.mxu0 %v11408_v20 }
 0x91d   :  { %11411 = vmatpush3.bf16.msra.mxu0 %v11408_v20  ;;  %v5542_v20 = vld [vmem:[#allocation4 + $0x60] sm:$0xff] }
 0x91e   :  { %11443 = vmatprep.subr.bf16.mxu0 %v11442_v57 }
 0x920   :  { %9998 = vmatmul.mubr.msk.f32.vlgmr.msra.gmra.mrb[32].mxu0 %vm2076_vm0, %v8599_v1  ;;  %v5543_v1 = vld [vmem:[#allocation4 + $0x68] sm:$0xff] }
 0x921   :  { %10000 = vmatprep.mubr.msk.f32.mxu0 %vm2076_vm0, %v8600_v61  ;;  %v11437_v61 = vpack.c.bf16 %v5543_v1, %v5542_v20  ;;  %11445 = vmatpush3.bf16.msra.mxu0 %v11442_v57 }
 0x922   :  { %11447 = vmatprep.subr.bf16.mxu0 %v11446_v13 }
 0x924   :  { %10001 = vmatmul.mubr.msk.f32.gmra.mrb[34].mxu0 %vm2076_vm0, %v8601_v6  ;;  %v5544_v6 = vld [vmem:[#allocation4 + $0x70] sm:$0xff] }
 0x925   :  { %v11440_v44 = vpack.c.bf16 %v5545_v58, %v5544_v6  ;;  %11449 = vmatpush3.bf16.msra.mxu0 %v11446_v13 }
 0x9f3   :  { %v9999_v39 = vpop.f32.mrb[32].mxu0 }
 0x9f4   :  { %v5418_v28 = vadd.f32 %v9999_v39, %v14013_v11  ;;  %v5370_v38 = vpop.f32.mrb[33].mxu0  ;;  %v5530_v11 = vld [vmem:[#allocation4] sm:$0xff] }
 0x9f5   :  { %v5417_v25 = vadd.f32 %v14011_v23, %v5370_v38  ;;  %v11419_v49 = vpack.c.bf16 %v5531_v24, %v5530_v11 }
 0x9f6   :  { %v5422_v16 = vmax.f32 %v5418_v28, 0.0  ;;  %v5430_v28 = vpop.permute.xlu1 %5429 }
 0x9f7   :  { %v5421_v8 = vmax.f32 %v5417_v25, 0.0  ;;  %v10002_v36 = vpop.f32.mrb[34].mxu0 }
 0x9f8   :  { %v5420_v50 = vadd.f32 %v10002_v36, %v14017_v30  ;;  %v5380_v22 = vpop.f32.mrb[35].mxu0  ;;  %v11422_v30 = vpack.c.bf16 %v5533_v33, %v5532_v9 }
 0x9f9   :  { %v11413_v59 = vpack.c.bf16 %v5422_v16, %v5421_v8  ;;  %v5419_v5 = vadd.f32 %v14015_v18, %v5380_v22  ;;  %v5534_v18 = vld [vmem:[#allocation4 + $0x20] sm:$0xff]  ;;  %v5550_v22 = vpop.permute.xlu0 %5549 }
 0x9fa   :  { %v5424_v34 = vmax.f32 %v5420_v50, 0.0  ;;  %v11425_v48 = vpack.c.bf16 %v5535_v0, %v5534_v18  ;;  %v5631_v38 = vpop.permute.xlu1 %5630 }
 0x9fb   :  { %v5423_v46 = vmax.f32 %v5419_v5, 0.0  ;;  %11414 = vmatpush3.bf16.msra.mxu1 %v11413_v59 }
 0x9fc   :  { %11415 = vmatprep.subr.bf16.mxu1 %v12106_v3 }
 0x9fd   :  { %v11416_v23 = vpack.c.bf16 %v5424_v34, %v5423_v46  ;;  %v5636_v59 = vpop.permute.xlu0 %5635 }
 0x9fe   :  { %v5658_v25 = vpop.permute.xlu1 %5657 }
 0x9ff   :  { %11417 = vmatpush3.bf16.msra.mxu1 %v11416_v23 }
 0xa00   :  { %11418 = vmatprep.subr.bf16.mxu1 %v12106_v3 }
 0xa01   :  { %v5666_v34 = vpop.permute.xlu0 %5665 }
 0xa02   :  { %10012 = vmatmul.mubr.msk.f32.vlgmr.msra.gmra.mrb[50].mxu1 %vm2076_vm0, %v5425_v51  ;;  %v5662_v16 = vpop.permute.xlu1 %5661 }
 0xa03   :  { %11420 = vmatpush3.bf16.msra.mxu1 %v11419_v49  ;;  %10046 = vmatprep.mubr.msk.f32.mxu1 %vm12107_vm1, %v12108_v14 }
 0xa04   :  { %11421 = vmatprep.subr.bf16.mxu1 %v12106_v3 }
 0xa05   :  { %v5670_v11 = vpop.permute.xlu0 %5669 }
 0xa06   :  { %v5690_v8 = vpop.permute.xlu1 %5689 }
 0xa07   :  { %11423 = vmatpush3.bf16.msra.mxu1 %v11422_v30 }
 0xa08   :  { %11424 = vmatprep.subr.bf16.mxu1 %v12106_v3 }
 0xa09   :  { %v5686_v23 = vpop.permute.xlu0 %5685 }
 0xa0a   :  { %v5641_v36 = vpop.permute.xlu1 %5640 }
 0xa0b   :  { %11426 = vmatpush3.bf16.msra.mxu1 %v11425_v48 }
 0xa0c   :  { %11427 = vmatprep.subr.bf16.mxu1 %v12106_v3 }
 0xa0d   :  { %v5694_v49 = vpop.permute.xlu0 %5693 }
 0xa0e   :  { %v5714_v50 = vpop.permute.xlu1 %5713 }
 0xa0f   :  { %11429 = vmatpush3.bf16.msra.mxu1 %v11428_v41  ;;  %v11668_v41 = vadd.f32 %v5550_v22, %v5430_v28 }
 0xa10   :  { %11430 = vmatprep.subr.bf16.mxu1 %v12106_v3 }
 0xa11   :  { %v5747_v33 = vpop.permute.xlu0 %5746 }
 0xa12   :  { %v5646_v5 = vpop.permute.xlu1 %5645 }
 0xa13   :  { %11432 = vmatpush3.bf16.msra.mxu1 %v11431_v19 }
 0xa14   :  { %11433 = vmatprep.subr.bf16.mxu1 %v12106_v3 }
 0xa15   :  { %v5757_v18 = vpop.permute.xlu0 %5756 }
 0xa16   :  { %v5718_v46 = vpop.permute.xlu1 %5717 }
 0xa17   :  { %11435 = vmatpush3.bf16.msra.mxu1 %v11434_v31 }
 0xa18   :  { %11436 = vmatprep.subr.bf16.mxu1 %v12106_v3 }
 0xa19   :  { %v14324_v48 = vpop.permute.xlu0 %7544 }
 0xa1a   :  { %v5698_v24 = vpop.permute.xlu1 %5697 }
 0xa1b   :  { %11438 = vmatpush3.bf16.msra.mxu1 %v11437_v61 }
 0xa1c   :  { %11439 = vmatprep.subr.bf16.mxu1 %v12106_v3 }
 0xa1d   :  { %v14328_v17 = vpop.permute.xlu0 %7554 }
 0xa1e   :  { %v5722_v51 = vpop.permute.xlu1 %5721 }
 0xa1f   :  { %11441 = vmatpush3.bf16.msra.mxu1 %v11440_v44 }
 0xa20   :  { %11451 = vmatprep.subr.bf16.mxu1 %v11450_v7 }
 0xa21   :  { %v7654_v31 = vpop.permute.xlu0 %7653 }
 0xa22   :  { %10047 = vmatmul.mubr.f32.vlgmr.msra.gmra.mrb[50].mxu1 %v14029_v37  ;;  %v6172_v37 = vld [vmem:[#allocation6 + $0x40] sm:$0xff]  ;;  %v5726_v9 = vpop.permute.xlu1 %5725 }
 0xa23   :  { %11453 = vmatpush3.bf16.msra.mxu1 %v11450_v7  ;;  %v14321_v39 = vpack.c.bf16 %v6173_v4, %v6172_v37 }
 0xa24   :  { %11455 = vmatprep.subr.bf16.mxu1 %v11454_v45 }
 0xa25   :  { %v7665_v37 = vpop.permute.xlu0 %7664 }
 0xa26   :  { %v5752_v30 = vpop.permute.xlu1 %5751 }
 0xa27   :  { %11457 = vmatpush3.bf16.msra.mxu1 %v11454_v45 }
 0xa28   :  { %11475 = vmatprep.subr.bf16.mxu1 %v14321_v39 }
 0xa2a   :  { %v5762_v0 = vpop.permute.xlu1 %5761 }
 0xa2e   :  { %v14326_v12 = vpop.permute.xlu1 %7549 }
 0xa32   :  { %v14330_v63 = vpop.permute.xlu1 %7559 }
 0xa36   :  { %v7659_v61 = vpop.permute.xlu1 %7658 }
 0xa3a   :  { %v7671_v22 = vpop.permute.xlu1 %7670 }
 0xaf5   :  { %v5618_v54 = vpop.f32.mrb[50].mxu1 }
 0xaf6   :  { %v11669_v19 = vadd.f32 %v11668_v41, %v5618_v54  ;;  %v10048_v15 = vpop.f32.mrb[51].mxu1 }
 0xaf8   :  { %v14332_v56 = vmax.f32 %v11669_v19, 0.0 }
 0xafa   :  { %v5675_v20 = vrot.slane %v14332_v56, %v14852_v2  ;;  %v5651_v1 = vrot.slane %v14332_v56, %v14853_v52  ;;  %v5703_v6 = vrot.slane %v14332_v56, %v14854_v27  ;;  %v5731_v62 = vrot.slane %v14332_v56, %v14855_v47 }
 0xafc   :  { %v5676_v58 = vmul.f32 %v5675_v20, %v5658_v25  ;;  %v5677_v44 = vmul.f32 %v5675_v20, %v5662_v16  ;;  %v5678_v10 = vmul.f32 %v5675_v20, %v5666_v34  ;;  %v5679_v26 = vmul.f32 %v5675_v20, %v5670_v11 }
 0xafd   :  { %v7661_v53 = vmul.f32 %v7659_v61, %v5675_v20  ;;  %v5652_v57 = vmul.f32 %v5651_v1, %v5631_v38  ;;  %v5653_v21 = vmul.f32 %v5651_v1, %v5636_v59  ;;  %v5654_v7 = vmul.f32 %v5651_v1, %v5641_v36 }
 0xafe   :  { %v5655_v29 = vmul.f32 %v5651_v1, %v5646_v5  ;;  %v7656_v32 = vmul.f32 %v7654_v31, %v5651_v1  ;;  %v5704_v25 = vmul.f32 %v5703_v6, %v5686_v23  ;;  %v5705_v16 = vmul.f32 %v5703_v6, %v5690_v8 }
 0xaff   :  { %v5680_v13 = vadd.f32 %v5676_v58, %v5652_v57  ;;  %v5681_v35 = vadd.f32 %v5677_v44, %v5653_v21  ;;  %v5682_v45 = vadd.f32 %v5678_v10, %v5654_v7  ;;  %v5706_v34 = vmul.f32 %v5703_v6, %v5694_v49  ;;  %v6370_v57 = vld [vmem:[#allocation6 + $0x70] sm:$0xff]  ;;  %v6371_v21 = vld [vmem:[#allocation6 + $0x78] sm:$0xff] }
 0xb00   :  { %v5683_v4 = vadd.f32 %v5679_v26, %v5655_v29  ;;  %v7662_v28 = vadd.f32 %v7661_v53, %v7656_v32  ;;  %v5707_v11 = vmul.f32 %v5703_v6, %v5698_v24  ;;  %v5732_v41 = vmul.f32 %v5731_v62, %v5714_v50  ;;  %v6174_v50 = vld [vmem:[#allocation6 + $0x50] sm:$0xff]  ;;  %v6564_v29 = vld [vmem:[#allocation6 + $0x80] sm:$0xff]  ;;  %v6565_v32 = vld [vmem:[#allocation6 + $0x88] sm:$0xff] }
 0xb01   :  { %v5733_v38 = vmul.f32 %v5731_v62, %v5718_v46  ;;  %v5734_v59 = vmul.f32 %v5731_v62, %v5722_v51  ;;  %v7667_v36 = vmul.f32 %v7665_v37, %v5703_v6  ;;  %v5708_v5 = vadd.f32 %v5704_v25, %v5680_v13  ;;  %v6175_v46 = vld [vmem:[#allocation6 + $0x58] sm:$0xff]  ;;  %v6761_v37 = vld [vmem:[#allocation6 + $0xa8] sm:$0xff] }
 0xb02   :  { %v5709_v54 = vadd.f32 %v5705_v16, %v5681_v35  ;;  %v5710_v19 = vadd.f32 %v5706_v34, %v5682_v45  ;;  %v5711_v15 = vadd.f32 %v5707_v11, %v5683_v4  ;;  %v5735_v31 = vmul.f32 %v5731_v62, %v5726_v9  ;;  %v6567_v13 = vld [vmem:[#allocation6 + $0x98] sm:$0xff]  ;;  %v6760_v45 = vld [vmem:[#allocation6 + $0xa0] sm:$0xff]  ;;  %v6957_v34 = vld [vmem:[#allocation6 + $0xc8] sm:$0xff] }
 0xb03   :  { %v7673_v20 = vmul.f32 %v7671_v22, %v5731_v62  ;;  %v7668_v1 = vadd.f32 %v7667_v36, %v7662_v28  ;;  %v5736_v61 = vadd.f32 %v5732_v41, %v5708_v5  ;;  %v11478_v9 = vpack.c.bf16 %v6175_v46, %v6174_v50  ;;  %v6566_v62 = vld [vmem:[#allocation6 + $0x90] sm:$0xff]  ;;  %v6763_v22 = vld [vmem:[#allocation6 + $0xb8] sm:$0xff]  ;;  %v6956_v16 = vld [vmem:[#allocation6 + $0xc0] sm:$0xff] }
 0xb04   :  { %v5737_v58 = vadd.f32 %v5733_v38, %v5709_v54  ;;  %v5738_v44 = vadd.f32 %v5734_v59, %v5710_v19  ;;  %v5739_v10 = vadd.f32 %v5735_v31, %v5711_v15  ;;  %v11494_v7 = vpack.c.bf16 %v6371_v21, %v6370_v57  ;;  %v6762_v28 = vld [vmem:[#allocation6 + $0xb0] sm:$0xff]  ;;  %v6959_v38 = vld [vmem:[#allocation6 + $0xd8] sm:$0xff]  ;;  %v7152_v36 = vld [vmem:[#allocation6 + $0xe0] sm:$0xff] }
 0xb05   :  { %v14342_v26 = vadd.f32 %v7673_v20, %v7668_v1  ;;  %v5764_v8 = vadd.f32 %v5747_v33, %v5736_v61  ;;  %v6368_v33 = vld [vmem:[#allocation6 + $0x60] sm:$0xff]  ;;  %v11510_v35 = vpack.c.bf16 %v6567_v13, %v6566_v62  ;;  %v11522_v4 = vpack.c.bf16 %v6761_v37, %v6760_v45  ;;  %v6958_v41 = vld [vmem:[#allocation6 + $0xd0] sm:$0xff]  ;;  %v7153_v5 = vld [vmem:[#allocation6 + $0xe8] sm:$0xff] }
 0xb06   :  { %v5765_v23 = vadd.f32 %v5752_v30, %v5737_v58  ;;  %v5766_v24 = vadd.f32 %v5757_v18, %v5738_v44  ;;  %v5767_v6 = vadd.f32 %v5762_v0, %v5739_v10  ;;  %v6369_v30 = vld [vmem:[#allocation6 + $0x68] sm:$0xff]  ;;  %v11526_v25 = vpack.c.bf16 %v6763_v22, %v6762_v28  ;;  %v7154_v19 = vld [vmem:[#allocation6 + $0xf0] sm:$0xff]  ;;  %v7155_v15 = vld [vmem:[#allocation6 + $0xf8] sm:$0xff] }
 0xb07   :  { %v14344_v51 = vmax.f32 %v5764_v8, 0.0  ;;  %v11490_v0 = vpack.c.bf16 %v6369_v30, %v6368_v33  ;;  %v11538_v11 = vpack.c.bf16 %v6957_v34, %v6956_v16  ;;  %v11542_v59 = vpack.c.bf16 %v6959_v38, %v6958_v41  ;;  %v7348_v20 = vld [vmem:[#allocation6 + $0x100] sm:$0xff]  ;;  %v7349_v1 = vld [vmem:[#allocation6 + $0x108] sm:$0xff]  ;;  %v7350_v58 = vld [vmem:[#allocation6 + $0x110] sm:$0xff] }
 0xb08   :  { %v14346_v49 = vmax.f32 %v5765_v23, 0.0  ;;  %v14348_v53 = vmax.f32 %v5766_v24, 0.0  ;;  %v14362_v18 = vmax.f32 %v5767_v6, 0.0  ;;  %v11554_v54 = vpack.c.bf16 %v7153_v5, %v7152_v36  ;;  %v7351_v44 = vld [vmem:[#allocation6 + $0x118] sm:$0xff]  ;;  %v8627_v8 = vld [vmem:[%s14864_s1 + $0x20] sm:$0xff]  ;;  %v8628_v57 = vld [vmem:[%s14864_s1 + $0x28] sm:$0xff] }
 0xb09   :  { %10057 = vmatprep.mubr.msk.f32.mxu0 %vm2076_vm0, %v14344_v51  ;;  %10071 = vmatprep.mubr.msk.f32.mxu1 %vm2076_vm0, %v14344_v51  ;;  %v11558_v31 = vpack.c.bf16 %v7155_v15, %v7154_v19  ;;  %v11570_v61 = vpack.c.bf16 %v7349_v1, %v7348_v20  ;;  %v11574_v10 = vpack.c.bf16 %v7351_v44, %v7350_v58  ;;  %v5772_v13 = vld [vmem:[%s14864_s1] sm:$0xff]  ;;  %v5773_v37 = vld [vmem:[%s14864_s1 + $0x8] sm:$0xff]  ;;  %v5774_v28 = vld [vmem:[%s14864_s1 + $0x10] sm:$0xff] }
 0xb0a   :  { %10058 = vmatmul.mubr.msk.f32.vlgmr.msra.gmra.mrb[48].mxu0 %vm2076_vm0, %v14346_v49  ;;  %10072 = vmatmul.mubr.msk.f32.vlgmr.msra.gmra.mrb[52].mxu1 %vm2076_vm0, %v14346_v49  ;;  %v5775_v16 = vld [vmem:[%s14864_s1 + $0x18] sm:$0xff]  ;;  %v8645_v5 = vld [vmem:[%s14864_s1 + $0x50] sm:$0xff]  ;;  %v8655_v20 = vld [vmem:[%s14864_s1 + $0x60] sm:$0xff] }
 0xb0b   :  { %10060 = vmatprep.mubr.msk.f32.mxu0 %vm2076_vm0, %v14348_v53  ;;  %10074 = vmatprep.mubr.msk.f32.mxu1 %vm2076_vm0, %v14348_v53  ;;  %v8646_v15 = vld [vmem:[%s14864_s1 + $0x58] sm:$0xff]  ;;  %v8656_v58 = vld [vmem:[%s14864_s1 + $0x68] sm:$0xff] }
 0xb0c   :  { %11477 = vmatpush3.bf16.msra.mxu1 %v14321_v39  ;;  %v11506_v39 = vpack.c.bf16 %v6565_v32, %v6564_v29 }
 0xb0d   :  { %11479 = vmatprep.subr.bf16.mxu1 %v11478_v9 }
 0xb0e   :  { %10061 = vmatmul.mubr.msk.f32.gmra.mrb[50].mxu0 %vm2076_vm0, %v14362_v18  ;;  %10075 = vmatmul.mubr.msk.f32.gmra.mrb[54].mxu1 %vm2076_vm0, %v14362_v18 }
 0xb0f   :  { %10113 = vmatprep.mubr.msk.f32.mxu1 %vm2076_vm0, %v14344_v51  ;;  %10085 = vmatprep.mubr.msk.f32.mxu0 %vm2076_vm0, %v8627_v8 }
 0xb10   :  { %11481 = vmatpush3.bf16.msra.mxu1 %v11478_v9 }
 0xb11   :  { %11491 = vmatprep.subr.bf16.mxu1 %v11490_v0 }
 0xb13   :  { %10114 = vmatmul.mubr.msk.f32.vlgmr.msra.gmra.mrb[56].mxu1 %vm2076_vm0, %v14346_v49 }
 0xb14   :  { %10116 = vmatprep.mubr.msk.f32.mxu1 %vm2076_vm0, %v14348_v53  ;;  %11493 = vmatpush3.bf16.msra.mxu1 %v11490_v0 }
 0xb15   :  { %11495 = vmatprep.subr.bf16.mxu1 %v11494_v7 }
 0xb17   :  { %10117 = vmatmul.mubr.msk.f32.gmra.mrb[58].mxu1 %vm2076_vm0, %v14362_v18 }
 0xb18   :  { %11497 = vmatpush3.bf16.msra.mxu1 %v11494_v7  ;;  %10141 = vmatprep.mubr.msk.f32.mxu1 %vm2076_vm0, %v14344_v51  ;;  %v8629_v7 = vld [vmem:[%s14864_s1 + $0x30] sm:$0xff] }
 0xb19   :  { %11507 = vmatprep.subr.bf16.mxu1 %v11506_v39 }
 0xb1b   :  { %10142 = vmatmul.mubr.msk.f32.vlgmr.msra.gmra.mrb[60].mxu1 %vm2076_vm0, %v14346_v49 }
 0xb1c   :  { %10144 = vmatprep.mubr.msk.f32.mxu1 %vm2076_vm0, %v14348_v53  ;;  %11509 = vmatpush3.bf16.msra.mxu1 %v11506_v39  ;;  %v8630_v39 = vld [vmem:[%s14864_s1 + $0x38] sm:$0xff] }
 0xb1d   :  { %11511 = vmatprep.subr.bf16.mxu1 %v11510_v35 }
 0xb1f   :  { %10145 = vmatmul.mubr.msk.f32.gmra.mrb[62].mxu1 %vm2076_vm0, %v14362_v18 }
 0xb20   :  { %11513 = vmatpush3.bf16.msra.mxu1 %v11510_v35  ;;  %10169 = vmatprep.mubr.msk.f32.mxu1 %vm2076_vm0, %v14344_v51 }
 0xb21   :  { %11523 = vmatprep.subr.bf16.mxu1 %v11522_v4 }
 0xb23   :  { %10170 = vmatmul.mubr.msk.f32.vlgmr.msra.gmra.mrb[64].mxu1 %vm2076_vm0, %v14346_v49 }
 0xb24   :  { %10172 = vmatprep.mubr.msk.f32.mxu1 %vm2076_vm0, %v14348_v53  ;;  %11525 = vmatpush3.bf16.msra.mxu1 %v11522_v4 }
 0xb25   :  { %11527 = vmatprep.subr.bf16.mxu1 %v11526_v25 }
 0xb27   :  { %10173 = vmatmul.mubr.msk.f32.gmra.mrb[66].mxu1 %vm2076_vm0, %v14362_v18 }
 0xb28   :  { %11529 = vmatpush3.bf16.msra.mxu1 %v11526_v25  ;;  %10197 = vmatprep.mubr.msk.f32.mxu1 %vm2076_vm0, %v14344_v51 }
 0xb29   :  { %11539 = vmatprep.subr.bf16.mxu1 %v11538_v11 }
 0xb2b   :  { %10198 = vmatmul.mubr.msk.f32.vlgmr.msra.gmra.mrb[68].mxu1 %vm2076_vm0, %v14346_v49 }
 0xb2c   :  { %10200 = vmatprep.mubr.msk.f32.mxu1 %vm2076_vm0, %v14348_v53  ;;  %11541 = vmatpush3.bf16.msra.mxu1 %v11538_v11  ;;  %v8643_v11 = vld [vmem:[%s14864_s1 + $0x40] sm:$0xff] }
 0xb2d   :  { %11543 = vmatprep.subr.bf16.mxu1 %v11542_v59 }
 0xb2f   :  { %10201 = vmatmul.mubr.msk.f32.gmra.mrb[70].mxu1 %vm2076_vm0, %v14362_v18 }
 0xb30   :  { %11545 = vmatpush3.bf16.msra.mxu1 %v11542_v59  ;;  %10225 = vmatprep.mubr.msk.f32.mxu1 %vm2076_vm0, %v14344_v51  ;;  %v8644_v59 = vld [vmem:[%s14864_s1 + $0x48] sm:$0xff] }
 0xb31   :  { %11555 = vmatprep.subr.bf16.mxu1 %v11554_v54 }
 0xb33   :  { %10226 = vmatmul.mubr.msk.f32.vlgmr.msra.gmra.mrb[72].mxu1 %vm2076_vm0, %v14346_v49 }
 0xb34   :  { %10228 = vmatprep.mubr.msk.f32.mxu1 %vm2076_vm0, %v14348_v53  ;;  %11557 = vmatpush3.bf16.msra.mxu1 %v11554_v54 }
 0xb35   :  { %11559 = vmatprep.subr.bf16.mxu1 %v11558_v31 }
 0xb37   :  { %10229 = vmatmul.mubr.msk.f32.gmra.mrb[74].mxu1 %vm2076_vm0, %v14362_v18 }
 0xb38   :  { %11561 = vmatpush3.bf16.msra.mxu1 %v11558_v31  ;;  %10253 = vmatprep.mubr.msk.f32.mxu1 %vm2076_vm0, %v14344_v51 }
 0xb39   :  { %11571 = vmatprep.subr.bf16.mxu1 %v11570_v61 }
 0xb3b   :  { %10254 = vmatmul.mubr.msk.f32.vlgmr.msra.gmra.mrb[76].mxu1 %vm2076_vm0, %v14346_v49 }
 0xb3c   :  { %10256 = vmatprep.mubr.msk.f32.mxu1 %vm2076_vm0, %v14348_v53  ;;  %11573 = vmatpush3.bf16.msra.mxu1 %v11570_v61 }
 0xb3d   :  { %11575 = vmatprep.subr.bf16.mxu1 %v11574_v10 }
 0xb3f   :  { %10257 = vmatmul.mubr.msk.f32.gmra.mrb[78].mxu1 %vm2076_vm0, %v14362_v18 }
 0xb40   :  { %11577 = vmatpush3.bf16.msra.mxu1 %v11574_v10  ;;  %10281 = vmatprep.mubr.msk.f32.mxu1 %vm2076_vm0, %v14344_v51  ;;  %v8657_v10 = vld [vmem:[%s14864_s1 + $0x70] sm:$0xff] }
 0xb41   :  { %11586 = vmatprep.subr.bf16.mxu1 %v12106_v3 }
 0xb43   :  { %10282 = vmatmul.mubr.msk.f32.vlgmr.msra.gmra.mrb[80].mxu1 %vm2076_vm0, %v14346_v49 }
 0xb44   :  { %10284 = vmatprep.mubr.msk.f32.mxu1 %vm2076_vm0, %v14348_v53 }
 0xb47   :  { %10285 = vmatmul.mubr.msk.f32.gmra.mrb[82].mxu1 %vm2076_vm0, %v14362_v18 }
 0xb48   :  { %10309 = vmatprep.mubr.msk.f32.mxu1 %vm12107_vm1, %v12108_v14 }
 0xbdd   :  { %v10059_v23 = vpop.f32.mrb[48].mxu0  ;;  %v10073_v24 = vpop.f32.mrb[52].mxu1 }
 0xbde   :  { %v5858_v50 = vpop.f32.mrb[49].mxu0  ;;  %v5953_v46 = vpop.f32.mrb[53].mxu1 }
 0xbdf   :  { %v11466_v51 = vpack.c.bf16 %v10059_v23, %v5858_v50  ;;  %v11458_v49 = vpack.c.bf16 %v10073_v24, %v5953_v46  ;;  %v8658_v24 = vld [vmem:[%s14864_s1 + $0x78] sm:$0xff]  ;;  %v8667_v46 = vld [vmem:[%s14864_s1 + $0x80] sm:$0xff] }
 0xbe1   :  { %v10062_v6 = vpop.f32.mrb[50].mxu0  ;;  %v10076_v9 = vpop.f32.mrb[54].mxu1  ;;  %11459 = vmatprep.subr.bf16.mxu0 %v11458_v49 }
 0xbe2   :  { %v5868_v53 = vpop.f32.mrb[51].mxu0  ;;  %v5963_v33 = vpop.f32.mrb[55].mxu1  ;;  %11461 = vmatpush3.bf16.msra.mxu0 %v11458_v49 }
 0xbe3   :  { %v11470_v30 = vpack.c.bf16 %v10062_v6, %v5868_v53  ;;  %v11462_v18 = vpack.c.bf16 %v10076_v9, %v5963_v33  ;;  %v8668_v6 = vld [vmem:[%s14864_s1 + $0x88] sm:$0xff]  ;;  %v8669_v53 = vld [vmem:[%s14864_s1 + $0x90] sm:$0xff] }
 0xbe5   :  { %11463 = vmatprep.subr.bf16.mxu0 %v11462_v18 }
 0xbe6   :  { %v10115_v0 = vpop.f32.mrb[56].mxu1  ;;  %11465 = vmatpush3.bf16.msra.mxu0 %v11462_v18  ;;  %v8670_v18 = vld [vmem:[%s14864_s1 + $0x98] sm:$0xff] }
 0xbe7   :  { %v6242_v21 = vpop.f32.mrb[57].mxu1  ;;  %11467 = vmatprep.subr.bf16.mxu0 %v11466_v51 }
 0xbe8   :  { %v11482_v29 = vpack.c.bf16 %v10115_v0, %v6242_v21 }
 0xbe9   :  { %10086 = vmatmul.mubr.msk.f32.vlgmr.msra.gmra.mrb[52].mxu0 %vm2076_vm0, %v8628_v57  ;;  %v8679_v57 = vld [vmem:[%s14864_s1 + $0xa0] sm:$0xff] }
 0xbea   :  { %v10118_v32 = vpop.f32.mrb[58].mxu1  ;;  %11469 = vmatpush3.bf16.msra.mxu0 %v11466_v51  ;;  %10088 = vmatprep.mubr.msk.f32.mxu0 %vm2076_vm0, %v8629_v7 }
 0xbeb   :  { %v6252_v62 = vpop.f32.mrb[59].mxu1  ;;  %11471 = vmatprep.subr.bf16.mxu0 %v11470_v30 }
 0xbec   :  { %v11486_v35 = vpack.c.bf16 %v10118_v32, %v6252_v62 }
 0xbed   :  { %10089 = vmatmul.mubr.msk.f32.gmra.mrb[54].mxu0 %vm2076_vm0, %v8630_v39  ;;  %v8681_v39 = vld [vmem:[%s14864_s1 + $0xb0] sm:$0xff] }
 0xbee   :  { %v10143_v45 = vpop.f32.mrb[60].mxu1  ;;  %11473 = vmatpush3.bf16.msra.mxu0 %v11470_v30  ;;  %10099 = vmatprep.mubr.msk.f32.mxu0 %vm2076_vm0, %v5772_v13 }
 0xbef   :  { %v6438_v4 = vpop.f32.mrb[61].mxu1  ;;  %11483 = vmatprep.subr.bf16.mxu0 %v11482_v29 }
 0xbf0   :  { %v11498_v22 = vpack.c.bf16 %v10143_v45, %v6438_v4 }
 0xbf1   :  { %10100 = vmatmul.mubr.msk.f32.vlgmr.msra.gmra.mrb[52].mxu0 %vm2076_vm0, %v5773_v37  ;;  %v8691_v37 = vld [vmem:[%s14864_s1 + $0xc0] sm:$0xff] }
 0xbf2   :  { %v10146_v25 = vpop.f32.mrb[62].mxu1  ;;  %11485 = vmatpush3.bf16.msra.mxu0 %v11482_v29  ;;  %10102 = vmatprep.mubr.msk.f32.mxu0 %vm2076_vm0, %v5774_v28  ;;  %v8680_v29 = vld [vmem:[%s14864_s1 + $0xa8] sm:$0xff] }
 0xbf3   :  { %v6448_v34 = vpop.f32.mrb[63].mxu1  ;;  %11487 = vmatprep.subr.bf16.mxu0 %v11486_v35 }
 0xbf4   :  { %v11502_v41 = vpack.c.bf16 %v10146_v25, %v6448_v34 }
 0xbf5   :  { %10103 = vmatmul.mubr.msk.f32.gmra.mrb[54].mxu0 %vm2076_vm0, %v5775_v16  ;;  %v8693_v16 = vld [vmem:[%s14864_s1 + $0xd0] sm:$0xff] }
 0xbf6   :  { %v10171_v38 = vpop.f32.mrb[64].mxu1  ;;  %11489 = vmatpush3.bf16.msra.mxu0 %v11486_v35  ;;  %10127 = vmatprep.mubr.msk.f32.mxu0 %vm2076_vm0, %v8643_v11  ;;  %v8682_v35 = vld [vmem:[%s14864_s1 + $0xb8] sm:$0xff] }
 0xbf7   :  { %v6634_v36 = vpop.f32.mrb[65].mxu1  ;;  %11499 = vmatprep.subr.bf16.mxu0 %v11498_v22 }
 0xbf8   :  { %v11514_v54 = vpack.c.bf16 %v10171_v38, %v6634_v36 }
 0xbf9   :  { %10128 = vmatmul.mubr.msk.f32.vlgmr.msra.gmra.mrb[52].mxu0 %vm2076_vm0, %v8644_v59  ;;  %v8703_v59 = vld [vmem:[%s14864_s1 + $0xe0] sm:$0xff] }
 0xbfa   :  { %v10174_v19 = vpop.f32.mrb[66].mxu1  ;;  %11501 = vmatpush3.bf16.msra.mxu0 %v11498_v22  ;;  %10130 = vmatprep.mubr.msk.f32.mxu0 %vm2076_vm0, %v8645_v5  ;;  %v8692_v22 = vld [vmem:[%s14864_s1 + $0xc8] sm:$0xff] }
 0xbfb   :  { %v6644_v31 = vpop.f32.mrb[67].mxu1  ;;  %11503 = vmatprep.subr.bf16.mxu0 %v11502_v41  ;;  %v8704_v5 = vld [vmem:[%s14864_s1 + $0xe8] sm:$0xff] }
 0xbfc   :  { %v11518_v1 = vpack.c.bf16 %v10174_v19, %v6644_v31  ;;  %v8706_v19 = vld [vmem:[%s14864_s1 + $0xf8] sm:$0xff]  ;;  %v8716_v31 = vld [vmem:[%s14864_s1 + $0x108] sm:$0xff] }
 0xbfd   :  { %10131 = vmatmul.mubr.msk.f32.gmra.mrb[54].mxu0 %vm2076_vm0, %v8646_v15  ;;  %v8715_v15 = vld [vmem:[%s14864_s1 + $0x100] sm:$0xff] }
 0xbfe   :  { %v10199_v61 = vpop.f32.mrb[68].mxu1  ;;  %11505 = vmatpush3.bf16.msra.mxu0 %v11502_v41  ;;  %10155 = vmatprep.mubr.msk.f32.mxu0 %vm2076_vm0, %v8655_v20  ;;  %v8694_v41 = vld [vmem:[%s14864_s1 + $0xd8] sm:$0xff]  ;;  %v8717_v20 = vld [vmem:[%s14864_s1 + $0x110] sm:$0xff] }
 0xbff   :  { %v6830_v44 = vpop.f32.mrb[69].mxu1  ;;  %11515 = vmatprep.subr.bf16.mxu0 %v11514_v54 }
 0xc00   :  { %v11530_v8 = vpack.c.bf16 %v10199_v61, %v6830_v44  ;;  %v7571_v61 = vld [vmem:[%s14865_s2] sm:$0xf] }
 0xc01   :  { %10156 = vmatmul.mubr.msk.f32.vlgmr.msra.gmra.mrb[52].mxu0 %vm2076_vm0, %v8656_v58  ;;  %v7679_v58 = vld [vmem:[%s14866_s7] sm:$0xf]  ;;  %7574 = vperm.xlu1 %11920, %v7571_v61  }
 0xc02   :  { %v10202_v23 = vpop.f32.mrb[70].mxu1  ;;  %11517 = vmatpush3.bf16.msra.mxu0 %v11514_v54  ;;  %10158 = vmatprep.mubr.msk.f32.mxu0 %vm2076_vm0, %v8657_v10  ;;  %v8705_v54 = vld [vmem:[%s14864_s1 + $0xf0] sm:$0xff]  ;;  %v7931_v61 = vld [vmem:[#allocation9 + $0x60] sm:$0xff] }
 0xc03   :  { %v6840_v50 = vpop.f32.mrb[71].mxu1  ;;  %11519 = vmatprep.subr.bf16.mxu0 %v11518_v1  ;;  %7682 = vperm.xlu0 %11921, %v7679_v58  }
 0xc04   :  { %v11534_v51 = vpack.c.bf16 %v10202_v23, %v6840_v50 }
 0xc05   :  { %10159 = vmatmul.mubr.msk.f32.gmra.mrb[54].mxu0 %vm2076_vm0, %v8658_v24 }
 0xc06   :  { %v10227_v49 = vpop.f32.mrb[72].mxu1  ;;  %11521 = vmatpush3.bf16.msra.mxu0 %v11518_v1  ;;  %10183 = vmatprep.mubr.msk.f32.mxu0 %vm2076_vm0, %v8667_v46  ;;  %v8718_v1 = vld [vmem:[%s14864_s1 + $0x118] sm:$0xff] }
 0xc07   :  { %v7026_v9 = vpop.f32.mrb[73].mxu1  ;;  %11531 = vmatprep.subr.bf16.mxu0 %v11530_v8  ;;  %11923 = vset.pattern.permute.xlu0 %v14838_v40 }
 0xc08   :  { %v11546_v33 = vpack.c.bf16 %v10227_v49, %v7026_v9 }
 0xc09   :  { %10184 = vmatmul.mubr.msk.f32.vlgmr.msra.gmra.mrb[52].mxu0 %vm2076_vm0, %v8668_v6 }
 0xc0a   :  { %v10230_v30 = vpop.f32.mrb[74].mxu1  ;;  %11533 = vmatpush3.bf16.msra.mxu0 %v11530_v8  ;;  %10186 = vmatprep.mubr.msk.f32.mxu0 %vm2076_vm0, %v8669_v53 }
 0xc0b   :  { %v7036_v0 = vpop.f32.mrb[75].mxu1  ;;  %11535 = vmatprep.subr.bf16.mxu0 %v11534_v51 }
 0xc0c   :  { %v11550_v21 = vpack.c.bf16 %v10230_v30, %v7036_v0  ;;  %v7676_v30 = vld [vmem:[%s14867_s10 + $0x8] sm:$0xff] }
 0xc0d   :  { %10187 = vmatmul.mubr.msk.f32.gmra.mrb[54].mxu0 %vm2076_vm0, %v8670_v18  ;;  %v7570_v18 = vld [vmem:[%s14868_s4] sm:$0xf] }
 0xc0e   :  { %v10255_v7 = vpop.f32.mrb[76].mxu1  ;;  %11537 = vmatpush3.bf16.msra.mxu0 %v11534_v51  ;;  %10211 = vmatprep.mubr.msk.f32.mxu0 %vm2076_vm0, %v8679_v57  ;;  %v7677_v57 = vld [vmem:[%s14867_s10 + $0x10] sm:$0xff] }
 0xc0f   :  { %v7222_v32 = vpop.f32.mrb[77].mxu1  ;;  %11547 = vmatprep.subr.bf16.mxu0 %v11546_v33 }
 0xc10   :  { %v11562_v62 = vpack.c.bf16 %v10255_v7, %v7222_v32 }
 0xc11   :  { %10212 = vmatmul.mubr.msk.f32.vlgmr.msra.gmra.mrb[52].mxu0 %vm2076_vm0, %v8680_v29 }
 0xc12   :  { %v10258_v13 = vpop.f32.mrb[78].mxu1  ;;  %11549 = vmatpush3.bf16.msra.mxu0 %v11546_v33  ;;  %10214 = vmatprep.mubr.msk.f32.mxu0 %vm2076_vm0, %v8681_v39 }
 0xc13   :  { %v7232_v45 = vpop.f32.mrb[79].mxu1  ;;  %11551 = vmatprep.subr.bf16.mxu0 %v11550_v21 }
 0xc14   :  { %v11566_v4 = vpack.c.bf16 %v10258_v13, %v7232_v45  ;;  %v12111_v45 = vmov 6  }
 0xc15   :  { %10215 = vmatmul.mubr.msk.f32.gmra.mrb[54].mxu0 %vm2076_vm0, %v8682_v35  ;;  %v12109_v35 = vmov 5  }
 0xc16   :  { %v10283_v28 = vpop.f32.mrb[80].mxu1  ;;  %11553 = vmatpush3.bf16.msra.mxu0 %v11550_v21  ;;  %10239 = vmatprep.mubr.msk.f32.mxu0 %vm2076_vm0, %v8691_v37  ;;  %v7842_v37 = vld [vmem:[#allocation7] sm:$0xff] }
 0xc17   :  { %v7418_v25 = vpop.f32.mrb[81].mxu1  ;;  %11563 = vmatprep.subr.bf16.mxu0 %v11562_v62 }
 0xc18   :  { %v11578_v34 = vpack.c.bf16 %v10283_v28, %v7418_v25  ;;  %v7844_v25 = vld [vmem:[#allocation7 + $0x10] sm:$0xff] }
 0xc19   :  { %10240 = vmatmul.mubr.msk.f32.vlgmr.msra.gmra.mrb[52].mxu0 %vm2076_vm0, %v8692_v22  ;;  %v12112_v22 = vmov 7  }
 0xc1a   :  { %v10286_v11 = vpop.f32.mrb[82].mxu1  ;;  %11565 = vmatpush3.bf16.msra.mxu0 %v11562_v62  ;;  %10242 = vmatprep.mubr.msk.f32.mxu0 %vm2076_vm0, %v8693_v16  ;;  %v7845_v16 = vld [vmem:[#allocation7 + $0x18] sm:$0xff] }
 0xc1b   :  { %v7428_v38 = vpop.f32.mrb[83].mxu1  ;;  %11567 = vmatprep.subr.bf16.mxu0 %v11566_v4 }
 0xc1c   :  { %v11582_v36 = vpack.c.bf16 %v10286_v11, %v7428_v38  ;;  %v7920_v11 = vld [vmem:[#allocation9 + $0x8] sm:$0xff]  ;;  %v7922_v38 = vld [vmem:[#allocation9 + $0x18] sm:$0xff] }
 0xc1d   :  { %10243 = vmatmul.mubr.msk.f32.gmra.mrb[54].mxu0 %vm2076_vm0, %v8694_v41  ;;  %v7924_v41 = vld [vmem:[#allocation9 + $0x28] sm:$0xff] }
 0xc1e   :  { %11569 = vmatpush3.bf16.msra.mxu0 %v11566_v4  ;;  %10267 = vmatprep.mubr.msk.f32.mxu0 %vm2076_vm0, %v8703_v59  ;;  %v7843_v4 = vld [vmem:[#allocation7 + $0x8] sm:$0xff]  ;;  %v11604_v59 = vpack.c.bf16 %v7924_v41, %v7920_v11 }
 0xc1f   :  { %11579 = vmatprep.subr.bf16.mxu0 %v11578_v34  ;;  %v11599_v28 = vpack.c.bf16 %v7843_v4, %v7842_v37  ;;  %v7980_v37 = vld [vmem:[#allocation9 + $0x1e8] sm:$0xff] }
 0xc21   :  { %10268 = vmatmul.mubr.msk.f32.vlgmr.msra.gmra.mrb[52].mxu0 %vm2076_vm0, %v8704_v5  ;;  %v7919_v5 = vld [vmem:[#allocation9] sm:$0xff] }
 0xc22   :  { %11581 = vmatpush3.bf16.msra.mxu0 %v11578_v34  ;;  %10270 = vmatprep.mubr.msk.f32.mxu0 %vm2076_vm0, %v8705_v54  ;;  %v11602_v34 = vpack.c.bf16 %v7845_v16, %v7844_v25  ;;  %v7923_v54 = vld [vmem:[#allocation9 + $0x20] sm:$0xff] }
 0xc23   :  { %11583 = vmatprep.subr.bf16.mxu0 %v11582_v36 }
 0xc25   :  { %10271 = vmatmul.mubr.msk.f32.gmra.mrb[54].mxu0 %vm2076_vm0, %v8706_v19 }
 0xc26   :  { %11585 = vmatpush3.bf16.msra.mxu0 %v11582_v36  ;;  %10295 = vmatprep.mubr.msk.f32.mxu0 %vm2076_vm0, %v8715_v15  ;;  %v7926_v36 = vld [vmem:[#allocation9 + $0x38] sm:$0xff]  ;;  %v11606_v15 = vpack.c.bf16 %v7923_v54, %v7919_v5 }
 0xc27   :  { %11598 = vmatprep.subr.bf16.mxu0 %v12106_v3  ;;  %v11636_v19 = vpack.c.bf16 %v7926_v36, %v7922_v38 }
 0xc29   :  { %10296 = vmatmul.mubr.msk.f32.vlgmr.msra.gmra.mrb[52].mxu0 %vm2076_vm0, %v8716_v31  ;;  %v7928_v31 = vld [vmem:[#allocation9 + $0x48] sm:$0xff] }
 0xc2a   :  { %10298 = vmatprep.mubr.msk.f32.mxu0 %vm2076_vm0, %v8717_v20  ;;  %11600 = vmatpush3.bf16.msra.mxu0 %v11599_v28  ;;  %v7932_v20 = vld [vmem:[#allocation9 + $0x68] sm:$0xff]  ;;  %v7760_v28 = vld [vmem:[%s14869_s11] sm:$0xff] }
 0xc2b   :  { %11601 = vmatprep.subr.bf16.mxu0 %v12106_v3  ;;  %v7769_v25 = vrot.slane %v7760_v28, %v14853_v52  ;;  %v7778_v16 = vrot.slane %v7760_v28, %v14852_v2  ;;  %v7788_v11 = vrot.slane %v7760_v28, %v14854_v27  ;;  %v7798_v5 = vrot.slane %v7760_v28, %v14855_v47 }
 0xc2d   :  { %10299 = vmatmul.mubr.msk.f32.gmra.mrb[54].mxu0 %vm2076_vm0, %v8718_v1  ;;  %v7927_v1 = vld [vmem:[#allocation9 + $0x40] sm:$0xff] }
 0xc2e   :  { %10331 = vmatprep.mubr.msk.f32.mxu0 %vm12107_vm1, %v12108_v14  ;;  %11603 = vmatpush3.bf16.msra.mxu0 %v11602_v34  ;;  %v11610_v58 = vpack.c.bf16 %v7931_v61, %v7927_v1  ;;  %v14871_v61 = vld [vmem:[#allocation36_spill] sm:$0xff] }
 0xc2f   :  { %11637 = vmatprep.subr.bf16.mxu0 %v11636_v19 }
 0xc82   :  { %v7683_v7 = vpop.permute.xlu0 %7682 }
 0xcfc   :  { %v10297_v44 = vpop.f32.mrb[52].mxu0 }
 0xcfd   :  { %v7563_v10 = vadd.f32 %v10297_v44, %v14326_v12  ;;  %v7515_v8 = vpop.f32.mrb[53].mxu0  ;;  %v7675_v12 = vld [vmem:[%s14867_s10] sm:$0xff]  ;;  %v7936_v44 = vld [vmem:[#allocation9 + $0x88] sm:$0xff] }
 0xcfe   :  { %v7562_v23 = vadd.f32 %v14324_v48, %v7515_v8  ;;  %v11593_v0 = vpack.c.bf16 %v7676_v30, %v7675_v12  ;;  %v7956_v12 = vld [vmem:[#allocation9 + $0x128] sm:$0xff] }
 0xcff   :  { %v7567_v24 = vmax.f32 %v7563_v10, 0.0  ;;  %v7940_v10 = vld [vmem:[#allocation9 + $0xa8] sm:$0xff] }
 0xd00   :  { %v7566_v50 = vmax.f32 %v7562_v23, 0.0  ;;  %v10300_v46 = vpop.f32.mrb[54].mxu0  ;;  %v11612_v8 = vpack.c.bf16 %v7940_v10, %v7936_v44  ;;  %v7935_v23 = vld [vmem:[#allocation9 + $0x80] sm:$0xff] }
 0xd01   :  { %v7565_v51 = vadd.f32 %v10300_v46, %v14330_v63  ;;  %v7525_v49 = vpop.f32.mrb[55].mxu0  ;;  %v7678_v63 = vld [vmem:[%s14867_s10 + $0x18] sm:$0xff]  ;;  %v7944_v46 = vld [vmem:[#allocation9 + $0xc8] sm:$0xff] }
 0xd02   :  { %v11587_v6 = vpack.c.bf16 %v7567_v24, %v7566_v50  ;;  %v7564_v9 = vadd.f32 %v14328_v17, %v7525_v49  ;;  %v11596_v21 = vpack.c.bf16 %v7678_v63, %v7677_v57  ;;  %v7575_v17 = vpop.permute.xlu1 %7574  ;;  %v7939_v24 = vld [vmem:[#allocation9 + $0xa0] sm:$0xff]  ;;  %v7960_v57 = vld [vmem:[#allocation9 + $0x148] sm:$0xff] }
 0xd03   :  { %v7569_v53 = vmax.f32 %v7565_v51, 0.0  ;;  %v11670_v29 = vadd.f32 %v7683_v7, %v7575_v17  ;;  %v11614_v50 = vpack.c.bf16 %v7939_v24, %v7935_v23  ;;  %v7948_v51 = vld [vmem:[#allocation9 + $0xe8] sm:$0xff]  ;;  %v7959_v17 = vld [vmem:[#allocation9 + $0x140] sm:$0xff]  ;;  %v14872_v24 = vld [vmem:[#allocation39_spill] sm:$0xff] }
 0xd04   :  { %v7568_v33 = vmax.f32 %v7564_v9, 0.0  ;;  %11588 = vmatpush3.bf16.msra.mxu1 %v11587_v6  ;;  %v11616_v49 = vpack.c.bf16 %v7948_v51, %v7944_v46  ;;  %v7943_v6 = vld [vmem:[#allocation9 + $0xc0] sm:$0xff]  ;;  %v7964_v63 = vld [vmem:[#allocation9 + $0x168] sm:$0xff] }
 0xd05   :  { %11589 = vmatprep.subr.bf16.mxu1 %v12106_v3  ;;  %v7947_v9 = vld [vmem:[#allocation9 + $0xe0] sm:$0xff] }
 0xd06   :  { %v11590_v48 = vpack.c.bf16 %v7569_v53, %v7568_v33  ;;  %v11618_v53 = vpack.c.bf16 %v7947_v9, %v7943_v6  ;;  %v7952_v33 = vld [vmem:[#allocation9 + $0x108] sm:$0xff]  ;;  %v7963_v7 = vld [vmem:[#allocation9 + $0x160] sm:$0xff]  ;;  %v14873_v9 = vld [vmem:[#allocation40_spill] sm:$0xff] }
 0xd07   :  { %v11620_v30 = vpack.c.bf16 %v7956_v12, %v7952_v33 }
 0xd08   :  { %11591 = vmatpush3.bf16.msra.mxu1 %v11590_v48  ;;  %v7951_v48 = vld [vmem:[#allocation9 + $0x100] sm:$0xff] }
 0xd09   :  { %11592 = vmatprep.subr.bf16.mxu1 %v12106_v3 }
 0xd0b   :  { %10310 = vmatmul.mubr.msk.f32.vlgmr.msra.gmra.mrb[84].mxu1 %vm2076_vm0, %v7570_v18  ;;  %v7955_v18 = vld [vmem:[#allocation9 + $0x120] sm:$0xff] }
 0xd0c   :  { %11594 = vmatpush3.bf16.msra.mxu1 %v11593_v0  ;;  %10320 = vmatprep.mubr.msk.f32.mxu1 %vm12107_vm1, %v12108_v14  ;;  %v11622_v0 = vpack.c.bf16 %v7955_v18, %v7951_v48  ;;  %v7921_v48 = vld [vmem:[#allocation9 + $0x10] sm:$0xff] }
 0xd0d   :  { %11595 = vmatprep.subr.bf16.mxu1 %v12106_v3  ;;  %v11608_v3 = vpack.c.bf16 %v7932_v20, %v7928_v31  ;;  %v14870_v20 = vld [vmem:[#allocation34_spill] sm:$0xff]  ;;  %v7925_v18 = vld [vmem:[#allocation9 + $0x30] sm:$0xff] }
 0xd10   :  { %11597 = vmatpush3.bf16.msra.mxu1 %v11596_v21  ;;  %v11624_v21 = vpack.c.bf16 %v7964_v63, %v7960_v57  ;;  %v7934_v57 = vld [vmem:[#allocation9 + $0x78] sm:$0xff] }
 0xd11   :  { %11605 = vmatprep.subr.bf16.mxu1 %v11604_v59 }
 0xd13   :  { %10321 = vmatmul.mubr.msk.f32.vlgmr.msra.gmra.mrb[84].mxu1 %vm2076_vm0, %v14342_v26  ;;  %v12110_v26 = vmov 4  }
 0xd14   :  { %8051 = vmatprep.mubr.f32.mxu1 %v12108_v14  ;;  %11607 = vmatpush1.bf16.msra.mxu1 %v11606_v15 }
 0xd15   :  { %11609 = vmatprep.subr.bf16.mxu1 %v11608_v3  ;;  %v7808_v3 = vrot.slane %v7760_v28, %v14870_v20  ;;  %v7974_v20 = vld [vmem:[#allocation9 + $0x1b8] sm:$0xff] }
 0xd18   :  { %11611 = vmatpush1.bf16.msra.mxu1 %v11610_v58  ;;  %v7818_v58 = vrot.slane %v7760_v28, %v14871_v61  ;;  %v7969_v61 = vld [vmem:[#allocation9 + $0x190] sm:$0xff] }
 0xd19   :  { %11613 = vmatprep.subr.bf16.mxu1 %v11612_v8 }
 0xd1c   :  { %11615 = vmatpush1.bf16.msra.mxu1 %v11614_v50  ;;  %v7828_v50 = vrot.slane %v7760_v28, %v14872_v24  ;;  %v7975_v24 = vld [vmem:[#allocation9 + $0x1c0] sm:$0xff] }
 0xd1d   :  { %11617 = vmatprep.subr.bf16.mxu1 %v11616_v49 }
 0xd20   :  { %11619 = vmatpush1.bf16.msra.mxu1 %v11618_v53  ;;  %v7838_v53 = vrot.slane %v7760_v28, %v14873_v9  ;;  %v8249_v9 = vld [vmem:[%s12296_s20] sm:$0xf] }
 0xd21   :  { %11621 = vmatprep.subr.bf16.mxu1 %v11620_v30 }
 0xd24   :  { %11623 = vmatpush1.bf16.msra.mxu1 %v11622_v0  ;;  %v7930_v0 = vld [vmem:[#allocation9 + $0x58] sm:$0xff] }
 0xd25   :  { %11625 = vmatprep.subr.bf16.mxu1 %v11624_v21  ;;  %v11638_v21 = vpack.c.bf16 %v7925_v18, %v7921_v48  ;;  %v14550_v18 = vld [vmem:[%s12121_s5] sm:$0xff] }
 0xde6   :  { %v7754_v32 = vpop.f32.mrb[84].mxu1 }
 0xde7   :  { %v11671_v39 = vadd.f32 %v11670_v29, %v7754_v32  ;;  %v10322_v62 = vpop.f32.mrb[85].mxu1  ;;  %v11626_v29 = vpack.c.bf16 %v7963_v7, %v7959_v17  ;;  %v7968_v32 = vld [vmem:[#allocation9 + $0x188] sm:$0xff]  ;;  %v11640_v7 = vpack.c.bf16 %v7934_v57, %v7930_v0 }
 0xde8   :  { %v14557_v0 = vld [vmem:[%s12121_s5 + $0x8] sm:$0xff] }
 0xde9   :  { %v7759_v13 = vmax.f32 %v11671_v39, 0.0  ;;  %v7972_v39 = vld [vmem:[#allocation9 + $0x1a8] sm:$0xff]  ;;  %11627 = vmatpush1.bf16.msra.mxu1 %v11626_v29  ;;  %v7929_v29 = vld [vmem:[#allocation9 + $0x50] sm:$0xff] }
 0xdea   :  { %v11628_v62 = vpack.c.bf16 %v7972_v39, %v7968_v32  ;;  %v7933_v32 = vld [vmem:[#allocation9 + $0x70] sm:$0xff]  ;;  %v7938_v39 = vld [vmem:[#allocation9 + $0x98] sm:$0xff] }
 0xdeb   :  { %7782 = vperm.xlu0 %11923, %v7759_v13   ;;  %7763 = vperm.xlu1 %11920, %v7759_v13  }
 0xdec   :  { %11629 = vmatprep.subr.bf16.mxu1 %v11628_v62  ;;  %v7942_v62 = vld [vmem:[#allocation9 + $0xb8] sm:$0xff] }
 0xdef   :  { %11926 = vset.pattern.permute.xlu0 %v12109_v35  ;;  %11922 = vset.pattern.permute.xlu1 %v14839_v55  ;;  %v7971_v35 = vld [vmem:[#allocation9 + $0x1a0] sm:$0xff] }
 0xdf0   :  { %7812 = vperm.xlu0 %11926, %v7759_v13   ;;  %7772 = vperm.xlu1 %11922, %v7759_v13  }
 0xdf4   :  { %11924 = vset.pattern.permute.xlu1 %v14841_v60  ;;  %11929 = vset.pattern.permute.xlu0 %v14842_v43 }
 0xdf5   :  { %7792 = vperm.xlu1 %11924, %v7759_v13   ;;  %8252 = vperm.xlu0 %11929, %v8249_v9  }
 0xdf9   :  { %11925 = vset.pattern.permute.xlu1 %v12110_v26  ;;  %11932 = vset.pattern.permute.xlu0 %v14839_v55 }
 0xdfa   :  { %7802 = vperm.xlu1 %11925, %v7759_v13  }
 0xdfe   :  { %11927 = vset.pattern.permute.xlu1 %v12111_v45  ;;  %v7976_v45 = vld [vmem:[#allocation9 + $0x1c8] sm:$0xff] }
 0xdff   :  { %7822 = vperm.xlu1 %11927, %v7759_v13   ;;  %v11632_v4 = vpack.c.bf16 %v7980_v37, %v7976_v45  ;;  %v7941_v45 = vld [vmem:[#allocation9 + $0xb0] sm:$0xff]  ;;  %v7946_v37 = vld [vmem:[#allocation9 + $0xd8] sm:$0xff] }
 0xe03   :  { %11928 = vset.pattern.permute.xlu1 %v12112_v22 }
 0xe04   :  { %7832 = vperm.xlu1 %11928, %v7759_v13   ;;  %v7967_v13 = vld [vmem:[#allocation9 + $0x180] sm:$0xff] }
 0xe05   :  { %v11630_v26 = vpack.c.bf16 %v7971_v35, %v7967_v13  ;;  %v11642_v13 = vpack.c.bf16 %v7933_v32, %v7929_v29  ;;  %v11644_v35 = vpack.c.bf16 %v7942_v62, %v7938_v39 }
 0xe07   :  { %11631 = vmatpush1.bf16.msra.mxu1 %v11630_v26  ;;  %v7937_v26 = vld [vmem:[#allocation9 + $0x90] sm:$0xff] }
 0xe08   :  { %11930 = vset.pattern.permute.xlu1 %v14839_v55  ;;  %11633 = vmatprep.subr.bf16.mxu1 %v11632_v4  ;;  %v7950_v4 = vld [vmem:[#allocation9 + $0xf8] sm:$0xff]  ;;  %v11646_v28 = vpack.c.bf16 %v7941_v45, %v7937_v26 }
 0xe09   :  { %8260 = vperm.xlu1 %11930, %v8249_v9  }
 0xe0d   :  { %11931 = vset.pattern.permute.xlu1 %v14842_v43 }
 0xe6a   :  { %v7764_v22 = vpop.permute.xlu1 %7763  ;;  %v7783_v59 = vpop.permute.xlu0 %7782 }
 0xe6b   :  { %v7770_v41 = vmul.f32 %v7769_v25, %v7764_v22  ;;  %v7789_v54 = vmul.f32 %v7788_v11, %v7783_v59  ;;  %v7945_v22 = vld [vmem:[#allocation9 + $0xd0] sm:$0xff]  ;;  %v7962_v59 = vld [vmem:[#allocation9 + $0x158] sm:$0xff] }
 0xe6c   :  { %v7949_v25 = vld [vmem:[#allocation9 + $0xf0] sm:$0xff] }
 0xe6d   :  { %v11650_v11 = vpack.c.bf16 %v7949_v25, %v7945_v22 }
 0xe6f   :  { %v7773_v34 = vpop.permute.xlu1 %7772  ;;  %v7813_v8 = vpop.permute.xlu0 %7812 }
 0xe70   :  { %v7779_v38 = vmul.f32 %v7778_v16, %v7773_v34  ;;  %v7819_v46 = vmul.f32 %v7818_v58, %v7813_v8  ;;  %v7954_v16 = vld [vmem:[#allocation9 + $0x118] sm:$0xff]  ;;  %v7973_v58 = vld [vmem:[#allocation9 + $0x1b0] sm:$0xff] }
 0xe71   :  { %v7958_v34 = vld [vmem:[#allocation9 + $0x138] sm:$0xff]  ;;  %v11662_v8 = vpack.c.bf16 %v7973_v58, %v7969_v61 }
 0xe72   :  { %v7780_v36 = vadd.f32 %v7779_v38, %v7770_v41  ;;  %v11652_v41 = vpack.c.bf16 %v7958_v34, %v7954_v16  ;;  %v7953_v38 = vld [vmem:[#allocation9 + $0x110] sm:$0xff] }
 0xe74   :  { %v7793_v19 = vpop.permute.xlu1 %7792  ;;  %v7790_v15 = vadd.f32 %v7789_v54, %v7780_v36  ;;  %v7966_v36 = vld [vmem:[#allocation9 + $0x178] sm:$0xff]  ;;  %v8253_v48 = vpop.permute.xlu0 %8252 }
 0xe75   :  { %v7799_v31 = vmul.f32 %v7798_v5, %v7793_v19  ;;  %v11656_v54 = vpack.c.bf16 %v7966_v36, %v7962_v59  ;;  %v7961_v19 = vld [vmem:[#allocation9 + $0x150] sm:$0xff] }
 0xe77   :  { %v7800_v44 = vadd.f32 %v7799_v31, %v7790_v15  ;;  %v7965_v15 = vld [vmem:[#allocation9 + $0x170] sm:$0xff]  ;;  %v7970_v31 = vld [vmem:[#allocation9 + $0x198] sm:$0xff] }
 0xe79   :  { %v7803_v1 = vpop.permute.xlu1 %7802 }
 0xe7a   :  { %v7809_v10 = vmul.f32 %v7808_v3, %v7803_v1  ;;  %v11658_v3 = vpack.c.bf16 %v7965_v15, %v7961_v19  ;;  %v11660_v1 = vpack.c.bf16 %v7974_v20, %v7970_v31 }
 0xe7c   :  { %v7810_v23 = vadd.f32 %v7809_v10, %v7800_v44  ;;  %v7978_v44 = vld [vmem:[#allocation9 + $0x1d8] sm:$0xff] }
 0xe7d   :  { %v7982_v10 = vld [vmem:[#allocation9 + $0x1f8] sm:$0xff] }
 0xe7e   :  { %v7823_v51 = vpop.permute.xlu1 %7822  ;;  %v7820_v49 = vadd.f32 %v7819_v46, %v7810_v23  ;;  %v11664_v23 = vpack.c.bf16 %v7982_v10, %v7978_v44  ;;  %v7977_v46 = vld [vmem:[#allocation9 + $0x1d0] sm:$0xff] }
 0xe7f   :  { %v7829_v6 = vmul.f32 %v7828_v50, %v7823_v51  ;;  %v7979_v50 = vld [vmem:[#allocation9 + $0x1e0] sm:$0xff] }
 0xe80   :  { %v11634_v51 = vpack.c.bf16 %v7979_v50, %v7975_v24 }
 0xe81   :  { %v7830_v12 = vadd.f32 %v7829_v6, %v7820_v49  ;;  %v7981_v49 = vld [vmem:[#allocation9 + $0x1f0] sm:$0xff] }
 0xe82   :  { %v11666_v6 = vpack.c.bf16 %v7981_v49, %v7977_v46  ;;  %11635 = vmatpush1.bf16.msra.mxu1 %v11634_v51 }
 0xe83   :  { %v7833_v33 = vpop.permute.xlu1 %7832 }
 0xe84   :  { %v7839_v30 = vmul.f32 %v7838_v53, %v7833_v33  ;;  %v8129_v53 = vld [vmem:[%s12291_s6] sm:$0xf] }
 0xe85   :  { %8132 = vperm.xlu1 %11931, %v8129_v53   ;;  %8156 = vperm.xlu0 %11932, %v8129_v53  }
 0xe86   :  { %v7840_v63 = vadd.f32 %v7839_v30, %v7830_v12 }
 0xe88   :  { %v7841_v17 = vadd.f32 %v7840_v63, %v14332_v56  ;;  %v11648_v56 = vpack.c.bf16 %v7950_v4, %v7946_v37  ;;  %v8261_v55 = vpop.permute.xlu1 %8260 }
 0xe89   :  { %11933 = vset.pattern.permute.xlu1 %v14838_v40  ;;  %11934 = vset.pattern.permute.xlu0 %v14841_v60  ;;  %v14554_v40 = vcombine.high %v14550_v18, %v14550_v18 }
 0xe8a   :  { %10332 = vmatmul.mubr.msk.f32.vlgmr.msra.gmra.mrb[56].mxu0 %vm2076_vm0, %v7841_v17  ;;  %8272 = vperm.xlu1 %11933, %v8249_v9  }
 0xe8b   :  { %11639 = vmatpush1.bf16.msra.mxu0 %v11638_v21  ;;  %8122 = vmatprep.mubr.f32.mxu0 %v12108_v14  ;;  %v7957_v14 = vld [vmem:[#allocation9 + $0x130] sm:$0xff] }
 0xe8c   :  { %11641 = vmatprep.subr.bf16.mxu0 %v11640_v7  ;;  %v11654_v5 = vpack.c.bf16 %v7957_v14, %v7953_v38  ;;  %8284 = vperm.xlu0 %11934, %v8249_v9  }
 0xe8e   :  { %8184 = vperm.xlu1 %11933, %v8129_v53  }
 0xe8f   :  { %11643 = vmatpush1.bf16.msra.mxu0 %v11642_v13 }
 0xe90   :  { %11645 = vmatprep.subr.bf16.mxu0 %v11644_v35 }
 0xe92   :  { %11935 = vset.pattern.permute.xlu1 %v14841_v60  ;;  %v14561_v60 = vcombine.high %v14557_v0, %v14557_v0 }
 0xe93   :  { %11647 = vmatpush1.bf16.msra.mxu0 %v11646_v28  ;;  %8212 = vperm.xlu1 %11935, %v8129_v53  }
 0xe94   :  { %11649 = vmatprep.subr.bf16.mxu0 %v11648_v56 }
 0xe97   :  { %11651 = vmatpush1.bf16.msra.mxu0 %v11650_v11 }
 0xe98   :  { %11653 = vmatprep.subr.bf16.mxu0 %v11652_v41 }
 0xe9b   :  { %11655 = vmatpush1.bf16.msra.mxu0 %v11654_v5 }
 0xe9c   :  { %11657 = vmatprep.subr.bf16.mxu0 %v11656_v54 }
 0xe9f   :  { %11659 = vmatpush1.bf16.msra.mxu0 %v11658_v3 }
 0xea0   :  { %11661 = vmatprep.subr.bf16.mxu0 %v11660_v1 }
 0xea3   :  { %11663 = vmatpush1.bf16.msra.mxu0 %v11662_v8 }
 0xea4   :  { %11665 = vmatprep.subr.bf16.mxu0 %v11664_v23 }
 0xea7   :  { %11667 = vmatpush1.bf16.msra.mxu0 %v11666_v6 }
 0xf04   :  { %v8133_v30 = vpop.permute.xlu1 %8132  ;;  %v8157_v45 = vpop.permute.xlu0 %8156 }
 0xf09   :  { %v8273_v57 = vpop.permute.xlu1 %8272 }
 0xf0b   :  { %v8285_v50 = vpop.permute.xlu0 %8284 }
 0xf0d   :  { %v8185_v11 = vpop.permute.xlu1 %8184 }
 0xf5d   :  { %v7915_v33 = vpop.f32.mrb[56].mxu0 }
 0xf5e   :  { %v7916_v12 = vadd.f32 %v7915_v33, %v14019_v42  ;;  %v10333_v43 = vpop.f32.mrb[57].mxu0 }
 0xf60   :  { %8052 = vmatmul.mubr.f32.vlgmr.msra.gmra.mrb[86].mxu1 %v7916_v12  ;;  %8123 = vmatmul.mubr.f32.vlgmr.msra.gmra.mrb[58].mxu0 %v7916_v12 }
0x1033   :  { %v8124_v42 = vpop.f32.mrb[58].mxu0  ;;  %v8053_v63 = vpop.f32.mrb[86].mxu1 }
0x1034   :  { %v8125_v21 = vadd.f32 %v14557_v0, %v8124_v42  ;;  %v8054_v17 = vadd.f32 %v14550_v18, %v8053_v63  ;;  %v8055_v7 = vpop.f32.mrb[87].mxu1  ;;  %v8126_v29 = vpop.f32.mrb[59].mxu0 }
0x1035   :  { %v8056_v32 = vadd.f32 %v8055_v7, %v14554_v40  ;;  %v8127_v39 = vadd.f32 %v8126_v29, %v14561_v60 }
0x1036   :  { %v8146_v62 = vrot.slane %v8125_v21, %v14853_v52  ;;  %v8170_v13 = vrot.slane %v8125_v21, %v14852_v2  ;;  %v8198_v35 = vrot.slane %v8125_v21, %v14854_v27  ;;  %v8138_v26 = vrot.slane %v8054_v17, %v14853_v52 }
0x1037   :  { %v8162_v37 = vrot.slane %v8054_v17, %v14852_v2  ;;  %v8190_v4 = vrot.slane %v8054_v17, %v14854_v27  ;;  %v8142_v28 = vrot.slane %v8056_v32, %v14853_v52  ;;  %v8166_v56 = vrot.slane %v8056_v32, %v14852_v2 }
0x1038   :  { %v8153_v22 = vmul.f32 %v8146_v62, %v8133_v30  ;;  %v8177_v25 = vmul.f32 %v8170_v13, %v8157_v45  ;;  %v8257_v16 = vmul.f32 %v8253_v48, %v8146_v62  ;;  %v8265_v34 = vmul.f32 %v8261_v55, %v8170_v13 }
0x1039   :  { %v8205_v41 = vmul.f32 %v8198_v35, %v8185_v11  ;;  %v8151_v38 = vmul.f32 %v8138_v26, %v8133_v30  ;;  %v8175_v14 = vmul.f32 %v8162_v37, %v8157_v45  ;;  %v8255_v59 = vmul.f32 %v8253_v48, %v8138_v26 }
0x103a   :  { %v8263_v36 = vmul.f32 %v8261_v55, %v8162_v37  ;;  %v8152_v5 = vmul.f32 %v8142_v28, %v8133_v30  ;;  %v8176_v54 = vmul.f32 %v8166_v56, %v8157_v45  ;;  %v8194_v19 = vrot.slane %v8056_v32, %v14854_v27 }
0x103b   :  { %v8256_v15 = vmul.f32 %v8253_v48, %v8142_v28  ;;  %v8264_v31 = vmul.f32 %v8261_v55, %v8166_v56  ;;  %v8150_v20 = vrot.slane %v8127_v39, %v14853_v52  ;;  %v8174_v3 = vrot.slane %v8127_v39, %v14852_v2 }
0x103c   :  { %v8202_v1 = vrot.slane %v8127_v39, %v14854_v27  ;;  %v8218_v61 = vrot.slane %v8054_v17, %v14855_v47  ;;  %v8222_v58 = vrot.slane %v8056_v32, %v14855_v47  ;;  %v8226_v44 = vrot.slane %v8125_v21, %v14855_v47 }
0x103d   :  { %v8154_v10 = vmul.f32 %v8150_v20, %v8133_v30  ;;  %v8178_v8 = vmul.f32 %v8174_v3, %v8157_v45  ;;  %v8258_v23 = vmul.f32 %v8253_v48, %v8150_v20  ;;  %v8266_v24 = vmul.f32 %v8261_v55, %v8174_v3 }
0x103e   :  { %v8230_v46 = vrot.slane %v8127_v39, %v14855_v47  ;;  %v8267_v51 = vadd.f32 %v8263_v36, %v8255_v59  ;;  %v8268_v49 = vadd.f32 %v8264_v31, %v8256_v15  ;;  %v8269_v52 = vadd.f32 %v8265_v34, %v8257_v16  ;;  %v8213_v39 = vpop.permute.xlu1 %8212 }
0x103f   :  { %v8270_v6 = vadd.f32 %v8266_v24, %v8258_v23  ;;  %v8275_v2 = vmul.f32 %v8273_v57, %v8190_v4  ;;  %v8276_v9 = vmul.f32 %v8273_v57, %v8194_v19  ;;  %v8277_v27 = vmul.f32 %v8273_v57, %v8198_v35 }
0x1040   :  { %v8278_v53 = vmul.f32 %v8273_v57, %v8202_v1  ;;  %v8287_v33 = vmul.f32 %v8285_v50, %v8218_v61  ;;  %v8288_v12 = vmul.f32 %v8285_v50, %v8222_v58  ;;  %v8289_v43 = vmul.f32 %v8285_v50, %v8226_v44 }
0x1041   :  { %v8279_v42 = vadd.f32 %v8275_v2, %v8267_v51  ;;  %v8280_v63 = vadd.f32 %v8276_v9, %v8268_v49  ;;  %v8281_v30 = vadd.f32 %v8277_v27, %v8269_v52  ;;  %v8290_v21 = vmul.f32 %v8285_v50, %v8230_v46 }
0x1042   :  { %v8282_v48 = vadd.f32 %v8278_v53, %v8270_v6  ;;  %v8181_v55 = vadd.f32 %v8177_v25, %v8153_v22  ;;  %v8182_v17 = vadd.f32 %v8178_v8, %v8154_v10  ;;  %v8206_v7 = vmul.f32 %v8202_v1, %v8185_v11 }
0x1043   :  { %v8291_v47 = vadd.f32 %v8287_v33, %v8279_v42  ;;  %v8292_v29 = vadd.f32 %v8288_v12, %v8280_v63  ;;  %v8293_v32 = vadd.f32 %v8289_v43, %v8281_v30  ;;  %v8179_v62 = vadd.f32 %v8175_v14, %v8151_v38 }
0x1044   :  { %v8294_v13 = vadd.f32 %v8290_v21, %v8282_v48  ;;  %v8209_v26 = vadd.f32 %v8205_v41, %v8181_v55  ;;  %v8210_v35 = vadd.f32 %v8206_v7, %v8182_v17  ;;  %v8180_v57 = vadd.f32 %v8176_v54, %v8152_v5 }
0x1045   :  { %v8295_v45 = vadd.f32 %v14550_v18, %v8291_v47  ;;  %v8296_v37 = vadd.f32 %v8292_v29, %v14554_v40  ;;  %v8297_v28 = vadd.f32 %v14557_v0, %v8293_v32  ;;  %v8203_v56 = vmul.f32 %v8190_v4, %v8185_v11 }
0x1046   :  { %v8298_v22 = vadd.f32 %v8294_v13, %v14561_v60  ;;  %v8204_v25 = vmul.f32 %v8194_v19, %v8185_v11  ;;  %v8231_v16 = vmul.f32 %v8218_v61, %v8213_v39  ;;  %v8233_v41 = vmul.f32 %v8226_v44, %v8213_v39 }
0x1047   :  { %v8303_v34 = vcombine.low %v8295_v45, %v8296_v37  ;;  %v8207_v38 = vadd.f32 %v8203_v56, %v8179_v62  ;;  %v8234_v14 = vmul.f32 %v8230_v46, %v8213_v39  ;;  %v8232_v5 = vmul.f32 %v8222_v58, %v8213_v39 }
0x1048   :  { %v8304_v59 = vcombine.low %v8297_v28, %v8298_v22  ;;  %v8208_v36 = vadd.f32 %v8204_v25, %v8180_v57  ;;  %v8237_v40 = vadd.f32 %v8233_v41, %v8209_v26 }
0x1049   :  { %8307 = vst [vmem:[%s12301_s30] sm:$0xff] %v8303_v34  ;;  %v8235_v18 = vadd.f32 %v8231_v16, %v8207_v38  ;;  %v8238_v54 = vadd.f32 %v8234_v14, %v8210_v35 }
0x104a   :  { %8308 = vst [vmem:[%s12301_s30 + $0x8] sm:$0xff] %v8304_v59  ;;  %v8236_v0 = vadd.f32 %v8232_v5, %v8208_v36 }
0x104b   :  { %v8244_v4 = vcombine.low %v8237_v40, %v8238_v54 }
0x104c   :  { %v8243_v15 = vcombine.low %v8235_v18, %v8236_v0 }
0x104d   :  { %8248 = vst [vmem:[%s12306_s24 + $0x8] sm:$0xff] %v8244_v4 }
0x104e   :  { %8247 = vst [vmem:[%s12306_s24] sm:$0xff] %v8243_v15 }
0x104f   :  { %8317 = vsyncpa [#allocation3], 1 }
0x1050   :  { %8318 = vsyncpa [#allocation5], 1 }
0x1051   :  { %8319 = vsyncpa [#allocation8], 1 }

</bundles_post_ra>
